<compile_context>
chip_gen: v5e
topology: v5e:2x2
jax: 0.10.0
libtpu: 0.0.40
codegen_flags: <defaults>
</compile_context>

<pallas_src>
import functools

import jax
import jax.numpy as jnp
from jax import lax
from jax.experimental import pallas as pl
from jax.experimental.pallas import tpu as pltpu

# ----------------------- small stand-in configuration ------------------------
B = 2
C_IN, IMG, PATCH = 3, 16, 8
NP = (IMG // PATCH) ** 2            # 4 patches
S_VIS = NP + 1                      # +1 cls token -> 5
E = 128                             # stands in for 768 (kept lane-dense)
NHEAD = 4
HD = E // NHEAD                     # 32
FF_VIS = 256                        # stands in for 3072 (DINOv2 MLP)
FF_ENC = 256                        # stands in for 2048 (TransformerEncoderLayer)
N_VIS_BLOCKS = 2                    # stands in for 12 DINOv2 blocks
N_ENC_LAYERS = 2                    # nn.TransformerEncoder(..., 2)
OUT_DIM = 128                       # stands in for 1024 (feat_projection)
CAM_IN, POLY_IN = 3, 2
K_PATCH = C_IN * PATCH * PATCH      # 192


# ============================ in-kernel math helpers ==========================
def _layernorm(x, g, b, eps):
    mu = jnp.mean(x, axis=-1, keepdims=True)
    var = jnp.mean((x - mu) ** 2, axis=-1, keepdims=True)
    return (x - mu) * lax.rsqrt(var + eps) * g + b


def _erf(z):
    # Abramowitz & Stegun 7.1.26, |error| < 1.5e-7 (f32-exact for our purposes).
    a1, a2, a3, a4, a5 = 0.254829592, -0.284496736, 1.421413741, -1.453152027, 1.061405429
    p = 0.3275911
    az = jnp.abs(z)
    t = 1.0 / (1.0 + p * az)
    poly = ((((a5 * t + a4) * t + a3) * t + a2) * t + a1) * t
    e = poly * jnp.exp(-(az * az))
    return jnp.where(z >= 0.0, 1.0 - e, e - 1.0)


def _gelu_exact(x):
    # PyTorch nn.GELU default = exact erf GELU.
    return 0.5 * x * (1.0 + _erf(x * 0.7071067811865476))


def _mha(x, wq, wk, wv, bq, bk, bv, wo, bo, nheads):
    """Multi-head self-attention over one sequence.

    x: (S, E) f32.  wq/wk/wv: (H, E, hd) bf16 (head-major, leading-axis index
    is a free offset).  bq/bk/bv: (H, 1, hd) f32.  wo: (H, hd, E) bf16,
    bo: (1, E) f32.  The 1/sqrt(hd) scale is pre-folded into wq/bq.
    QK^T and PV run as single head-batched bf16 einsums; softmax stays f32.
    """
    xb = x.astype(jnp.bfloat16)
    q = jnp.stack([jnp.dot(xb, wq[h], preferred_element_type=jnp.float32)
                   for h in range(nheads)], axis=0) + bq          # (H, S, hd)
    k = jnp.stack([jnp.dot(xb, wk[h], preferred_element_type=jnp.float32)
                   for h in range(nheads)], axis=0) + bk
    v = jnp.stack([jnp.dot(xb, wv[h], preferred_element_type=jnp.float32)
                   for h in range(nheads)], axis=0) + bv

    s = jnp.einsum('hqd,hkd->hqk', q.astype(jnp.bfloat16), k.astype(jnp.bfloat16),
                   preferred_element_type=jnp.float32)            # (H, S, S) f32
    s = s - jnp.max(s, axis=-1, keepdims=True)
    p = jnp.exp(s)
    p = p * pl.reciprocal(jnp.sum(p, axis=-1, keepdims=True), approx=True)

    ctx = jnp.einsum('hqk,hkd->hqd', p.astype(jnp.bfloat16), v.astype(jnp.bfloat16),
                     preferred_element_type=jnp.float32)          # (H, S, hd)

    out = jnp.zeros_like(x)
    for h in range(nheads):                                       # fold through W_o, no concat
        out = out + jnp.dot(ctx[h].astype(jnp.bfloat16), wo[h],
                            preferred_element_type=jnp.float32)
    return out + bo


def _prenorm_block(x, ln1_g, ln1_b, wq, wk, wv, bq, bk, bv, wo, bo, ls1,
                   ln2_g, ln2_b, w_m1, b_m1, w_m2, b_m2, ls2, *, nheads):
    """DINOv2-style pre-norm block with LayerScale and exact GELU."""
    a = _mha(_layernorm(x, ln1_g, ln1_b, 1e-6), wq, wk, wv, bq, bk, bv, wo, bo, nheads)
    x = x + ls1 * a
    h = _gelu_exact(
        jnp.dot(_layernorm(x, ln2_g, ln2_b, 1e-6).astype(jnp.bfloat16), w_m1,
                preferred_element_type=jnp.float32) + b_m1)
    f = jnp.dot(h.astype(jnp.bfloat16), w_m2, preferred_element_type=jnp.float32) + b_m2
    return x + ls2 * f


def _postnorm_layer(x, wq, wk, wv, bq, bk, bv, wo, bo, ln1_g, ln1_b,
                    w_ff1, b_ff1, w_ff2, b_ff2, ln2_g, ln2_b, *, nheads):
    """PyTorch nn.TransformerEncoderLayer (norm_first=False, relu, eval)."""
    a = _mha(x, wq, wk, wv, bq, bk, bv, wo, bo, nheads)
    x = _layernorm(x + a, ln1_g, ln1_b, 1e-5)
    h = jnp.maximum(jnp.dot(x.astype(jnp.bfloat16), w_ff1,
                            preferred_element_type=jnp.float32) + b_ff1, 0.0)
    f = jnp.dot(h.astype(jnp.bfloat16), w_ff2, preferred_element_type=jnp.float32) + b_ff2
    return _layernorm(x + f, ln2_g, ln2_b, 1e-5)


# ================================ fused kernel ================================
def _fused_forward_kernel(
    # data (one batch element per grid step)
    patches_ref,
    # patch embed / tokens
    pw_ref, pb_ref, cls_ref, pos_ref,
    # vision blocks (stacked along leading axis)
    v_ln1_g, v_ln1_b, v_wq, v_wk, v_wv, v_bq, v_bk, v_bv, v_wo, v_bo, v_ls1,
    v_ln2_g, v_ln2_b, v_wm1, v_bm1, v_wm2, v_bm2, v_ls2,
    # vision final LN
    fin_g, fin_b,
    # encoder layers (stacked)
    e_wq, e_wk, e_wv, e_bq, e_bk, e_bv, e_wo, e_bo, e_ln1_g, e_ln1_b,
    e_wff1, e_bff1, e_wff2, e_bff2, e_ln2_g, e_ln2_b,
    # head
    feat_w, feat_b,
    # output
    out_ref,
    *, nheads, n_vis, n_enc):

    # ---- patch embedding: one bf16 MXU matmul for this batch element ---------
    emb = jnp.dot(patches_ref[0], pw_ref[...],
                  preferred_element_type=jnp.float32) + pb_ref[...]       # (NP, E)

    # ---- token assembly, cls-first (contiguous) + positional embedding -------
    pos = pos_ref[...]
    x = jnp.concatenate([cls_ref[...] + pos[0:1, :], emb + pos[1:, :]],
                        axis=0)                                            # (S, E) f32

    # ---- DINOv2-style pre-norm blocks (LayerScale + exact GELU) --------------
    for i in range(n_vis):
        x = _prenorm_block(
            x, v_ln1_g[i], v_ln1_b[i], v_wq[i], v_wk[i], v_wv[i],
            v_bq[i], v_bk[i], v_bv[i], v_wo[i], v_bo[i], v_ls1[i],
            v_ln2_g[i], v_ln2_b[i], v_wm1[i], v_bm1[i], v_wm2[i], v_bm2[i],
            v_ls2[i], nheads=nheads)
    x = _layernorm(x, fin_g[...], fin_b[...], 1e-6)

    # ---- nn.TransformerEncoder: 2 post-norm layers (eval-mode dropout) -------
    for i in range(n_enc):
        x = _postnorm_layer(
            x, e_wq[i], e_wk[i], e_wv[i], e_bq[i], e_bk[i], e_bv[i],
            e_wo[i], e_bo[i], e_ln1_g[i], e_ln1_b[i],
            e_wff1[i], e_bff1[i], e_wff2[i], e_bff2[i],
            e_ln2_g[i], e_ln2_b[i], nheads=nheads)

    # ---- cls token (row 0, contiguous) -> feat_projection + tanh -------------
    # TODO(synk): cam/poly projections + cat_feats are dead in the reference
    # forward (cat_feats is discarded); omitted per performance review.
    img = x[0:1, :]                                                        # (1, E)
    out = jnp.tanh(jnp.dot(img.astype(jnp.bfloat16), feat_w[...],
                           preferred_element_type=jnp.float32) + feat_b[...])
    out_ref[...] = out.reshape(1, 1, -1).astype(out_ref.dtype)


def _resident_spec(a):
    """Full-array block; constant index map -> DMA'd once, VMEM-resident."""
    n = a.ndim
    return pl.BlockSpec(a.shape, lambda b, _n=n: (0,) * _n)


def _flop_estimate(bsz):
    S = S_VIS

    def mm(m, k, n):
        return 2 * m * k * n

    attn = 4 * mm(S, E, E) + NHEAD * (mm(S, HD, S) + mm(S, S, HD))
    flops = mm(NP, K_PATCH, E)
    flops += N_VIS_BLOCKS * (attn + mm(S, E, FF_VIS) + mm(S, FF_VIS, E))
    flops += N_ENC_LAYERS * (attn + mm(S, E, FF_ENC) + mm(S, FF_ENC, E))
    flops += mm(1, E, OUT_DIM)
    trans = (N_VIS_BLOCKS + N_ENC_LAYERS) * NHEAD * S * S                  # softmax exp
    trans += N_VIS_BLOCKS * S * FF_VIS                                     # gelu exp
    trans += OUT_DIM                                                       # tanh head
    return int(bsz * flops), int(bsz * trans)


# ============================ deterministic params ============================
def init_params(key):
    keys = iter(jax.random.split(key, 64))

    def nrm(shape, scale=0.02, dtype=jnp.float32):
        return (scale * jax.random.normal(next(keys), shape, jnp.float32)).astype(dtype)

    def zeros(shape):
        return jnp.zeros(shape, jnp.float32)

    def ones(shape):
        return jnp.ones(shape, jnp.float32)

    q_scale = 1.0 / (HD ** 0.5)

    def head_wq(n):
        # head-major layout; 1/sqrt(head_dim) scale pre-folded into w_q (and b_q).
        return (nrm((n, NHEAD, E, HD)) * q_scale).astype(jnp.bfloat16)

    def head_w(n):
        return nrm((n, NHEAD, E, HD), dtype=jnp.bfloat16)

    params = {
        # vision tower (synthetic DINOv2-style)
        "patch_w": nrm((K_PATCH, E), dtype=jnp.bfloat16),
        "patch_b": zeros((1, E)),
        "cls_token": nrm((1, E)),
        "pos_emb": nrm((S_VIS, E)),
        "v_ln1_g": ones((N_VIS_BLOCKS, 1, E)), "v_ln1_b": zeros((N_VIS_BLOCKS, 1, E)),
        "v_wq": head_wq(N_VIS_BLOCKS), "v_wk": head_w(N_VIS_BLOCKS), "v_wv": head_w(N_VIS_BLOCKS),
        "v_bq": zeros((N_VIS_BLOCKS, NHEAD, 1, HD)),
        "v_bk": zeros((N_VIS_BLOCKS, NHEAD, 1, HD)),
        "v_bv": zeros((N_VIS_BLOCKS, NHEAD, 1, HD)),
        "v_wo": nrm((N_VIS_BLOCKS, NHEAD, HD, E), dtype=jnp.bfloat16),
        "v_bo": zeros((N_VIS_BLOCKS, 1, E)),
        "v_ls1": ones((N_VIS_BLOCKS, 1, E)),
        "v_ln2_g": ones((N_VIS_BLOCKS, 1, E)), "v_ln2_b": zeros((N_VIS_BLOCKS, 1, E)),
        "v_wm1": nrm((N_VIS_BLOCKS, E, FF_VIS), dtype=jnp.bfloat16),
        "v_bm1": zeros((N_VIS_BLOCKS, 1, FF_VIS)),
        "v_wm2": nrm((N_VIS_BLOCKS, FF_VIS, E), dtype=jnp.bfloat16),
        "v_bm2": zeros((N_VIS_BLOCKS, 1, E)),
        "v_ls2": ones((N_VIS_BLOCKS, 1, E)),
        "vis_ln_g": ones((1, E)), "vis_ln_b": zeros((1, E)),
        # transformer_encoder_block: 2 independent post-norm layers
        "e_wq": head_wq(N_ENC_LAYERS), "e_wk": head_w(N_ENC_LAYERS), "e_wv": head_w(N_ENC_LAYERS),
        "e_bq": zeros((N_ENC_LAYERS, NHEAD, 1, HD)),
        "e_bk": zeros((N_ENC_LAYERS, NHEAD, 1, HD)),
        "e_bv": zeros((N_ENC_LAYERS, NHEAD, 1, HD)),
        "e_wo": nrm((N_ENC_LAYERS, NHEAD, HD, E), dtype=jnp.bfloat16),
        "e_bo": zeros((N_ENC_LAYERS, 1, E)),
        "e_ln1_g": ones((N_ENC_LAYERS, 1, E)), "e_ln1_b": zeros((N_ENC_LAYERS, 1, E)),
        "e_wff1": nrm((N_ENC_LAYERS, E, FF_ENC), dtype=jnp.bfloat16),
        "e_bff1": zeros((N_ENC_LAYERS, 1, FF_ENC)),
        "e_wff2": nrm((N_ENC_LAYERS, FF_ENC, E), dtype=jnp.bfloat16),
        "e_bff2": zeros((N_ENC_LAYERS, 1, E)),
        "e_ln2_g": ones((N_ENC_LAYERS, 1, E)), "e_ln2_b": zeros((N_ENC_LAYERS, 1, E)),
        # head
        "feat_w": nrm((E, OUT_DIM), dtype=jnp.bfloat16),
        "feat_b": zeros((1, OUT_DIM)),
        # cls_cam / cls_poly / cls_im exist in the module but only feed the dead
        # cat_feats tensor; kept for structural fidelity, not passed to the kernel.
        "cls_cam": jax.random.normal(next(keys), (1, E), jnp.float32),
        "cls_poly": jax.random.normal(next(keys), (1, E), jnp.float32),
        "cls_im": jax.random.normal(next(keys), (1, E), jnp.float32),
    }
    return params


# ================================== forward ===================================
def forward(params, image, cameraposition, polygon):
    Bs = image.shape[0]

    # im2col (pure layout op): stride-PATCH conv == matmul over unfolded patches
    patches = image.reshape(Bs, C_IN, IMG // PATCH, PATCH, IMG // PATCH, PATCH)
    patches = patches.transpose(0, 2, 4, 1, 3, 5).reshape(Bs, NP, K_PATCH)
    patches = patches.astype(jnp.bfloat16)                    # bf16 MXU input

    # cam/poly projections only feed the discarded cat_feats tensor in the
    # reference forward (dead code) -> not computed (per performance review).
    del cameraposition, polygon

    p = params
    weight_args = [
        p["patch_w"], p["patch_b"], p["cls_token"], p["pos_emb"],
        p["v_ln1_g"], p["v_ln1_b"], p["v_wq"], p["v_wk"], p["v_wv"],
        p["v_bq"], p["v_bk"], p["v_bv"], p["v_wo"], p["v_bo"], p["v_ls1"],
        p["v_ln2_g"], p["v_ln2_b"], p["v_wm1"], p["v_bm1"], p["v_wm2"], p["v_bm2"], p["v_ls2"],
        p["vis_ln_g"], p["vis_ln_b"],
        p["e_wq"], p["e_wk"], p["e_wv"], p["e_bq"], p["e_bk"], p["e_bv"],
        p["e_wo"], p["e_bo"], p["e_ln1_g"], p["e_ln1_b"],
        p["e_wff1"], p["e_bff1"], p["e_wff2"], p["e_bff2"],
        p["e_ln2_g"], p["e_ln2_b"],
        p["feat_w"], p["feat_b"],
    ]

    flops, trans = _flop_estimate(Bs)
    bytes_accessed = (int(patches.size) * patches.dtype.itemsize
                      + sum(int(a.size) * a.dtype.itemsize for a in weight_args)
                      + Bs * OUT_DIM * 4)

    in_specs = ([pl.BlockSpec((1, NP, K_PATCH), lambda b: (b, 0, 0))]
                + [_resident_spec(a) for a in weight_args])

    out = pl.pallas_call(
        functools.partial(_fused_forward_kernel, nheads=NHEAD,
                          n_vis=N_VIS_BLOCKS, n_enc=N_ENC_LAYERS),
        out_shape=jax.ShapeDtypeStruct((Bs, 1, OUT_DIM), jnp.float32),
        grid=(Bs,),
        in_specs=in_specs,
        out_specs=pl.BlockSpec((1, 1, OUT_DIM), lambda b: (b, 0, 0)),
        compiler_params=pltpu.CompilerParams(dimension_semantics=("parallel",)),
        cost_estimate=pl.CostEstimate(flops=flops, transcendentals=trans,
                                      bytes_accessed=int(bytes_accessed)),
    )(patches, *weight_args)

    return out                                                   # (B, 1, OUT_DIM)


# ==================================== main ====================================
if __name__ == "__main__":
    key = jax.random.PRNGKey(0)
    k_img, k_cam, k_poly, k_param = jax.random.split(key, 4)

    image = jax.random.normal(k_img, (B, C_IN, IMG, IMG), jnp.float32)     # NCHW
    cameraposition = jax.random.normal(k_cam, (B, CAM_IN), jnp.float32)
    polygon = jax.random.normal(k_poly, (B, POLY_IN), jnp.float32)

    params = init_params(k_param)

    fwd = jax.jit(forward)
    out = jax.block_until_ready(fwd(params, image, cameraposition, polygon))

    assert out.shape == (B, 1, OUT_DIM), out.shape
    assert bool(jnp.all(jnp.isfinite(out)))
    print("KERNEL_OK")
</pallas_src>

<mosaic_0001>
module attributes {stable_mosaic.version = 11 : i64} {
  func.func @_fused_forward_kernel(%arg0: i32, %arg1: memref<1x4x192xbf16, #tpu.memory_space<vmem>>, %arg2: memref<192x128xbf16, #tpu.memory_space<vmem>>, %arg3: memref<1x128xf32, #tpu.memory_space<vmem>>, %arg4: memref<1x128xf32, #tpu.memory_space<vmem>>, %arg5: memref<5x128xf32, #tpu.memory_space<vmem>>, %arg6: memref<2x1x128xf32, #tpu.memory_space<vmem>>, %arg7: memref<2x1x128xf32, #tpu.memory_space<vmem>>, %arg8: memref<2x4x128x32xbf16, #tpu.memory_space<vmem>>, %arg9: memref<2x4x128x32xbf16, #tpu.memory_space<vmem>>, %arg10: memref<2x4x128x32xbf16, #tpu.memory_space<vmem>>, %arg11: memref<2x4x1x32xf32, #tpu.memory_space<vmem>>, %arg12: memref<2x4x1x32xf32, #tpu.memory_space<vmem>>, %arg13: memref<2x4x1x32xf32, #tpu.memory_space<vmem>>, %arg14: memref<2x4x32x128xbf16, #tpu.memory_space<vmem>>, %arg15: memref<2x1x128xf32, #tpu.memory_space<vmem>>, %arg16: memref<2x1x128xf32, #tpu.memory_space<vmem>>, %arg17: memref<2x1x128xf32, #tpu.memory_space<vmem>>, %arg18: memref<2x1x128xf32, #tpu.memory_space<vmem>>, %arg19: memref<2x128x256xbf16, #tpu.memory_space<vmem>>, %arg20: memref<2x1x256xf32, #tpu.memory_space<vmem>>, %arg21: memref<2x256x128xbf16, #tpu.memory_space<vmem>>, %arg22: memref<2x1x128xf32, #tpu.memory_space<vmem>>, %arg23: memref<2x1x128xf32, #tpu.memory_space<vmem>>, %arg24: memref<1x128xf32, #tpu.memory_space<vmem>>, %arg25: memref<1x128xf32, #tpu.memory_space<vmem>>, %arg26: memref<2x4x128x32xbf16, #tpu.memory_space<vmem>>, %arg27: memref<2x4x128x32xbf16, #tpu.memory_space<vmem>>, %arg28: memref<2x4x128x32xbf16, #tpu.memory_space<vmem>>, %arg29: memref<2x4x1x32xf32, #tpu.memory_space<vmem>>, %arg30: memref<2x4x1x32xf32, #tpu.memory_space<vmem>>, %arg31: memref<2x4x1x32xf32, #tpu.memory_space<vmem>>, %arg32: memref<2x4x32x128xbf16, #tpu.memory_space<vmem>>, %arg33: memref<2x1x128xf32, #tpu.memory_space<vmem>>, %arg34: memref<2x1x128xf32, #tpu.memory_space<vmem>>, %arg35: memref<2x1x128xf32, #tpu.memory_space<vmem>>, %arg36: memref<2x128x256xbf16, #tpu.memory_space<vmem>>, %arg37: memref<2x1x256xf32, #tpu.memory_space<vmem>>, %arg38: memref<2x256x128xbf16, #tpu.memory_space<vmem>>, %arg39: memref<2x1x128xf32, #tpu.memory_space<vmem>>, %arg40: memref<2x1x128xf32, #tpu.memory_space<vmem>>, %arg41: memref<2x1x128xf32, #tpu.memory_space<vmem>>, %arg42: memref<128x128xbf16, #tpu.memory_space<vmem>>, %arg43: memref<1x128xf32, #tpu.memory_space<vmem>>, %arg44: memref<1x1x128xf32, #tpu.memory_space<vmem>>) attributes {dimension_semantics = [#tpu.dimension_semantics<parallel>], iteration_bounds = array<i64: 2>, scalar_prefetch = 0 : i64, scratch_operands = 0 : i64, tpu.core_type = #tpu.core_type<tc>, window_params = [{transform_indices = @transform_0, window_bounds = array<i64: 1, 4, 192>}, {pipeline_mode = #tpu.pipeline_mode<synchronous>, transform_indices = @transform_1, window_bounds = array<i64: 192, 128>}, {pipeline_mode = #tpu.pipeline_mode<synchronous>, transform_indices = @transform_2, window_bounds = array<i64: 1, 128>}, {pipeline_mode = #tpu.pipeline_mode<synchronous>, transform_indices = @transform_3, window_bounds = array<i64: 1, 128>}, {pipeline_mode = #tpu.pipeline_mode<synchronous>, transform_indices = @transform_4, window_bounds = array<i64: 5, 128>}, {pipeline_mode = #tpu.pipeline_mode<synchronous>, transform_indices = @transform_5, window_bounds = array<i64: 2, 1, 128>}, {pipeline_mode = #tpu.pipeline_mode<synchronous>, transform_indices = @transform_6, window_bounds = array<i64: 2, 1, 128>}, {pipeline_mode = #tpu.pipeline_mode<synchronous>, transform_indices = @transform_7, window_bounds = array<i64: 2, 4, 128, 32>}, {pipeline_mode = #tpu.pipeline_mode<synchronous>, transform_indices = @transform_8, window_bounds = array<i64: 2, 4, 128, 32>}, {pipeline_mode = #tpu.pipeline_mode<synchronous>, transform_indices = @transform_9, window_bounds = array<i64: 2, 4, 128, 32>}, {pipeline_mode = #tpu.pipeline_mode<synchronous>, transform_indices = @transform_10, window_bounds = array<i64: 2, 4, 1, 32>}, {pipeline_mode = #tpu.pipeline_mode<synchronous>, transform_indices = @transform_11, window_bounds = array<i64: 2, 4, 1, 32>}, {pipeline_mode = #tpu.pipeline_mode<synchronous>, transform_indices = @transform_12, window_bounds = array<i64: 2, 4, 1, 32>}, {pipeline_mode = #tpu.pipeline_mode<synchronous>, transform_indices = @transform_13, window_bounds = array<i64: 2, 4, 32, 128>}, {pipeline_mode = #tpu.pipeline_mode<synchronous>, transform_indices = @transform_14, window_bounds = array<i64: 2, 1, 128>}, {pipeline_mode = #tpu.pipeline_mode<synchronous>, transform_indices = @transform_15, window_bounds = array<i64: 2, 1, 128>}, {pipeline_mode = #tpu.pipeline_mode<synchronous>, transform_indices = @transform_16, window_bounds = array<i64: 2, 1, 128>}, {pipeline_mode = #tpu.pipeline_mode<synchronous>, transform_indices = @transform_17, window_bounds = array<i64: 2, 1, 128>}, {pipeline_mode = #tpu.pipeline_mode<synchronous>, transform_indices = @transform_18, window_bounds = array<i64: 2, 128, 256>}, {pipeline_mode = #tpu.pipeline_mode<synchronous>, transform_indices = @transform_19, window_bounds = array<i64: 2, 1, 256>}, {pipeline_mode = #tpu.pipeline_mode<synchronous>, transform_indices = @transform_20, window_bounds = array<i64: 2, 256, 128>}, {pipeline_mode = #tpu.pipeline_mode<synchronous>, transform_indices = @transform_21, window_bounds = array<i64: 2, 1, 128>}, {pipeline_mode = #tpu.pipeline_mode<synchronous>, transform_indices = @transform_22, window_bounds = array<i64: 2, 1, 128>}, {pipeline_mode = #tpu.pipeline_mode<synchronous>, transform_indices = @transform_23, window_bounds = array<i64: 1, 128>}, {pipeline_mode = #tpu.pipeline_mode<synchronous>, transform_indices = @transform_24, window_bounds = array<i64: 1, 128>}, {pipeline_mode = #tpu.pipeline_mode<synchronous>, transform_indices = @transform_25, window_bounds = array<i64: 2, 4, 128, 32>}, {pipeline_mode = #tpu.pipeline_mode<synchronous>, transform_indices = @transform_26, window_bounds = array<i64: 2, 4, 128, 32>}, {pipeline_mode = #tpu.pipeline_mode<synchronous>, transform_indices = @transform_27, window_bounds = array<i64: 2, 4, 128, 32>}, {pipeline_mode = #tpu.pipeline_mode<synchronous>, transform_indices = @transform_28, window_bounds = array<i64: 2, 4, 1, 32>}, {pipeline_mode = #tpu.pipeline_mode<synchronous>, transform_indices = @transform_29, window_bounds = array<i64: 2, 4, 1, 32>}, {pipeline_mode = #tpu.pipeline_mode<synchronous>, transform_indices = @transform_30, window_bounds = array<i64: 2, 4, 1, 32>}, {pipeline_mode = #tpu.pipeline_mode<synchronous>, transform_indices = @transform_31, window_bounds = array<i64: 2, 4, 32, 128>}, {pipeline_mode = #tpu.pipeline_mode<synchronous>, transform_indices = @transform_32, window_bounds = array<i64: 2, 1, 128>}, {pipeline_mode = #tpu.pipeline_mode<synchronous>, transform_indices = @transform_33, window_bounds = array<i64: 2, 1, 128>}, {pipeline_mode = #tpu.pipeline_mode<synchronous>, transform_indices = @transform_34, window_bounds = array<i64: 2, 1, 128>}, {pipeline_mode = #tpu.pipeline_mode<synchronous>, transform_indices = @transform_35, window_bounds = array<i64: 2, 128, 256>}, {pipeline_mode = #tpu.pipeline_mode<synchronous>, transform_indices = @transform_36, window_bounds = array<i64: 2, 1, 256>}, {pipeline_mode = #tpu.pipeline_mode<synchronous>, transform_indices = @transform_37, window_bounds = array<i64: 2, 256, 128>}, {pipeline_mode = #tpu.pipeline_mode<synchronous>, transform_indices = @transform_38, window_bounds = array<i64: 2, 1, 128>}, {pipeline_mode = #tpu.pipeline_mode<synchronous>, transform_indices = @transform_39, window_bounds = array<i64: 2, 1, 128>}, {pipeline_mode = #tpu.pipeline_mode<synchronous>, transform_indices = @transform_40, window_bounds = array<i64: 2, 1, 128>}, {pipeline_mode = #tpu.pipeline_mode<synchronous>, transform_indices = @transform_41, window_bounds = array<i64: 128, 128>}, {pipeline_mode = #tpu.pipeline_mode<synchronous>, transform_indices = @transform_42, window_bounds = array<i64: 1, 128>}, {transform_indices = @transform_43, window_bounds = array<i64: 1, 1, 128>}]} {
    %c0 = arith.constant 0 : index
    %c0_0 = arith.constant 0 : index
    %c0_1 = arith.constant 0 : index
    %0 = vector.load %arg1[%c0, %c0_0, %c0_1] : memref<1x4x192xbf16, #tpu.memory_space<vmem>>, vector<1x4x192xbf16>
    %1 = vector.shape_cast %0 : vector<1x4x192xbf16> to vector<4x192xbf16>
    %c0_2 = arith.constant 0 : index
    %c0_3 = arith.constant 0 : index
    %2 = vector.load %arg2[%c0_2, %c0_3] : memref<192x128xbf16, #tpu.memory_space<vmem>>, vector<192x128xbf16>
    %cst = arith.constant dense<0.000000e+00> : vector<4x128xf32>
    %3 = tpu.matmul %1, %2, %cst {dimension_numbers = #tpu.dot_dimension_numbers<[1], [0], [0], [1], [0, 0, 1, 1], [], []>} : vector<4x192xbf16>, vector<192x128xbf16>, vector<4x128xf32> -> vector<4x128xf32>
    %c0_4 = arith.constant 0 : index
    %c0_5 = arith.constant 0 : index
    %4 = vector.load %arg3[%c0_4, %c0_5] : memref<1x128xf32, #tpu.memory_space<vmem>>, vector<1x128xf32>
    %5 = vector.broadcast %4 : vector<1x128xf32> to vector<4x128xf32>
    %6 = arith.addf %3, %5 : vector<4x128xf32>
    %c0_6 = arith.constant 0 : index
    %c0_7 = arith.constant 0 : index
    %7 = vector.load %arg5[%c0_6, %c0_7] : memref<5x128xf32, #tpu.memory_space<vmem>>, vector<5x128xf32>
    %c0_8 = arith.constant 0 : index
    %c0_9 = arith.constant 0 : index
    %8 = vector.load %arg4[%c0_8, %c0_9] : memref<1x128xf32, #tpu.memory_space<vmem>>, vector<1x128xf32>
    %9 = vector.extract_strided_slice %7 {offsets = [0, 0], sizes = [1, 128], strides = [1, 1]} : vector<5x128xf32> to vector<1x128xf32>
    %10 = arith.addf %8, %9 : vector<1x128xf32>
    %11 = vector.extract_strided_slice %7 {offsets = [1, 0], sizes = [4, 128], strides = [1, 1]} : vector<5x128xf32> to vector<4x128xf32>
    %12 = arith.addf %6, %11 : vector<4x128xf32>
    %13 = tpu.concatenate %10, %12 in 0 : vector<1x128xf32>, vector<4x128xf32> -> vector<5x128xf32>
    %c0_10 = arith.constant 0 : index
    %c0_11 = arith.constant 0 : index
    %c0_12 = arith.constant 0 : index
    %14 = vector.load %arg6[%c0_10, %c0_11, %c0_12] : memref<2x1x128xf32, #tpu.memory_space<vmem>>, vector<1x1x128xf32>
    %15 = vector.shape_cast %14 : vector<1x1x128xf32> to vector<1x128xf32>
    %c0_13 = arith.constant 0 : index
    %c0_14 = arith.constant 0 : index
    %c0_15 = arith.constant 0 : index
    %16 = vector.load %arg7[%c0_13, %c0_14, %c0_15] : memref<2x1x128xf32, #tpu.memory_space<vmem>>, vector<1x1x128xf32>
    %17 = vector.shape_cast %16 : vector<1x1x128xf32> to vector<1x128xf32>
    %c0_16 = arith.constant 0 : index
    %c0_17 = arith.constant 0 : index
    %c0_18 = arith.constant 0 : index
    %c0_19 = arith.constant 0 : index
    %18 = vector.load %arg8[%c0_16, %c0_17, %c0_18, %c0_19] : memref<2x4x128x32xbf16, #tpu.memory_space<vmem>>, vector<1x4x128x32xbf16>
    %19 = vector.shape_cast %18 : vector<1x4x128x32xbf16> to vector<4x128x32xbf16>
    %c0_20 = arith.constant 0 : index
    %c0_21 = arith.constant 0 : index
    %c0_22 = arith.constant 0 : index
    %c0_23 = arith.constant 0 : index
    %20 = vector.load %arg9[%c0_20, %c0_21, %c0_22, %c0_23] : memref<2x4x128x32xbf16, #tpu.memory_space<vmem>>, vector<1x4x128x32xbf16>
    %21 = vector.shape_cast %20 : vector<1x4x128x32xbf16> to vector<4x128x32xbf16>
    %c0_24 = arith.constant 0 : index
    %c0_25 = arith.constant 0 : index
    %c0_26 = arith.constant 0 : index
    %c0_27 = arith.constant 0 : index
    %22 = vector.load %arg10[%c0_24, %c0_25, %c0_26, %c0_27] : memref<2x4x128x32xbf16, #tpu.memory_space<vmem>>, vector<1x4x128x32xbf16>
    %23 = vector.shape_cast %22 : vector<1x4x128x32xbf16> to vector<4x128x32xbf16>
    %c0_28 = arith.constant 0 : index
    %c0_29 = arith.constant 0 : index
    %c0_30 = arith.constant 0 : index
    %c0_31 = arith.constant 0 : index
    %24 = vector.load %arg11[%c0_28, %c0_29, %c0_30, %c0_31] : memref<2x4x1x32xf32, #tpu.memory_space<vmem>>, vector<1x4x1x32xf32>
    %25 = vector.shape_cast %24 : vector<1x4x1x32xf32> to vector<4x1x32xf32>
    %c0_32 = arith.constant 0 : index
    %c0_33 = arith.constant 0 : index
    %c0_34 = arith.constant 0 : index
    %c0_35 = arith.constant 0 : index
    %26 = vector.load %arg12[%c0_32, %c0_33, %c0_34, %c0_35] : memref<2x4x1x32xf32, #tpu.memory_space<vmem>>, vector<1x4x1x32xf32>
    %27 = vector.shape_cast %26 : vector<1x4x1x32xf32> to vector<4x1x32xf32>
    %c0_36 = arith.constant 0 : index
    %c0_37 = arith.constant 0 : index
    %c0_38 = arith.constant 0 : index
    %c0_39 = arith.constant 0 : index
    %28 = vector.load %arg13[%c0_36, %c0_37, %c0_38, %c0_39] : memref<2x4x1x32xf32, #tpu.memory_space<vmem>>, vector<1x4x1x32xf32>
    %29 = vector.shape_cast %28 : vector<1x4x1x32xf32> to vector<4x1x32xf32>
    %c0_40 = arith.constant 0 : index
    %c0_41 = arith.constant 0 : index
    %c0_42 = arith.constant 0 : index
    %c0_43 = arith.constant 0 : index
    %30 = vector.load %arg14[%c0_40, %c0_41, %c0_42, %c0_43] : memref<2x4x32x128xbf16, #tpu.memory_space<vmem>>, vector<1x4x32x128xbf16>
    %31 = vector.shape_cast %30 : vector<1x4x32x128xbf16> to vector<4x32x128xbf16>
    %c0_44 = arith.constant 0 : index
    %c0_45 = arith.constant 0 : index
    %c0_46 = arith.constant 0 : index
    %32 = vector.load %arg15[%c0_44, %c0_45, %c0_46] : memref<2x1x128xf32, #tpu.memory_space<vmem>>, vector<1x1x128xf32>
    %33 = vector.shape_cast %32 : vector<1x1x128xf32> to vector<1x128xf32>
    %c0_47 = arith.constant 0 : index
    %c0_48 = arith.constant 0 : index
    %c0_49 = arith.constant 0 : index
    %34 = vector.load %arg16[%c0_47, %c0_48, %c0_49] : memref<2x1x128xf32, #tpu.memory_space<vmem>>, vector<1x1x128xf32>
    %35 = vector.shape_cast %34 : vector<1x1x128xf32> to vector<1x128xf32>
    %c0_50 = arith.constant 0 : index
    %c0_51 = arith.constant 0 : index
    %c0_52 = arith.constant 0 : index
    %36 = vector.load %arg17[%c0_50, %c0_51, %c0_52] : memref<2x1x128xf32, #tpu.memory_space<vmem>>, vector<1x1x128xf32>
    %37 = vector.shape_cast %36 : vector<1x1x128xf32> to vector<1x128xf32>
    %c0_53 = arith.constant 0 : index
    %c0_54 = arith.constant 0 : index
    %c0_55 = arith.constant 0 : index
    %38 = vector.load %arg18[%c0_53, %c0_54, %c0_55] : memref<2x1x128xf32, #tpu.memory_space<vmem>>, vector<1x1x128xf32>
    %39 = vector.shape_cast %38 : vector<1x1x128xf32> to vector<1x128xf32>
    %c0_56 = arith.constant 0 : index
    %c0_57 = arith.constant 0 : index
    %c0_58 = arith.constant 0 : index
    %40 = vector.load %arg19[%c0_56, %c0_57, %c0_58] : memref<2x128x256xbf16, #tpu.memory_space<vmem>>, vector<1x128x256xbf16>
    %41 = vector.shape_cast %40 : vector<1x128x256xbf16> to vector<128x256xbf16>
    %c0_59 = arith.constant 0 : index
    %c0_60 = arith.constant 0 : index
    %c0_61 = arith.constant 0 : index
    %42 = vector.load %arg20[%c0_59, %c0_60, %c0_61] : memref<2x1x256xf32, #tpu.memory_space<vmem>>, vector<1x1x256xf32>
    %43 = vector.shape_cast %42 : vector<1x1x256xf32> to vector<1x256xf32>
    %c0_62 = arith.constant 0 : index
    %c0_63 = arith.constant 0 : index
    %c0_64 = arith.constant 0 : index
    %44 = vector.load %arg21[%c0_62, %c0_63, %c0_64] : memref<2x256x128xbf16, #tpu.memory_space<vmem>>, vector<1x256x128xbf16>
    %45 = vector.shape_cast %44 : vector<1x256x128xbf16> to vector<256x128xbf16>
    %c0_65 = arith.constant 0 : index
    %c0_66 = arith.constant 0 : index
    %c0_67 = arith.constant 0 : index
    %46 = vector.load %arg22[%c0_65, %c0_66, %c0_67] : memref<2x1x128xf32, #tpu.memory_space<vmem>>, vector<1x1x128xf32>
    %47 = vector.shape_cast %46 : vector<1x1x128xf32> to vector<1x128xf32>
    %c0_68 = arith.constant 0 : index
    %c0_69 = arith.constant 0 : index
    %c0_70 = arith.constant 0 : index
    %48 = vector.load %arg23[%c0_68, %c0_69, %c0_70] : memref<2x1x128xf32, #tpu.memory_space<vmem>>, vector<1x1x128xf32>
    %49 = vector.shape_cast %48 : vector<1x1x128xf32> to vector<1x128xf32>
    %cst_71 = arith.constant dense<0.000000e+00> : vector<5xf32>
    %50 = vector.multi_reduction <add>, %13, %cst_71 [1] : vector<5x128xf32> to vector<5xf32>
    %51 = vector.shape_cast %50 : vector<5xf32> to vector<5x1xf32>
    %cst_72 = arith.constant 1.280000e+02 : f32
    %52 = vector.broadcast %cst_72 : f32 to vector<5x1xf32>
    %53 = arith.divf %51, %52 : vector<5x1xf32>
    %54 = vector.broadcast %53 : vector<5x1xf32> to vector<5x128xf32>
    %55 = arith.subf %13, %54 : vector<5x128xf32>
    %56 = arith.mulf %55, %55 : vector<5x128xf32>
    %cst_73 = arith.constant dense<0.000000e+00> : vector<5xf32>
    %57 = vector.multi_reduction <add>, %56, %cst_73 [1] : vector<5x128xf32> to vector<5xf32>
    %58 = vector.shape_cast %57 : vector<5xf32> to vector<5x1xf32>
    %cst_74 = arith.constant 1.280000e+02 : f32
    %59 = vector.broadcast %cst_74 : f32 to vector<5x1xf32>
    %60 = arith.divf %58, %59 : vector<5x1xf32>
    %61 = vector.broadcast %53 : vector<5x1xf32> to vector<5x128xf32>
    %62 = arith.subf %13, %61 : vector<5x128xf32>
    %cst_75 = arith.constant 9.99999997E-7 : f32
    %63 = vector.broadcast %cst_75 : f32 to vector<5x1xf32>
    %64 = arith.addf %60, %63 : vector<5x1xf32>
    %65 = math.rsqrt %64 : vector<5x1xf32>
    %66 = vector.broadcast %65 : vector<5x1xf32> to vector<5x128xf32>
    %67 = arith.mulf %62, %66 : vector<5x128xf32>
    %68 = vector.broadcast %15 : vector<1x128xf32> to vector<5x128xf32>
    %69 = arith.mulf %67, %68 : vector<5x128xf32>
    %70 = vector.broadcast %17 : vector<1x128xf32> to vector<5x128xf32>
    %71 = arith.addf %69, %70 : vector<5x128xf32>
    %72 = arith.truncf %71 : vector<5x128xf32> to vector<5x128xbf16>
    %73 = vector.extract_strided_slice %19 {offsets = [0, 0, 0], sizes = [1, 128, 32], strides = [1, 1, 1]} : vector<4x128x32xbf16> to vector<1x128x32xbf16>
    %74 = vector.shape_cast %73 : vector<1x128x32xbf16> to vector<128x32xbf16>
    %cst_76 = arith.constant dense<0.000000e+00> : vector<5x32xf32>
    %75 = tpu.matmul %72, %74, %cst_76 {dimension_numbers = #tpu.dot_dimension_numbers<[1], [0], [0], [1], [0, 0, 1, 1], [], []>} : vector<5x128xbf16>, vector<128x32xbf16>, vector<5x32xf32> -> vector<5x32xf32>
    %76 = vector.extract_strided_slice %19 {offsets = [1, 0, 0], sizes = [1, 128, 32], strides = [1, 1, 1]} : vector<4x128x32xbf16> to vector<1x128x32xbf16>
    %77 = vector.shape_cast %76 : vector<1x128x32xbf16> to vector<128x32xbf16>
    %cst_77 = arith.constant dense<0.000000e+00> : vector<5x32xf32>
    %78 = tpu.matmul %72, %77, %cst_77 {dimension_numbers = #tpu.dot_dimension_numbers<[1], [0], [0], [1], [0, 0, 1, 1], [], []>} : vector<5x128xbf16>, vector<128x32xbf16>, vector<5x32xf32> -> vector<5x32xf32>
    %79 = vector.extract_strided_slice %19 {offsets = [2, 0, 0], sizes = [1, 128, 32], strides = [1, 1, 1]} : vector<4x128x32xbf16> to vector<1x128x32xbf16>
    %80 = vector.shape_cast %79 : vector<1x128x32xbf16> to vector<128x32xbf16>
    %cst_78 = arith.constant dense<0.000000e+00> : vector<5x32xf32>
    %81 = tpu.matmul %72, %80, %cst_78 {dimension_numbers = #tpu.dot_dimension_numbers<[1], [0], [0], [1], [0, 0, 1, 1], [], []>} : vector<5x128xbf16>, vector<128x32xbf16>, vector<5x32xf32> -> vector<5x32xf32>
    %82 = vector.extract_strided_slice %19 {offsets = [3, 0, 0], sizes = [1, 128, 32], strides = [1, 1, 1]} : vector<4x128x32xbf16> to vector<1x128x32xbf16>
    %83 = vector.shape_cast %82 : vector<1x128x32xbf16> to vector<128x32xbf16>
    %cst_79 = arith.constant dense<0.000000e+00> : vector<5x32xf32>
    %84 = tpu.matmul %72, %83, %cst_79 {dimension_numbers = #tpu.dot_dimension_numbers<[1], [0], [0], [1], [0, 0, 1, 1], [], []>} : vector<5x128xbf16>, vector<128x32xbf16>, vector<5x32xf32> -> vector<5x32xf32>
    %85 = vector.shape_cast %75 : vector<5x32xf32> to vector<1x5x32xf32>
    %86 = vector.shape_cast %78 : vector<5x32xf32> to vector<1x5x32xf32>
    %87 = vector.shape_cast %81 : vector<5x32xf32> to vector<1x5x32xf32>
    %88 = vector.shape_cast %84 : vector<5x32xf32> to vector<1x5x32xf32>
    %89 = tpu.concatenate %85, %86, %87, %88 in 0 : vector<1x5x32xf32>, vector<1x5x32xf32>, vector<1x5x32xf32>, vector<1x5x32xf32> -> vector<4x5x32xf32>
    %90 = vector.broadcast %25 : vector<4x1x32xf32> to vector<4x5x32xf32>
    %91 = arith.addf %89, %90 : vector<4x5x32xf32>
    %92 = vector.extract_strided_slice %21 {offsets = [0, 0, 0], sizes = [1, 128, 32], strides = [1, 1, 1]} : vector<4x128x32xbf16> to vector<1x128x32xbf16>
    %93 = vector.shape_cast %92 : vector<1x128x32xbf16> to vector<128x32xbf16>
    %cst_80 = arith.constant dense<0.000000e+00> : vector<5x32xf32>
    %94 = tpu.matmul %72, %93, %cst_80 {dimension_numbers = #tpu.dot_dimension_numbers<[1], [0], [0], [1], [0, 0, 1, 1], [], []>} : vector<5x128xbf16>, vector<128x32xbf16>, vector<5x32xf32> -> vector<5x32xf32>
    %95 = vector.extract_strided_slice %21 {offsets = [1, 0, 0], sizes = [1, 128, 32], strides = [1, 1, 1]} : vector<4x128x32xbf16> to vector<1x128x32xbf16>
    %96 = vector.shape_cast %95 : vector<1x128x32xbf16> to vector<128x32xbf16>
    %cst_81 = arith.constant dense<0.000000e+00> : vector<5x32xf32>
    %97 = tpu.matmul %72, %96, %cst_81 {dimension_numbers = #tpu.dot_dimension_numbers<[1], [0], [0], [1], [0, 0, 1, 1], [], []>} : vector<5x128xbf16>, vector<128x32xbf16>, vector<5x32xf32> -> vector<5x32xf32>
    %98 = vector.extract_strided_slice %21 {offsets = [2, 0, 0], sizes = [1, 128, 32], strides = [1, 1, 1]} : vector<4x128x32xbf16> to vector<1x128x32xbf16>
    %99 = vector.shape_cast %98 : vector<1x128x32xbf16> to vector<128x32xbf16>
    %cst_82 = arith.constant dense<0.000000e+00> : vector<5x32xf32>
    %100 = tpu.matmul %72, %99, %cst_82 {dimension_numbers = #tpu.dot_dimension_numbers<[1], [0], [0], [1], [0, 0, 1, 1], [], []>} : vector<5x128xbf16>, vector<128x32xbf16>, vector<5x32xf32> -> vector<5x32xf32>
    %101 = vector.extract_strided_slice %21 {offsets = [3, 0, 0], sizes = [1, 128, 32], strides = [1, 1, 1]} : vector<4x128x32xbf16> to vector<1x128x32xbf16>
    %102 = vector.shape_cast %101 : vector<1x128x32xbf16> to vector<128x32xbf16>
    %cst_83 = arith.constant dense<0.000000e+00> : vector<5x32xf32>
    %103 = tpu.matmul %72, %102, %cst_83 {dimension_numbers = #tpu.dot_dimension_numbers<[1], [0], [0], [1], [0, 0, 1, 1], [], []>} : vector<5x128xbf16>, vector<128x32xbf16>, vector<5x32xf32> -> vector<5x32xf32>
    %104 = vector.shape_cast %94 : vector<5x32xf32> to vector<1x5x32xf32>
    %105 = vector.shape_cast %97 : vector<5x32xf32> to vector<1x5x32xf32>
    %106 = vector.shape_cast %100 : vector<5x32xf32> to vector<1x5x32xf32>
    %107 = vector.shape_cast %103 : vector<5x32xf32> to vector<1x5x32xf32>
    %108 = tpu.concatenate %104, %105, %106, %107 in 0 : vector<1x5x32xf32>, vector<1x5x32xf32>, vector<1x5x32xf32>, vector<1x5x32xf32> -> vector<4x5x32xf32>
    %109 = vector.broadcast %27 : vector<4x1x32xf32> to vector<4x5x32xf32>
    %110 = arith.addf %108, %109 : vector<4x5x32xf32>
    %111 = vector.extract_strided_slice %23 {offsets = [0, 0, 0], sizes = [1, 128, 32], strides = [1, 1, 1]} : vector<4x128x32xbf16> to vector<1x128x32xbf16>
    %112 = vector.shape_cast %111 : vector<1x128x32xbf16> to vector<128x32xbf16>
    %cst_84 = arith.constant dense<0.000000e+00> : vector<5x32xf32>
    %113 = tpu.matmul %72, %112, %cst_84 {dimension_numbers = #tpu.dot_dimension_numbers<[1], [0], [0], [1], [0, 0, 1, 1], [], []>} : vector<5x128xbf16>, vector<128x32xbf16>, vector<5x32xf32> -> vector<5x32xf32>
    %114 = vector.extract_strided_slice %23 {offsets = [1, 0, 0], sizes = [1, 128, 32], strides = [1, 1, 1]} : vector<4x128x32xbf16> to vector<1x128x32xbf16>
    %115 = vector.shape_cast %114 : vector<1x128x32xbf16> to vector<128x32xbf16>
    %cst_85 = arith.constant dense<0.000000e+00> : vector<5x32xf32>
    %116 = tpu.matmul %72, %115, %cst_85 {dimension_numbers = #tpu.dot_dimension_numbers<[1], [0], [0], [1], [0, 0, 1, 1], [], []>} : vector<5x128xbf16>, vector<128x32xbf16>, vector<5x32xf32> -> vector<5x32xf32>
    %117 = vector.extract_strided_slice %23 {offsets = [2, 0, 0], sizes = [1, 128, 32], strides = [1, 1, 1]} : vector<4x128x32xbf16> to vector<1x128x32xbf16>
    %118 = vector.shape_cast %117 : vector<1x128x32xbf16> to vector<128x32xbf16>
    %cst_86 = arith.constant dense<0.000000e+00> : vector<5x32xf32>
    %119 = tpu.matmul %72, %118, %cst_86 {dimension_numbers = #tpu.dot_dimension_numbers<[1], [0], [0], [1], [0, 0, 1, 1], [], []>} : vector<5x128xbf16>, vector<128x32xbf16>, vector<5x32xf32> -> vector<5x32xf32>
    %120 = vector.extract_strided_slice %23 {offsets = [3, 0, 0], sizes = [1, 128, 32], strides = [1, 1, 1]} : vector<4x128x32xbf16> to vector<1x128x32xbf16>
    %121 = vector.shape_cast %120 : vector<1x128x32xbf16> to vector<128x32xbf16>
    %cst_87 = arith.constant dense<0.000000e+00> : vector<5x32xf32>
    %122 = tpu.matmul %72, %121, %cst_87 {dimension_numbers = #tpu.dot_dimension_numbers<[1], [0], [0], [1], [0, 0, 1, 1], [], []>} : vector<5x128xbf16>, vector<128x32xbf16>, vector<5x32xf32> -> vector<5x32xf32>
    %123 = vector.shape_cast %113 : vector<5x32xf32> to vector<1x5x32xf32>
    %124 = vector.shape_cast %116 : vector<5x32xf32> to vector<1x5x32xf32>
    %125 = vector.shape_cast %119 : vector<5x32xf32> to vector<1x5x32xf32>
    %126 = vector.shape_cast %122 : vector<5x32xf32> to vector<1x5x32xf32>
    %127 = tpu.concatenate %123, %124, %125, %126 in 0 : vector<1x5x32xf32>, vector<1x5x32xf32>, vector<1x5x32xf32>, vector<1x5x32xf32> -> vector<4x5x32xf32>
    %128 = vector.broadcast %29 : vector<4x1x32xf32> to vector<4x5x32xf32>
    %129 = arith.addf %127, %128 : vector<4x5x32xf32>
    %130 = arith.truncf %91 : vector<4x5x32xf32> to vector<4x5x32xbf16>
    %131 = arith.truncf %110 : vector<4x5x32xf32> to vector<4x5x32xbf16>
    "tpu.trace_start"() <{level = 10 : i32, message = "hqd,hkd->hqk"}> : () -> ()
    %cst_88 = arith.constant dense<0.000000e+00> : vector<4x5x5xf32>
    %132 = tpu.matmul %130, %131, %cst_88 {dimension_numbers = #tpu.dot_dimension_numbers<[2], [2], [1], [1], [0, 0, 0, 1, 1, 1], [0], [0]>} : vector<4x5x32xbf16>, vector<4x5x32xbf16>, vector<4x5x5xf32> -> vector<4x5x5xf32>
    "tpu.trace_stop"() : () -> ()
    %cst_89 = arith.constant dense<0xFF800000> : vector<4x5xf32>
    %133 = vector.multi_reduction <maximumf>, %132, %cst_89 [2] : vector<4x5x5xf32> to vector<4x5xf32>
    %134 = vector.shape_cast %133 : vector<4x5xf32> to vector<4x5x1xf32>
    %135 = vector.broadcast %134 : vector<4x5x1xf32> to vector<4x5x5xf32>
    %136 = arith.subf %132, %135 : vector<4x5x5xf32>
    %137 = math.exp %136 : vector<4x5x5xf32>
    %cst_90 = arith.constant dense<0.000000e+00> : vector<4x5xf32>
    %138 = vector.multi_reduction <add>, %137, %cst_90 [2] : vector<4x5x5xf32> to vector<4x5xf32>
    %139 = vector.shape_cast %138 : vector<4x5xf32> to vector<4x5x1xf32>
    %140 = tpu.reciprocal %139 {approx = true} : vector<4x5x1xf32> -> vector<4x5x1xf32>
    %141 = vector.broadcast %140 : vector<4x5x1xf32> to vector<4x5x5xf32>
    %142 = arith.mulf %137, %141 : vector<4x5x5xf32>
    %143 = arith.truncf %142 : vector<4x5x5xf32> to vector<4x5x5xbf16>
    %144 = arith.truncf %129 : vector<4x5x32xf32> to vector<4x5x32xbf16>
    "tpu.trace_start"() <{level = 10 : i32, message = "hqk,hkd->hqd"}> : () -> ()
    %cst_91 = arith.constant dense<0.000000e+00> : vector<4x5x32xf32>
    %145 = tpu.matmul %143, %144, %cst_91 {dimension_numbers = #tpu.dot_dimension_numbers<[2], [1], [1], [2], [0, 0, 0, 1, 1, 2], [0], [0]>} : vector<4x5x5xbf16>, vector<4x5x32xbf16>, vector<4x5x32xf32> -> vector<4x5x32xf32>
    %cst_92 = arith.constant 0.000000e+00 : f32
    "tpu.trace_stop"() : () -> ()
    %146 = vector.broadcast %cst_92 : f32 to vector<5x128xf32>
    %147 = vector.extract_strided_slice %145 {offsets = [0, 0, 0], sizes = [1, 5, 32], strides = [1, 1, 1]} : vector<4x5x32xf32> to vector<1x5x32xf32>
    %148 = vector.shape_cast %147 : vector<1x5x32xf32> to vector<5x32xf32>
    %149 = arith.truncf %148 : vector<5x32xf32> to vector<5x32xbf16>
    %150 = vector.extract_strided_slice %31 {offsets = [0, 0, 0], sizes = [1, 32, 128], strides = [1, 1, 1]} : vector<4x32x128xbf16> to vector<1x32x128xbf16>
    %151 = vector.shape_cast %150 : vector<1x32x128xbf16> to vector<32x128xbf16>
    %cst_93 = arith.constant dense<0.000000e+00> : vector<5x128xf32>
    %152 = tpu.matmul %149, %151, %cst_93 {dimension_numbers = #tpu.dot_dimension_numbers<[1], [0], [0], [1], [0, 0, 1, 1], [], []>} : vector<5x32xbf16>, vector<32x128xbf16>, vector<5x128xf32> -> vector<5x128xf32>
    %153 = arith.addf %146, %152 : vector<5x128xf32>
    %154 = vector.extract_strided_slice %145 {offsets = [1, 0, 0], sizes = [1, 5, 32], strides = [1, 1, 1]} : vector<4x5x32xf32> to vector<1x5x32xf32>
    %155 = vector.shape_cast %154 : vector<1x5x32xf32> to vector<5x32xf32>
    %156 = arith.truncf %155 : vector<5x32xf32> to vector<5x32xbf16>
    %157 = vector.extract_strided_slice %31 {offsets = [1, 0, 0], sizes = [1, 32, 128], strides = [1, 1, 1]} : vector<4x32x128xbf16> to vector<1x32x128xbf16>
    %158 = vector.shape_cast %157 : vector<1x32x128xbf16> to vector<32x128xbf16>
    %cst_94 = arith.constant dense<0.000000e+00> : vector<5x128xf32>
    %159 = tpu.matmul %156, %158, %cst_94 {dimension_numbers = #tpu.dot_dimension_numbers<[1], [0], [0], [1], [0, 0, 1, 1], [], []>} : vector<5x32xbf16>, vector<32x128xbf16>, vector<5x128xf32> -> vector<5x128xf32>
    %160 = arith.addf %153, %159 : vector<5x128xf32>
    %161 = vector.extract_strided_slice %145 {offsets = [2, 0, 0], sizes = [1, 5, 32], strides = [1, 1, 1]} : vector<4x5x32xf32> to vector<1x5x32xf32>
    %162 = vector.shape_cast %161 : vector<1x5x32xf32> to vector<5x32xf32>
    %163 = arith.truncf %162 : vector<5x32xf32> to vector<5x32xbf16>
    %164 = vector.extract_strided_slice %31 {offsets = [2, 0, 0], sizes = [1, 32, 128], strides = [1, 1, 1]} : vector<4x32x128xbf16> to vector<1x32x128xbf16>
    %165 = vector.shape_cast %164 : vector<1x32x128xbf16> to vector<32x128xbf16>
    %cst_95 = arith.constant dense<0.000000e+00> : vector<5x128xf32>
    %166 = tpu.matmul %163, %165, %cst_95 {dimension_numbers = #tpu.dot_dimension_numbers<[1], [0], [0], [1], [0, 0, 1, 1], [], []>} : vector<5x32xbf16>, vector<32x128xbf16>, vector<5x128xf32> -> vector<5x128xf32>
    %167 = arith.addf %160, %166 : vector<5x128xf32>
    %168 = vector.extract_strided_slice %145 {offsets = [3, 0, 0], sizes = [1, 5, 32], strides = [1, 1, 1]} : vector<4x5x32xf32> to vector<1x5x32xf32>
    %169 = vector.shape_cast %168 : vector<1x5x32xf32> to vector<5x32xf32>
    %170 = arith.truncf %169 : vector<5x32xf32> to vector<5x32xbf16>
    %171 = vector.extract_strided_slice %31 {offsets = [3, 0, 0], sizes = [1, 32, 128], strides = [1, 1, 1]} : vector<4x32x128xbf16> to vector<1x32x128xbf16>
    %172 = vector.shape_cast %171 : vector<1x32x128xbf16> to vector<32x128xbf16>
    %cst_96 = arith.constant dense<0.000000e+00> : vector<5x128xf32>
    %173 = tpu.matmul %170, %172, %cst_96 {dimension_numbers = #tpu.dot_dimension_numbers<[1], [0], [0], [1], [0, 0, 1, 1], [], []>} : vector<5x32xbf16>, vector<32x128xbf16>, vector<5x128xf32> -> vector<5x128xf32>
    %174 = arith.addf %167, %173 : vector<5x128xf32>
    %175 = vector.broadcast %33 : vector<1x128xf32> to vector<5x128xf32>
    %176 = arith.addf %174, %175 : vector<5x128xf32>
    %177 = vector.broadcast %35 : vector<1x128xf32> to vector<5x128xf32>
    %178 = arith.mulf %177, %176 : vector<5x128xf32>
    %179 = arith.addf %13, %178 : vector<5x128xf32>
    %cst_97 = arith.constant dense<0.000000e+00> : vector<5xf32>
    %180 = vector.multi_reduction <add>, %179, %cst_97 [1] : vector<5x128xf32> to vector<5xf32>
    %181 = vector.shape_cast %180 : vector<5xf32> to vector<5x1xf32>
    %cst_98 = arith.constant 1.280000e+02 : f32
    %182 = vector.broadcast %cst_98 : f32 to vector<5x1xf32>
    %183 = arith.divf %181, %182 : vector<5x1xf32>
    %184 = vector.broadcast %183 : vector<5x1xf32> to vector<5x128xf32>
    %185 = arith.subf %179, %184 : vector<5x128xf32>
    %186 = arith.mulf %185, %185 : vector<5x128xf32>
    %cst_99 = arith.constant dense<0.000000e+00> : vector<5xf32>
    %187 = vector.multi_reduction <add>, %186, %cst_99 [1] : vector<5x128xf32> to vector<5xf32>
    %188 = vector.shape_cast %187 : vector<5xf32> to vector<5x1xf32>
    %cst_100 = arith.constant 1.280000e+02 : f32
    %189 = vector.broadcast %cst_100 : f32 to vector<5x1xf32>
    %190 = arith.divf %188, %189 : vector<5x1xf32>
    %191 = vector.broadcast %183 : vector<5x1xf32> to vector<5x128xf32>
    %192 = arith.subf %179, %191 : vector<5x128xf32>
    %cst_101 = arith.constant 9.99999997E-7 : f32
    %193 = vector.broadcast %cst_101 : f32 to vector<5x1xf32>
    %194 = arith.addf %190, %193 : vector<5x1xf32>
    %195 = math.rsqrt %194 : vector<5x1xf32>
    %196 = vector.broadcast %195 : vector<5x1xf32> to vector<5x128xf32>
    %197 = arith.mulf %192, %196 : vector<5x128xf32>
    %198 = vector.broadcast %37 : vector<1x128xf32> to vector<5x128xf32>
    %199 = arith.mulf %197, %198 : vector<5x128xf32>
    %200 = vector.broadcast %39 : vector<1x128xf32> to vector<5x128xf32>
    %201 = arith.addf %199, %200 : vector<5x128xf32>
    %202 = arith.truncf %201 : vector<5x128xf32> to vector<5x128xbf16>
    %cst_102 = arith.constant dense<0.000000e+00> : vector<5x256xf32>
    %203 = tpu.matmul %202, %41, %cst_102 {dimension_numbers = #tpu.dot_dimension_numbers<[1], [0], [0], [1], [0, 0, 1, 1], [], []>} : vector<5x128xbf16>, vector<128x256xbf16>, vector<5x256xf32> -> vector<5x256xf32>
    %204 = vector.broadcast %43 : vector<1x256xf32> to vector<5x256xf32>
    %205 = arith.addf %203, %204 : vector<5x256xf32>
    %cst_103 = arith.constant 5.000000e-01 : f32
    %206 = vector.broadcast %cst_103 : f32 to vector<5x256xf32>
    %207 = arith.mulf %206, %205 : vector<5x256xf32>
    %cst_104 = arith.constant 0.707106769 : f32
    %208 = vector.broadcast %cst_104 : f32 to vector<5x256xf32>
    %209 = arith.mulf %205, %208 : vector<5x256xf32>
    %210 = math.absf %209 : vector<5x256xf32>
    %cst_105 = arith.constant 0.327591091 : f32
    %211 = vector.broadcast %cst_105 : f32 to vector<5x256xf32>
    %212 = arith.mulf %211, %210 : vector<5x256xf32>
    %cst_106 = arith.constant 1.000000e+00 : f32
    %213 = vector.broadcast %cst_106 : f32 to vector<5x256xf32>
    %214 = arith.addf %213, %212 : vector<5x256xf32>
    %cst_107 = arith.constant 1.000000e+00 : f32
    %215 = vector.broadcast %cst_107 : f32 to vector<5x256xf32>
    %216 = arith.divf %215, %214 : vector<5x256xf32>
    %cst_108 = arith.constant 1.06140542 : f32
    %217 = vector.broadcast %cst_108 : f32 to vector<5x256xf32>
    %218 = arith.mulf %217, %216 : vector<5x256xf32>
    %cst_109 = arith.constant -1.45315206 : f32
    %219 = vector.broadcast %cst_109 : f32 to vector<5x256xf32>
    %220 = arith.addf %218, %219 : vector<5x256xf32>
    %221 = arith.mulf %220, %216 : vector<5x256xf32>
    %cst_110 = arith.constant 1.42141378 : f32
    %222 = vector.broadcast %cst_110 : f32 to vector<5x256xf32>
    %223 = arith.addf %221, %222 : vector<5x256xf32>
    %224 = arith.mulf %223, %216 : vector<5x256xf32>
    %cst_111 = arith.constant -0.284496725 : f32
    %225 = vector.broadcast %cst_111 : f32 to vector<5x256xf32>
    %226 = arith.addf %224, %225 : vector<5x256xf32>
    %227 = arith.mulf %226, %216 : vector<5x256xf32>
    %cst_112 = arith.constant 0.254829586 : f32
    %228 = vector.broadcast %cst_112 : f32 to vector<5x256xf32>
    %229 = arith.addf %227, %228 : vector<5x256xf32>
    %230 = arith.mulf %229, %216 : vector<5x256xf32>
    %231 = arith.mulf %210, %210 : vector<5x256xf32>
    %cst_113 = arith.constant 0.000000e+00 : f32
    %232 = vector.broadcast %cst_113 : f32 to vector<5x256xf32>
    %233 = arith.subf %232, %231 : vector<5x256xf32>
    %234 = math.exp %233 : vector<5x256xf32>
    %235 = arith.mulf %230, %234 : vector<5x256xf32>
    %cst_114 = arith.constant 0.000000e+00 : f32
    %236 = vector.broadcast %cst_114 : f32 to vector<5x256xf32>
    %237 = arith.cmpf oge, %209, %236 : vector<5x256xf32>
    %cst_115 = arith.constant 1.000000e+00 : f32
    %238 = vector.broadcast %cst_115 : f32 to vector<5x256xf32>
    %239 = arith.subf %238, %235 : vector<5x256xf32>
    %cst_116 = arith.constant 1.000000e+00 : f32
    %240 = vector.broadcast %cst_116 : f32 to vector<5x256xf32>
    %241 = arith.subf %235, %240 : vector<5x256xf32>
    %242 = arith.select %237, %239, %241 : vector<5x256xi1>, vector<5x256xf32>
    %cst_117 = arith.constant 1.000000e+00 : f32
    %243 = vector.broadcast %cst_117 : f32 to vector<5x256xf32>
    %244 = arith.addf %243, %242 : vector<5x256xf32>
    %245 = arith.mulf %207, %244 : vector<5x256xf32>
    %246 = arith.truncf %245 : vector<5x256xf32> to vector<5x256xbf16>
    %cst_118 = arith.constant dense<0.000000e+00> : vector<5x128xf32>
    %247 = tpu.matmul %246, %45, %cst_118 {dimension_numbers = #tpu.dot_dimension_numbers<[1], [0], [0], [1], [0, 0, 1, 1], [], []>} : vector<5x256xbf16>, vector<256x128xbf16>, vector<5x128xf32> -> vector<5x128xf32>
    %248 = vector.broadcast %47 : vector<1x128xf32> to vector<5x128xf32>
    %249 = arith.addf %247, %248 : vector<5x128xf32>
    %250 = vector.broadcast %49 : vector<1x128xf32> to vector<5x128xf32>
    %251 = arith.mulf %250, %249 : vector<5x128xf32>
    %252 = arith.addf %179, %251 : vector<5x128xf32>
    %c1 = arith.constant 1 : index
    %c0_119 = arith.constant 0 : index
    %c0_120 = arith.constant 0 : index
    %253 = vector.load %arg6[%c1, %c0_119, %c0_120] : memref<2x1x128xf32, #tpu.memory_space<vmem>>, vector<1x1x128xf32>
    %254 = vector.shape_cast %253 : vector<1x1x128xf32> to vector<1x128xf32>
    %c1_121 = arith.constant 1 : index
    %c0_122 = arith.constant 0 : index
    %c0_123 = arith.constant 0 : index
    %255 = vector.load %arg7[%c1_121, %c0_122, %c0_123] : memref<2x1x128xf32, #tpu.memory_space<vmem>>, vector<1x1x128xf32>
    %256 = vector.shape_cast %255 : vector<1x1x128xf32> to vector<1x128xf32>
    %c1_124 = arith.constant 1 : index
    %c0_125 = arith.constant 0 : index
    %c0_126 = arith.constant 0 : index
    %c0_127 = arith.constant 0 : index
    %257 = vector.load %arg8[%c1_124, %c0_125, %c0_126, %c0_127] : memref<2x4x128x32xbf16, #tpu.memory_space<vmem>>, vector<1x4x128x32xbf16>
    %258 = vector.shape_cast %257 : vector<1x4x128x32xbf16> to vector<4x128x32xbf16>
    %c1_128 = arith.constant 1 : index
    %c0_129 = arith.constant 0 : index
    %c0_130 = arith.constant 0 : index
    %c0_131 = arith.constant 0 : index
    %259 = vector.load %arg9[%c1_128, %c0_129, %c0_130, %c0_131] : memref<2x4x128x32xbf16, #tpu.memory_space<vmem>>, vector<1x4x128x32xbf16>
    %260 = vector.shape_cast %259 : vector<1x4x128x32xbf16> to vector<4x128x32xbf16>
    %c1_132 = arith.constant 1 : index
    %c0_133 = arith.constant 0 : index
    %c0_134 = arith.constant 0 : index
    %c0_135 = arith.constant 0 : index
    %261 = vector.load %arg10[%c1_132, %c0_133, %c0_134, %c0_135] : memref<2x4x128x32xbf16, #tpu.memory_space<vmem>>, vector<1x4x128x32xbf16>
    %262 = vector.shape_cast %261 : vector<1x4x128x32xbf16> to vector<4x128x32xbf16>
    %c1_136 = arith.constant 1 : index
    %c0_137 = arith.constant 0 : index
    %c0_138 = arith.constant 0 : index
    %c0_139 = arith.constant 0 : index
    %263 = vector.load %arg11[%c1_136, %c0_137, %c0_138, %c0_139] : memref<2x4x1x32xf32, #tpu.memory_space<vmem>>, vector<1x4x1x32xf32>
    %264 = vector.shape_cast %263 : vector<1x4x1x32xf32> to vector<4x1x32xf32>
    %c1_140 = arith.constant 1 : index
    %c0_141 = arith.constant 0 : index
    %c0_142 = arith.constant 0 : index
    %c0_143 = arith.constant 0 : index
    %265 = vector.load %arg12[%c1_140, %c0_141, %c0_142, %c0_143] : memref<2x4x1x32xf32, #tpu.memory_space<vmem>>, vector<1x4x1x32xf32>
    %266 = vector.shape_cast %265 : vector<1x4x1x32xf32> to vector<4x1x32xf32>
    %c1_144 = arith.constant 1 : index
    %c0_145 = arith.constant 0 : index
    %c0_146 = arith.constant 0 : index
    %c0_147 = arith.constant 0 : index
    %267 = vector.load %arg13[%c1_144, %c0_145, %c0_146, %c0_147] : memref<2x4x1x32xf32, #tpu.memory_space<vmem>>, vector<1x4x1x32xf32>
    %268 = vector.shape_cast %267 : vector<1x4x1x32xf32> to vector<4x1x32xf32>
    %c1_148 = arith.constant 1 : index
    %c0_149 = arith.constant 0 : index
    %c0_150 = arith.constant 0 : index
    %c0_151 = arith.constant 0 : index
    %269 = vector.load %arg14[%c1_148, %c0_149, %c0_150, %c0_151] : memref<2x4x32x128xbf16, #tpu.memory_space<vmem>>, vector<1x4x32x128xbf16>
    %270 = vector.shape_cast %269 : vector<1x4x32x128xbf16> to vector<4x32x128xbf16>
    %c1_152 = arith.constant 1 : index
    %c0_153 = arith.constant 0 : index
    %c0_154 = arith.constant 0 : index
    %271 = vector.load %arg15[%c1_152, %c0_153, %c0_154] : memref<2x1x128xf32, #tpu.memory_space<vmem>>, vector<1x1x128xf32>
    %272 = vector.shape_cast %271 : vector<1x1x128xf32> to vector<1x128xf32>
    %c1_155 = arith.constant 1 : index
    %c0_156 = arith.constant 0 : index
    %c0_157 = arith.constant 0 : index
    %273 = vector.load %arg16[%c1_155, %c0_156, %c0_157] : memref<2x1x128xf32, #tpu.memory_space<vmem>>, vector<1x1x128xf32>
    %274 = vector.shape_cast %273 : vector<1x1x128xf32> to vector<1x128xf32>
    %c1_158 = arith.constant 1 : index
    %c0_159 = arith.constant 0 : index
    %c0_160 = arith.constant 0 : index
    %275 = vector.load %arg17[%c1_158, %c0_159, %c0_160] : memref<2x1x128xf32, #tpu.memory_space<vmem>>, vector<1x1x128xf32>
    %276 = vector.shape_cast %275 : vector<1x1x128xf32> to vector<1x128xf32>
    %c1_161 = arith.constant 1 : index
    %c0_162 = arith.constant 0 : index
    %c0_163 = arith.constant 0 : index
    %277 = vector.load %arg18[%c1_161, %c0_162, %c0_163] : memref<2x1x128xf32, #tpu.memory_space<vmem>>, vector<1x1x128xf32>
    %278 = vector.shape_cast %277 : vector<1x1x128xf32> to vector<1x128xf32>
    %c1_164 = arith.constant 1 : index
    %c0_165 = arith.constant 0 : index
    %c0_166 = arith.constant 0 : index
    %279 = vector.load %arg19[%c1_164, %c0_165, %c0_166] : memref<2x128x256xbf16, #tpu.memory_space<vmem>>, vector<1x128x256xbf16>
    %280 = vector.shape_cast %279 : vector<1x128x256xbf16> to vector<128x256xbf16>
    %c1_167 = arith.constant 1 : index
    %c0_168 = arith.constant 0 : index
    %c0_169 = arith.constant 0 : index
    %281 = vector.load %arg20[%c1_167, %c0_168, %c0_169] : memref<2x1x256xf32, #tpu.memory_space<vmem>>, vector<1x1x256xf32>
    %282 = vector.shape_cast %281 : vector<1x1x256xf32> to vector<1x256xf32>
    %c1_170 = arith.constant 1 : index
    %c0_171 = arith.constant 0 : index
    %c0_172 = arith.constant 0 : index
    %283 = vector.load %arg21[%c1_170, %c0_171, %c0_172] : memref<2x256x128xbf16, #tpu.memory_space<vmem>>, vector<1x256x128xbf16>
    %284 = vector.shape_cast %283 : vector<1x256x128xbf16> to vector<256x128xbf16>
    %c1_173 = arith.constant 1 : index
    %c0_174 = arith.constant 0 : index
    %c0_175 = arith.constant 0 : index
    %285 = vector.load %arg22[%c1_173, %c0_174, %c0_175] : memref<2x1x128xf32, #tpu.memory_space<vmem>>, vector<1x1x128xf32>
    %286 = vector.shape_cast %285 : vector<1x1x128xf32> to vector<1x128xf32>
    %c1_176 = arith.constant 1 : index
    %c0_177 = arith.constant 0 : index
    %c0_178 = arith.constant 0 : index
    %287 = vector.load %arg23[%c1_176, %c0_177, %c0_178] : memref<2x1x128xf32, #tpu.memory_space<vmem>>, vector<1x1x128xf32>
    %288 = vector.shape_cast %287 : vector<1x1x128xf32> to vector<1x128xf32>
    %cst_179 = arith.constant dense<0.000000e+00> : vector<5xf32>
    %289 = vector.multi_reduction <add>, %252, %cst_179 [1] : vector<5x128xf32> to vector<5xf32>
    %290 = vector.shape_cast %289 : vector<5xf32> to vector<5x1xf32>
    %cst_180 = arith.constant 1.280000e+02 : f32
    %291 = vector.broadcast %cst_180 : f32 to vector<5x1xf32>
    %292 = arith.divf %290, %291 : vector<5x1xf32>
    %293 = vector.broadcast %292 : vector<5x1xf32> to vector<5x128xf32>
    %294 = arith.subf %252, %293 : vector<5x128xf32>
    %295 = arith.mulf %294, %294 : vector<5x128xf32>
    %cst_181 = arith.constant dense<0.000000e+00> : vector<5xf32>
    %296 = vector.multi_reduction <add>, %295, %cst_181 [1] : vector<5x128xf32> to vector<5xf32>
    %297 = vector.shape_cast %296 : vector<5xf32> to vector<5x1xf32>
    %cst_182 = arith.constant 1.280000e+02 : f32
    %298 = vector.broadcast %cst_182 : f32 to vector<5x1xf32>
    %299 = arith.divf %297, %298 : vector<5x1xf32>
    %300 = vector.broadcast %292 : vector<5x1xf32> to vector<5x128xf32>
    %301 = arith.subf %252, %300 : vector<5x128xf32>
    %cst_183 = arith.constant 9.99999997E-7 : f32
    %302 = vector.broadcast %cst_183 : f32 to vector<5x1xf32>
    %303 = arith.addf %299, %302 : vector<5x1xf32>
    %304 = math.rsqrt %303 : vector<5x1xf32>
    %305 = vector.broadcast %304 : vector<5x1xf32> to vector<5x128xf32>
    %306 = arith.mulf %301, %305 : vector<5x128xf32>
    %307 = vector.broadcast %254 : vector<1x128xf32> to vector<5x128xf32>
    %308 = arith.mulf %306, %307 : vector<5x128xf32>
    %309 = vector.broadcast %256 : vector<1x128xf32> to vector<5x128xf32>
    %310 = arith.addf %308, %309 : vector<5x128xf32>
    %311 = arith.truncf %310 : vector<5x128xf32> to vector<5x128xbf16>
    %312 = vector.extract_strided_slice %258 {offsets = [0, 0, 0], sizes = [1, 128, 32], strides = [1, 1, 1]} : vector<4x128x32xbf16> to vector<1x128x32xbf16>
    %313 = vector.shape_cast %312 : vector<1x128x32xbf16> to vector<128x32xbf16>
    %cst_184 = arith.constant dense<0.000000e+00> : vector<5x32xf32>
    %314 = tpu.matmul %311, %313, %cst_184 {dimension_numbers = #tpu.dot_dimension_numbers<[1], [0], [0], [1], [0, 0, 1, 1], [], []>} : vector<5x128xbf16>, vector<128x32xbf16>, vector<5x32xf32> -> vector<5x32xf32>
    %315 = vector.extract_strided_slice %258 {offsets = [1, 0, 0], sizes = [1, 128, 32], strides = [1, 1, 1]} : vector<4x128x32xbf16> to vector<1x128x32xbf16>
    %316 = vector.shape_cast %315 : vector<1x128x32xbf16> to vector<128x32xbf16>
    %cst_185 = arith.constant dense<0.000000e+00> : vector<5x32xf32>
    %317 = tpu.matmul %311, %316, %cst_185 {dimension_numbers = #tpu.dot_dimension_numbers<[1], [0], [0], [1], [0, 0, 1, 1], [], []>} : vector<5x128xbf16>, vector<128x32xbf16>, vector<5x32xf32> -> vector<5x32xf32>
    %318 = vector.extract_strided_slice %258 {offsets = [2, 0, 0], sizes = [1, 128, 32], strides = [1, 1, 1]} : vector<4x128x32xbf16> to vector<1x128x32xbf16>
    %319 = vector.shape_cast %318 : vector<1x128x32xbf16> to vector<128x32xbf16>
    %cst_186 = arith.constant dense<0.000000e+00> : vector<5x32xf32>
    %320 = tpu.matmul %311, %319, %cst_186 {dimension_numbers = #tpu.dot_dimension_numbers<[1], [0], [0], [1], [0, 0, 1, 1], [], []>} : vector<5x128xbf16>, vector<128x32xbf16>, vector<5x32xf32> -> vector<5x32xf32>
    %321 = vector.extract_strided_slice %258 {offsets = [3, 0, 0], sizes = [1, 128, 32], strides = [1, 1, 1]} : vector<4x128x32xbf16> to vector<1x128x32xbf16>
    %322 = vector.shape_cast %321 : vector<1x128x32xbf16> to vector<128x32xbf16>
    %cst_187 = arith.constant dense<0.000000e+00> : vector<5x32xf32>
    %323 = tpu.matmul %311, %322, %cst_187 {dimension_numbers = #tpu.dot_dimension_numbers<[1], [0], [0], [1], [0, 0, 1, 1], [], []>} : vector<5x128xbf16>, vector<128x32xbf16>, vector<5x32xf32> -> vector<5x32xf32>
    %324 = vector.shape_cast %314 : vector<5x32xf32> to vector<1x5x32xf32>
    %325 = vector.shape_cast %317 : vector<5x32xf32> to vector<1x5x32xf32>
    %326 = vector.shape_cast %320 : vector<5x32xf32> to vector<1x5x32xf32>
    %327 = vector.shape_cast %323 : vector<5x32xf32> to vector<1x5x32xf32>
    %328 = tpu.concatenate %324, %325, %326, %327 in 0 : vector<1x5x32xf32>, vector<1x5x32xf32>, vector<1x5x32xf32>, vector<1x5x32xf32> -> vector<4x5x32xf32>
    %329 = vector.broadcast %264 : vector<4x1x32xf32> to vector<4x5x32xf32>
    %330 = arith.addf %328, %329 : vector<4x5x32xf32>
    %331 = vector.extract_strided_slice %260 {offsets = [0, 0, 0], sizes = [1, 128, 32], strides = [1, 1, 1]} : vector<4x128x32xbf16> to vector<1x128x32xbf16>
    %332 = vector.shape_cast %331 : vector<1x128x32xbf16> to vector<128x32xbf16>
    %cst_188 = arith.constant dense<0.000000e+00> : vector<5x32xf32>
    %333 = tpu.matmul %311, %332, %cst_188 {dimension_numbers = #tpu.dot_dimension_numbers<[1], [0], [0], [1], [0, 0, 1, 1], [], []>} : vector<5x128xbf16>, vector<128x32xbf16>, vector<5x32xf32> -> vector<5x32xf32>
    %334 = vector.extract_strided_slice %260 {offsets = [1, 0, 0], sizes = [1, 128, 32], strides = [1, 1, 1]} : vector<4x128x32xbf16> to vector<1x128x32xbf16>
    %335 = vector.shape_cast %334 : vector<1x128x32xbf16> to vector<128x32xbf16>
    %cst_189 = arith.constant dense<0.000000e+00> : vector<5x32xf32>
    %336 = tpu.matmul %311, %335, %cst_189 {dimension_numbers = #tpu.dot_dimension_numbers<[1], [0], [0], [1], [0, 0, 1, 1], [], []>} : vector<5x128xbf16>, vector<128x32xbf16>, vector<5x32xf32> -> vector<5x32xf32>
    %337 = vector.extract_strided_slice %260 {offsets = [2, 0, 0], sizes = [1, 128, 32], strides = [1, 1, 1]} : vector<4x128x32xbf16> to vector<1x128x32xbf16>
    %338 = vector.shape_cast %337 : vector<1x128x32xbf16> to vector<128x32xbf16>
    %cst_190 = arith.constant dense<0.000000e+00> : vector<5x32xf32>
    %339 = tpu.matmul %311, %338, %cst_190 {dimension_numbers = #tpu.dot_dimension_numbers<[1], [0], [0], [1], [0, 0, 1, 1], [], []>} : vector<5x128xbf16>, vector<128x32xbf16>, vector<5x32xf32> -> vector<5x32xf32>
    %340 = vector.extract_strided_slice %260 {offsets = [3, 0, 0], sizes = [1, 128, 32], strides = [1, 1, 1]} : vector<4x128x32xbf16> to vector<1x128x32xbf16>
    %341 = vector.shape_cast %340 : vector<1x128x32xbf16> to vector<128x32xbf16>
    %cst_191 = arith.constant dense<0.000000e+00> : vector<5x32xf32>
    %342 = tpu.matmul %311, %341, %cst_191 {dimension_numbers = #tpu.dot_dimension_numbers<[1], [0], [0], [1], [0, 0, 1, 1], [], []>} : vector<5x128xbf16>, vector<128x32xbf16>, vector<5x32xf32> -> vector<5x32xf32>
    %343 = vector.shape_cast %333 : vector<5x32xf32> to vector<1x5x32xf32>
    %344 = vector.shape_cast %336 : vector<5x32xf32> to vector<1x5x32xf32>
    %345 = vector.shape_cast %339 : vector<5x32xf32> to vector<1x5x32xf32>
    %346 = vector.shape_cast %342 : vector<5x32xf32> to vector<1x5x32xf32>
    %347 = tpu.concatenate %343, %344, %345, %346 in 0 : vector<1x5x32xf32>, vector<1x5x32xf32>, vector<1x5x32xf32>, vector<1x5x32xf32> -> vector<4x5x32xf32>
    %348 = vector.broadcast %266 : vector<4x1x32xf32> to vector<4x5x32xf32>
    %349 = arith.addf %347, %348 : vector<4x5x32xf32>
    %350 = vector.extract_strided_slice %262 {offsets = [0, 0, 0], sizes = [1, 128, 32], strides = [1, 1, 1]} : vector<4x128x32xbf16> to vector<1x128x32xbf16>
    %351 = vector.shape_cast %350 : vector<1x128x32xbf16> to vector<128x32xbf16>
    %cst_192 = arith.constant dense<0.000000e+00> : vector<5x32xf32>
    %352 = tpu.matmul %311, %351, %cst_192 {dimension_numbers = #tpu.dot_dimension_numbers<[1], [0], [0], [1], [0, 0, 1, 1], [], []>} : vector<5x128xbf16>, vector<128x32xbf16>, vector<5x32xf32> -> vector<5x32xf32>
    %353 = vector.extract_strided_slice %262 {offsets = [1, 0, 0], sizes = [1, 128, 32], strides = [1, 1, 1]} : vector<4x128x32xbf16> to vector<1x128x32xbf16>
    %354 = vector.shape_cast %353 : vector<1x128x32xbf16> to vector<128x32xbf16>
    %cst_193 = arith.constant dense<0.000000e+00> : vector<5x32xf32>
    %355 = tpu.matmul %311, %354, %cst_193 {dimension_numbers = #tpu.dot_dimension_numbers<[1], [0], [0], [1], [0, 0, 1, 1], [], []>} : vector<5x128xbf16>, vector<128x32xbf16>, vector<5x32xf32> -> vector<5x32xf32>
    %356 = vector.extract_strided_slice %262 {offsets = [2, 0, 0], sizes = [1, 128, 32], strides = [1, 1, 1]} : vector<4x128x32xbf16> to vector<1x128x32xbf16>
    %357 = vector.shape_cast %356 : vector<1x128x32xbf16> to vector<128x32xbf16>
    %cst_194 = arith.constant dense<0.000000e+00> : vector<5x32xf32>
    %358 = tpu.matmul %311, %357, %cst_194 {dimension_numbers = #tpu.dot_dimension_numbers<[1], [0], [0], [1], [0, 0, 1, 1], [], []>} : vector<5x128xbf16>, vector<128x32xbf16>, vector<5x32xf32> -> vector<5x32xf32>
    %359 = vector.extract_strided_slice %262 {offsets = [3, 0, 0], sizes = [1, 128, 32], strides = [1, 1, 1]} : vector<4x128x32xbf16> to vector<1x128x32xbf16>
    %360 = vector.shape_cast %359 : vector<1x128x32xbf16> to vector<128x32xbf16>
    %cst_195 = arith.constant dense<0.000000e+00> : vector<5x32xf32>
    %361 = tpu.matmul %311, %360, %cst_195 {dimension_numbers = #tpu.dot_dimension_numbers<[1], [0], [0], [1], [0, 0, 1, 1], [], []>} : vector<5x128xbf16>, vector<128x32xbf16>, vector<5x32xf32> -> vector<5x32xf32>
    %362 = vector.shape_cast %352 : vector<5x32xf32> to vector<1x5x32xf32>
    %363 = vector.shape_cast %355 : vector<5x32xf32> to vector<1x5x32xf32>
    %364 = vector.shape_cast %358 : vector<5x32xf32> to vector<1x5x32xf32>
    %365 = vector.shape_cast %361 : vector<5x32xf32> to vector<1x5x32xf32>
    %366 = tpu.concatenate %362, %363, %364, %365 in 0 : vector<1x5x32xf32>, vector<1x5x32xf32>, vector<1x5x32xf32>, vector<1x5x32xf32> -> vector<4x5x32xf32>
    %367 = vector.broadcast %268 : vector<4x1x32xf32> to vector<4x5x32xf32>
    %368 = arith.addf %366, %367 : vector<4x5x32xf32>
    %369 = arith.truncf %330 : vector<4x5x32xf32> to vector<4x5x32xbf16>
    %370 = arith.truncf %349 : vector<4x5x32xf32> to vector<4x5x32xbf16>
    "tpu.trace_start"() <{level = 10 : i32, message = "hqd,hkd->hqk"}> : () -> ()
    %cst_196 = arith.constant dense<0.000000e+00> : vector<4x5x5xf32>
    %371 = tpu.matmul %369, %370, %cst_196 {dimension_numbers = #tpu.dot_dimension_numbers<[2], [2], [1], [1], [0, 0, 0, 1, 1, 1], [0], [0]>} : vector<4x5x32xbf16>, vector<4x5x32xbf16>, vector<4x5x5xf32> -> vector<4x5x5xf32>
    "tpu.trace_stop"() : () -> ()
    %cst_197 = arith.constant dense<0xFF800000> : vector<4x5xf32>
    %372 = vector.multi_reduction <maximumf>, %371, %cst_197 [2] : vector<4x5x5xf32> to vector<4x5xf32>
    %373 = vector.shape_cast %372 : vector<4x5xf32> to vector<4x5x1xf32>
    %374 = vector.broadcast %373 : vector<4x5x1xf32> to vector<4x5x5xf32>
    %375 = arith.subf %371, %374 : vector<4x5x5xf32>
    %376 = math.exp %375 : vector<4x5x5xf32>
    %cst_198 = arith.constant dense<0.000000e+00> : vector<4x5xf32>
    %377 = vector.multi_reduction <add>, %376, %cst_198 [2] : vector<4x5x5xf32> to vector<4x5xf32>
    %378 = vector.shape_cast %377 : vector<4x5xf32> to vector<4x5x1xf32>
    %379 = tpu.reciprocal %378 {approx = true} : vector<4x5x1xf32> -> vector<4x5x1xf32>
    %380 = vector.broadcast %379 : vector<4x5x1xf32> to vector<4x5x5xf32>
    %381 = arith.mulf %376, %380 : vector<4x5x5xf32>
    %382 = arith.truncf %381 : vector<4x5x5xf32> to vector<4x5x5xbf16>
    %383 = arith.truncf %368 : vector<4x5x32xf32> to vector<4x5x32xbf16>
    "tpu.trace_start"() <{level = 10 : i32, message = "hqk,hkd->hqd"}> : () -> ()
    %cst_199 = arith.constant dense<0.000000e+00> : vector<4x5x32xf32>
    %384 = tpu.matmul %382, %383, %cst_199 {dimension_numbers = #tpu.dot_dimension_numbers<[2], [1], [1], [2], [0, 0, 0, 1, 1, 2], [0], [0]>} : vector<4x5x5xbf16>, vector<4x5x32xbf16>, vector<4x5x32xf32> -> vector<4x5x32xf32>
    %cst_200 = arith.constant 0.000000e+00 : f32
    "tpu.trace_stop"() : () -> ()
    %385 = vector.broadcast %cst_200 : f32 to vector<5x128xf32>
    %386 = vector.extract_strided_slice %384 {offsets = [0, 0, 0], sizes = [1, 5, 32], strides = [1, 1, 1]} : vector<4x5x32xf32> to vector<1x5x32xf32>
    %387 = vector.shape_cast %386 : vector<1x5x32xf32> to vector<5x32xf32>
    %388 = arith.truncf %387 : vector<5x32xf32> to vector<5x32xbf16>
    %389 = vector.extract_strided_slice %270 {offsets = [0, 0, 0], sizes = [1, 32, 128], strides = [1, 1, 1]} : vector<4x32x128xbf16> to vector<1x32x128xbf16>
    %390 = vector.shape_cast %389 : vector<1x32x128xbf16> to vector<32x128xbf16>
    %cst_201 = arith.constant dense<0.000000e+00> : vector<5x128xf32>
    %391 = tpu.matmul %388, %390, %cst_201 {dimension_numbers = #tpu.dot_dimension_numbers<[1], [0], [0], [1], [0, 0, 1, 1], [], []>} : vector<5x32xbf16>, vector<32x128xbf16>, vector<5x128xf32> -> vector<5x128xf32>
    %392 = arith.addf %385, %391 : vector<5x128xf32>
    %393 = vector.extract_strided_slice %384 {offsets = [1, 0, 0], sizes = [1, 5, 32], strides = [1, 1, 1]} : vector<4x5x32xf32> to vector<1x5x32xf32>
    %394 = vector.shape_cast %393 : vector<1x5x32xf32> to vector<5x32xf32>
    %395 = arith.truncf %394 : vector<5x32xf32> to vector<5x32xbf16>
    %396 = vector.extract_strided_slice %270 {offsets = [1, 0, 0], sizes = [1, 32, 128], strides = [1, 1, 1]} : vector<4x32x128xbf16> to vector<1x32x128xbf16>
    %397 = vector.shape_cast %396 : vector<1x32x128xbf16> to vector<32x128xbf16>
    %cst_202 = arith.constant dense<0.000000e+00> : vector<5x128xf32>
    %398 = tpu.matmul %395, %397, %cst_202 {dimension_numbers = #tpu.dot_dimension_numbers<[1], [0], [0], [1], [0, 0, 1, 1], [], []>} : vector<5x32xbf16>, vector<32x128xbf16>, vector<5x128xf32> -> vector<5x128xf32>
    %399 = arith.addf %392, %398 : vector<5x128xf32>
    %400 = vector.extract_strided_slice %384 {offsets = [2, 0, 0], sizes = [1, 5, 32], strides = [1, 1, 1]} : vector<4x5x32xf32> to vector<1x5x32xf32>
    %401 = vector.shape_cast %400 : vector<1x5x32xf32> to vector<5x32xf32>
    %402 = arith.truncf %401 : vector<5x32xf32> to vector<5x32xbf16>
    %403 = vector.extract_strided_slice %270 {offsets = [2, 0, 0], sizes = [1, 32, 128], strides = [1, 1, 1]} : vector<4x32x128xbf16> to vector<1x32x128xbf16>
    %404 = vector.shape_cast %403 : vector<1x32x128xbf16> to vector<32x128xbf16>
    %cst_203 = arith.constant dense<0.000000e+00> : vector<5x128xf32>
    %405 = tpu.matmul %402, %404, %cst_203 {dimension_numbers = #tpu.dot_dimension_numbers<[1], [0], [0], [1], [0, 0, 1, 1], [], []>} : vector<5x32xbf16>, vector<32x128xbf16>, vector<5x128xf32> -> vector<5x128xf32>
    %406 = arith.addf %399, %405 : vector<5x128xf32>
    %407 = vector.extract_strided_slice %384 {offsets = [3, 0, 0], sizes = [1, 5, 32], strides = [1, 1, 1]} : vector<4x5x32xf32> to vector<1x5x32xf32>
    %408 = vector.shape_cast %407 : vector<1x5x32xf32> to vector<5x32xf32>
    %409 = arith.truncf %408 : vector<5x32xf32> to vector<5x32xbf16>
    %410 = vector.extract_strided_slice %270 {offsets = [3, 0, 0], sizes = [1, 32, 128], strides = [1, 1, 1]} : vector<4x32x128xbf16> to vector<1x32x128xbf16>
    %411 = vector.shape_cast %410 : vector<1x32x128xbf16> to vector<32x128xbf16>
    %cst_204 = arith.constant dense<0.000000e+00> : vector<5x128xf32>
    %412 = tpu.matmul %409, %411, %cst_204 {dimension_numbers = #tpu.dot_dimension_numbers<[1], [0], [0], [1], [0, 0, 1, 1], [], []>} : vector<5x32xbf16>, vector<32x128xbf16>, vector<5x128xf32> -> vector<5x128xf32>
    %413 = arith.addf %406, %412 : vector<5x128xf32>
    %414 = vector.broadcast %272 : vector<1x128xf32> to vector<5x128xf32>
    %415 = arith.addf %413, %414 : vector<5x128xf32>
    %416 = vector.broadcast %274 : vector<1x128xf32> to vector<5x128xf32>
    %417 = arith.mulf %416, %415 : vector<5x128xf32>
    %418 = arith.addf %252, %417 : vector<5x128xf32>
    %cst_205 = arith.constant dense<0.000000e+00> : vector<5xf32>
    %419 = vector.multi_reduction <add>, %418, %cst_205 [1] : vector<5x128xf32> to vector<5xf32>
    %420 = vector.shape_cast %419 : vector<5xf32> to vector<5x1xf32>
    %cst_206 = arith.constant 1.280000e+02 : f32
    %421 = vector.broadcast %cst_206 : f32 to vector<5x1xf32>
    %422 = arith.divf %420, %421 : vector<5x1xf32>
    %423 = vector.broadcast %422 : vector<5x1xf32> to vector<5x128xf32>
    %424 = arith.subf %418, %423 : vector<5x128xf32>
    %425 = arith.mulf %424, %424 : vector<5x128xf32>
    %cst_207 = arith.constant dense<0.000000e+00> : vector<5xf32>
    %426 = vector.multi_reduction <add>, %425, %cst_207 [1] : vector<5x128xf32> to vector<5xf32>
    %427 = vector.shape_cast %426 : vector<5xf32> to vector<5x1xf32>
    %cst_208 = arith.constant 1.280000e+02 : f32
    %428 = vector.broadcast %cst_208 : f32 to vector<5x1xf32>
    %429 = arith.divf %427, %428 : vector<5x1xf32>
    %430 = vector.broadcast %422 : vector<5x1xf32> to vector<5x128xf32>
    %431 = arith.subf %418, %430 : vector<5x128xf32>
    %cst_209 = arith.constant 9.99999997E-7 : f32
    %432 = vector.broadcast %cst_209 : f32 to vector<5x1xf32>
    %433 = arith.addf %429, %432 : vector<5x1xf32>
    %434 = math.rsqrt %433 : vector<5x1xf32>
    %435 = vector.broadcast %434 : vector<5x1xf32> to vector<5x128xf32>
    %436 = arith.mulf %431, %435 : vector<5x128xf32>
    %437 = vector.broadcast %276 : vector<1x128xf32> to vector<5x128xf32>
    %438 = arith.mulf %436, %437 : vector<5x128xf32>
    %439 = vector.broadcast %278 : vector<1x128xf32> to vector<5x128xf32>
    %440 = arith.addf %438, %439 : vector<5x128xf32>
    %441 = arith.truncf %440 : vector<5x128xf32> to vector<5x128xbf16>
    %cst_210 = arith.constant dense<0.000000e+00> : vector<5x256xf32>
    %442 = tpu.matmul %441, %280, %cst_210 {dimension_numbers = #tpu.dot_dimension_numbers<[1], [0], [0], [1], [0, 0, 1, 1], [], []>} : vector<5x128xbf16>, vector<128x256xbf16>, vector<5x256xf32> -> vector<5x256xf32>
    %443 = vector.broadcast %282 : vector<1x256xf32> to vector<5x256xf32>
    %444 = arith.addf %442, %443 : vector<5x256xf32>
    %cst_211 = arith.constant 5.000000e-01 : f32
    %445 = vector.broadcast %cst_211 : f32 to vector<5x256xf32>
    %446 = arith.mulf %445, %444 : vector<5x256xf32>
    %cst_212 = arith.constant 0.707106769 : f32
    %447 = vector.broadcast %cst_212 : f32 to vector<5x256xf32>
    %448 = arith.mulf %444, %447 : vector<5x256xf32>
    %449 = math.absf %448 : vector<5x256xf32>
    %cst_213 = arith.constant 0.327591091 : f32
    %450 = vector.broadcast %cst_213 : f32 to vector<5x256xf32>
    %451 = arith.mulf %450, %449 : vector<5x256xf32>
    %cst_214 = arith.constant 1.000000e+00 : f32
    %452 = vector.broadcast %cst_214 : f32 to vector<5x256xf32>
    %453 = arith.addf %452, %451 : vector<5x256xf32>
    %cst_215 = arith.constant 1.000000e+00 : f32
    %454 = vector.broadcast %cst_215 : f32 to vector<5x256xf32>
    %455 = arith.divf %454, %453 : vector<5x256xf32>
    %cst_216 = arith.constant 1.06140542 : f32
    %456 = vector.broadcast %cst_216 : f32 to vector<5x256xf32>
    %457 = arith.mulf %456, %455 : vector<5x256xf32>
    %cst_217 = arith.constant -1.45315206 : f32
    %458 = vector.broadcast %cst_217 : f32 to vector<5x256xf32>
    %459 = arith.addf %457, %458 : vector<5x256xf32>
    %460 = arith.mulf %459, %455 : vector<5x256xf32>
    %cst_218 = arith.constant 1.42141378 : f32
    %461 = vector.broadcast %cst_218 : f32 to vector<5x256xf32>
    %462 = arith.addf %460, %461 : vector<5x256xf32>
    %463 = arith.mulf %462, %455 : vector<5x256xf32>
    %cst_219 = arith.constant -0.284496725 : f32
    %464 = vector.broadcast %cst_219 : f32 to vector<5x256xf32>
    %465 = arith.addf %463, %464 : vector<5x256xf32>
    %466 = arith.mulf %465, %455 : vector<5x256xf32>
    %cst_220 = arith.constant 0.254829586 : f32
    %467 = vector.broadcast %cst_220 : f32 to vector<5x256xf32>
    %468 = arith.addf %466, %467 : vector<5x256xf32>
    %469 = arith.mulf %468, %455 : vector<5x256xf32>
    %470 = arith.mulf %449, %449 : vector<5x256xf32>
    %cst_221 = arith.constant 0.000000e+00 : f32
    %471 = vector.broadcast %cst_221 : f32 to vector<5x256xf32>
    %472 = arith.subf %471, %470 : vector<5x256xf32>
    %473 = math.exp %472 : vector<5x256xf32>
    %474 = arith.mulf %469, %473 : vector<5x256xf32>
    %cst_222 = arith.constant 0.000000e+00 : f32
    %475 = vector.broadcast %cst_222 : f32 to vector<5x256xf32>
    %476 = arith.cmpf oge, %448, %475 : vector<5x256xf32>
    %cst_223 = arith.constant 1.000000e+00 : f32
    %477 = vector.broadcast %cst_223 : f32 to vector<5x256xf32>
    %478 = arith.subf %477, %474 : vector<5x256xf32>
    %cst_224 = arith.constant 1.000000e+00 : f32
    %479 = vector.broadcast %cst_224 : f32 to vector<5x256xf32>
    %480 = arith.subf %474, %479 : vector<5x256xf32>
    %481 = arith.select %476, %478, %480 : vector<5x256xi1>, vector<5x256xf32>
    %cst_225 = arith.constant 1.000000e+00 : f32
    %482 = vector.broadcast %cst_225 : f32 to vector<5x256xf32>
    %483 = arith.addf %482, %481 : vector<5x256xf32>
    %484 = arith.mulf %446, %483 : vector<5x256xf32>
    %485 = arith.truncf %484 : vector<5x256xf32> to vector<5x256xbf16>
    %cst_226 = arith.constant dense<0.000000e+00> : vector<5x128xf32>
    %486 = tpu.matmul %485, %284, %cst_226 {dimension_numbers = #tpu.dot_dimension_numbers<[1], [0], [0], [1], [0, 0, 1, 1], [], []>} : vector<5x256xbf16>, vector<256x128xbf16>, vector<5x128xf32> -> vector<5x128xf32>
    %487 = vector.broadcast %286 : vector<1x128xf32> to vector<5x128xf32>
    %488 = arith.addf %486, %487 : vector<5x128xf32>
    %489 = vector.broadcast %288 : vector<1x128xf32> to vector<5x128xf32>
    %490 = arith.mulf %489, %488 : vector<5x128xf32>
    %491 = arith.addf %418, %490 : vector<5x128xf32>
    %c0_227 = arith.constant 0 : index
    %c0_228 = arith.constant 0 : index
    %492 = vector.load %arg24[%c0_227, %c0_228] : memref<1x128xf32, #tpu.memory_space<vmem>>, vector<1x128xf32>
    %c0_229 = arith.constant 0 : index
    %c0_230 = arith.constant 0 : index
    %493 = vector.load %arg25[%c0_229, %c0_230] : memref<1x128xf32, #tpu.memory_space<vmem>>, vector<1x128xf32>
    %cst_231 = arith.constant dense<0.000000e+00> : vector<5xf32>
    %494 = vector.multi_reduction <add>, %491, %cst_231 [1] : vector<5x128xf32> to vector<5xf32>
    %495 = vector.shape_cast %494 : vector<5xf32> to vector<5x1xf32>
    %cst_232 = arith.constant 1.280000e+02 : f32
    %496 = vector.broadcast %cst_232 : f32 to vector<5x1xf32>
    %497 = arith.divf %495, %496 : vector<5x1xf32>
    %498 = vector.broadcast %497 : vector<5x1xf32> to vector<5x128xf32>
    %499 = arith.subf %491, %498 : vector<5x128xf32>
    %500 = arith.mulf %499, %499 : vector<5x128xf32>
    %cst_233 = arith.constant dense<0.000000e+00> : vector<5xf32>
    %501 = vector.multi_reduction <add>, %500, %cst_233 [1] : vector<5x128xf32> to vector<5xf32>
    %502 = vector.shape_cast %501 : vector<5xf32> to vector<5x1xf32>
    %cst_234 = arith.constant 1.280000e+02 : f32
    %503 = vector.broadcast %cst_234 : f32 to vector<5x1xf32>
    %504 = arith.divf %502, %503 : vector<5x1xf32>
    %505 = vector.broadcast %497 : vector<5x1xf32> to vector<5x128xf32>
    %506 = arith.subf %491, %505 : vector<5x128xf32>
    %cst_235 = arith.constant 9.99999997E-7 : f32
    %507 = vector.broadcast %cst_235 : f32 to vector<5x1xf32>
    %508 = arith.addf %504, %507 : vector<5x1xf32>
    %509 = math.rsqrt %508 : vector<5x1xf32>
    %510 = vector.broadcast %509 : vector<5x1xf32> to vector<5x128xf32>
    %511 = arith.mulf %506, %510 : vector<5x128xf32>
    %512 = vector.broadcast %492 : vector<1x128xf32> to vector<5x128xf32>
    %513 = arith.mulf %511, %512 : vector<5x128xf32>
    %514 = vector.broadcast %493 : vector<1x128xf32> to vector<5x128xf32>
    %515 = arith.addf %513, %514 : vector<5x128xf32>
    %c0_236 = arith.constant 0 : index
    %c0_237 = arith.constant 0 : index
    %c0_238 = arith.constant 0 : index
    %c0_239 = arith.constant 0 : index
    %516 = vector.load %arg26[%c0_236, %c0_237, %c0_238, %c0_239] : memref<2x4x128x32xbf16, #tpu.memory_space<vmem>>, vector<1x4x128x32xbf16>
    %517 = vector.shape_cast %516 : vector<1x4x128x32xbf16> to vector<4x128x32xbf16>
    %c0_240 = arith.constant 0 : index
    %c0_241 = arith.constant 0 : index
    %c0_242 = arith.constant 0 : index
    %c0_243 = arith.constant 0 : index
    %518 = vector.load %arg27[%c0_240, %c0_241, %c0_242, %c0_243] : memref<2x4x128x32xbf16, #tpu.memory_space<vmem>>, vector<1x4x128x32xbf16>
    %519 = vector.shape_cast %518 : vector<1x4x128x32xbf16> to vector<4x128x32xbf16>
    %c0_244 = arith.constant 0 : index
    %c0_245 = arith.constant 0 : index
    %c0_246 = arith.constant 0 : index
    %c0_247 = arith.constant 0 : index
    %520 = vector.load %arg28[%c0_244, %c0_245, %c0_246, %c0_247] : memref<2x4x128x32xbf16, #tpu.memory_space<vmem>>, vector<1x4x128x32xbf16>
    %521 = vector.shape_cast %520 : vector<1x4x128x32xbf16> to vector<4x128x32xbf16>
    %c0_248 = arith.constant 0 : index
    %c0_249 = arith.constant 0 : index
    %c0_250 = arith.constant 0 : index
    %c0_251 = arith.constant 0 : index
    %522 = vector.load %arg29[%c0_248, %c0_249, %c0_250, %c0_251] : memref<2x4x1x32xf32, #tpu.memory_space<vmem>>, vector<1x4x1x32xf32>
    %523 = vector.shape_cast %522 : vector<1x4x1x32xf32> to vector<4x1x32xf32>
    %c0_252 = arith.constant 0 : index
    %c0_253 = arith.constant 0 : index
    %c0_254 = arith.constant 0 : index
    %c0_255 = arith.constant 0 : index
    %524 = vector.load %arg30[%c0_252, %c0_253, %c0_254, %c0_255] : memref<2x4x1x32xf32, #tpu.memory_space<vmem>>, vector<1x4x1x32xf32>
    %525 = vector.shape_cast %524 : vector<1x4x1x32xf32> to vector<4x1x32xf32>
    %c0_256 = arith.constant 0 : index
    %c0_257 = arith.constant 0 : index
    %c0_258 = arith.constant 0 : index
    %c0_259 = arith.constant 0 : index
    %526 = vector.load %arg31[%c0_256, %c0_257, %c0_258, %c0_259] : memref<2x4x1x32xf32, #tpu.memory_space<vmem>>, vector<1x4x1x32xf32>
    %527 = vector.shape_cast %526 : vector<1x4x1x32xf32> to vector<4x1x32xf32>
    %c0_260 = arith.constant 0 : index
    %c0_261 = arith.constant 0 : index
    %c0_262 = arith.constant 0 : index
    %c0_263 = arith.constant 0 : index
    %528 = vector.load %arg32[%c0_260, %c0_261, %c0_262, %c0_263] : memref<2x4x32x128xbf16, #tpu.memory_space<vmem>>, vector<1x4x32x128xbf16>
    %529 = vector.shape_cast %528 : vector<1x4x32x128xbf16> to vector<4x32x128xbf16>
    %c0_264 = arith.constant 0 : index
    %c0_265 = arith.constant 0 : index
    %c0_266 = arith.constant 0 : index
    %530 = vector.load %arg33[%c0_264, %c0_265, %c0_266] : memref<2x1x128xf32, #tpu.memory_space<vmem>>, vector<1x1x128xf32>
    %531 = vector.shape_cast %530 : vector<1x1x128xf32> to vector<1x128xf32>
    %c0_267 = arith.constant 0 : index
    %c0_268 = arith.constant 0 : index
    %c0_269 = arith.constant 0 : index
    %532 = vector.load %arg34[%c0_267, %c0_268, %c0_269] : memref<2x1x128xf32, #tpu.memory_space<vmem>>, vector<1x1x128xf32>
    %533 = vector.shape_cast %532 : vector<1x1x128xf32> to vector<1x128xf32>
    %c0_270 = arith.constant 0 : index
    %c0_271 = arith.constant 0 : index
    %c0_272 = arith.constant 0 : index
    %534 = vector.load %arg35[%c0_270, %c0_271, %c0_272] : memref<2x1x128xf32, #tpu.memory_space<vmem>>, vector<1x1x128xf32>
    %535 = vector.shape_cast %534 : vector<1x1x128xf32> to vector<1x128xf32>
    %c0_273 = arith.constant 0 : index
    %c0_274 = arith.constant 0 : index
    %c0_275 = arith.constant 0 : index
    %536 = vector.load %arg36[%c0_273, %c0_274, %c0_275] : memref<2x128x256xbf16, #tpu.memory_space<vmem>>, vector<1x128x256xbf16>
    %537 = vector.shape_cast %536 : vector<1x128x256xbf16> to vector<128x256xbf16>
    %c0_276 = arith.constant 0 : index
    %c0_277 = arith.constant 0 : index
    %c0_278 = arith.constant 0 : index
    %538 = vector.load %arg37[%c0_276, %c0_277, %c0_278] : memref<2x1x256xf32, #tpu.memory_space<vmem>>, vector<1x1x256xf32>
    %539 = vector.shape_cast %538 : vector<1x1x256xf32> to vector<1x256xf32>
    %c0_279 = arith.constant 0 : index
    %c0_280 = arith.constant 0 : index
    %c0_281 = arith.constant 0 : index
    %540 = vector.load %arg38[%c0_279, %c0_280, %c0_281] : memref<2x256x128xbf16, #tpu.memory_space<vmem>>, vector<1x256x128xbf16>
    %541 = vector.shape_cast %540 : vector<1x256x128xbf16> to vector<256x128xbf16>
    %c0_282 = arith.constant 0 : index
    %c0_283 = arith.constant 0 : index
    %c0_284 = arith.constant 0 : index
    %542 = vector.load %arg39[%c0_282, %c0_283, %c0_284] : memref<2x1x128xf32, #tpu.memory_space<vmem>>, vector<1x1x128xf32>
    %543 = vector.shape_cast %542 : vector<1x1x128xf32> to vector<1x128xf32>
    %c0_285 = arith.constant 0 : index
    %c0_286 = arith.constant 0 : index
    %c0_287 = arith.constant 0 : index
    %544 = vector.load %arg40[%c0_285, %c0_286, %c0_287] : memref<2x1x128xf32, #tpu.memory_space<vmem>>, vector<1x1x128xf32>
    %545 = vector.shape_cast %544 : vector<1x1x128xf32> to vector<1x128xf32>
    %c0_288 = arith.constant 0 : index
    %c0_289 = arith.constant 0 : index
    %c0_290 = arith.constant 0 : index
    %546 = vector.load %arg41[%c0_288, %c0_289, %c0_290] : memref<2x1x128xf32, #tpu.memory_space<vmem>>, vector<1x1x128xf32>
    %547 = vector.shape_cast %546 : vector<1x1x128xf32> to vector<1x128xf32>
    %548 = arith.truncf %515 : vector<5x128xf32> to vector<5x128xbf16>
    %549 = vector.extract_strided_slice %517 {offsets = [0, 0, 0], sizes = [1, 128, 32], strides = [1, 1, 1]} : vector<4x128x32xbf16> to vector<1x128x32xbf16>
    %550 = vector.shape_cast %549 : vector<1x128x32xbf16> to vector<128x32xbf16>
    %cst_291 = arith.constant dense<0.000000e+00> : vector<5x32xf32>
    %551 = tpu.matmul %548, %550, %cst_291 {dimension_numbers = #tpu.dot_dimension_numbers<[1], [0], [0], [1], [0, 0, 1, 1], [], []>} : vector<5x128xbf16>, vector<128x32xbf16>, vector<5x32xf32> -> vector<5x32xf32>
    %552 = vector.extract_strided_slice %517 {offsets = [1, 0, 0], sizes = [1, 128, 32], strides = [1, 1, 1]} : vector<4x128x32xbf16> to vector<1x128x32xbf16>
    %553 = vector.shape_cast %552 : vector<1x128x32xbf16> to vector<128x32xbf16>
    %cst_292 = arith.constant dense<0.000000e+00> : vector<5x32xf32>
    %554 = tpu.matmul %548, %553, %cst_292 {dimension_numbers = #tpu.dot_dimension_numbers<[1], [0], [0], [1], [0, 0, 1, 1], [], []>} : vector<5x128xbf16>, vector<128x32xbf16>, vector<5x32xf32> -> vector<5x32xf32>
    %555 = vector.extract_strided_slice %517 {offsets = [2, 0, 0], sizes = [1, 128, 32], strides = [1, 1, 1]} : vector<4x128x32xbf16> to vector<1x128x32xbf16>
    %556 = vector.shape_cast %555 : vector<1x128x32xbf16> to vector<128x32xbf16>
    %cst_293 = arith.constant dense<0.000000e+00> : vector<5x32xf32>
    %557 = tpu.matmul %548, %556, %cst_293 {dimension_numbers = #tpu.dot_dimension_numbers<[1], [0], [0], [1], [0, 0, 1, 1], [], []>} : vector<5x128xbf16>, vector<128x32xbf16>, vector<5x32xf32> -> vector<5x32xf32>
    %558 = vector.extract_strided_slice %517 {offsets = [3, 0, 0], sizes = [1, 128, 32], strides = [1, 1, 1]} : vector<4x128x32xbf16> to vector<1x128x32xbf16>
    %559 = vector.shape_cast %558 : vector<1x128x32xbf16> to vector<128x32xbf16>
    %cst_294 = arith.constant dense<0.000000e+00> : vector<5x32xf32>
    %560 = tpu.matmul %548, %559, %cst_294 {dimension_numbers = #tpu.dot_dimension_numbers<[1], [0], [0], [1], [0, 0, 1, 1], [], []>} : vector<5x128xbf16>, vector<128x32xbf16>, vector<5x32xf32> -> vector<5x32xf32>
    %561 = vector.shape_cast %551 : vector<5x32xf32> to vector<1x5x32xf32>
    %562 = vector.shape_cast %554 : vector<5x32xf32> to vector<1x5x32xf32>
    %563 = vector.shape_cast %557 : vector<5x32xf32> to vector<1x5x32xf32>
    %564 = vector.shape_cast %560 : vector<5x32xf32> to vector<1x5x32xf32>
    %565 = tpu.concatenate %561, %562, %563, %564 in 0 : vector<1x5x32xf32>, vector<1x5x32xf32>, vector<1x5x32xf32>, vector<1x5x32xf32> -> vector<4x5x32xf32>
    %566 = vector.broadcast %523 : vector<4x1x32xf32> to vector<4x5x32xf32>
    %567 = arith.addf %565, %566 : vector<4x5x32xf32>
    %568 = vector.extract_strided_slice %519 {offsets = [0, 0, 0], sizes = [1, 128, 32], strides = [1, 1, 1]} : vector<4x128x32xbf16> to vector<1x128x32xbf16>
    %569 = vector.shape_cast %568 : vector<1x128x32xbf16> to vector<128x32xbf16>
    %cst_295 = arith.constant dense<0.000000e+00> : vector<5x32xf32>
    %570 = tpu.matmul %548, %569, %cst_295 {dimension_numbers = #tpu.dot_dimension_numbers<[1], [0], [0], [1], [0, 0, 1, 1], [], []>} : vector<5x128xbf16>, vector<128x32xbf16>, vector<5x32xf32> -> vector<5x32xf32>
    %571 = vector.extract_strided_slice %519 {offsets = [1, 0, 0], sizes = [1, 128, 32], strides = [1, 1, 1]} : vector<4x128x32xbf16> to vector<1x128x32xbf16>
    %572 = vector.shape_cast %571 : vector<1x128x32xbf16> to vector<128x32xbf16>
    %cst_296 = arith.constant dense<0.000000e+00> : vector<5x32xf32>
    %573 = tpu.matmul %548, %572, %cst_296 {dimension_numbers = #tpu.dot_dimension_numbers<[1], [0], [0], [1], [0, 0, 1, 1], [], []>} : vector<5x128xbf16>, vector<128x32xbf16>, vector<5x32xf32> -> vector<5x32xf32>
    %574 = vector.extract_strided_slice %519 {offsets = [2, 0, 0], sizes = [1, 128, 32], strides = [1, 1, 1]} : vector<4x128x32xbf16> to vector<1x128x32xbf16>
    %575 = vector.shape_cast %574 : vector<1x128x32xbf16> to vector<128x32xbf16>
    %cst_297 = arith.constant dense<0.000000e+00> : vector<5x32xf32>
    %576 = tpu.matmul %548, %575, %cst_297 {dimension_numbers = #tpu.dot_dimension_numbers<[1], [0], [0], [1], [0, 0, 1, 1], [], []>} : vector<5x128xbf16>, vector<128x32xbf16>, vector<5x32xf32> -> vector<5x32xf32>
    %577 = vector.extract_strided_slice %519 {offsets = [3, 0, 0], sizes = [1, 128, 32], strides = [1, 1, 1]} : vector<4x128x32xbf16> to vector<1x128x32xbf16>
    %578 = vector.shape_cast %577 : vector<1x128x32xbf16> to vector<128x32xbf16>
    %cst_298 = arith.constant dense<0.000000e+00> : vector<5x32xf32>
    %579 = tpu.matmul %548, %578, %cst_298 {dimension_numbers = #tpu.dot_dimension_numbers<[1], [0], [0], [1], [0, 0, 1, 1], [], []>} : vector<5x128xbf16>, vector<128x32xbf16>, vector<5x32xf32> -> vector<5x32xf32>
    %580 = vector.shape_cast %570 : vector<5x32xf32> to vector<1x5x32xf32>
    %581 = vector.shape_cast %573 : vector<5x32xf32> to vector<1x5x32xf32>
    %582 = vector.shape_cast %576 : vector<5x32xf32> to vector<1x5x32xf32>
    %583 = vector.shape_cast %579 : vector<5x32xf32> to vector<1x5x32xf32>
    %584 = tpu.concatenate %580, %581, %582, %583 in 0 : vector<1x5x32xf32>, vector<1x5x32xf32>, vector<1x5x32xf32>, vector<1x5x32xf32> -> vector<4x5x32xf32>
    %585 = vector.broadcast %525 : vector<4x1x32xf32> to vector<4x5x32xf32>
    %586 = arith.addf %584, %585 : vector<4x5x32xf32>
    %587 = vector.extract_strided_slice %521 {offsets = [0, 0, 0], sizes = [1, 128, 32], strides = [1, 1, 1]} : vector<4x128x32xbf16> to vector<1x128x32xbf16>
    %588 = vector.shape_cast %587 : vector<1x128x32xbf16> to vector<128x32xbf16>
    %cst_299 = arith.constant dense<0.000000e+00> : vector<5x32xf32>
    %589 = tpu.matmul %548, %588, %cst_299 {dimension_numbers = #tpu.dot_dimension_numbers<[1], [0], [0], [1], [0, 0, 1, 1], [], []>} : vector<5x128xbf16>, vector<128x32xbf16>, vector<5x32xf32> -> vector<5x32xf32>
    %590 = vector.extract_strided_slice %521 {offsets = [1, 0, 0], sizes = [1, 128, 32], strides = [1, 1, 1]} : vector<4x128x32xbf16> to vector<1x128x32xbf16>
    %591 = vector.shape_cast %590 : vector<1x128x32xbf16> to vector<128x32xbf16>
    %cst_300 = arith.constant dense<0.000000e+00> : vector<5x32xf32>
    %592 = tpu.matmul %548, %591, %cst_300 {dimension_numbers = #tpu.dot_dimension_numbers<[1], [0], [0], [1], [0, 0, 1, 1], [], []>} : vector<5x128xbf16>, vector<128x32xbf16>, vector<5x32xf32> -> vector<5x32xf32>
    %593 = vector.extract_strided_slice %521 {offsets = [2, 0, 0], sizes = [1, 128, 32], strides = [1, 1, 1]} : vector<4x128x32xbf16> to vector<1x128x32xbf16>
    %594 = vector.shape_cast %593 : vector<1x128x32xbf16> to vector<128x32xbf16>
    %cst_301 = arith.constant dense<0.000000e+00> : vector<5x32xf32>
    %595 = tpu.matmul %548, %594, %cst_301 {dimension_numbers = #tpu.dot_dimension_numbers<[1], [0], [0], [1], [0, 0, 1, 1], [], []>} : vector<5x128xbf16>, vector<128x32xbf16>, vector<5x32xf32> -> vector<5x32xf32>
    %596 = vector.extract_strided_slice %521 {offsets = [3, 0, 0], sizes = [1, 128, 32], strides = [1, 1, 1]} : vector<4x128x32xbf16> to vector<1x128x32xbf16>
    %597 = vector.shape_cast %596 : vector<1x128x32xbf16> to vector<128x32xbf16>
    %cst_302 = arith.constant dense<0.000000e+00> : vector<5x32xf32>
    %598 = tpu.matmul %548, %597, %cst_302 {dimension_numbers = #tpu.dot_dimension_numbers<[1], [0], [0], [1], [0, 0, 1, 1], [], []>} : vector<5x128xbf16>, vector<128x32xbf16>, vector<5x32xf32> -> vector<5x32xf32>
    %599 = vector.shape_cast %589 : vector<5x32xf32> to vector<1x5x32xf32>
    %600 = vector.shape_cast %592 : vector<5x32xf32> to vector<1x5x32xf32>
    %601 = vector.shape_cast %595 : vector<5x32xf32> to vector<1x5x32xf32>
    %602 = vector.shape_cast %598 : vector<5x32xf32> to vector<1x5x32xf32>
    %603 = tpu.concatenate %599, %600, %601, %602 in 0 : vector<1x5x32xf32>, vector<1x5x32xf32>, vector<1x5x32xf32>, vector<1x5x32xf32> -> vector<4x5x32xf32>
    %604 = vector.broadcast %527 : vector<4x1x32xf32> to vector<4x5x32xf32>
    %605 = arith.addf %603, %604 : vector<4x5x32xf32>
    %606 = arith.truncf %567 : vector<4x5x32xf32> to vector<4x5x32xbf16>
    %607 = arith.truncf %586 : vector<4x5x32xf32> to vector<4x5x32xbf16>
    "tpu.trace_start"() <{level = 10 : i32, message = "hqd,hkd->hqk"}> : () -> ()
    %cst_303 = arith.constant dense<0.000000e+00> : vector<4x5x5xf32>
    %608 = tpu.matmul %606, %607, %cst_303 {dimension_numbers = #tpu.dot_dimension_numbers<[2], [2], [1], [1], [0, 0, 0, 1, 1, 1], [0], [0]>} : vector<4x5x32xbf16>, vector<4x5x32xbf16>, vector<4x5x5xf32> -> vector<4x5x5xf32>
    "tpu.trace_stop"() : () -> ()
    %cst_304 = arith.constant dense<0xFF800000> : vector<4x5xf32>
    %609 = vector.multi_reduction <maximumf>, %608, %cst_304 [2] : vector<4x5x5xf32> to vector<4x5xf32>
    %610 = vector.shape_cast %609 : vector<4x5xf32> to vector<4x5x1xf32>
    %611 = vector.broadcast %610 : vector<4x5x1xf32> to vector<4x5x5xf32>
    %612 = arith.subf %608, %611 : vector<4x5x5xf32>
    %613 = math.exp %612 : vector<4x5x5xf32>
    %cst_305 = arith.constant dense<0.000000e+00> : vector<4x5xf32>
    %614 = vector.multi_reduction <add>, %613, %cst_305 [2] : vector<4x5x5xf32> to vector<4x5xf32>
    %615 = vector.shape_cast %614 : vector<4x5xf32> to vector<4x5x1xf32>
    %616 = tpu.reciprocal %615 {approx = true} : vector<4x5x1xf32> -> vector<4x5x1xf32>
    %617 = vector.broadcast %616 : vector<4x5x1xf32> to vector<4x5x5xf32>
    %618 = arith.mulf %613, %617 : vector<4x5x5xf32>
    %619 = arith.truncf %618 : vector<4x5x5xf32> to vector<4x5x5xbf16>
    %620 = arith.truncf %605 : vector<4x5x32xf32> to vector<4x5x32xbf16>
    "tpu.trace_start"() <{level = 10 : i32, message = "hqk,hkd->hqd"}> : () -> ()
    %cst_306 = arith.constant dense<0.000000e+00> : vector<4x5x32xf32>
    %621 = tpu.matmul %619, %620, %cst_306 {dimension_numbers = #tpu.dot_dimension_numbers<[2], [1], [1], [2], [0, 0, 0, 1, 1, 2], [0], [0]>} : vector<4x5x5xbf16>, vector<4x5x32xbf16>, vector<4x5x32xf32> -> vector<4x5x32xf32>
    %cst_307 = arith.constant 0.000000e+00 : f32
    "tpu.trace_stop"() : () -> ()
    %622 = vector.broadcast %cst_307 : f32 to vector<5x128xf32>
    %623 = vector.extract_strided_slice %621 {offsets = [0, 0, 0], sizes = [1, 5, 32], strides = [1, 1, 1]} : vector<4x5x32xf32> to vector<1x5x32xf32>
    %624 = vector.shape_cast %623 : vector<1x5x32xf32> to vector<5x32xf32>
    %625 = arith.truncf %624 : vector<5x32xf32> to vector<5x32xbf16>
    %626 = vector.extract_strided_slice %529 {offsets = [0, 0, 0], sizes = [1, 32, 128], strides = [1, 1, 1]} : vector<4x32x128xbf16> to vector<1x32x128xbf16>
    %627 = vector.shape_cast %626 : vector<1x32x128xbf16> to vector<32x128xbf16>
    %cst_308 = arith.constant dense<0.000000e+00> : vector<5x128xf32>
    %628 = tpu.matmul %625, %627, %cst_308 {dimension_numbers = #tpu.dot_dimension_numbers<[1], [0], [0], [1], [0, 0, 1, 1], [], []>} : vector<5x32xbf16>, vector<32x128xbf16>, vector<5x128xf32> -> vector<5x128xf32>
    %629 = arith.addf %622, %628 : vector<5x128xf32>
    %630 = vector.extract_strided_slice %621 {offsets = [1, 0, 0], sizes = [1, 5, 32], strides = [1, 1, 1]} : vector<4x5x32xf32> to vector<1x5x32xf32>
    %631 = vector.shape_cast %630 : vector<1x5x32xf32> to vector<5x32xf32>
    %632 = arith.truncf %631 : vector<5x32xf32> to vector<5x32xbf16>
    %633 = vector.extract_strided_slice %529 {offsets = [1, 0, 0], sizes = [1, 32, 128], strides = [1, 1, 1]} : vector<4x32x128xbf16> to vector<1x32x128xbf16>
    %634 = vector.shape_cast %633 : vector<1x32x128xbf16> to vector<32x128xbf16>
    %cst_309 = arith.constant dense<0.000000e+00> : vector<5x128xf32>
    %635 = tpu.matmul %632, %634, %cst_309 {dimension_numbers = #tpu.dot_dimension_numbers<[1], [0], [0], [1], [0, 0, 1, 1], [], []>} : vector<5x32xbf16>, vector<32x128xbf16>, vector<5x128xf32> -> vector<5x128xf32>
    %636 = arith.addf %629, %635 : vector<5x128xf32>
    %637 = vector.extract_strided_slice %621 {offsets = [2, 0, 0], sizes = [1, 5, 32], strides = [1, 1, 1]} : vector<4x5x32xf32> to vector<1x5x32xf32>
    %638 = vector.shape_cast %637 : vector<1x5x32xf32> to vector<5x32xf32>
    %639 = arith.truncf %638 : vector<5x32xf32> to vector<5x32xbf16>
    %640 = vector.extract_strided_slice %529 {offsets = [2, 0, 0], sizes = [1, 32, 128], strides = [1, 1, 1]} : vector<4x32x128xbf16> to vector<1x32x128xbf16>
    %641 = vector.shape_cast %640 : vector<1x32x128xbf16> to vector<32x128xbf16>
    %cst_310 = arith.constant dense<0.000000e+00> : vector<5x128xf32>
    %642 = tpu.matmul %639, %641, %cst_310 {dimension_numbers = #tpu.dot_dimension_numbers<[1], [0], [0], [1], [0, 0, 1, 1], [], []>} : vector<5x32xbf16>, vector<32x128xbf16>, vector<5x128xf32> -> vector<5x128xf32>
    %643 = arith.addf %636, %642 : vector<5x128xf32>
    %644 = vector.extract_strided_slice %621 {offsets = [3, 0, 0], sizes = [1, 5, 32], strides = [1, 1, 1]} : vector<4x5x32xf32> to vector<1x5x32xf32>
    %645 = vector.shape_cast %644 : vector<1x5x32xf32> to vector<5x32xf32>
    %646 = arith.truncf %645 : vector<5x32xf32> to vector<5x32xbf16>
    %647 = vector.extract_strided_slice %529 {offsets = [3, 0, 0], sizes = [1, 32, 128], strides = [1, 1, 1]} : vector<4x32x128xbf16> to vector<1x32x128xbf16>
    %648 = vector.shape_cast %647 : vector<1x32x128xbf16> to vector<32x128xbf16>
    %cst_311 = arith.constant dense<0.000000e+00> : vector<5x128xf32>
    %649 = tpu.matmul %646, %648, %cst_311 {dimension_numbers = #tpu.dot_dimension_numbers<[1], [0], [0], [1], [0, 0, 1, 1], [], []>} : vector<5x32xbf16>, vector<32x128xbf16>, vector<5x128xf32> -> vector<5x128xf32>
    %650 = arith.addf %643, %649 : vector<5x128xf32>
    %651 = vector.broadcast %531 : vector<1x128xf32> to vector<5x128xf32>
    %652 = arith.addf %650, %651 : vector<5x128xf32>
    %653 = arith.addf %515, %652 : vector<5x128xf32>
    %cst_312 = arith.constant dense<0.000000e+00> : vector<5xf32>
    %654 = vector.multi_reduction <add>, %653, %cst_312 [1] : vector<5x128xf32> to vector<5xf32>
    %655 = vector.shape_cast %654 : vector<5xf32> to vector<5x1xf32>
    %cst_313 = arith.constant 1.280000e+02 : f32
    %656 = vector.broadcast %cst_313 : f32 to vector<5x1xf32>
    %657 = arith.divf %655, %656 : vector<5x1xf32>
    %658 = vector.broadcast %657 : vector<5x1xf32> to vector<5x128xf32>
    %659 = arith.subf %653, %658 : vector<5x128xf32>
    %660 = arith.mulf %659, %659 : vector<5x128xf32>
    %cst_314 = arith.constant dense<0.000000e+00> : vector<5xf32>
    %661 = vector.multi_reduction <add>, %660, %cst_314 [1] : vector<5x128xf32> to vector<5xf32>
    %662 = vector.shape_cast %661 : vector<5xf32> to vector<5x1xf32>
    %cst_315 = arith.constant 1.280000e+02 : f32
    %663 = vector.broadcast %cst_315 : f32 to vector<5x1xf32>
    %664 = arith.divf %662, %663 : vector<5x1xf32>
    %665 = vector.broadcast %657 : vector<5x1xf32> to vector<5x128xf32>
    %666 = arith.subf %653, %665 : vector<5x128xf32>
    %cst_316 = arith.constant 9.99999974E-6 : f32
    %667 = vector.broadcast %cst_316 : f32 to vector<5x1xf32>
    %668 = arith.addf %664, %667 : vector<5x1xf32>
    %669 = math.rsqrt %668 : vector<5x1xf32>
    %670 = vector.broadcast %669 : vector<5x1xf32> to vector<5x128xf32>
    %671 = arith.mulf %666, %670 : vector<5x128xf32>
    %672 = vector.broadcast %533 : vector<1x128xf32> to vector<5x128xf32>
    %673 = arith.mulf %671, %672 : vector<5x128xf32>
    %674 = vector.broadcast %535 : vector<1x128xf32> to vector<5x128xf32>
    %675 = arith.addf %673, %674 : vector<5x128xf32>
    %676 = arith.truncf %675 : vector<5x128xf32> to vector<5x128xbf16>
    %cst_317 = arith.constant dense<0.000000e+00> : vector<5x256xf32>
    %677 = tpu.matmul %676, %537, %cst_317 {dimension_numbers = #tpu.dot_dimension_numbers<[1], [0], [0], [1], [0, 0, 1, 1], [], []>} : vector<5x128xbf16>, vector<128x256xbf16>, vector<5x256xf32> -> vector<5x256xf32>
    %678 = vector.broadcast %539 : vector<1x256xf32> to vector<5x256xf32>
    %679 = arith.addf %677, %678 : vector<5x256xf32>
    %cst_318 = arith.constant 0.000000e+00 : f32
    %680 = vector.broadcast %cst_318 : f32 to vector<5x256xf32>
    %681 = arith.maximumf %679, %680 : vector<5x256xf32>
    %682 = arith.truncf %681 : vector<5x256xf32> to vector<5x256xbf16>
    %cst_319 = arith.constant dense<0.000000e+00> : vector<5x128xf32>
    %683 = tpu.matmul %682, %541, %cst_319 {dimension_numbers = #tpu.dot_dimension_numbers<[1], [0], [0], [1], [0, 0, 1, 1], [], []>} : vector<5x256xbf16>, vector<256x128xbf16>, vector<5x128xf32> -> vector<5x128xf32>
    %684 = vector.broadcast %543 : vector<1x128xf32> to vector<5x128xf32>
    %685 = arith.addf %683, %684 : vector<5x128xf32>
    %686 = arith.addf %675, %685 : vector<5x128xf32>
    %cst_320 = arith.constant dense<0.000000e+00> : vector<5xf32>
    %687 = vector.multi_reduction <add>, %686, %cst_320 [1] : vector<5x128xf32> to vector<5xf32>
    %688 = vector.shape_cast %687 : vector<5xf32> to vector<5x1xf32>
    %cst_321 = arith.constant 1.280000e+02 : f32
    %689 = vector.broadcast %cst_321 : f32 to vector<5x1xf32>
    %690 = arith.divf %688, %689 : vector<5x1xf32>
    %691 = vector.broadcast %690 : vector<5x1xf32> to vector<5x128xf32>
    %692 = arith.subf %686, %691 : vector<5x128xf32>
    %693 = arith.mulf %692, %692 : vector<5x128xf32>
    %cst_322 = arith.constant dense<0.000000e+00> : vector<5xf32>
    %694 = vector.multi_reduction <add>, %693, %cst_322 [1] : vector<5x128xf32> to vector<5xf32>
    %695 = vector.shape_cast %694 : vector<5xf32> to vector<5x1xf32>
    %cst_323 = arith.constant 1.280000e+02 : f32
    %696 = vector.broadcast %cst_323 : f32 to vector<5x1xf32>
    %697 = arith.divf %695, %696 : vector<5x1xf32>
    %698 = vector.broadcast %690 : vector<5x1xf32> to vector<5x128xf32>
    %699 = arith.subf %686, %698 : vector<5x128xf32>
    %cst_324 = arith.constant 9.99999974E-6 : f32
    %700 = vector.broadcast %cst_324 : f32 to vector<5x1xf32>
    %701 = arith.addf %697, %700 : vector<5x1xf32>
    %702 = math.rsqrt %701 : vector<5x1xf32>
    %703 = vector.broadcast %702 : vector<5x1xf32> to vector<5x128xf32>
    %704 = arith.mulf %699, %703 : vector<5x128xf32>
    %705 = vector.broadcast %545 : vector<1x128xf32> to vector<5x128xf32>
    %706 = arith.mulf %704, %705 : vector<5x128xf32>
    %707 = vector.broadcast %547 : vector<1x128xf32> to vector<5x128xf32>
    %708 = arith.addf %706, %707 : vector<5x128xf32>
    %c1_325 = arith.constant 1 : index
    %c0_326 = arith.constant 0 : index
    %c0_327 = arith.constant 0 : index
    %c0_328 = arith.constant 0 : index
    %709 = vector.load %arg26[%c1_325, %c0_326, %c0_327, %c0_328] : memref<2x4x128x32xbf16, #tpu.memory_space<vmem>>, vector<1x4x128x32xbf16>
    %710 = vector.shape_cast %709 : vector<1x4x128x32xbf16> to vector<4x128x32xbf16>
    %c1_329 = arith.constant 1 : index
    %c0_330 = arith.constant 0 : index
    %c0_331 = arith.constant 0 : index
    %c0_332 = arith.constant 0 : index
    %711 = vector.load %arg27[%c1_329, %c0_330, %c0_331, %c0_332] : memref<2x4x128x32xbf16, #tpu.memory_space<vmem>>, vector<1x4x128x32xbf16>
    %712 = vector.shape_cast %711 : vector<1x4x128x32xbf16> to vector<4x128x32xbf16>
    %c1_333 = arith.constant 1 : index
    %c0_334 = arith.constant 0 : index
    %c0_335 = arith.constant 0 : index
    %c0_336 = arith.constant 0 : index
    %713 = vector.load %arg28[%c1_333, %c0_334, %c0_335, %c0_336] : memref<2x4x128x32xbf16, #tpu.memory_space<vmem>>, vector<1x4x128x32xbf16>
    %714 = vector.shape_cast %713 : vector<1x4x128x32xbf16> to vector<4x128x32xbf16>
    %c1_337 = arith.constant 1 : index
    %c0_338 = arith.constant 0 : index
    %c0_339 = arith.constant 0 : index
    %c0_340 = arith.constant 0 : index
    %715 = vector.load %arg29[%c1_337, %c0_338, %c0_339, %c0_340] : memref<2x4x1x32xf32, #tpu.memory_space<vmem>>, vector<1x4x1x32xf32>
    %716 = vector.shape_cast %715 : vector<1x4x1x32xf32> to vector<4x1x32xf32>
    %c1_341 = arith.constant 1 : index
    %c0_342 = arith.constant 0 : index
    %c0_343 = arith.constant 0 : index
    %c0_344 = arith.constant 0 : index
    %717 = vector.load %arg30[%c1_341, %c0_342, %c0_343, %c0_344] : memref<2x4x1x32xf32, #tpu.memory_space<vmem>>, vector<1x4x1x32xf32>
    %718 = vector.shape_cast %717 : vector<1x4x1x32xf32> to vector<4x1x32xf32>
    %c1_345 = arith.constant 1 : index
    %c0_346 = arith.constant 0 : index
    %c0_347 = arith.constant 0 : index
    %c0_348 = arith.constant 0 : index
    %719 = vector.load %arg31[%c1_345, %c0_346, %c0_347, %c0_348] : memref<2x4x1x32xf32, #tpu.memory_space<vmem>>, vector<1x4x1x32xf32>
    %720 = vector.shape_cast %719 : vector<1x4x1x32xf32> to vector<4x1x32xf32>
    %c1_349 = arith.constant 1 : index
    %c0_350 = arith.constant 0 : index
    %c0_351 = arith.constant 0 : index
    %c0_352 = arith.constant 0 : index
    %721 = vector.load %arg32[%c1_349, %c0_350, %c0_351, %c0_352] : memref<2x4x32x128xbf16, #tpu.memory_space<vmem>>, vector<1x4x32x128xbf16>
    %722 = vector.shape_cast %721 : vector<1x4x32x128xbf16> to vector<4x32x128xbf16>
    %c1_353 = arith.constant 1 : index
    %c0_354 = arith.constant 0 : index
    %c0_355 = arith.constant 0 : index
    %723 = vector.load %arg33[%c1_353, %c0_354, %c0_355] : memref<2x1x128xf32, #tpu.memory_space<vmem>>, vector<1x1x128xf32>
    %724 = vector.shape_cast %723 : vector<1x1x128xf32> to vector<1x128xf32>
    %c1_356 = arith.constant 1 : index
    %c0_357 = arith.constant 0 : index
    %c0_358 = arith.constant 0 : index
    %725 = vector.load %arg34[%c1_356, %c0_357, %c0_358] : memref<2x1x128xf32, #tpu.memory_space<vmem>>, vector<1x1x128xf32>
    %726 = vector.shape_cast %725 : vector<1x1x128xf32> to vector<1x128xf32>
    %c1_359 = arith.constant 1 : index
    %c0_360 = arith.constant 0 : index
    %c0_361 = arith.constant 0 : index
    %727 = vector.load %arg35[%c1_359, %c0_360, %c0_361] : memref<2x1x128xf32, #tpu.memory_space<vmem>>, vector<1x1x128xf32>
    %728 = vector.shape_cast %727 : vector<1x1x128xf32> to vector<1x128xf32>
    %c1_362 = arith.constant 1 : index
    %c0_363 = arith.constant 0 : index
    %c0_364 = arith.constant 0 : index
    %729 = vector.load %arg36[%c1_362, %c0_363, %c0_364] : memref<2x128x256xbf16, #tpu.memory_space<vmem>>, vector<1x128x256xbf16>
    %730 = vector.shape_cast %729 : vector<1x128x256xbf16> to vector<128x256xbf16>
    %c1_365 = arith.constant 1 : index
    %c0_366 = arith.constant 0 : index
    %c0_367 = arith.constant 0 : index
    %731 = vector.load %arg37[%c1_365, %c0_366, %c0_367] : memref<2x1x256xf32, #tpu.memory_space<vmem>>, vector<1x1x256xf32>
    %732 = vector.shape_cast %731 : vector<1x1x256xf32> to vector<1x256xf32>
    %c1_368 = arith.constant 1 : index
    %c0_369 = arith.constant 0 : index
    %c0_370 = arith.constant 0 : index
    %733 = vector.load %arg38[%c1_368, %c0_369, %c0_370] : memref<2x256x128xbf16, #tpu.memory_space<vmem>>, vector<1x256x128xbf16>
    %734 = vector.shape_cast %733 : vector<1x256x128xbf16> to vector<256x128xbf16>
    %c1_371 = arith.constant 1 : index
    %c0_372 = arith.constant 0 : index
    %c0_373 = arith.constant 0 : index
    %735 = vector.load %arg39[%c1_371, %c0_372, %c0_373] : memref<2x1x128xf32, #tpu.memory_space<vmem>>, vector<1x1x128xf32>
    %736 = vector.shape_cast %735 : vector<1x1x128xf32> to vector<1x128xf32>
    %c1_374 = arith.constant 1 : index
    %c0_375 = arith.constant 0 : index
    %c0_376 = arith.constant 0 : index
    %737 = vector.load %arg40[%c1_374, %c0_375, %c0_376] : memref<2x1x128xf32, #tpu.memory_space<vmem>>, vector<1x1x128xf32>
    %738 = vector.shape_cast %737 : vector<1x1x128xf32> to vector<1x128xf32>
    %c1_377 = arith.constant 1 : index
    %c0_378 = arith.constant 0 : index
    %c0_379 = arith.constant 0 : index
    %739 = vector.load %arg41[%c1_377, %c0_378, %c0_379] : memref<2x1x128xf32, #tpu.memory_space<vmem>>, vector<1x1x128xf32>
    %740 = vector.shape_cast %739 : vector<1x1x128xf32> to vector<1x128xf32>
    %741 = arith.truncf %708 : vector<5x128xf32> to vector<5x128xbf16>
    %742 = vector.extract_strided_slice %710 {offsets = [0, 0, 0], sizes = [1, 128, 32], strides = [1, 1, 1]} : vector<4x128x32xbf16> to vector<1x128x32xbf16>
    %743 = vector.shape_cast %742 : vector<1x128x32xbf16> to vector<128x32xbf16>
    %cst_380 = arith.constant dense<0.000000e+00> : vector<5x32xf32>
    %744 = tpu.matmul %741, %743, %cst_380 {dimension_numbers = #tpu.dot_dimension_numbers<[1], [0], [0], [1], [0, 0, 1, 1], [], []>} : vector<5x128xbf16>, vector<128x32xbf16>, vector<5x32xf32> -> vector<5x32xf32>
    %745 = vector.extract_strided_slice %710 {offsets = [1, 0, 0], sizes = [1, 128, 32], strides = [1, 1, 1]} : vector<4x128x32xbf16> to vector<1x128x32xbf16>
    %746 = vector.shape_cast %745 : vector<1x128x32xbf16> to vector<128x32xbf16>
    %cst_381 = arith.constant dense<0.000000e+00> : vector<5x32xf32>
    %747 = tpu.matmul %741, %746, %cst_381 {dimension_numbers = #tpu.dot_dimension_numbers<[1], [0], [0], [1], [0, 0, 1, 1], [], []>} : vector<5x128xbf16>, vector<128x32xbf16>, vector<5x32xf32> -> vector<5x32xf32>
    %748 = vector.extract_strided_slice %710 {offsets = [2, 0, 0], sizes = [1, 128, 32], strides = [1, 1, 1]} : vector<4x128x32xbf16> to vector<1x128x32xbf16>
    %749 = vector.shape_cast %748 : vector<1x128x32xbf16> to vector<128x32xbf16>
    %cst_382 = arith.constant dense<0.000000e+00> : vector<5x32xf32>
    %750 = tpu.matmul %741, %749, %cst_382 {dimension_numbers = #tpu.dot_dimension_numbers<[1], [0], [0], [1], [0, 0, 1, 1], [], []>} : vector<5x128xbf16>, vector<128x32xbf16>, vector<5x32xf32> -> vector<5x32xf32>
    %751 = vector.extract_strided_slice %710 {offsets = [3, 0, 0], sizes = [1, 128, 32], strides = [1, 1, 1]} : vector<4x128x32xbf16> to vector<1x128x32xbf16>
    %752 = vector.shape_cast %751 : vector<1x128x32xbf16> to vector<128x32xbf16>
    %cst_383 = arith.constant dense<0.000000e+00> : vector<5x32xf32>
    %753 = tpu.matmul %741, %752, %cst_383 {dimension_numbers = #tpu.dot_dimension_numbers<[1], [0], [0], [1], [0, 0, 1, 1], [], []>} : vector<5x128xbf16>, vector<128x32xbf16>, vector<5x32xf32> -> vector<5x32xf32>
    %754 = vector.shape_cast %744 : vector<5x32xf32> to vector<1x5x32xf32>
    %755 = vector.shape_cast %747 : vector<5x32xf32> to vector<1x5x32xf32>
    %756 = vector.shape_cast %750 : vector<5x32xf32> to vector<1x5x32xf32>
    %757 = vector.shape_cast %753 : vector<5x32xf32> to vector<1x5x32xf32>
    %758 = tpu.concatenate %754, %755, %756, %757 in 0 : vector<1x5x32xf32>, vector<1x5x32xf32>, vector<1x5x32xf32>, vector<1x5x32xf32> -> vector<4x5x32xf32>
    %759 = vector.broadcast %716 : vector<4x1x32xf32> to vector<4x5x32xf32>
    %760 = arith.addf %758, %759 : vector<4x5x32xf32>
    %761 = vector.extract_strided_slice %712 {offsets = [0, 0, 0], sizes = [1, 128, 32], strides = [1, 1, 1]} : vector<4x128x32xbf16> to vector<1x128x32xbf16>
    %762 = vector.shape_cast %761 : vector<1x128x32xbf16> to vector<128x32xbf16>
    %cst_384 = arith.constant dense<0.000000e+00> : vector<5x32xf32>
    %763 = tpu.matmul %741, %762, %cst_384 {dimension_numbers = #tpu.dot_dimension_numbers<[1], [0], [0], [1], [0, 0, 1, 1], [], []>} : vector<5x128xbf16>, vector<128x32xbf16>, vector<5x32xf32> -> vector<5x32xf32>
    %764 = vector.extract_strided_slice %712 {offsets = [1, 0, 0], sizes = [1, 128, 32], strides = [1, 1, 1]} : vector<4x128x32xbf16> to vector<1x128x32xbf16>
    %765 = vector.shape_cast %764 : vector<1x128x32xbf16> to vector<128x32xbf16>
    %cst_385 = arith.constant dense<0.000000e+00> : vector<5x32xf32>
    %766 = tpu.matmul %741, %765, %cst_385 {dimension_numbers = #tpu.dot_dimension_numbers<[1], [0], [0], [1], [0, 0, 1, 1], [], []>} : vector<5x128xbf16>, vector<128x32xbf16>, vector<5x32xf32> -> vector<5x32xf32>
    %767 = vector.extract_strided_slice %712 {offsets = [2, 0, 0], sizes = [1, 128, 32], strides = [1, 1, 1]} : vector<4x128x32xbf16> to vector<1x128x32xbf16>
    %768 = vector.shape_cast %767 : vector<1x128x32xbf16> to vector<128x32xbf16>
    %cst_386 = arith.constant dense<0.000000e+00> : vector<5x32xf32>
    %769 = tpu.matmul %741, %768, %cst_386 {dimension_numbers = #tpu.dot_dimension_numbers<[1], [0], [0], [1], [0, 0, 1, 1], [], []>} : vector<5x128xbf16>, vector<128x32xbf16>, vector<5x32xf32> -> vector<5x32xf32>
    %770 = vector.extract_strided_slice %712 {offsets = [3, 0, 0], sizes = [1, 128, 32], strides = [1, 1, 1]} : vector<4x128x32xbf16> to vector<1x128x32xbf16>
    %771 = vector.shape_cast %770 : vector<1x128x32xbf16> to vector<128x32xbf16>
    %cst_387 = arith.constant dense<0.000000e+00> : vector<5x32xf32>
    %772 = tpu.matmul %741, %771, %cst_387 {dimension_numbers = #tpu.dot_dimension_numbers<[1], [0], [0], [1], [0, 0, 1, 1], [], []>} : vector<5x128xbf16>, vector<128x32xbf16>, vector<5x32xf32> -> vector<5x32xf32>
    %773 = vector.shape_cast %763 : vector<5x32xf32> to vector<1x5x32xf32>
    %774 = vector.shape_cast %766 : vector<5x32xf32> to vector<1x5x32xf32>
    %775 = vector.shape_cast %769 : vector<5x32xf32> to vector<1x5x32xf32>
    %776 = vector.shape_cast %772 : vector<5x32xf32> to vector<1x5x32xf32>
    %777 = tpu.concatenate %773, %774, %775, %776 in 0 : vector<1x5x32xf32>, vector<1x5x32xf32>, vector<1x5x32xf32>, vector<1x5x32xf32> -> vector<4x5x32xf32>
    %778 = vector.broadcast %718 : vector<4x1x32xf32> to vector<4x5x32xf32>
    %779 = arith.addf %777, %778 : vector<4x5x32xf32>
    %780 = vector.extract_strided_slice %714 {offsets = [0, 0, 0], sizes = [1, 128, 32], strides = [1, 1, 1]} : vector<4x128x32xbf16> to vector<1x128x32xbf16>
    %781 = vector.shape_cast %780 : vector<1x128x32xbf16> to vector<128x32xbf16>
    %cst_388 = arith.constant dense<0.000000e+00> : vector<5x32xf32>
    %782 = tpu.matmul %741, %781, %cst_388 {dimension_numbers = #tpu.dot_dimension_numbers<[1], [0], [0], [1], [0, 0, 1, 1], [], []>} : vector<5x128xbf16>, vector<128x32xbf16>, vector<5x32xf32> -> vector<5x32xf32>
    %783 = vector.extract_strided_slice %714 {offsets = [1, 0, 0], sizes = [1, 128, 32], strides = [1, 1, 1]} : vector<4x128x32xbf16> to vector<1x128x32xbf16>
    %784 = vector.shape_cast %783 : vector<1x128x32xbf16> to vector<128x32xbf16>
    %cst_389 = arith.constant dense<0.000000e+00> : vector<5x32xf32>
    %785 = tpu.matmul %741, %784, %cst_389 {dimension_numbers = #tpu.dot_dimension_numbers<[1], [0], [0], [1], [0, 0, 1, 1], [], []>} : vector<5x128xbf16>, vector<128x32xbf16>, vector<5x32xf32> -> vector<5x32xf32>
    %786 = vector.extract_strided_slice %714 {offsets = [2, 0, 0], sizes = [1, 128, 32], strides = [1, 1, 1]} : vector<4x128x32xbf16> to vector<1x128x32xbf16>
    %787 = vector.shape_cast %786 : vector<1x128x32xbf16> to vector<128x32xbf16>
    %cst_390 = arith.constant dense<0.000000e+00> : vector<5x32xf32>
    %788 = tpu.matmul %741, %787, %cst_390 {dimension_numbers = #tpu.dot_dimension_numbers<[1], [0], [0], [1], [0, 0, 1, 1], [], []>} : vector<5x128xbf16>, vector<128x32xbf16>, vector<5x32xf32> -> vector<5x32xf32>
    %789 = vector.extract_strided_slice %714 {offsets = [3, 0, 0], sizes = [1, 128, 32], strides = [1, 1, 1]} : vector<4x128x32xbf16> to vector<1x128x32xbf16>
    %790 = vector.shape_cast %789 : vector<1x128x32xbf16> to vector<128x32xbf16>
    %cst_391 = arith.constant dense<0.000000e+00> : vector<5x32xf32>
    %791 = tpu.matmul %741, %790, %cst_391 {dimension_numbers = #tpu.dot_dimension_numbers<[1], [0], [0], [1], [0, 0, 1, 1], [], []>} : vector<5x128xbf16>, vector<128x32xbf16>, vector<5x32xf32> -> vector<5x32xf32>
    %792 = vector.shape_cast %782 : vector<5x32xf32> to vector<1x5x32xf32>
    %793 = vector.shape_cast %785 : vector<5x32xf32> to vector<1x5x32xf32>
    %794 = vector.shape_cast %788 : vector<5x32xf32> to vector<1x5x32xf32>
    %795 = vector.shape_cast %791 : vector<5x32xf32> to vector<1x5x32xf32>
    %796 = tpu.concatenate %792, %793, %794, %795 in 0 : vector<1x5x32xf32>, vector<1x5x32xf32>, vector<1x5x32xf32>, vector<1x5x32xf32> -> vector<4x5x32xf32>
    %797 = vector.broadcast %720 : vector<4x1x32xf32> to vector<4x5x32xf32>
    %798 = arith.addf %796, %797 : vector<4x5x32xf32>
    %799 = arith.truncf %760 : vector<4x5x32xf32> to vector<4x5x32xbf16>
    %800 = arith.truncf %779 : vector<4x5x32xf32> to vector<4x5x32xbf16>
    "tpu.trace_start"() <{level = 10 : i32, message = "hqd,hkd->hqk"}> : () -> ()
    %cst_392 = arith.constant dense<0.000000e+00> : vector<4x5x5xf32>
    %801 = tpu.matmul %799, %800, %cst_392 {dimension_numbers = #tpu.dot_dimension_numbers<[2], [2], [1], [1], [0, 0, 0, 1, 1, 1], [0], [0]>} : vector<4x5x32xbf16>, vector<4x5x32xbf16>, vector<4x5x5xf32> -> vector<4x5x5xf32>
    "tpu.trace_stop"() : () -> ()
    %cst_393 = arith.constant dense<0xFF800000> : vector<4x5xf32>
    %802 = vector.multi_reduction <maximumf>, %801, %cst_393 [2] : vector<4x5x5xf32> to vector<4x5xf32>
    %803 = vector.shape_cast %802 : vector<4x5xf32> to vector<4x5x1xf32>
    %804 = vector.broadcast %803 : vector<4x5x1xf32> to vector<4x5x5xf32>
    %805 = arith.subf %801, %804 : vector<4x5x5xf32>
    %806 = math.exp %805 : vector<4x5x5xf32>
    %cst_394 = arith.constant dense<0.000000e+00> : vector<4x5xf32>
    %807 = vector.multi_reduction <add>, %806, %cst_394 [2] : vector<4x5x5xf32> to vector<4x5xf32>
    %808 = vector.shape_cast %807 : vector<4x5xf32> to vector<4x5x1xf32>
    %809 = tpu.reciprocal %808 {approx = true} : vector<4x5x1xf32> -> vector<4x5x1xf32>
    %810 = vector.broadcast %809 : vector<4x5x1xf32> to vector<4x5x5xf32>
    %811 = arith.mulf %806, %810 : vector<4x5x5xf32>
    %812 = arith.truncf %811 : vector<4x5x5xf32> to vector<4x5x5xbf16>
    %813 = arith.truncf %798 : vector<4x5x32xf32> to vector<4x5x32xbf16>
    "tpu.trace_start"() <{level = 10 : i32, message = "hqk,hkd->hqd"}> : () -> ()
    %cst_395 = arith.constant dense<0.000000e+00> : vector<4x5x32xf32>
    %814 = tpu.matmul %812, %813, %cst_395 {dimension_numbers = #tpu.dot_dimension_numbers<[2], [1], [1], [2], [0, 0, 0, 1, 1, 2], [0], [0]>} : vector<4x5x5xbf16>, vector<4x5x32xbf16>, vector<4x5x32xf32> -> vector<4x5x32xf32>
    %cst_396 = arith.constant 0.000000e+00 : f32
    "tpu.trace_stop"() : () -> ()
    %815 = vector.broadcast %cst_396 : f32 to vector<5x128xf32>
    %816 = vector.extract_strided_slice %814 {offsets = [0, 0, 0], sizes = [1, 5, 32], strides = [1, 1, 1]} : vector<4x5x32xf32> to vector<1x5x32xf32>
    %817 = vector.shape_cast %816 : vector<1x5x32xf32> to vector<5x32xf32>
    %818 = arith.truncf %817 : vector<5x32xf32> to vector<5x32xbf16>
    %819 = vector.extract_strided_slice %722 {offsets = [0, 0, 0], sizes = [1, 32, 128], strides = [1, 1, 1]} : vector<4x32x128xbf16> to vector<1x32x128xbf16>
    %820 = vector.shape_cast %819 : vector<1x32x128xbf16> to vector<32x128xbf16>
    %cst_397 = arith.constant dense<0.000000e+00> : vector<5x128xf32>
    %821 = tpu.matmul %818, %820, %cst_397 {dimension_numbers = #tpu.dot_dimension_numbers<[1], [0], [0], [1], [0, 0, 1, 1], [], []>} : vector<5x32xbf16>, vector<32x128xbf16>, vector<5x128xf32> -> vector<5x128xf32>
    %822 = arith.addf %815, %821 : vector<5x128xf32>
    %823 = vector.extract_strided_slice %814 {offsets = [1, 0, 0], sizes = [1, 5, 32], strides = [1, 1, 1]} : vector<4x5x32xf32> to vector<1x5x32xf32>
    %824 = vector.shape_cast %823 : vector<1x5x32xf32> to vector<5x32xf32>
    %825 = arith.truncf %824 : vector<5x32xf32> to vector<5x32xbf16>
    %826 = vector.extract_strided_slice %722 {offsets = [1, 0, 0], sizes = [1, 32, 128], strides = [1, 1, 1]} : vector<4x32x128xbf16> to vector<1x32x128xbf16>
    %827 = vector.shape_cast %826 : vector<1x32x128xbf16> to vector<32x128xbf16>
    %cst_398 = arith.constant dense<0.000000e+00> : vector<5x128xf32>
    %828 = tpu.matmul %825, %827, %cst_398 {dimension_numbers = #tpu.dot_dimension_numbers<[1], [0], [0], [1], [0, 0, 1, 1], [], []>} : vector<5x32xbf16>, vector<32x128xbf16>, vector<5x128xf32> -> vector<5x128xf32>
    %829 = arith.addf %822, %828 : vector<5x128xf32>
    %830 = vector.extract_strided_slice %814 {offsets = [2, 0, 0], sizes = [1, 5, 32], strides = [1, 1, 1]} : vector<4x5x32xf32> to vector<1x5x32xf32>
    %831 = vector.shape_cast %830 : vector<1x5x32xf32> to vector<5x32xf32>
    %832 = arith.truncf %831 : vector<5x32xf32> to vector<5x32xbf16>
    %833 = vector.extract_strided_slice %722 {offsets = [2, 0, 0], sizes = [1, 32, 128], strides = [1, 1, 1]} : vector<4x32x128xbf16> to vector<1x32x128xbf16>
    %834 = vector.shape_cast %833 : vector<1x32x128xbf16> to vector<32x128xbf16>
    %cst_399 = arith.constant dense<0.000000e+00> : vector<5x128xf32>
    %835 = tpu.matmul %832, %834, %cst_399 {dimension_numbers = #tpu.dot_dimension_numbers<[1], [0], [0], [1], [0, 0, 1, 1], [], []>} : vector<5x32xbf16>, vector<32x128xbf16>, vector<5x128xf32> -> vector<5x128xf32>
    %836 = arith.addf %829, %835 : vector<5x128xf32>
    %837 = vector.extract_strided_slice %814 {offsets = [3, 0, 0], sizes = [1, 5, 32], strides = [1, 1, 1]} : vector<4x5x32xf32> to vector<1x5x32xf32>
    %838 = vector.shape_cast %837 : vector<1x5x32xf32> to vector<5x32xf32>
    %839 = arith.truncf %838 : vector<5x32xf32> to vector<5x32xbf16>
    %840 = vector.extract_strided_slice %722 {offsets = [3, 0, 0], sizes = [1, 32, 128], strides = [1, 1, 1]} : vector<4x32x128xbf16> to vector<1x32x128xbf16>
    %841 = vector.shape_cast %840 : vector<1x32x128xbf16> to vector<32x128xbf16>
    %cst_400 = arith.constant dense<0.000000e+00> : vector<5x128xf32>
    %842 = tpu.matmul %839, %841, %cst_400 {dimension_numbers = #tpu.dot_dimension_numbers<[1], [0], [0], [1], [0, 0, 1, 1], [], []>} : vector<5x32xbf16>, vector<32x128xbf16>, vector<5x128xf32> -> vector<5x128xf32>
    %843 = arith.addf %836, %842 : vector<5x128xf32>
    %844 = vector.broadcast %724 : vector<1x128xf32> to vector<5x128xf32>
    %845 = arith.addf %843, %844 : vector<5x128xf32>
    %846 = arith.addf %708, %845 : vector<5x128xf32>
    %cst_401 = arith.constant dense<0.000000e+00> : vector<5xf32>
    %847 = vector.multi_reduction <add>, %846, %cst_401 [1] : vector<5x128xf32> to vector<5xf32>
    %848 = vector.shape_cast %847 : vector<5xf32> to vector<5x1xf32>
    %cst_402 = arith.constant 1.280000e+02 : f32
    %849 = vector.broadcast %cst_402 : f32 to vector<5x1xf32>
    %850 = arith.divf %848, %849 : vector<5x1xf32>
    %851 = vector.broadcast %850 : vector<5x1xf32> to vector<5x128xf32>
    %852 = arith.subf %846, %851 : vector<5x128xf32>
    %853 = arith.mulf %852, %852 : vector<5x128xf32>
    %cst_403 = arith.constant dense<0.000000e+00> : vector<5xf32>
    %854 = vector.multi_reduction <add>, %853, %cst_403 [1] : vector<5x128xf32> to vector<5xf32>
    %855 = vector.shape_cast %854 : vector<5xf32> to vector<5x1xf32>
    %cst_404 = arith.constant 1.280000e+02 : f32
    %856 = vector.broadcast %cst_404 : f32 to vector<5x1xf32>
    %857 = arith.divf %855, %856 : vector<5x1xf32>
    %858 = vector.broadcast %850 : vector<5x1xf32> to vector<5x128xf32>
    %859 = arith.subf %846, %858 : vector<5x128xf32>
    %cst_405 = arith.constant 9.99999974E-6 : f32
    %860 = vector.broadcast %cst_405 : f32 to vector<5x1xf32>
    %861 = arith.addf %857, %860 : vector<5x1xf32>
    %862 = math.rsqrt %861 : vector<5x1xf32>
    %863 = vector.broadcast %862 : vector<5x1xf32> to vector<5x128xf32>
    %864 = arith.mulf %859, %863 : vector<5x128xf32>
    %865 = vector.broadcast %726 : vector<1x128xf32> to vector<5x128xf32>
    %866 = arith.mulf %864, %865 : vector<5x128xf32>
    %867 = vector.broadcast %728 : vector<1x128xf32> to vector<5x128xf32>
    %868 = arith.addf %866, %867 : vector<5x128xf32>
    %869 = arith.truncf %868 : vector<5x128xf32> to vector<5x128xbf16>
    %cst_406 = arith.constant dense<0.000000e+00> : vector<5x256xf32>
    %870 = tpu.matmul %869, %730, %cst_406 {dimension_numbers = #tpu.dot_dimension_numbers<[1], [0], [0], [1], [0, 0, 1, 1], [], []>} : vector<5x128xbf16>, vector<128x256xbf16>, vector<5x256xf32> -> vector<5x256xf32>
    %871 = vector.broadcast %732 : vector<1x256xf32> to vector<5x256xf32>
    %872 = arith.addf %870, %871 : vector<5x256xf32>
    %cst_407 = arith.constant 0.000000e+00 : f32
    %873 = vector.broadcast %cst_407 : f32 to vector<5x256xf32>
    %874 = arith.maximumf %872, %873 : vector<5x256xf32>
    %875 = arith.truncf %874 : vector<5x256xf32> to vector<5x256xbf16>
    %cst_408 = arith.constant dense<0.000000e+00> : vector<5x128xf32>
    %876 = tpu.matmul %875, %734, %cst_408 {dimension_numbers = #tpu.dot_dimension_numbers<[1], [0], [0], [1], [0, 0, 1, 1], [], []>} : vector<5x256xbf16>, vector<256x128xbf16>, vector<5x128xf32> -> vector<5x128xf32>
    %877 = vector.broadcast %736 : vector<1x128xf32> to vector<5x128xf32>
    %878 = arith.addf %876, %877 : vector<5x128xf32>
    %879 = arith.addf %868, %878 : vector<5x128xf32>
    %cst_409 = arith.constant dense<0.000000e+00> : vector<5xf32>
    %880 = vector.multi_reduction <add>, %879, %cst_409 [1] : vector<5x128xf32> to vector<5xf32>
    %881 = vector.shape_cast %880 : vector<5xf32> to vector<5x1xf32>
    %cst_410 = arith.constant 1.280000e+02 : f32
    %882 = vector.broadcast %cst_410 : f32 to vector<5x1xf32>
    %883 = arith.divf %881, %882 : vector<5x1xf32>
    %884 = vector.broadcast %883 : vector<5x1xf32> to vector<5x128xf32>
    %885 = arith.subf %879, %884 : vector<5x128xf32>
    %886 = arith.mulf %885, %885 : vector<5x128xf32>
    %cst_411 = arith.constant dense<0.000000e+00> : vector<5xf32>
    %887 = vector.multi_reduction <add>, %886, %cst_411 [1] : vector<5x128xf32> to vector<5xf32>
    %888 = vector.shape_cast %887 : vector<5xf32> to vector<5x1xf32>
    %cst_412 = arith.constant 1.280000e+02 : f32
    %889 = vector.broadcast %cst_412 : f32 to vector<5x1xf32>
    %890 = arith.divf %888, %889 : vector<5x1xf32>
    %891 = vector.broadcast %883 : vector<5x1xf32> to vector<5x128xf32>
    %892 = arith.subf %879, %891 : vector<5x128xf32>
    %cst_413 = arith.constant 9.99999974E-6 : f32
    %893 = vector.broadcast %cst_413 : f32 to vector<5x1xf32>
    %894 = arith.addf %890, %893 : vector<5x1xf32>
    %895 = math.rsqrt %894 : vector<5x1xf32>
    %896 = vector.broadcast %895 : vector<5x1xf32> to vector<5x128xf32>
    %897 = arith.mulf %892, %896 : vector<5x128xf32>
    %898 = vector.broadcast %738 : vector<1x128xf32> to vector<5x128xf32>
    %899 = arith.mulf %897, %898 : vector<5x128xf32>
    %900 = vector.broadcast %740 : vector<1x128xf32> to vector<5x128xf32>
    %901 = arith.addf %899, %900 : vector<5x128xf32>
    %902 = vector.extract_strided_slice %901 {offsets = [0, 0], sizes = [1, 128], strides = [1, 1]} : vector<5x128xf32> to vector<1x128xf32>
    %903 = arith.truncf %902 : vector<1x128xf32> to vector<1x128xbf16>
    %c0_414 = arith.constant 0 : index
    %c0_415 = arith.constant 0 : index
    %904 = vector.load %arg42[%c0_414, %c0_415] : memref<128x128xbf16, #tpu.memory_space<vmem>>, vector<128x128xbf16>
    %cst_416 = arith.constant dense<0.000000e+00> : vector<1x128xf32>
    %905 = tpu.matmul %903, %904, %cst_416 {dimension_numbers = #tpu.dot_dimension_numbers<[1], [0], [0], [1], [0, 0, 1, 1], [], []>} : vector<1x128xbf16>, vector<128x128xbf16>, vector<1x128xf32> -> vector<1x128xf32>
    %c0_417 = arith.constant 0 : index
    %c0_418 = arith.constant 0 : index
    %906 = vector.load %arg43[%c0_417, %c0_418] : memref<1x128xf32, #tpu.memory_space<vmem>>, vector<1x128xf32>
    %907 = arith.addf %905, %906 : vector<1x128xf32>
    %908 = math.tanh %907 : vector<1x128xf32>
    %909 = vector.shape_cast %908 : vector<1x128xf32> to vector<1x1x128xf32>
    %c0_419 = arith.constant 0 : index
    %c0_420 = arith.constant 0 : index
    %c0_421 = arith.constant 0 : index
    %910 = vector.load %arg44[%c0_419, %c0_420, %c0_421] : memref<1x1x128xf32, #tpu.memory_space<vmem>>, vector<1x1x128xf32>
    tpu.vector_store %arg44[%c0_419, %c0_420, %c0_421], %909 {strides = array<i32>} : memref<1x1x128xf32, #tpu.memory_space<vmem>>, vector<1x1x128xf32>,
    return
  }
  func.func @transform_0(%arg0: i32) -> (i32, i32, i32) {
    %c0_i32 = arith.constant 0 : i32
    %c0_i32_0 = arith.constant 0 : i32
    %c0_i32_1 = arith.constant 0 : i32
    return %arg0, %c0_i32, %c0_i32_0 : i32, i32, i32
  }
  func.func @transform_1(%arg0: i32) -> (i32, i32) {
    %c0_i32 = arith.constant 0 : i32
    %c0_i32_0 = arith.constant 0 : i32
    %c0_i32_1 = arith.constant 0 : i32
    return %c0_i32, %c0_i32_0 : i32, i32
  }
  func.func @transform_2(%arg0: i32) -> (i32, i32) {
    %c0_i32 = arith.constant 0 : i32
    %c0_i32_0 = arith.constant 0 : i32
    %c0_i32_1 = arith.constant 0 : i32
    return %c0_i32, %c0_i32_0 : i32, i32
  }
  func.func @transform_3(%arg0: i32) -> (i32, i32) {
    %c0_i32 = arith.constant 0 : i32
    %c0_i32_0 = arith.constant 0 : i32
    %c0_i32_1 = arith.constant 0 : i32
    return %c0_i32, %c0_i32_0 : i32, i32
  }
  func.func @transform_4(%arg0: i32) -> (i32, i32) {
    %c0_i32 = arith.constant 0 : i32
    %c0_i32_0 = arith.constant 0 : i32
    %c0_i32_1 = arith.constant 0 : i32
    return %c0_i32, %c0_i32_0 : i32, i32
  }
  func.func @transform_5(%arg0: i32) -> (i32, i32, i32) {
    %c0_i32 = arith.constant 0 : i32
    %c0_i32_0 = arith.constant 0 : i32
    %c0_i32_1 = arith.constant 0 : i32
    %c0_i32_2 = arith.constant 0 : i32
    return %c0_i32, %c0_i32_0, %c0_i32_1 : i32, i32, i32
  }
  func.func @transform_6(%arg0: i32) -> (i32, i32, i32) {
    %c0_i32 = arith.constant 0 : i32
    %c0_i32_0 = arith.constant 0 : i32
    %c0_i32_1 = arith.constant 0 : i32
    %c0_i32_2 = arith.constant 0 : i32
    return %c0_i32, %c0_i32_0, %c0_i32_1 : i32, i32, i32
  }
  func.func @transform_7(%arg0: i32) -> (i32, i32, i32, i32) {
    %c0_i32 = arith.constant 0 : i32
    %c0_i32_0 = arith.constant 0 : i32
    %c0_i32_1 = arith.constant 0 : i32
    %c0_i32_2 = arith.constant 0 : i32
    %c0_i32_3 = arith.constant 0 : i32
    return %c0_i32, %c0_i32_0, %c0_i32_1, %c0_i32_2 : i32, i32, i32, i32
  }
  func.func @transform_8(%arg0: i32) -> (i32, i32, i32, i32) {
    %c0_i32 = arith.constant 0 : i32
    %c0_i32_0 = arith.constant 0 : i32
    %c0_i32_1 = arith.constant 0 : i32
    %c0_i32_2 = arith.constant 0 : i32
    %c0_i32_3 = arith.constant 0 : i32
    return %c0_i32, %c0_i32_0, %c0_i32_1, %c0_i32_2 : i32, i32, i32, i32
  }
  func.func @transform_9(%arg0: i32) -> (i32, i32, i32, i32) {
    %c0_i32 = arith.constant 0 : i32
    %c0_i32_0 = arith.constant 0 : i32
    %c0_i32_1 = arith.constant 0 : i32
    %c0_i32_2 = arith.constant 0 : i32
    %c0_i32_3 = arith.constant 0 : i32
    return %c0_i32, %c0_i32_0, %c0_i32_1, %c0_i32_2 : i32, i32, i32, i32
  }
  func.func @transform_10(%arg0: i32) -> (i32, i32, i32, i32) {
    %c0_i32 = arith.constant 0 : i32
    %c0_i32_0 = arith.constant 0 : i32
    %c0_i32_1 = arith.constant 0 : i32
    %c0_i32_2 = arith.constant 0 : i32
    %c0_i32_3 = arith.constant 0 : i32
    return %c0_i32, %c0_i32_0, %c0_i32_1, %c0_i32_2 : i32, i32, i32, i32
  }
  func.func @transform_11(%arg0: i32) -> (i32, i32, i32, i32) {
    %c0_i32 = arith.constant 0 : i32
    %c0_i32_0 = arith.constant 0 : i32
    %c0_i32_1 = arith.constant 0 : i32
    %c0_i32_2 = arith.constant 0 : i32
    %c0_i32_3 = arith.constant 0 : i32
    return %c0_i32, %c0_i32_0, %c0_i32_1, %c0_i32_2 : i32, i32, i32, i32
  }
  func.func @transform_12(%arg0: i32) -> (i32, i32, i32, i32) {
    %c0_i32 = arith.constant 0 : i32
    %c0_i32_0 = arith.constant 0 : i32
    %c0_i32_1 = arith.constant 0 : i32
    %c0_i32_2 = arith.constant 0 : i32
    %c0_i32_3 = arith.constant 0 : i32
    return %c0_i32, %c0_i32_0, %c0_i32_1, %c0_i32_2 : i32, i32, i32, i32
  }
  func.func @transform_13(%arg0: i32) -> (i32, i32, i32, i32) {
    %c0_i32 = arith.constant 0 : i32
    %c0_i32_0 = arith.constant 0 : i32
    %c0_i32_1 = arith.constant 0 : i32
    %c0_i32_2 = arith.constant 0 : i32
    %c0_i32_3 = arith.constant 0 : i32
    return %c0_i32, %c0_i32_0, %c0_i32_1, %c0_i32_2 : i32, i32, i32, i32
  }
  func.func @transform_14(%arg0: i32) -> (i32, i32, i32) {
    %c0_i32 = arith.constant 0 : i32
    %c0_i32_0 = arith.constant 0 : i32
    %c0_i32_1 = arith.constant 0 : i32
    %c0_i32_2 = arith.constant 0 : i32
    return %c0_i32, %c0_i32_0, %c0_i32_1 : i32, i32, i32
  }
  func.func @transform_15(%arg0: i32) -> (i32, i32, i32) {
    %c0_i32 = arith.constant 0 : i32
    %c0_i32_0 = arith.constant 0 : i32
    %c0_i32_1 = arith.constant 0 : i32
    %c0_i32_2 = arith.constant 0 : i32
    return %c0_i32, %c0_i32_0, %c0_i32_1 : i32, i32, i32
  }
  func.func @transform_16(%arg0: i32) -> (i32, i32, i32) {
    %c0_i32 = arith.constant 0 : i32
    %c0_i32_0 = arith.constant 0 : i32
    %c0_i32_1 = arith.constant 0 : i32
    %c0_i32_2 = arith.constant 0 : i32
    return %c0_i32, %c0_i32_0, %c0_i32_1 : i32, i32, i32
  }
  func.func @transform_17(%arg0: i32) -> (i32, i32, i32) {
    %c0_i32 = arith.constant 0 : i32
    %c0_i32_0 = arith.constant 0 : i32
    %c0_i32_1 = arith.constant 0 : i32
    %c0_i32_2 = arith.constant 0 : i32
    return %c0_i32, %c0_i32_0, %c0_i32_1 : i32, i32, i32
  }
  func.func @transform_18(%arg0: i32) -> (i32, i32, i32) {
    %c0_i32 = arith.constant 0 : i32
    %c0_i32_0 = arith.constant 0 : i32
    %c0_i32_1 = arith.constant 0 : i32
    %c0_i32_2 = arith.constant 0 : i32
    return %c0_i32, %c0_i32_0, %c0_i32_1 : i32, i32, i32
  }
  func.func @transform_19(%arg0: i32) -> (i32, i32, i32) {
    %c0_i32 = arith.constant 0 : i32
    %c0_i32_0 = arith.constant 0 : i32
    %c0_i32_1 = arith.constant 0 : i32
    %c0_i32_2 = arith.constant 0 : i32
    return %c0_i32, %c0_i32_0, %c0_i32_1 : i32, i32, i32
  }
  func.func @transform_20(%arg0: i32) -> (i32, i32, i32) {
    %c0_i32 = arith.constant 0 : i32
    %c0_i32_0 = arith.constant 0 : i32
    %c0_i32_1 = arith.constant 0 : i32
    %c0_i32_2 = arith.constant 0 : i32
    return %c0_i32, %c0_i32_0, %c0_i32_1 : i32, i32, i32
  }
  func.func @transform_21(%arg0: i32) -> (i32, i32, i32) {
    %c0_i32 = arith.constant 0 : i32
    %c0_i32_0 = arith.constant 0 : i32
    %c0_i32_1 = arith.constant 0 : i32
    %c0_i32_2 = arith.constant 0 : i32
    return %c0_i32, %c0_i32_0, %c0_i32_1 : i32, i32, i32
  }
  func.func @transform_22(%arg0: i32) -> (i32, i32, i32) {
    %c0_i32 = arith.constant 0 : i32
    %c0_i32_0 = arith.constant 0 : i32
    %c0_i32_1 = arith.constant 0 : i32
    %c0_i32_2 = arith.constant 0 : i32
    return %c0_i32, %c0_i32_0, %c0_i32_1 : i32, i32, i32
  }
  func.func @transform_23(%arg0: i32) -> (i32, i32) {
    %c0_i32 = arith.constant 0 : i32
    %c0_i32_0 = arith.constant 0 : i32
    %c0_i32_1 = arith.constant 0 : i32
    return %c0_i32, %c0_i32_0 : i32, i32
  }
  func.func @transform_24(%arg0: i32) -> (i32, i32) {
    %c0_i32 = arith.constant 0 : i32
    %c0_i32_0 = arith.constant 0 : i32
    %c0_i32_1 = arith.constant 0 : i32
    return %c0_i32, %c0_i32_0 : i32, i32
  }
  func.func @transform_25(%arg0: i32) -> (i32, i32, i32, i32) {
    %c0_i32 = arith.constant 0 : i32
    %c0_i32_0 = arith.constant 0 : i32
    %c0_i32_1 = arith.constant 0 : i32
    %c0_i32_2 = arith.constant 0 : i32
    %c0_i32_3 = arith.constant 0 : i32
    return %c0_i32, %c0_i32_0, %c0_i32_1, %c0_i32_2 : i32, i32, i32, i32
  }
  func.func @transform_26(%arg0: i32) -> (i32, i32, i32, i32) {
    %c0_i32 = arith.constant 0 : i32
    %c0_i32_0 = arith.constant 0 : i32
    %c0_i32_1 = arith.constant 0 : i32
    %c0_i32_2 = arith.constant 0 : i32
    %c0_i32_3 = arith.constant 0 : i32
    return %c0_i32, %c0_i32_0, %c0_i32_1, %c0_i32_2 : i32, i32, i32, i32
  }
  func.func @transform_27(%arg0: i32) -> (i32, i32, i32, i32) {
    %c0_i32 = arith.constant 0 : i32
    %c0_i32_0 = arith.constant 0 : i32
    %c0_i32_1 = arith.constant 0 : i32
    %c0_i32_2 = arith.constant 0 : i32
    %c0_i32_3 = arith.constant 0 : i32
    return %c0_i32, %c0_i32_0, %c0_i32_1, %c0_i32_2 : i32, i32, i32, i32
  }
  func.func @transform_28(%arg0: i32) -> (i32, i32, i32, i32) {
    %c0_i32 = arith.constant 0 : i32
    %c0_i32_0 = arith.constant 0 : i32
    %c0_i32_1 = arith.constant 0 : i32
    %c0_i32_2 = arith.constant 0 : i32
    %c0_i32_3 = arith.constant 0 : i32
    return %c0_i32, %c0_i32_0, %c0_i32_1, %c0_i32_2 : i32, i32, i32, i32
  }
  func.func @transform_29(%arg0: i32) -> (i32, i32, i32, i32) {
    %c0_i32 = arith.constant 0 : i32
    %c0_i32_0 = arith.constant 0 : i32
    %c0_i32_1 = arith.constant 0 : i32
    %c0_i32_2 = arith.constant 0 : i32
    %c0_i32_3 = arith.constant 0 : i32
    return %c0_i32, %c0_i32_0, %c0_i32_1, %c0_i32_2 : i32, i32, i32, i32
  }
  func.func @transform_30(%arg0: i32) -> (i32, i32, i32, i32) {
    %c0_i32 = arith.constant 0 : i32
    %c0_i32_0 = arith.constant 0 : i32
    %c0_i32_1 = arith.constant 0 : i32
    %c0_i32_2 = arith.constant 0 : i32
    %c0_i32_3 = arith.constant 0 : i32
    return %c0_i32, %c0_i32_0, %c0_i32_1, %c0_i32_2 : i32, i32, i32, i32
  }
  func.func @transform_31(%arg0: i32) -> (i32, i32, i32, i32) {
    %c0_i32 = arith.constant 0 : i32
    %c0_i32_0 = arith.constant 0 : i32
    %c0_i32_1 = arith.constant 0 : i32
    %c0_i32_2 = arith.constant 0 : i32
    %c0_i32_3 = arith.constant 0 : i32
    return %c0_i32, %c0_i32_0, %c0_i32_1, %c0_i32_2 : i32, i32, i32, i32
  }
  func.func @transform_32(%arg0: i32) -> (i32, i32, i32) {
    %c0_i32 = arith.constant 0 : i32
    %c0_i32_0 = arith.constant 0 : i32
    %c0_i32_1 = arith.constant 0 : i32
    %c0_i32_2 = arith.constant 0 : i32
    return %c0_i32, %c0_i32_0, %c0_i32_1 : i32, i32, i32
  }
  func.func @transform_33(%arg0: i32) -> (i32, i32, i32) {
    %c0_i32 = arith.constant 0 : i32
    %c0_i32_0 = arith.constant 0 : i32
    %c0_i32_1 = arith.constant 0 : i32
    %c0_i32_2 = arith.constant 0 : i32
    return %c0_i32, %c0_i32_0, %c0_i32_1 : i32, i32, i32
  }
  func.func @transform_34(%arg0: i32) -> (i32, i32, i32) {
    %c0_i32 = arith.constant 0 : i32
    %c0_i32_0 = arith.constant 0 : i32
    %c0_i32_1 = arith.constant 0 : i32
    %c0_i32_2 = arith.constant 0 : i32
    return %c0_i32, %c0_i32_0, %c0_i32_1 : i32, i32, i32
  }
  func.func @transform_35(%arg0: i32) -> (i32, i32, i32) {
    %c0_i32 = arith.constant 0 : i32
    %c0_i32_0 = arith.constant 0 : i32
    %c0_i32_1 = arith.constant 0 : i32
    %c0_i32_2 = arith.constant 0 : i32
    return %c0_i32, %c0_i32_0, %c0_i32_1 : i32, i32, i32
  }
  func.func @transform_36(%arg0: i32) -> (i32, i32, i32) {
    %c0_i32 = arith.constant 0 : i32
    %c0_i32_0 = arith.constant 0 : i32
    %c0_i32_1 = arith.constant 0 : i32
    %c0_i32_2 = arith.constant 0 : i32
    return %c0_i32, %c0_i32_0, %c0_i32_1 : i32, i32, i32
  }
  func.func @transform_37(%arg0: i32) -> (i32, i32, i32) {
    %c0_i32 = arith.constant 0 : i32
    %c0_i32_0 = arith.constant 0 : i32
    %c0_i32_1 = arith.constant 0 : i32
    %c0_i32_2 = arith.constant 0 : i32
    return %c0_i32, %c0_i32_0, %c0_i32_1 : i32, i32, i32
  }
  func.func @transform_38(%arg0: i32) -> (i32, i32, i32) {
    %c0_i32 = arith.constant 0 : i32
    %c0_i32_0 = arith.constant 0 : i32
    %c0_i32_1 = arith.constant 0 : i32
    %c0_i32_2 = arith.constant 0 : i32
    return %c0_i32, %c0_i32_0, %c0_i32_1 : i32, i32, i32
  }
  func.func @transform_39(%arg0: i32) -> (i32, i32, i32) {
    %c0_i32 = arith.constant 0 : i32
    %c0_i32_0 = arith.constant 0 : i32
    %c0_i32_1 = arith.constant 0 : i32
    %c0_i32_2 = arith.constant 0 : i32
    return %c0_i32, %c0_i32_0, %c0_i32_1 : i32, i32, i32
  }
  func.func @transform_40(%arg0: i32) -> (i32, i32, i32) {
    %c0_i32 = arith.constant 0 : i32
    %c0_i32_0 = arith.constant 0 : i32
    %c0_i32_1 = arith.constant 0 : i32
    %c0_i32_2 = arith.constant 0 : i32
    return %c0_i32, %c0_i32_0, %c0_i32_1 : i32, i32, i32
  }
  func.func @transform_41(%arg0: i32) -> (i32, i32) {
    %c0_i32 = arith.constant 0 : i32
    %c0_i32_0 = arith.constant 0 : i32
    %c0_i32_1 = arith.constant 0 : i32
    return %c0_i32, %c0_i32_0 : i32, i32
  }
  func.func @transform_42(%arg0: i32) -> (i32, i32) {
    %c0_i32 = arith.constant 0 : i32
    %c0_i32_0 = arith.constant 0 : i32
    %c0_i32_1 = arith.constant 0 : i32
    return %c0_i32, %c0_i32_0 : i32, i32
  }
  func.func @transform_43(%arg0: i32) -> (i32, i32, i32) {
    %c0_i32 = arith.constant 0 : i32
    %c0_i32_0 = arith.constant 0 : i32
    %c0_i32_1 = arith.constant 0 : i32
    return %arg0, %c0_i32, %c0_i32_0 : i32, i32, i32
  }
}

</mosaic_0001>

<bundles_post_ra>
// kernel: forward.1
= control target key start
LH: loop header
LB: loop body
LE: loop exit
PB: predicated region body
PF: predicated region fallthrough
CT: control target
= control target key end

     0   :  { %s12424_s6 = smov 1   ;;  %s12425_s10 = smov 2   ;;  %s13798_s0 = inlined_call_operand.smem [shape: u32[44], index: -1, kind: input, shape index: {}] }
   0x1   :  { %s12477_s5 = sld [smem:[%s13798_s0]]   ;;  %s12426_s14 = smov 3  }
   0x2   :  { %s12482_s9 = sld [smem:[%s13798_s0 + %s12424_s6]]   ;;  %s12427_s18 = smov 4  }
   0x3   :  { %s12487_s13 = sld [smem:[%s13798_s0 + %s12425_s10]]   ;;  %s12428_s22 = smov 5  }
   0x4   :  { %s12492_s17 = sld [smem:[%s13798_s0 + %s12426_s14]]   ;;  %s12429_s26 = smov 6  }
   0x5   :  { %s12497_s21 = sld [smem:[%s13798_s0 + %s12427_s18]]   ;;  %s12430_s30 = smov 7  }
   0x6   :  { %s12502_s25 = sld [smem:[%s13798_s0 + %s12428_s22]]   ;;  %s12431_s4 = smov 8  }
   0x7   :  { %13847 = sst [smem:[#allocation5_spill]] %s12477_s5  ;;  %s12432_s10 = smov 9  }
   0x8   :  { %13848 = sst [smem:[#allocation6_spill]] %s12482_s9  ;;  %s12433_s15 = smov 10  }
   0x9   :  { %13849 = sst [smem:[#allocation7_spill]] %s12487_s13  ;;  %s12434_s20 = smov 11  }
   0xa   :  { %13850 = sst [smem:[#allocation8_spill]] %s12492_s17  ;;  %s12436_s1 = smov 13  }
   0xb   :  { %13851 = sst [smem:[#allocation9_spill]] %s12497_s21  ;;  %s12437_s7 = smov 14  }
   0xc   :  { %s12507_s29 = sld [smem:[%s13798_s0 + %s12429_s26]]   ;;  %s12435_s26 = smov 12  }
   0xd   :  { %s12512_s3 = sld [smem:[%s13798_s0 + %s12430_s30]]   ;;  %s12439_s22 = smov 16  }
   0xe   :  { %s12517_s8 = sld [smem:[%s13798_s0 + %s12431_s4]]   ;;  %s12440_s28 = smov 17  }
   0xf   :  { %s12522_s14 = sld [smem:[%s13798_s0 + %s12432_s10]]  }
  0x10   :  { %s12527_s19 = sld [smem:[%s13798_s0 + %s12433_s15]]   ;;  %s12438_s15 = smov 15  }
  0x11   :  { %s12532_s24 = sld [smem:[%s13798_s0 + %s12434_s20]]  }
  0x12   :  { %s12537_s30 = sld [smem:[%s13798_s0 + %s12435_s26]]  }
  0x13   :  { %13852 = sst [smem:[#allocation10_spill]] %s12512_s3 }
  0x14   :  { %13853 = sst [smem:[#allocation11_spill]] %s12517_s8 }
  0x15   :  { %13854 = sst [smem:[#allocation12_spill]] %s12522_s14 }
  0x16   :  { %13855 = sst [smem:[#allocation13_spill]] %s12527_s19 }
  0x17   :  { %s12542_s6 = sld [smem:[%s13798_s0 + %s12436_s1]]  }
  0x18   :  { %s12547_s12 = sld [smem:[%s13798_s0 + %s12437_s7]]   ;;  %s12441_s7 = smov 18  }
  0x19   :  { %s12552_s20 = sld [smem:[%s13798_s0 + %s12438_s15]]   ;;  %s12442_s15 = smov 19  }
  0x1a   :  { %s12557_s27 = sld [smem:[%s13798_s0 + %s12439_s22]]   ;;  %s12443_s22 = smov 20  }
  0x1b   :  { %s12562_s4 = sld [smem:[%s13798_s0 + %s12440_s28]]   ;;  %s12444_s28 = smov 21  }
  0x1d   :  { %13856 = sst [smem:[#allocation14_spill]] %s12542_s6 }
  0x1e   :  { %13857 = sst [smem:[#allocation15_spill]] %s12547_s12 }
  0x1f   :  { %13858 = sst [smem:[#allocation16_spill]] %s12552_s20 }
  0x20   :  { %13859 = sst [smem:[#allocation17_spill]] %s12557_s27 }
  0x21   :  { %13860 = sst [smem:[#allocation18_spill]] %s12562_s4 }
  0x22   :  { %s12567_s12 = sld [smem:[%s13798_s0 + %s12441_s7]]   ;;  %s12445_s7 = smov 22  }
  0x23   :  { %s12572_s20 = sld [smem:[%s13798_s0 + %s12442_s15]]   ;;  %s12446_s15 = smov 23  }
  0x24   :  { %s12577_s27 = sld [smem:[%s13798_s0 + %s12443_s22]]   ;;  %s12447_s22 = smov 24  }
  0x25   :  { %s12582_s4 = sld [smem:[%s13798_s0 + %s12444_s28]]   ;;  %s12448_s28 = smov 25  }
  0x28   :  { %13861 = sst [smem:[#allocation19_spill]] %s12567_s12 }
  0x29   :  { %13862 = sst [smem:[#allocation20_spill]] %s12572_s20 }
  0x2a   :  { %13863 = sst [smem:[#allocation21_spill]] %s12577_s27 }
  0x2b   :  { %13864 = sst [smem:[#allocation22_spill]] %s12582_s4 }
  0x2c   :  { %s12587_s12 = sld [smem:[%s13798_s0 + %s12445_s7]]   ;;  %s12449_s7 = smov 26  }
  0x2d   :  { %s12592_s20 = sld [smem:[%s13798_s0 + %s12446_s15]]   ;;  %s12450_s15 = smov 27  }
  0x2e   :  { %s12597_s27 = sld [smem:[%s13798_s0 + %s12447_s22]]   ;;  %s12451_s22 = smov 28  }
  0x2f   :  { %s12602_s4 = sld [smem:[%s13798_s0 + %s12448_s28]]   ;;  %s12452_s28 = smov 29  }
  0x32   :  { %13865 = sst [smem:[#allocation23_spill]] %s12587_s12 }
  0x33   :  { %13866 = sst [smem:[#allocation24_spill]] %s12592_s20 }
  0x34   :  { %13867 = sst [smem:[#allocation25_spill]] %s12597_s27 }
  0x35   :  { %13868 = sst [smem:[#allocation26_spill]] %s12602_s4 }
  0x36   :  { %s12607_s12 = sld [smem:[%s13798_s0 + %s12449_s7]]   ;;  %s12453_s7 = smov 30  }
  0x37   :  { %s12612_s20 = sld [smem:[%s13798_s0 + %s12450_s15]]   ;;  %s12454_s15 = smov 31  }
  0x38   :  { %s12617_s27 = sld [smem:[%s13798_s0 + %s12451_s22]]   ;;  %s12455_s22 = smov 32  }
  0x39   :  { %s12622_s4 = sld [smem:[%s13798_s0 + %s12452_s28]]   ;;  %s12456_s28 = smov 33  }
  0x3c   :  { %13869 = sst [smem:[#allocation27_spill]] %s12607_s12 }
  0x3d   :  { %13870 = sst [smem:[#allocation28_spill]] %s12612_s20 }
  0x3e   :  { %13871 = sst [smem:[#allocation29_spill]] %s12617_s27 }
  0x3f   :  { %13872 = sst [smem:[#allocation30_spill]] %s12622_s4 }
  0x40   :  { %s12627_s12 = sld [smem:[%s13798_s0 + %s12453_s7]]   ;;  %s12457_s7 = smov 34  }
  0x41   :  { %s12632_s20 = sld [smem:[%s13798_s0 + %s12454_s15]]   ;;  %s12458_s15 = smov 35  }
  0x42   :  { %s12637_s27 = sld [smem:[%s13798_s0 + %s12455_s22]]   ;;  %s12459_s22 = smov 36  }
  0x43   :  { %s12642_s4 = sld [smem:[%s13798_s0 + %s12456_s28]]   ;;  %s12460_s28 = smov 37  }
  0x46   :  { %13873 = sst [smem:[#allocation31_spill]] %s12627_s12 }
  0x47   :  { %13874 = sst [smem:[#allocation32_spill]] %s12632_s20 }
  0x48   :  { %13875 = sst [smem:[#allocation33_spill]] %s12637_s27 }
  0x49   :  { %13876 = sst [smem:[#allocation34_spill]] %s12642_s4 }
  0x4a   :  { %s12647_s12 = sld [smem:[%s13798_s0 + %s12457_s7]]   ;;  %s12461_s7 = smov 38  }
  0x4b   :  { %s12652_s20 = sld [smem:[%s13798_s0 + %s12458_s15]]   ;;  %s12462_s15 = smov 39  }
  0x4c   :  { %s12657_s27 = sld [smem:[%s13798_s0 + %s12459_s22]]   ;;  %s12463_s22 = smov 40  }
  0x4d   :  { %s12662_s4 = sld [smem:[%s13798_s0 + %s12460_s28]]   ;;  %s12464_s28 = smov 41  }
  0x50   :  { %13877 = sst [smem:[#allocation35_spill]] %s12647_s12 }
  0x51   :  { %13878 = sst [smem:[#allocation36_spill]] %s12652_s20 }
  0x52   :  { %13879 = sst [smem:[#allocation37_spill]] %s12657_s27 }
  0x53   :  { %13880 = sst [smem:[#allocation38_spill]] %s12662_s4 }
  0x54   :  { %s12667_s12 = sld [smem:[%s13798_s0 + %s12461_s7]]   ;;  %s12465_s7 = smov 42  }
  0x55   :  { %s12672_s20 = sld [smem:[%s13798_s0 + %s12462_s15]]   ;;  %s12466_s15 = smov 43  }
  0x56   :  { %s12677_s27 = sld [smem:[%s13798_s0 + %s12463_s22]]  }
  0x57   :  { %s12682_s4 = sld [smem:[%s13798_s0 + %s12464_s28]]  }
  0x5a   :  { %13881 = sst [smem:[#allocation39_spill]] %s12667_s12 }
  0x5b   :  { %13882 = sst [smem:[#allocation40_spill]] %s12672_s20 }
  0x5c   :  { %s12687_s12 = sld [smem:[%s13798_s0 + %s12465_s7]]  }
  0x5d   :  { %13883 = sst [smem:[#allocation41_spill]] %s12682_s4 }
  0x5e   :  { %s12692_s20 = sld [smem:[%s13798_s0 + %s12466_s15]]  }
  0x5f   :  { %92 = vsyncpa [#allocation3], 0 }
  0x60   :  { %94 = vsyncpa [#allocation3 + $0x1], 0  ;;  %s12694_s22 = smov 0   ;;  %s12696_s23 = smov 0  }
  0x61   :  { %s12698_s26 = smov 0   ;;  %s12700_s28 = smov 0  }
  0x62 LB: > { %s13884_s4 = sld [smem:[#allocation41_spill]]  ;;  %s12715_s0 = sadd.s32 4294967295, %s12422_s28   ;;  %s12418_s26 = sphi %s12698_s26, %s13925_s26   ;;  %s12414_s23 = sphi %s12696_s23, %s13924_s23   ;;  %s12410_s22 = sphi %s12694_s22, %s13923_s22   ;;  %s12422_s28 = sphi %s12700_s28, %s13926_s28  }
  0x63   : > { %s13885_s19 = sld [smem:[#allocation13_spill]]  ;;  %s8661_s1 = sadd.s32 4294967294, %s12422_s28  }
  0x64   : > { %s13886_s14 = sld [smem:[#allocation12_spill]]  ;;  %s12719_s2 = sadd.s32 1, %s12422_s28  }
  0x65   : > { %s13887_s8 = sld [smem:[#allocation11_spill]]  ;;  %s1015_s7 = sadd.s32 1, %s12418_s26 }
  0x66   : > { %s13888_s6 = sld [smem:[#allocation14_spill]]  ;;  %s1012_s10 = ssub.s32 %s12422_s28, %s12719_s2 }
  0x67   : > { %s13889_s3 = sld [smem:[#allocation10_spill]]  ;;  %p1025_p0 = scmp.ne.s32.totalorder %s12418_s26, %s12414_s23 }
  0x68   : > { %s13890_s9 = sld [smem:[#allocation6_spill]]  ;;  %p1013_p1 = scmp.eq.s32.totalorder %s1012_s10, 0 }
  0x69   : > { %p1026_p2 = scmp.eq.s32.totalorder %s12715_s0, 1  ;;  %p1031_p3 = scmp.ne.s32.totalorder %s12414_s23, %s12410_s22 }
  0x6a   : > { %p1032_p4 = scmp.eq.s32.totalorder %s8661_s1, 1  ;;  %p8664_p7 = scmp.ge.s32.totalorder %s12422_s28, 1 }
  0x6b   : > { %s12730_s11 = scalar_select %p1013_p1, %s12418_s26, %s1015_s7  }
  0x6c   : > { %p12732_p5 = por %p1026_p2, %p1025_p0  ;;  %p12736_p6 = por %p1032_p4, %p1031_p3 }
  0x6d   : > { %p1184_p8 = scmp.lt.s32.totalorder %s12422_s28, 3 }
  0x6f   : > { %p1185_p9 = pnand %p8664_p7, %p1184_p8 }
  0x70   : > { %s13893_s5 = sld [smem:[#allocation5_spill]] (!%p1185_p9)  ;;  %p1287_p10 = scmp.lt.s32.totalorder (!%p1185_p9), %s12715_s0, 1 }
  0x71   : > { %1188 = sbr.rel (%p1185_p9) target bundleno = 7353 (0x1cb9), region = 192  ;;  %s13894_s13 = sld [smem:[#allocation7_spill]] (!%p1185_p9) }
  0x72   : > { %s13895_s21 = sld [smem:[#allocation9_spill]] (!%p1185_p9) }
  0x73   : > { %s13896_s17 = sld [smem:[#allocation8_spill]] (!%p1185_p9) }
  0x74   : > { %s13897_s10 = sld [smem:[#allocation15_spill]] (!%p1185_p9) }
  0x76   : > { %v11538_v0 = vld [vmem:[%s13890_s9 + $0x38] sm:$0xff]  ;;  %v11537_v2 = vld [vmem:[%s13890_s9 + $0x30] sm:$0xff]  ;;  %s1288_s18 = scalar_select %p1287_p10, %s12715_s0, 1  ;;  %v11536_v4 = vld [vmem:[%s13890_s9 + $0x28] sm:$0xff]  ;;  %vm1399_vm0 = vcmask 523264   ;;  %vm1438_vm1 = vcmask 1040384  }
  0x77   : > { %v11542_v1 = vld [vmem:[%s13890_s9 + $0x58] sm:$0xff]  ;;  %1402 = vmatpush.bf16.msra.mxu0 %v11538_v0  ;;  %v11541_v3 = vld [vmem:[%s13890_s9 + $0x50] sm:$0xff]  ;;  %v11540_v5 = vld [vmem:[%s13890_s9 + $0x48] sm:$0xff]  ;;  %vm1717_vm2 = vcmask 1044480   ;;  %v12467_v30 = vmov 128.0   ;;  %vm2544_vm7 = vcmask 261120  }
  0x78   : > { %1419 = vmatpush.bf16.msra.mxu1 %v11542_v1  ;;  %s11530_s1 = sshll.u32 %s1288_s18, 2  ;;  %v11535_v7 = vld [vmem:[%s13890_s9 + $0x20] sm:$0xff]  ;;  %v11534_v9 = vld [vmem:[%s13890_s9 + $0x18] sm:$0xff]  ;;  %v11533_v11 = vld [vmem:[%s13890_s9 + $0x10] sm:$0xff]  ;;  %12258 = vrcp.f32 %v12467_v30  ;;  %vm2678_vm8 = vcmask 1041408   ;;  %vm2679_vm9 = vcmask 1042432  }
  0x79   : > { %s1291_s7 = scalar_lea.vmem %s13893_s5, %s11530_s1  ;;  %v11539_v8 = vld [vmem:[%s13890_s9 + $0x40] sm:$0xff]  ;;  %v11532_v12 = vld [vmem:[%s13890_s9 + $0x8] sm:$0xff]  ;;  %v11550_v31 = vld [vmem:[%s13889_s3 + $0x38] sm:$0xff]  ;;  %vm2621_vm10 = vcmask 36864   ;;  %vm2674_vm11 = vcmask 39936   ;;  %s13898_s18 = sld [smem:[#allocation16_spill]] }
  0x7a   : > { %v1293_v6 = vld [vmem:[%s1291_s7] sm:$0xf]  ;;  %v11558_v32 = vld [vmem:[%s13889_s3 + $0x78] sm:$0xff]  ;;  %1804 = vmatpush.bf16.msra.mxu2 %v11550_v31  ;;  %v11549_v35 = vld [vmem:[%s13889_s3 + $0x30] sm:$0xff]  ;;  %s13899_s1 = sld [smem:[#allocation19_spill]] }
  0x7b   : > { %1403 = vmatpush.bf16.msra.mxu0 %v11537_v2  ;;  %1323 = vst [vmem:[#allocation1] ss:$4 sm:$0xff] %v1293_v6  ;;  %v11531_v13 = vld [vmem:[%s13890_s9] sm:$0xff]  ;;  %v11566_v33 = vld [vmem:[%s13889_s3 + $0xb8] sm:$0xff]  ;;  %1865 = vmatpush.bf16.msra.mxu3 %v11558_v32  ;;  %v11557_v36 = vld [vmem:[%s13889_s3 + $0x70] sm:$0xff]  ;;  %s13900_s7 = sld [smem:[#allocation17_spill]] }
  0x7c   : > { %1420 = vmatpush.bf16.msra.mxu1 %v11541_v3  ;;  %v12179_v17 = vld [vmem:[%s13894_s13] ss:$0 sm:$0xff]  ;;  %v11574_v34 = vld [vmem:[%s13889_s3 + $0xf8] sm:$0xff]  ;;  %v11565_v38 = vld [vmem:[%s13889_s3 + $0xb0] sm:$0xff]  ;;  %s13901_s5 = sld [smem:[#allocation18_spill]] }
  0x7d   : > { %v1428_v18 = vld [vmem:[%s13895_s21] sm:$0x1f]  ;;  %v11573_v39 = vld [vmem:[%s13889_s3 + $0xf0] sm:$0xff]  ;;  %v11548_v41 = vld [vmem:[%s13889_s3 + $0x28] sm:$0xff]  ;;  %s13902_s9 = sld [smem:[#allocation20_spill]] }
  0x7e   : > { %v1432_v21 = vrot.slane %v1428_v18, 1  ;;  %v1429_v22 = vld [vmem:[%s13896_s17] sm:$0x1]  ;;  %v12259_v37 = vpop.eup %12258  ;;  %1805 = vmatpush.bf16.msra.mxu2 %v11549_v35  ;;  %v11556_v42 = vld [vmem:[%s13889_s3 + $0x68] sm:$0xff]  ;;  %v11546_v51 = vld [vmem:[%s13889_s3 + $0x18] sm:$0xff]  ;;  %s13903_s13 = sld [smem:[#allocation21_spill]] }
  0x7f   : > { %1404 = vmatpush.bf16.msra.mxu0 %v11536_v4  ;;  %v1430_v25 = vadd.f32 %v1429_v22, %v1428_v18  ;;  %v1722_v40 = vmul.f32 128.0, %v12259_v37  ;;  %1866 = vmatpush.bf16.msra.mxu3 %v11557_v36  ;;  %v11564_v43 = vld [vmem:[%s13889_s3 + $0xa8] sm:$0xff]  ;;  %v11547_v46 = vld [vmem:[%s13889_s3 + $0x20] sm:$0xff]  ;;  %v11554_v52 = vld [vmem:[%s13889_s3 + $0x58] sm:$0xff]  ;;  %vm1726_vm3 = vweird.f32 %v12259_v37  ;;  %s13904_s17 = sld [smem:[#allocation22_spill]] }
  0x80   : > { %1421 = vmatpush.bf16.msra.mxu1 %v11540_v5  ;;  %v11572_v44 = vld [vmem:[%s13889_s3 + $0xe8] sm:$0xff]  ;;  %v11555_v47 = vld [vmem:[%s13889_s3 + $0x60] sm:$0xff]  ;;  %v11562_v53 = vld [vmem:[%s13889_s3 + $0x98] sm:$0xff]  ;;  %s13905_s21 = sld [smem:[#allocation23_spill]] }
  0x81   : > { %v1723_v45 = vsub.f32 1.0, %v1722_v40  ;;  %v11563_v48 = vld [vmem:[%s13889_s3 + $0xa0] sm:$0xff]  ;;  %v11570_v54 = vld [vmem:[%s13889_s3 + $0xd8] sm:$0xff]  ;;  %v11545_v56 = vld [vmem:[%s13889_s3 + $0x10] sm:$0xff] }
  0x82   : > { %v1325_v10 = vld.sshfl [vmem:[#allocation1 + $0x8] sm:$0xff pattern:$0x73625140]  ;;  %v1324_v14 = vld.sshfl [vmem:[#allocation1] sm:$0xff pattern:$0x73625140]  ;;  %1806 = vmatpush.bf16.msra.mxu2 %v11548_v41 }
  0x83   : > { %1405 = vmatpush.bf16.msra.mxu0 %v11535_v7  ;;  %1867 = vmatpush.bf16.msra.mxu3 %v11556_v42  ;;  %v11571_v49 = vld [vmem:[%s13889_s3 + $0xe0] sm:$0xff]  ;;  %v1724_v50 = vmul.f32 %v12259_v37, %v1723_v45  ;;  %v11553_v57 = vld [vmem:[%s13889_s3 + $0x50] sm:$0xff]  ;;  %v11544_v61 = vld [vmem:[%s13889_s3 + $0x8] sm:$0xff] }
  0x84   : > { %1422 = vmatpush.bf16.msra.mxu1 %v11539_v8  ;;  %v11561_v58 = vld [vmem:[%s13889_s3 + $0x90] sm:$0xff]  ;;  %v11552_v62 = vld [vmem:[%s13889_s3 + $0x48] sm:$0xff]  ;;  %v11543_v6 = vld [vmem:[%s13889_s3] sm:$0xff] }
  0x85   : > { %v1725_v55 = vadd.f32 %v12259_v37, %v1724_v50  ;;  %v11569_v59 = vld [vmem:[%s13889_s3 + $0xd0] sm:$0xff]  ;;  %v11560_v63 = vld [vmem:[%s13889_s3 + $0x88] sm:$0xff]  ;;  %v11551_v7 = vld [vmem:[%s13889_s3 + $0x40] sm:$0xff] }
  0x86   : > { %1807 = vmatpush.bf16.msra.mxu2 %v11547_v46  ;;  %v11568_v0 = vld [vmem:[%s13889_s3 + $0xc8] sm:$0xff]  ;;  %v11559_v8 = vld [vmem:[%s13889_s3 + $0x80] sm:$0xff]  ;;  %v11602_v30 = vld [vmem:[%s13887_s8 + $0xd8] sm:$0xff] }
  0x87   : > { %1406 = vmatpush.bf16.msra.mxu0 %v11534_v9  ;;  %8715 = vmatmul.msk.bf16.vlgmr.msra.gmra.mxu1 %vm1399_vm0, %v1325_v10  ;;  %v12788_v60 = vsel %vm1726_vm3, %v12259_v37, %v1725_v55  ;;  %v11567_v9 = vld [vmem:[%s13889_s3 + $0xc0] sm:$0xff]  ;;  %v11582_v10 = vld [vmem:[%s13887_s8 + $0x38] sm:$0xff]  ;;  %v11580_v18 = vld [vmem:[%s13887_s8 + $0x28] sm:$0xff] }
  0x88   : > { %1926 = vmatpush.bf16.msrb.mxu1 %v11566_v33  ;;  %1868 = vmatpush.bf16.msra.mxu3 %v11555_v47  ;;  %v11579_v22 = vld [vmem:[%s13887_s8 + $0x20] sm:$0xff]  ;;  %v11577_v31 = vld [vmem:[%s13887_s8 + $0x10] sm:$0xff]  ;;  %v11576_v35 = vld [vmem:[%s13887_s8 + $0x8] sm:$0xff] }
  0x89   : > { %v11585_v32 = vld [vmem:[%s13887_s8 + $0x50] sm:$0xff]  ;;  %v11584_v36 = vld [vmem:[%s13887_s8 + $0x48] sm:$0xff]  ;;  %v11583_v40 = vld [vmem:[%s13887_s8 + $0x40] sm:$0xff] }
  0x8a   : > { %1808 = vmatpush.bf16.msra.mxu2 %v11546_v51  ;;  %v11593_v33 = vld [vmem:[%s13887_s8 + $0x90] sm:$0xff]  ;;  %v11592_v37 = vld [vmem:[%s13887_s8 + $0x88] sm:$0xff]  ;;  %v11591_v41 = vld [vmem:[%s13887_s8 + $0x80] sm:$0xff] }
  0x8b   : > { %1407 = vmatpush.bf16.msra.mxu0 %v11533_v11  ;;  %v11590_v11 = vld [vmem:[%s13887_s8 + $0x78] sm:$0xff]  ;;  %v11599_v42 = vld [vmem:[%s13887_s8 + $0xc0] sm:$0xff] }
  0x8c   : > { %1927 = vmatpush.bf16.msrb.mxu1 %v11565_v38  ;;  %1869 = vmatpush.bf16.msra.mxu3 %v11554_v52  ;;  %v11600_v38 = vld [vmem:[%s13887_s8 + $0xc8] sm:$0xff]  ;;  %v12180_v52 = vld [vmem:[%s12502_s25] ss:$0 sm:$0xff] }
  0x8e   : > { %1809 = vmatpush.bf16.msra.mxu2 %v11545_v56 }
  0x8f   : > { %1408 = vmatpush.bf16.msra.mxu0 %v11532_v12  ;;  %v11598_v12 = vld [vmem:[%s13887_s8 + $0xb8] sm:$0xff] }
  0x90   : > { %1928 = vmatpush.bf16.msrb.mxu1 %v11564_v43  ;;  %1870 = vmatpush.bf16.msra.mxu3 %v11553_v57 }
  0x92   : > { %1810 = vmatpush.bf16.msra.mxu2 %v11544_v61  ;;  %v11622_v61 = vld [vmem:[%s13886_s14 + $0x78] sm:$0xff] }
  0x93   : > { %1409 = vmatpush.bf16.msra.mxu0 %v11531_v13  ;;  %v11606_v13 = vld [vmem:[%s13887_s8 + $0xf8] sm:$0xff] }
  0x94   : > { %1929 = vmatpush.bf16.msrb.mxu1 %v11563_v48  ;;  %1871 = vmatpush.bf16.msra.mxu3 %v11552_v62  ;;  %v11630_v62 = vld [vmem:[%s13886_s14 + $0xb8] sm:$0xff] }
  0x96   : > { %1410 = vmatmul.bf16.vlgmr.msra.gmra.mxu0 %v1324_v14  ;;  %1811 = vmatpush.bf16.msra.mxu2 %v11543_v6  ;;  %v11581_v14 = vld [vmem:[%s13887_s8 + $0x30] sm:$0xff]  ;;  %v11628_v6 = vld [vmem:[%s13886_s14 + $0xa8] sm:$0xff] }
  0x97   : > { %1987 = vmatpush.bf16.msrb.mxu0 %v11574_v34  ;;  %v11601_v34 = vld [vmem:[%s13887_s8 + $0xd0] sm:$0xff] }
  0x98   : > { %1930 = vmatpush.bf16.msrb.mxu1 %v11562_v53  ;;  %1872 = vmatpush.bf16.msra.mxu3 %v11551_v7  ;;  %v11636_v7 = vld [vmem:[%s13886_s14 + $0xe8] sm:$0xff] }
  0x9a   : > { %2064 = vmatpush.bf16.msrb.mxu2 %v11582_v10  ;;  %v11627_v10 = vld [vmem:[%s13886_s14 + $0xa0] sm:$0xff] }
  0x9b   : > { %1988 = vmatpush.bf16.msrb.mxu0 %v11573_v39  ;;  %v11575_v39 = vld [vmem:[%s13887_s8] sm:$0xff] }
  0x9c   : > { %1931 = vmatpush.bf16.msrb.mxu1 %v11561_v58  ;;  %2125 = vmatpush.bf16.msrb.mxu3 %v11590_v11  ;;  %v11635_v11 = vld [vmem:[%s13886_s14 + $0xe0] sm:$0xff] }
  0x9e   : > { %2065 = vmatpush.bf16.msrb.mxu2 %v11581_v14  ;;  %v11626_v14 = vld [vmem:[%s13886_s14 + $0x98] sm:$0xff] }
  0x9f   : > { %1989 = vmatpush.bf16.msrb.mxu0 %v11572_v44 }
  0xa0   : > { %1932 = vmatpush.bf16.msrb.mxu1 %v11560_v63  ;;  %v11638_v63 = vld [vmem:[%s13886_s14 + $0xf8] sm:$0xff] }
  0xa2   : > { %2066 = vmatpush.bf16.msrb.mxu2 %v11580_v18  ;;  %v11625_v18 = vld [vmem:[%s13886_s14 + $0x90] sm:$0xff] }
  0xa3   : > { %1990 = vmatpush.bf16.msrb.mxu0 %v11571_v49 }
  0xa4   : > { %1933 = vmatpush.bf16.msrb.mxu1 %v11559_v8  ;;  %v11611_v8 = vld [vmem:[%s13886_s14 + $0x20] sm:$0xff] }
  0xa6   : > { %2067 = vmatpush.bf16.msrb.mxu2 %v11579_v22  ;;  %v11624_v22 = vld [vmem:[%s13886_s14 + $0x88] sm:$0xff] }
  0xa7   : > { %1991 = vmatpush.bf16.msrb.mxu0 %v11570_v54  ;;  %v12181_v54 = vld [vmem:[%s12507_s29] ss:$0 sm:$0xff] }
  0xa8   : > { %2186 = vmatpush.bf16.msra.mxu1 %v11598_v12  ;;  %v11610_v12 = vld [vmem:[%s13886_s14 + $0x18] sm:$0xff] }
  0xab   : > { %1992 = vmatpush.bf16.msrb.mxu0 %v11569_v59  ;;  %v11614_v59 = vld [vmem:[%s13886_s14 + $0x38] sm:$0xff] }
  0xaf   : > { %1993 = vmatpush.bf16.msrb.mxu0 %v11568_v0  ;;  %v11613_v0 = vld [vmem:[%s13886_s14 + $0x30] sm:$0xff] }
  0xb3   : > { %1994 = vmatpush.bf16.msrb.mxu0 %v11567_v9  ;;  %v11619_v9 = vld [vmem:[%s13886_s14 + $0x60] sm:$0xff] }
  0xb7   : > { %2247 = vmatpush.bf16.msra.mxu0 %v11606_v13  ;;  %v11618_v13 = vld [vmem:[%s13886_s14 + $0x58] sm:$0xff] }
 0x104   : > { %v1424_v15 = vpop.f32.mrf.mxu1 }
 0x10c   : > { %v1426_v16 = vpop.f32.mrf.mxu1 }
 0x10d   : > { %v11597_v16 = vld [vmem:[%s13887_s8 + $0xb0] sm:$0xff] }
 0x10e   : > { %2187 = vmatpush.bf16.msra.mxu1 %v11597_v16  ;;  %v11609_v16 = vld [vmem:[%s13886_s14 + $0x10] sm:$0xff] }
 0x113   : > { %v1411_v19 = vpop.f32.mrf.mxu0 }
 0x114   : > { %v1412_v20 = vadd.f32 %v12179_v17, %v1411_v19  ;;  %v11605_v17 = vld [vmem:[%s13887_s8 + $0xf0] sm:$0xff]  ;;  %v11588_v19 = vld [vmem:[%s13887_s8 + $0x68] sm:$0xff] }
 0x115   : > { %2248 = vmatpush.bf16.msra.mxu0 %v11605_v17  ;;  %v11617_v17 = vld [vmem:[%s13886_s14 + $0x50] sm:$0xff] }
 0x116   : > { %v1425_v23 = vadd.f32 %v1424_v15, %v1412_v20  ;;  %v11589_v15 = vld [vmem:[%s13887_s8 + $0x70] sm:$0xff]  ;;  %v11596_v20 = vld [vmem:[%s13887_s8 + $0xa8] sm:$0xff] }
 0x117   : > { %2126 = vmatpush.bf16.msrb.mxu3 %v11589_v15  ;;  %2188 = vmatpush.bf16.msra.mxu1 %v11596_v20  ;;  %v11634_v15 = vld [vmem:[%s13886_s14 + $0xd8] sm:$0xff]  ;;  %v11608_v20 = vld [vmem:[%s13886_s14 + $0x8] sm:$0xff] }
 0x118   : > { %v1434_v24 = vadd.f32 %v1432_v21, %v1425_v23  ;;  %v11604_v21 = vld [vmem:[%s13887_s8 + $0xe8] sm:$0xff]  ;;  %v11587_v23 = vld [vmem:[%s13887_s8 + $0x60] sm:$0xff] }
 0x119   : > { %2249 = vmatpush.bf16.msra.mxu0 %v11604_v21  ;;  %v11616_v21 = vld [vmem:[%s13886_s14 + $0x48] sm:$0xff] }
 0x11a   : > { %v1436_v26 = vrot.slane %v1434_v24, 7  ;;  %v11595_v24 = vld [vmem:[%s13887_s8 + $0xa0] sm:$0xff] }
 0x11b   : > { %v1413_v27 = vpop.f32.mrf.mxu0  ;;  %2127 = vmatpush.bf16.msrb.mxu3 %v11588_v19  ;;  %2189 = vmatpush.bf16.msra.mxu1 %v11595_v24  ;;  %v11633_v19 = vld [vmem:[%s13886_s14 + $0xd0] sm:$0xff]  ;;  %v11607_v24 = vld [vmem:[%s13886_s14] sm:$0xff] }
 0x11c   : > { %v12760_v28 = vsel %vm1438_vm1, %v1430_v25, %v1436_v26  ;;  %v11603_v25 = vld [vmem:[%s13887_s8 + $0xe0] sm:$0xff]  ;;  %v11578_v26 = vld [vmem:[%s13887_s8 + $0x18] sm:$0xff] }
 0x11d   : > { %v1718_v29 = vsel %vm1717_vm2, %v12760_v28, 0.0  ;;  %2250 = vmatpush.bf16.msra.mxu0 %v11603_v25  ;;  %v11586_v27 = vld [vmem:[%s13887_s8 + $0x58] sm:$0xff]  ;;  %2068 = vmatpush.bf16.msrb.mxu2 %v11578_v26  ;;  %v11615_v25 = vld [vmem:[%s13886_s14 + $0x40] sm:$0xff] }
 0x11e   : > { %1719 = vadd.xlane.f32.xlu0 %v1718_v29  ;;  %v11594_v29 = vld [vmem:[%s13887_s8 + $0x98] sm:$0xff]  ;;  %v11623_v26 = vld [vmem:[%s13886_s14 + $0x80] sm:$0xff] }
 0x11f   : > { %2128 = vmatpush.bf16.msrb.mxu3 %v11587_v23  ;;  %2190 = vmatpush.bf16.msra.mxu1 %v11594_v29  ;;  %v11632_v23 = vld [vmem:[%s13886_s14 + $0xc8] sm:$0xff] }
 0x121   : > { %2251 = vmatpush.bf16.msra.mxu0 %v11602_v30  ;;  %2069 = vmatpush.bf16.msrb.mxu2 %v11577_v31 }
 0x123   : > { %2129 = vmatpush.bf16.msrb.mxu3 %v11586_v27  ;;  %2191 = vmatpush.bf16.msra.mxu1 %v11593_v33  ;;  %v11631_v27 = vld [vmem:[%s13886_s14 + $0xc0] sm:$0xff] }
 0x125   : > { %2252 = vmatpush.bf16.msra.mxu0 %v11601_v34  ;;  %2070 = vmatpush.bf16.msrb.mxu2 %v11576_v35 }
 0x127   : > { %2130 = vmatpush.bf16.msrb.mxu3 %v11585_v32  ;;  %2192 = vmatpush.bf16.msra.mxu1 %v11592_v37  ;;  %v12186_v37 = vld [vmem:[%s12532_s24 + $0x2] ss:$0 sm:$0xff] }
 0x129   : > { %2253 = vmatpush.bf16.msra.mxu0 %v11600_v38  ;;  %2071 = vmatpush.bf16.msrb.mxu2 %v11575_v39  ;;  %v12187_v38 = vld [vmem:[%s12532_s24 + $0x3] ss:$0 sm:$0xff] }
 0x12b   : > { %2131 = vmatpush.bf16.msrb.mxu3 %v11584_v36  ;;  %2193 = vmatpush.bf16.msra.mxu1 %v11591_v41 }
 0x12d   : > { %2254 = vmatpush.bf16.msra.mxu0 %v11599_v42  ;;  %v12188_v42 = vld [vmem:[%s12532_s24] ss:$0 sm:$0xff] }
 0x12f   : > { %2132 = vmatpush.bf16.msrb.mxu3 %v11583_v40 }
 0x191   : > { %v1720_v1 = vpop.xlane.xlu0 %1719 }
 0x192   : > { %v1728_v2 = vmul.f32 %v12788_v60, %v1720_v1  ;;  %v11621_v1 = vld [vmem:[%s13886_s14 + $0x70] sm:$0xff] }
 0x194   : > { %v12796_v3 = vsub.f32 %v12760_v28, %v1728_v2  ;;  %v11629_v2 = vld [vmem:[%s13886_s14 + $0xb0] sm:$0xff] }
 0x196   : > { %v1730_v4 = vmul.f32 %v12796_v3, %v12796_v3 }
 0x198   : > { %v1731_v5 = vsel %vm1717_vm2, %v1730_v4, 0.0  ;;  %v11612_v4 = vld [vmem:[%s13886_s14 + $0x28] sm:$0xff] }
 0x199   : > { %1732 = vadd.xlane.f32.xlu0 %v1731_v5  ;;  %v11620_v5 = vld [vmem:[%s13886_s14 + $0x68] sm:$0xff] }
 0x20c   : > { %v1733_v43 = vpop.xlane.xlu0 %1732 }
 0x20d   : > { %v1734_v44 = vmul.f32 %v1733_v43, %v12788_v60  ;;  %v12189_v43 = vld [vmem:[%s12532_s24 + $0x1] ss:$0 sm:$0xff] }
 0x20f   : > { %v1735_v45 = vadd.f32 1e-06, %v1734_v44  ;;  %v12182_v44 = vld [vmem:[%s13885_s19 + $0x2] ss:$0 sm:$0xff] }
 0x211   : > { %12260 = vrsqrt.f32 %v1735_v45  ;;  %vm1742_vm5 = vweird.f32 %v1735_v45 }
 0x217   : > { %v12261_v46 = vpop.eup %12260 }
 0x218   : > { %v1737_v47 = vmul.f32 %v12261_v46, %v1735_v45  ;;  %vm1743_vm4 = vweird.f32 %v12261_v46 }
 0x219   : > { %vm1744_vm6 = vmor %vm1742_vm5, %vm1743_vm4 }
 0x21a   : > { %v1738_v48 = vmul.f32 %v12261_v46, %v1737_v47 }
 0x21c   : > { %v1739_v49 = vmul.f32 0.5, %v1738_v48 }
 0x21e   : > { %v1740_v50 = vsub.f32 1.5, %v1739_v49 }
 0x220   : > { %v1741_v51 = vmul.f32 %v12261_v46, %v1740_v50 }
 0x222   : > { %v1745_v53 = vsel %vm1744_vm6, %v12261_v46, %v1741_v51 }
 0x223   : > { %v1746_v55 = vmul.f32 %v1745_v53, %v12796_v3  ;;  %v11637_v3 = vld [vmem:[%s13886_s14 + $0xf0] sm:$0xff] }
 0x225   : > { %v1750_v56 = vmul.f32 %v12180_v52, %v1746_v55  ;;  %v12185_v55 = vld [vmem:[%s13885_s19 + $0x1] ss:$0 sm:$0xff] }
 0x227   : > { %v1754_v57 = vadd.f32 %v12181_v54, %v1750_v56  ;;  %v12184_v54 = vld [vmem:[%s13885_s19] ss:$0 sm:$0xff] }
 0x229   : > { %v12841_v58 = vpack.c.bf16 %v1754_v57, %v1754_v57 }
 0x22b   : > { %1812 = vmatmul.bf16.vlgmr.msra.gmra.mxu2 %v12841_v58  ;;  %1873 = vmatmul.bf16.vlgmr.msra.gmra.mxu3 %v12841_v58 }
 0x22c   : > { %1934 = vmatmul.bf16.vlgmr.msrb.gmra.mxu1 %v12841_v58  ;;  %1995 = vmatmul.bf16.vlgmr.msrb.gmra.mxu0 %v12841_v58 }
 0x22d   : > { %2324 = vmatpush.bf16.msra.mxu2 %v11614_v59  ;;  %2385 = vmatpush.bf16.msra.mxu3 %v11622_v61 }
 0x22e   : > { %2446 = vmatpush.bf16.msrb.mxu1 %v11630_v62  ;;  %2507 = vmatpush.bf16.msrb.mxu0 %v11638_v63 }
 0x231   : > { %2325 = vmatpush.bf16.msra.mxu2 %v11613_v0  ;;  %2386 = vmatpush.bf16.msra.mxu3 %v11621_v1 }
 0x232   : > { %2447 = vmatpush.bf16.msrb.mxu1 %v11629_v2  ;;  %2508 = vmatpush.bf16.msrb.mxu0 %v11637_v3 }
 0x235   : > { %2326 = vmatpush.bf16.msra.mxu2 %v11612_v4  ;;  %2387 = vmatpush.bf16.msra.mxu3 %v11620_v5  ;;  %v12190_v5 = vld [vmem:[%s12537_s30 + $0x2] ss:$0 sm:$0xff] }
 0x236   : > { %2448 = vmatpush.bf16.msrb.mxu1 %v11628_v6  ;;  %2509 = vmatpush.bf16.msrb.mxu0 %v11636_v7  ;;  %v12191_v6 = vld [vmem:[%s12537_s30 + $0x3] ss:$0 sm:$0xff] }
 0x239   : > { %2327 = vmatpush.bf16.msra.mxu2 %v11611_v8  ;;  %2388 = vmatpush.bf16.msra.mxu3 %v11619_v9  ;;  %v12468_v9 = vmov 65535  }
 0x23a   : > { %2449 = vmatpush.bf16.msrb.mxu1 %v11627_v10  ;;  %2510 = vmatpush.bf16.msrb.mxu0 %v11635_v11  ;;  %v2680_v10 = vsel %vm2678_vm8, 4294967295, %v12468_v9 }
 0x23b   : > { %2072 = vmatmul.bf16.vlgmr.msrb.gmra.mxu2 %v12841_v58  ;;  %2133 = vmatmul.bf16.vlgmr.msrb.gmra.mxu3 %v12841_v58 }
 0x23c   : > { %2194 = vmatmul.bf16.vlgmr.msra.gmra.mxu1 %v12841_v58  ;;  %2255 = vmatmul.bf16.vlgmr.msra.gmra.mxu0 %v12841_v58 }
 0x23d   : > { %2328 = vmatpush.bf16.msra.mxu2 %v11610_v12  ;;  %2389 = vmatpush.bf16.msra.mxu3 %v11618_v13 }
 0x23e   : > { %2450 = vmatpush.bf16.msrb.mxu1 %v11626_v14  ;;  %2511 = vmatpush.bf16.msrb.mxu0 %v11634_v15  ;;  %v12905_v15 = vsel %vm2679_vm9, %v2680_v10, 0 }
 0x241   : > { %2329 = vmatpush.bf16.msra.mxu2 %v11609_v16  ;;  %2390 = vmatpush.bf16.msra.mxu3 %v11617_v17  ;;  %v12192_v16 = vld [vmem:[%s12537_s30] ss:$0 sm:$0xff]  ;;  %v12193_v17 = vld [vmem:[%s12537_s30 + $0x1] ss:$0 sm:$0xff] }
 0x242   : > { %2451 = vmatpush.bf16.msrb.mxu1 %v11625_v18  ;;  %2512 = vmatpush.bf16.msrb.mxu0 %v11633_v19 }
 0x245   : > { %2330 = vmatpush.bf16.msra.mxu2 %v11608_v20  ;;  %2391 = vmatpush.bf16.msra.mxu3 %v11616_v21 }
 0x246   : > { %2452 = vmatpush.bf16.msrb.mxu1 %v11624_v22  ;;  %2513 = vmatpush.bf16.msrb.mxu0 %v11632_v23 }
 0x249   : > { %2331 = vmatpush.bf16.msra.mxu2 %v11607_v24  ;;  %2392 = vmatpush.bf16.msra.mxu3 %v11615_v25 }
 0x24a   : > { %2453 = vmatpush.bf16.msrb.mxu1 %v11623_v26  ;;  %2514 = vmatpush.bf16.msrb.mxu0 %v11631_v27  ;;  %v12183_v26 = vld [vmem:[%s13885_s19 + $0x3] ss:$0 sm:$0xff] }
 0x24c   : > { %2332 = vmatmul.bf16.vlgmr.msra.gmra.mxu2 %v12841_v58  ;;  %2393 = vmatmul.bf16.vlgmr.msra.gmra.mxu3 %v12841_v58 }
 0x24d   : > { %2454 = vmatmul.bf16.vlgmr.msrb.gmra.mxu1 %v12841_v58  ;;  %2515 = vmatmul.bf16.vlgmr.msrb.gmra.mxu0 %v12841_v58 }
 0x2a9   : > { %v1935_v29 = vpop.f32.mrf.mxu1  ;;  %v12887_v30 = vpop.f32.mrf.mxu0 }
 0x2aa   : > { %v2014_v52 = vadd.f32 %v12182_v44, %v1935_v29 }
 0x2ac   : > { %v2538_v63 = vpack.c.bf16 %v2014_v52, %v2014_v52 }
 0x2ae   : > { %v1813_v31 = vpop.f32.mrf.mxu2  ;;  %v1874_v32 = vpop.f32.mrf.mxu3 }
 0x2af   : > { %v2012_v1 = vadd.f32 %v12184_v54, %v1813_v31  ;;  %v2013_v2 = vadd.f32 %v12185_v55, %v1874_v32 }
 0x2b1   : > { %v1937_v33 = vpop.f32.mrf.mxu1  ;;  %v1998_v34 = vpop.f32.mrf.mxu0  ;;  %v2536_v7 = vpack.c.bf16 %v2012_v1, %v2012_v1  ;;  %v2537_v8 = vpack.c.bf16 %v2013_v2, %v2013_v2 }
 0x2b6   : > { %v1815_v35 = vpop.f32.mrf.mxu2  ;;  %v1876_v36 = vpop.f32.mrf.mxu3 }
 0x2b7   : > { %v2015_v35 = vadd.f32 %v12183_v26, %v12887_v30  ;;  %v11646_v26 = vld [vmem:[%s13888_s6 + $0x38] sm:$0xff] }
 0x2b9   : > { %v2195_v39 = vpop.f32.mrf.mxu1  ;;  %v2256_v40 = vpop.f32.mrf.mxu0 }
 0x2ba   : > { %v2274_v41 = vadd.f32 %v12186_v37, %v2195_v39  ;;  %v2275_v46 = vadd.f32 %v12187_v38, %v2256_v40  ;;  %v2539_v38 = vpack.c.bf16 %v2015_v35, %v2015_v35 }
 0x2bc   : > { %v2542_v45 = vpack.c.bf16 %v2274_v41, %v2274_v41  ;;  %v2543_v53 = vpack.c.bf16 %v2275_v46, %v2275_v46 }
 0x2be   : > { %v2587_v47 = vsel %vm2544_vm7, %v2542_v45, 0  ;;  %v2073_v48 = vpop.f32.mrf.mxu2  ;;  %v2134_v49 = vpop.f32.mrf.mxu3  ;;  %v2606_v0 = vsel %vm2544_vm7, %v2543_v53, 0 }
 0x2bf   : > { %v2272_v50 = vadd.f32 %v12188_v42, %v2073_v48  ;;  %v2273_v51 = vadd.f32 %v12189_v43, %v2134_v49  ;;  %2596 = vmatpush.bf16.xpose.msra.mxu1 %v2587_v47 }
 0x2c1   : > { %v2540_v56 = vpack.c.bf16 %v2272_v50, %v2272_v50  ;;  %v2541_v57 = vpack.c.bf16 %v2273_v51, %v2273_v51  ;;  %v2197_v58 = vpop.f32.mrf.mxu1  ;;  %v2258_v59 = vpop.f32.mrf.mxu0 }
 0x2c3   : > { %v2549_v61 = vsel %vm2544_vm7, %v2540_v56, 0  ;;  %v2568_v62 = vsel %vm2544_vm7, %v2541_v57, 0 }
 0x2c4   : > { %2558 = vmatpush.bf16.xpose.msrb.mxu2 %v2549_v61  ;;  %2577 = vmatpush.bf16.xpose.msrb.mxu3 %v2568_v62 }
 0x2c6   : > { %9102 = vmatmul.msk.bf16.vlgmr.msra.gmra.mxu1 %vm2544_vm7, %v2538_v63  ;;  %v2075_v3 = vpop.f32.mrf.mxu2  ;;  %v2136_v4 = vpop.f32.mrf.mxu3 }
 0x2ca   : > { %v2455_v11 = vpop.f32.mrf.mxu1  ;;  %v2516_v12 = vpop.f32.mrf.mxu0 }
 0x2cb   : > { %v2534_v13 = vadd.f32 %v12190_v5, %v2455_v11  ;;  %v2535_v14 = vadd.f32 %v12191_v6, %v2516_v12  ;;  %9100 = vmatmul.msk.bf16.vlgmr.msrb.gmra.mxu2 %vm2544_vm7, %v2536_v7  ;;  %9101 = vmatmul.msk.bf16.vlgmr.msrb.gmra.mxu3 %vm2544_vm7, %v2537_v8  ;;  %v11642_v8 = vld [vmem:[%s13888_s6 + $0x18] sm:$0xff] }
 0x2cc   : > { %2615 = vmatpush.bf16.xpose.msra.mxu2 %v2606_v0 }
 0x2cd   : > { %v2672_v18 = vpack.c.bf16 %v2534_v13, %v2534_v13  ;;  %v2673_v19 = vpack.c.bf16 %v2535_v14, %v2535_v14 }
 0x2cf   : > { %v2721_v20 = vand.u32 %v12905_v15, %v2672_v18  ;;  %v2740_v21 = vand.u32 %v12905_v15, %v2673_v19  ;;  %v2333_v22 = vpop.f32.mrf.mxu2  ;;  %v2394_v23 = vpop.f32.mrf.mxu3 }
 0x2d0   : > { %v2532_v24 = vadd.f32 %v12192_v16, %v2333_v22  ;;  %v2533_v25 = vadd.f32 %v12193_v17, %v2394_v23 }
 0x2d1   : > { %2730 = vmatpush.bf16.msrb.mxu1 %v2721_v20 }
 0x2d2   : > { %v2670_v27 = vpack.c.bf16 %v2532_v24, %v2532_v24  ;;  %v2671_v29 = vpack.c.bf16 %v2533_v25, %v2533_v25  ;;  %v2457_v31 = vpop.f32.mrf.mxu1  ;;  %v2518_v32 = vpop.f32.mrf.mxu0  ;;  %v11641_v25 = vld [vmem:[%s13888_s6 + $0x10] sm:$0xff] }
 0x2d3   : > { %v11643_v31 = vld [vmem:[%s13888_s6 + $0x20] sm:$0xff]  ;;  %v11640_v32 = vld [vmem:[%s13888_s6 + $0x8] sm:$0xff] }
 0x2d4   : > { %2749 = vmatpush.bf16.msrb.mxu2 %v2740_v21  ;;  %v2683_v33 = vand.u32 %v12905_v15, %v2670_v27  ;;  %v2702_v34 = vand.u32 %v12905_v15, %v2671_v29  ;;  %v11644_v27 = vld [vmem:[%s13888_s6 + $0x28] sm:$0xff]  ;;  %v11645_v29 = vld [vmem:[%s13888_s6 + $0x30] sm:$0xff] }
 0x2d5   : > { %2835 = vmatpush.bf16.msra.mxu1 %v11644_v27 }
 0x2d6   : > { %2692 = vmatpush.bf16.msra.mxu3 %v2683_v33  ;;  %2711 = vmatpush.bf16.msra.mxu0 %v2702_v34  ;;  %v11639_v33 = vld [vmem:[%s13888_s6] sm:$0xff] }
 0x2d7   : > { %v2335_v36 = vpop.f32.mrf.mxu2  ;;  %v2396_v37 = vpop.f32.mrf.mxu3 }
 0x2d9   : > { %2836 = vmatpush.bf16.msra.mxu1 %v11643_v31  ;;  %v11654_v31 = vld [vmem:[%s13899_s1 + $0x34] sm:$0xf0] }
 0x2da   : > { %2778 = vmatpush.bf16.msrb.mxu3 %v11642_v8  ;;  %2806 = vmatpush.bf16.msrb.mxu0 %v11640_v32  ;;  %v11653_v32 = vld [vmem:[%s13899_s1 + $0x34] sm:$0xf] }
 0x2db   : > { %9103 = vmatmul.msk.bf16.vlgmr.msra.gmra.mxu2 %vm2544_vm7, %v2539_v38 }
 0x2dc   : > { %2865 = vmatpush.bf16.msra.mxu2 %v11646_v26  ;;  %v9180_v26 = vld [vmem:[%s13899_s1 + $0x48] sm:$0xf0] }
 0x2de   : > { %2779 = vmatpush.bf16.msrb.mxu3 %v11641_v25  ;;  %2807 = vmatpush.bf16.msrb.mxu0 %v11639_v33 }
 0x2e0   : > { %2866 = vmatpush.bf16.msra.mxu2 %v11645_v29  ;;  %v9170_v29 = vld [vmem:[%s13899_s1 + $0x30] sm:$0xf] }
 0x2e1   : > { %v9171_v33 = vor.u32 %v11654_v31, %v9170_v29  ;;  %v11667_v31 = vld [vmem:[%s13903_s13 + $0x20] sm:$0xff] }
 0x343   : > { %v2598_v39 = vpop.f32.mrf.mxu1 }
 0x344   : > { %v2628_v46 = vsel %vm2621_vm10, %v2598_v39, -inf }
 0x34b   : > { %v2600_v40 = vpop.f32.mrf.mxu1 }
 0x34e   : > { %v2560_v41 = vpop.f32.mrf.mxu2  ;;  %v2579_v42 = vpop.f32.mrf.mxu3 }
 0x34f   : > { %v2625_v43 = vsel %vm2621_vm10, %v2579_v42, -inf  ;;  %v2622_v49 = vsel %vm2621_vm10, %v2560_v41, -inf }
 0x350   : > { %2626 = vmax.xlane.f32.xlu2 %v2625_v43 }
 0x356   : > { %v2562_v44 = vpop.f32.mrf.mxu2  ;;  %v2581_v45 = vpop.f32.mrf.mxu3 }
 0x358   : > { %2629 = vmax.xlane.f32.xlu2 %v2628_v46 }
 0x35e   : > { %v2617_v30 = vpop.f32.mrf.mxu2 }
 0x35f   : > { %v2631_v47 = vsel %vm2621_vm10, %v2617_v30, -inf }
 0x360   : > { %2632 = vmax.xlane.f32.xlu1 %v2631_v47 }
 0x366   : > { %v2619_v48 = vpop.f32.mrf.mxu2 }
 0x368   : > { %2623 = vmax.xlane.f32.xlu1 %v2622_v49 }
 0x3c3   : > { %v2627_v50 = vpop.xlane.xlu2 %2626 }
 0x3c4   : > { %v2635_v51 = vsub.f32 %v2579_v42, %v2627_v50 }
 0x3c6   : > { %v2640_v52 = vmul.f32 1.442695, %v2635_v51 }
 0x3c8   : > { %12262 = vpow2.f32 %v2640_v52 }
 0x3cb   : > { %v2630_v55 = vpop.xlane.xlu2 %2629 }
 0x3cc   : > { %v2636_v58 = vsub.f32 %v2598_v39, %v2630_v55 }
 0x3ce   : > { %v12263_v53 = vpop.eup %12262  ;;  %v2642_v61 = vmul.f32 1.442695, %v2636_v58 }
 0x3cf   : > { %v2649_v54 = vsel %vm2621_vm10, %v12263_v53, 0.0 }
 0x3d0   : > { %2650 = vadd.xlane.f32.xlu2 %v2649_v54 }
 0x3d3   : > { %v2633_v56 = vpop.xlane.xlu1 %2632 }
 0x3d4   : > { %v2637_v57 = vsub.f32 %v2617_v30, %v2633_v56  ;;  %v12195_v56 = vld [vmem:[%s13898_s18] ss:$0 sm:$0xff] }
 0x3d6   : > { %v2644_v59 = vmul.f32 1.442695, %v2637_v57 }
 0x3d8   : > { %12264 = vpow2.f32 %v2644_v59 }
 0x3d9   : > { %12266 = vpow2.f32 %v2642_v61 }
 0x3db   : > { %v2624_v62 = vpop.xlane.xlu1 %2623 }
 0x3dc   : > { %v2634_v63 = vsub.f32 %v2560_v41, %v2624_v62 }
 0x3de   : > { %v12265_v0 = vpop.eup %12264  ;;  %v2638_v1 = vmul.f32 1.442695, %v2634_v63  ;;  %v9202_v63 = vld [vmem:[%s13899_s1 + $0x70] sm:$0xf] }
 0x3df   : > { %v2655_v2 = vsel %vm2621_vm10, %v12265_v0, 0.0  ;;  %v12267_v3 = vpop.eup %12266 }
 0x3e0   : > { %12268 = vpow2.f32 %v2638_v1  ;;  %2656 = vadd.xlane.f32.xlu0 %v2655_v2  ;;  %v2652_v5 = vsel %vm2621_vm10, %v12267_v3, 0.0  ;;  %v11661_v1 = vld [vmem:[%s13899_s1 + $0x74] sm:$0xf] }
 0x3e6   : > { %v12269_v4 = vpop.eup %12268 }
 0x3e7   : > { %v2646_v6 = vsel %vm2621_vm10, %v12269_v4, 0.0 }
 0x3e8   : > { %2653 = vadd.xlane.f32.xlu0 %v2652_v5  ;;  %2647 = vadd.xlane.f32.xlu1 %v2646_v6 }
 0x443   : > { %v2651_v7 = vpop.xlane.xlu2 %2650 }
 0x444   : > { %12270 = vrcp.f32 %v2651_v7 }
 0x44a   : > { %v12271_v9 = vpop.eup %12270 }
 0x44b   : > { %v2663_v10 = vmul.f32 %v12271_v9, %v12263_v53  ;;  %v12194_v53 = vld [vmem:[%s13897_s10] ss:$0 sm:$0xff] }
 0x44c   : > { %v9194_v9 = vld [vmem:[%s13899_s1 + $0x60] sm:$0xf] }
 0x44d   : > { %v2667_v11 = vpack.c.bf16 %v2663_v10, %v2663_v10  ;;  %v11660_v10 = vld [vmem:[%s13899_s1 + $0x64] sm:$0xf0] }
 0x44f   : > { %9105 = vmatmul.msk.bf16.vlgmr.msra.gmra.mxu0 %vm2674_vm11, %v2667_v11  ;;  %v11659_v11 = vld [vmem:[%s13899_s1 + $0x64] sm:$0xf] }
 0x453   : > { %v2657_v12 = vpop.xlane.xlu0 %2656 }
 0x454   : > { %12272 = vrcp.f32 %v2657_v12  ;;  %v9195_v12 = vor.u32 %v11660_v10, %v9194_v9  ;;  %v11677_v10 = vld [vmem:[%s13903_s13 + $0x70] sm:$0xff] }
 0x45a   : > { %v12273_v13 = vpop.eup %12272 }
 0x45b   : > { %v2665_v14 = vmul.f32 %v12273_v13, %v12265_v0  ;;  %v2654_v16 = vpop.xlane.xlu0 %2653  ;;  %v2648_v17 = vpop.xlane.xlu1 %2647  ;;  %v11662_v0 = vld [vmem:[%s13899_s1 + $0x74] sm:$0xf0]  ;;  %v9196_v13 = vld [vmem:[%s13899_s1 + $0x68] sm:$0xf0] }
 0x45c   : > { %12274 = vrcp.f32 %v2654_v16  ;;  %v9203_v2 = vor.u32 %v11662_v0, %v9202_v63  ;;  %v9186_v16 = vld [vmem:[%s13899_s1 + $0x50] sm:$0xf]  ;;  %v12196_v0 = vld [vmem:[%s13900_s7] ss:$0 sm:$0xff] }
 0x45d   : > { %v2669_v18 = vpack.c.bf16 %v2665_v14, %v2665_v14  ;;  %12276 = vrcp.f32 %v2648_v17  ;;  %v9199_v14 = vor.u32 %v11659_v11, %v9196_v13  ;;  %v11658_v17 = vld [vmem:[%s13899_s1 + $0x54] sm:$0xf0] }
 0x45f   : > { %9107 = vmatmul.msk.bf16.vlgmr.msrb.gmra.mxu2 %vm2674_vm11, %v2669_v18  ;;  %v11657_v18 = vld [vmem:[%s13899_s1 + $0x54] sm:$0xf] }
 0x462   : > { %v12275_v19 = vpop.eup %12274 }
 0x463   : > { %v12277_v20 = vpop.eup %12276  ;;  %v2664_v21 = vmul.f32 %v12275_v19, %v12267_v3  ;;  %v9204_v3 = vld [vmem:[%s13899_s1 + $0x78] sm:$0xf0]  ;;  %v9187_v19 = vor.u32 %v11658_v17, %v9186_v16  ;;  %v11669_v17 = vld [vmem:[%s13903_s13 + $0x30] sm:$0xff] }
 0x464   : > { %v2662_v22 = vmul.f32 %v12277_v20, %v12269_v4  ;;  %v9207_v4 = vor.u32 %v11661_v1, %v9204_v3  ;;  %v9188_v20 = vld [vmem:[%s13899_s1 + $0x58] sm:$0xf0]  ;;  %v12197_v3 = vld [vmem:[%s13901_s5] ss:$0 sm:$0xff] }
 0x465   : > { %v2668_v23 = vpack.c.bf16 %v2664_v21, %v2664_v21  ;;  %v9191_v21 = vor.u32 %v11657_v18, %v9188_v20  ;;  %v11675_v20 = vld [vmem:[%s13903_s13 + $0x60] sm:$0xff] }
 0x466   : > { %v2666_v24 = vpack.c.bf16 %v2662_v22, %v2662_v22  ;;  %3011 = vmatpush.bf16.msra.mxu0 %v9207_v4  ;;  %v9178_v22 = vld [vmem:[%s13899_s1 + $0x40] sm:$0xf] }
 0x467   : > { %9106 = vmatmul.msk.bf16.vlgmr.msrb.gmra.mxu1 %vm2674_vm11, %v2668_v23  ;;  %v11656_v23 = vld [vmem:[%s13899_s1 + $0x44] sm:$0xf0] }
 0x468   : > { %9104 = vmatmul.msk.bf16.vlgmr.msra.gmra.mxu3 %vm2674_vm11, %v2666_v24  ;;  %v11655_v24 = vld [vmem:[%s13899_s1 + $0x44] sm:$0xf]  ;;  %v9179_v25 = vor.u32 %v11656_v23, %v9178_v22 }
 0x469   : > { %2998 = vmatpush.bf16.msra.mxu3 %v9203_v2  ;;  %v9183_v27 = vor.u32 %v11655_v24, %v9180_v26  ;;  %v11668_v24 = vld [vmem:[%s13903_s13 + $0x28] sm:$0xff] }
 0x46a   : > { %3012 = vmatpush.bf16.msra.mxu0 %v9199_v14 }
 0x46d   : > { %2999 = vmatpush.bf16.msra.mxu3 %v9195_v12  ;;  %v11670_v12 = vld [vmem:[%s13903_s13 + $0x38] sm:$0xff] }
 0x46e   : > { %3013 = vmatpush.bf16.msra.mxu0 %v9191_v21  ;;  %3205 = vmatpush.bf16.msrb.mxu1 %v11670_v12 }
 0x471   : > { %3000 = vmatpush.bf16.msra.mxu3 %v9187_v19 }
 0x472   : > { %3014 = vmatpush.bf16.msra.mxu0 %v9183_v27  ;;  %3206 = vmatpush.bf16.msrb.mxu1 %v11669_v17  ;;  %v11674_v27 = vld [vmem:[%s13903_s13 + $0x58] sm:$0xff] }
 0x475   : > { %3001 = vmatpush.bf16.msra.mxu3 %v9179_v25 }
 0x476   : > { %3207 = vmatpush.bf16.msrb.mxu1 %v11668_v24 }
 0x479   : > { %3002 = vmatpush.bf16.msra.mxu3 %v9171_v33 }
 0x47a   : > { %3208 = vmatpush.bf16.msrb.mxu1 %v11667_v31 }
 0x4cc   : > { %v2713_v34 = vpop.f32.mrf.mxu0 }
 0x4cd   : > { %v2756_v35 = vpack.c.bf16 %v2713_v34, %v2713_v34  ;;  %v9172_v34 = vld [vmem:[%s13899_s1 + $0x38] sm:$0xf0] }
 0x4cf   : > { %9116 = vmatmul.msk.bf16.vlgmr.msrb.gmra.mxu3 %vm2544_vm7, %v2756_v35  ;;  %v9175_v35 = vor.u32 %v11653_v32, %v9172_v34  ;;  %v11673_v34 = vld [vmem:[%s13903_s13 + $0x50] sm:$0xff] }
 0x4d1   : > { %3015 = vmatpush.bf16.msra.mxu0 %v9175_v35 }
 0x4d4   : > { %v2715_v36 = vpop.f32.mrf.mxu0 }
 0x4d5   : > { %v9162_v36 = vld [vmem:[%s13899_s1 + $0x20] sm:$0xf] }
 0x4e2   : > { %v2751_v37 = vpop.f32.mrf.mxu2 }
 0x4e3   : > { %v2843_v38 = vpack.c.bf16 %v2751_v37, %v2751_v37  ;;  %v11652_v37 = vld [vmem:[%s13899_s1 + $0x24] sm:$0xf0] }
 0x4e4   : > { %v2732_v39 = vpop.f32.mrf.mxu1 }
 0x4e5   : > { %v2813_v40 = vpack.c.bf16 %v2732_v39, %v2732_v39  ;;  %9143 = vmatmul.msk.bf16.vlgmr.msra.gmra.mxu2 %vm2544_vm7, %v2843_v38  ;;  %v11651_v38 = vld [vmem:[%s13899_s1 + $0x24] sm:$0xf]  ;;  %v9163_v39 = vor.u32 %v11652_v37, %v9162_v36  ;;  %v11666_v36 = vld [vmem:[%s13903_s13 + $0x18] sm:$0xff] }
 0x4e6   : > { %3209 = vmatpush.bf16.msrb.mxu1 %v11666_v36 }
 0x4e7   : > { %9134 = vmatmul.msk.bf16.vlgmr.msra.gmra.mxu1 %vm2544_vm7, %v2813_v40  ;;  %v9164_v40 = vld [vmem:[%s13899_s1 + $0x28] sm:$0xf0]  ;;  %3003 = vmatpush.bf16.msra.mxu3 %v9163_v39 }
 0x4e8   : > { %v11672_v39 = vld [vmem:[%s13903_s13 + $0x48] sm:$0xff] }
 0x4ea   : > { %v2753_v41 = vpop.f32.mrf.mxu2 }
 0x4eb   : > { %v2694_v42 = vpop.f32.mrf.mxu3  ;;  %v9167_v41 = vor.u32 %v11651_v38, %v9164_v40 }
 0x4ec   : > { %v2755_v43 = vpack.c.bf16 %v2694_v42, %v2694_v42  ;;  %v2734_v44 = vpop.f32.mrf.mxu1  ;;  %v9154_v42 = vld [vmem:[%s13899_s1 + $0x10] sm:$0xf] }
 0x4ed   : > { %3016 = vmatpush.bf16.msra.mxu0 %v9167_v41  ;;  %v11649_v44 = vld [vmem:[%s13899_s1 + $0x14] sm:$0xf] }
 0x4ee   : > { %9125 = vmatmul.msk.bf16.vlgmr.msrb.gmra.mxu0 %vm2544_vm7, %v2755_v43  ;;  %v11650_v43 = vld [vmem:[%s13899_s1 + $0x14] sm:$0xf0]  ;;  %v11665_v41 = vld [vmem:[%s13903_s13 + $0x10] sm:$0xff] }
 0x4ef   : > { %3210 = vmatpush.bf16.msrb.mxu1 %v11665_v41 }
 0x4f3   : > { %v2696_v45 = vpop.f32.mrf.mxu3 }
 0x4f4   : > { %v9155_v45 = vor.u32 %v11650_v43, %v9154_v42 }
 0x4f6   : > { %3004 = vmatpush.bf16.msra.mxu3 %v9155_v45  ;;  %v11671_v45 = vld [vmem:[%s13903_s13 + $0x40] sm:$0xff] }
 0x552   : > { %v2781_v46 = vpop.f32.mrf.mxu3 }
 0x55a   : > { %v2783_v30 = vpop.f32.mrf.mxu3 }
 0x55b   : > { %v9146_v30 = vld [vmem:[%s13899_s1] sm:$0xf] }
 0x564   : > { %v2838_v47 = vpop.f32.mrf.mxu1 }
 0x568   : > { %v2868_v48 = vpop.f32.mrf.mxu2 }
 0x56b   : > { %v2809_v49 = vpop.f32.mrf.mxu0 }
 0x56c   : > { %v2810_v50 = vadd.f32 %v2809_v49, %v2781_v46  ;;  %v2840_v51 = vpop.f32.mrf.mxu1  ;;  %v9156_v46 = vld [vmem:[%s13899_s1 + $0x18] sm:$0xf0]  ;;  %v11647_v49 = vld [vmem:[%s13899_s1 + $0x4] sm:$0xf] }
 0x56e   : > { %v2842_v52 = vadd.f32 %v2838_v47, %v2810_v50  ;;  %v11648_v47 = vld [vmem:[%s13899_s1 + $0x4] sm:$0xf0]  ;;  %v9148_v50 = vld [vmem:[%s13899_s1 + $0x8] sm:$0xf0] }
 0x56f   : > { %v9147_v51 = vor.u32 %v11648_v47, %v9146_v30  ;;  %v11664_v47 = vld [vmem:[%s13903_s13 + $0x8] sm:$0xff] }
 0x570   : > { %v2872_v54 = vadd.f32 %v2868_v48, %v2842_v52  ;;  %v2870_v55 = vpop.f32.mrf.mxu2  ;;  %v9159_v48 = vor.u32 %v11649_v44, %v9156_v46  ;;  %v9151_v52 = vor.u32 %v11647_v49, %v9148_v50  ;;  %3211 = vmatpush.bf16.msrb.mxu1 %v11664_v47 }
 0x571   : > { %3005 = vmatpush.bf16.msra.mxu3 %v9147_v51 }
 0x572   : > { %v2876_v57 = vadd.f32 %v12194_v53, %v2872_v54  ;;  %3017 = vmatpush.bf16.msra.mxu0 %v9159_v48 }
 0x573   : > { %v2811_v58 = vpop.f32.mrf.mxu0 }
 0x574   : > { %v2880_v59 = vmul.f32 %v12195_v56, %v2876_v57 }
 0x576   : > { %v12943_v61 = vadd.f32 %v2880_v59, %v12760_v28  ;;  %3018 = vmatpush.bf16.msra.mxu0 %v9151_v52 }
 0x578   : > { %v2882_v62 = vsel %vm1717_vm2, %v12943_v61, 0.0 }
 0x579   : > { %2883 = vadd.xlane.f32.xlu1 %v2882_v62 }
 0x5ec   : > { %v2884_v28 = vpop.xlane.xlu1 %2883 }
 0x5ed   : > { %v2885_v5 = vmul.f32 %v2884_v28, %v12788_v60 }
 0x5ef   : > { %v12953_v6 = vsub.f32 %v12943_v61, %v2885_v5 }
 0x5f1   : > { %v2887_v7 = vmul.f32 %v12953_v6, %v12953_v6 }
 0x5f3   : > { %v2888_v8 = vsel %vm1717_vm2, %v2887_v7, 0.0  ;;  %v1682_v7 = vld [vmem:[%s13902_s9] sm:$0x3] }
 0x5f4   : > { %2889 = vadd.xlane.f32.xlu2 %v2888_v8  ;;  %v11678_v8 = vld [vmem:[%s13903_s13 + $0x78] sm:$0xff]  ;;  %v2915_v9 = vperm.slane %v1682_v7, 1  ;;  %v2914_v16 = vperm.slane %v1682_v7, 0 }
 0x5f5   : > { %3218 = vmatpush.bf16.msrb.mxu2 %v11678_v8 }
 0x5f9   : > { %3219 = vmatpush.bf16.msrb.mxu2 %v11677_v10 }
 0x667   : > { %v2890_v53 = vpop.xlane.xlu2 %2889 }
 0x668   : > { %v2891_v54 = vmul.f32 %v2890_v53, %v12788_v60 }
 0x66a   : > { %v2892_v55 = vadd.f32 1e-06, %v2891_v54 }
 0x66c   : > { %12278 = vrsqrt.f32 %v2892_v55  ;;  %vm2899_vm13 = vweird.f32 %v2892_v55 }
 0x672   : > { %v12279_v56 = vpop.eup %12278 }
 0x673   : > { %v2894_v57 = vmul.f32 %v12279_v56, %v2892_v55  ;;  %vm2900_vm12 = vweird.f32 %v12279_v56 }
 0x674   : > { %vm2901_vm14 = vmor %vm2899_vm13, %vm2900_vm12 }
 0x675   : > { %v2895_v58 = vmul.f32 %v12279_v56, %v2894_v57 }
 0x677   : > { %v2896_v59 = vmul.f32 0.5, %v2895_v58 }
 0x679   : > { %v2897_v62 = vsub.f32 1.5, %v2896_v59 }
 0x67b   : > { %v2898_v63 = vmul.f32 %v12279_v56, %v2897_v62 }
 0x67d   : > { %v2902_v1 = vsel %vm2901_vm14, %v12279_v56, %v2898_v63  ;;  %v11663_v56 = vld [vmem:[%s13903_s13] sm:$0xff] }
 0x67e   : > { %v2903_v2 = vmul.f32 %v2902_v1, %v12953_v6  ;;  %v11676_v6 = vld [vmem:[%s13903_s13 + $0x68] sm:$0xff]  ;;  %3212 = vmatpush.bf16.msrb.mxu1 %v11663_v56  ;;  %v11710_v56 = vld [vmem:[%s13889_s3 + $0x1f8] sm:$0xff] }
 0x67f   : > { %3220 = vmatpush.bf16.msrb.mxu2 %v11676_v6 }
 0x680   : > { %v2907_v4 = vmul.f32 %v12196_v0, %v2903_v2 }
 0x682   : > { %v2911_v28 = vadd.f32 %v12197_v3, %v2907_v4 }
 0x683   : > { %3221 = vmatpush.bf16.msrb.mxu2 %v11675_v20 }
 0x684   : > { %v2912_v5 = vpack.c.bf16 %v2911_v28, %v2911_v28 }
 0x686   : > { %3006 = vmatmul.bf16.vlgmr.msra.gmra.mxu3 %v2912_v5  ;;  %3019 = vmatmul.bf16.vlgmr.msra.gmra.mxu0 %v2912_v5 }
 0x687   : > { %3222 = vmatpush.bf16.msrb.mxu2 %v11674_v27 }
 0x68b   : > { %3223 = vmatpush.bf16.msrb.mxu2 %v11673_v34 }
 0x68f   : > { %3224 = vmatpush.bf16.msrb.mxu2 %v11672_v39 }
 0x693   : > { %3225 = vmatpush.bf16.msrb.mxu2 %v11671_v45  ;;  %v12198_v45 = vld [vmem:[%s13904_s17] ss:$0 sm:$0xff] }
 0x697   : > { %3793 = vmatpush.bf16.msra.mxu2 %v11710_v56  ;;  %v11736_v56 = vld [vmem:[%s13887_s8 + $0x1c8] sm:$0xff] }
 0x703   : > { %v3020_v11 = vpop.f32.mrf.mxu0 }
 0x704   : > { %v12994_v13 = vadd.f32 %v3020_v11, %v2915_v9 }
 0x706   : > { %v12998_v14 = vmul.f32 0.70710677, %v12994_v13 }
 0x708   : > { %v3029_v18 = vand.u32 2147483647, %v12998_v14  ;;  %vm3093_vm9 = vcmp.ge.f32.partialorder %v12998_v14, 0.0 }
 0x709   : > { %v3007_v19 = vpop.f32.mrf.mxu3 }
 0x70a   : > { %v3031_v21 = vmul.f32 0.3275911, %v3029_v18  ;;  %v13003_v22 = vadd.f32 %v3007_v19, %v2914_v16  ;;  %v3083_v52 = vmul.f32 %v3029_v18, %v3029_v18 }
 0x70b   : > { %v3022_v23 = vpop.f32.mrf.mxu0 }
 0x70c   : > { %v3033_v25 = vadd.f32 1.0, %v3031_v21  ;;  %v13007_v26 = vmul.f32 0.70710677, %v13003_v22  ;;  %v3085_v62 = vsub.f32 0.0, %v3083_v52  ;;  %v3024_v14 = vmul.f32 0.5, %v13003_v22 }
 0x70e   : > { %12280 = vrcp.f32 %v3033_v25  ;;  %v3028_v29 = vand.u32 2147483647, %v13007_v26  ;;  %v3060_v42 = vand.u32 2147483648, %v3033_v25  ;;  %v3058_v44 = vand.u32 2147483647, %v3033_v25 }
 0x70f   : > { %vm3054_vm0 = vweird.f32 %v3033_v25  ;;  %v3088_v5 = vmul.f32 1.442695, %v3085_v62  ;;  %vm3092_vm12 = vcmp.ge.f32.partialorder %v13007_v26, 0.0  ;;  %v11684_v62 = vld [vmem:[%s13889_s3 + $0x128] sm:$0xff] }
 0x710   : > { %v3030_v32 = vmul.f32 0.3275911, %v3028_v29  ;;  %v3061_v48 = vor.u32 1.1754944e-38, %v3060_v42  ;;  %vm3059_vm3 = vcmp.eq.f32.partialorder %v3058_v44, 8.507059e+37  ;;  %v3082_v28 = vmul.f32 %v3028_v29, %v3028_v29 }
 0x711   : > { %v3009_v33 = vpop.f32.mrf.mxu3 }
 0x712   : > { %v3032_v35 = vadd.f32 1.0, %v3030_v32  ;;  %v3084_v11 = vsub.f32 0.0, %v3082_v28  ;;  %v3025_v33 = vmul.f32 0.5, %v12994_v13  ;;  %v11707_v28 = vld [vmem:[%s13889_s3 + $0x1e0] sm:$0xff] }
 0x714   : > { %v12281_v37 = vpop.eup %12280  ;;  %12282 = vrcp.f32 %v3032_v35  ;;  %v3045_v55 = vand.u32 2147483648, %v3032_v35  ;;  %v3043_v58 = vand.u32 2147483647, %v3032_v35  ;;  %vm3039_vm5 = vweird.f32 %v3032_v35 }
 0x715   : > { %v3050_v38 = vmul.f32 %v12281_v37, %v3033_v25  ;;  %vm3055_vm15 = vweird.f32 %v12281_v37  ;;  %12284 = vpow2.f32 %v3088_v5  ;;  %v3086_v18 = vmul.f32 1.442695, %v3084_v11  ;;  %v11682_v5 = vld [vmem:[%s13889_s3 + $0x118] sm:$0xff]  ;;  %v11689_v11 = vld [vmem:[%s13889_s3 + $0x150] sm:$0xff] }
 0x716   : > { %vm3056_vm1 = vmor %vm3054_vm0, %vm3055_vm15  ;;  %v3046_v1 = vor.u32 1.1754944e-38, %v3045_v55  ;;  %vm3044_vm8 = vcmp.eq.f32.partialorder %v3043_v58, 8.507059e+37  ;;  %v11702_v55 = vld [vmem:[%s13889_s3 + $0x1b8] sm:$0xff]  ;;  %v11701_v58 = vld [vmem:[%s13889_s3 + $0x1b0] sm:$0xff] }
 0x717   : > { %v3051_v40 = vsub.f32 1.0, %v3050_v38  ;;  %12286 = vpow2.f32 %v3086_v18  ;;  %3732 = vmatpush.bf16.msra.mxu1 %v11702_v55  ;;  %v11696_v18 = vld [vmem:[%s13889_s3 + $0x188] sm:$0xff] }
 0x718   : > { %v11728_v55 = vld [vmem:[%s13887_s8 + $0x188] sm:$0xff] }
 0x719   : > { %v3052_v43 = vmul.f32 %v12281_v37, %v3051_v40 }
 0x71a   : > { %v12283_v46 = vpop.eup %12282 }
 0x71b   : > { %v3053_v30 = vadd.f32 %v12281_v37, %v3052_v43  ;;  %v3035_v49 = vmul.f32 %v12283_v46, %v3032_v35  ;;  %vm3040_vm4 = vweird.f32 %v12283_v46  ;;  %v12285_v21 = vpop.eup %12284  ;;  %3733 = vmatpush.bf16.msra.mxu1 %v11701_v58  ;;  %v11727_v58 = vld [vmem:[%s13887_s8 + $0x180] sm:$0xff] }
 0x71c   : > { %vm3041_vm6 = vmor %vm3039_vm5, %vm3040_vm4 }
 0x71d   : > { %v3057_v50 = vsel %vm3056_vm1, %v12281_v37, %v3053_v30  ;;  %v3036_v53 = vsub.f32 1.0, %v3035_v49  ;;  %v12287_v36 = vpop.eup %12286 }
 0x71e   : > { %v3062_v51 = vsel %vm3059_vm3, %v3061_v48, %v3057_v50  ;;  %v12199_v48 = vld [vmem:[%s13905_s21] ss:$0 sm:$0xff] }
 0x71f   : > { %v3065_v54 = vmul.f32 1.0614054, %v3062_v51  ;;  %v3037_v57 = vmul.f32 %v12283_v46, %v3036_v53  ;;  %v11686_v53 = vld [vmem:[%s13889_s3 + $0x138] sm:$0xff] }
 0x720   : > { %3610 = vmatpush.bf16.msrb.mxu3 %v11686_v53  ;;  %v11712_v53 = vld [vmem:[%s13887_s8 + $0x108] sm:$0xff] }
 0x721   : > { %v3067_v59 = vadd.f32 -1.4531521, %v3065_v54  ;;  %v3038_v63 = vadd.f32 %v12283_v46, %v3037_v57  ;;  %v11694_v54 = vld [vmem:[%s13889_s3 + $0x178] sm:$0xff]  ;;  %v11685_v57 = vld [vmem:[%s13889_s3 + $0x130] sm:$0xff] }
 0x722   : > { %3671 = vmatpush.bf16.msrb.mxu0 %v11694_v54  ;;  %v11720_v54 = vld [vmem:[%s13887_s8 + $0x148] sm:$0xff] }
 0x723   : > { %v3069_v0 = vmul.f32 %v3067_v59, %v3062_v51  ;;  %v3042_v2 = vsel %vm3041_vm6, %v12283_v46, %v3038_v63  ;;  %v11709_v59 = vld [vmem:[%s13889_s3 + $0x1f0] sm:$0xff]  ;;  %v11692_v63 = vld [vmem:[%s13889_s3 + $0x168] sm:$0xff] }
 0x724   : > { %v3047_v4 = vsel %vm3044_vm8, %v3046_v1, %v3042_v2  ;;  %3611 = vmatpush.bf16.msrb.mxu3 %v11685_v57  ;;  %3794 = vmatpush.bf16.msra.mxu2 %v11709_v59  ;;  %v11708_v1 = vld [vmem:[%s13889_s3 + $0x1e8] sm:$0xff]  ;;  %v11683_v2 = vld [vmem:[%s13889_s3 + $0x120] sm:$0xff] }
 0x725   : > { %v3071_v3 = vadd.f32 1.4214138, %v3069_v0  ;;  %v3064_v7 = vmul.f32 1.0614054, %v3047_v4  ;;  %v11700_v0 = vld [vmem:[%s13889_s3 + $0x1a8] sm:$0xff]  ;;  %v11711_v57 = vld [vmem:[%s13887_s8 + $0x100] sm:$0xff] }
 0x726   : > { %3734 = vmatpush.bf16.msra.mxu1 %v11700_v0  ;;  %v11735_v59 = vld [vmem:[%s13887_s8 + $0x1c0] sm:$0xff] }
 0x727   : > { %v3073_v8 = vmul.f32 %v3071_v3, %v3062_v51  ;;  %v3066_v9 = vadd.f32 -1.4531521, %v3064_v7  ;;  %v11691_v3 = vld [vmem:[%s13889_s3 + $0x160] sm:$0xff]  ;;  %v11690_v7 = vld [vmem:[%s13889_s3 + $0x158] sm:$0xff] }
 0x728   : > { %3612 = vmatpush.bf16.msrb.mxu3 %v11684_v62  ;;  %3795 = vmatpush.bf16.msra.mxu2 %v11708_v1 }
 0x729   : > { %v3075_v10 = vadd.f32 -0.28449672, %v3073_v8  ;;  %v3068_v12 = vmul.f32 %v3066_v9, %v3047_v4  ;;  %v11698_v8 = vld [vmem:[%s13889_s3 + $0x198] sm:$0xff] }
 0x72a   : > { %v11706_v9 = vld [vmem:[%s13889_s3 + $0x1d8] sm:$0xff] }
 0x72b   : > { %v3077_v6 = vmul.f32 %v3075_v10, %v3062_v51  ;;  %v3070_v16 = vadd.f32 1.4214138, %v3068_v12  ;;  %v11681_v10 = vld [vmem:[%s13889_s3 + $0x110] sm:$0xff] }
 0x72c   : > { %3613 = vmatpush.bf16.msrb.mxu3 %v11683_v2  ;;  %3796 = vmatpush.bf16.msra.mxu2 %v11707_v28  ;;  %v11697_v12 = vld [vmem:[%s13889_s3 + $0x190] sm:$0xff] }
 0x72d   : > { %v3079_v17 = vadd.f32 0.2548296, %v3077_v6  ;;  %v3072_v19 = vmul.f32 %v3070_v16, %v3047_v4  ;;  %v11705_v6 = vld [vmem:[%s13889_s3 + $0x1d0] sm:$0xff]  ;;  %v11680_v16 = vld [vmem:[%s13889_s3 + $0x108] sm:$0xff] }
 0x72f   : > { %v3081_v20 = vmul.f32 %v3079_v17, %v3062_v51  ;;  %v3074_v23 = vadd.f32 -0.28449672, %v3072_v19  ;;  %v11688_v17 = vld [vmem:[%s13889_s3 + $0x148] sm:$0xff] }
 0x730   : > { %3614 = vmatpush.bf16.msrb.mxu3 %v11682_v5  ;;  %3797 = vmatpush.bf16.msra.mxu2 %v11706_v9  ;;  %v11704_v19 = vld [vmem:[%s13889_s3 + $0x1c8] sm:$0xff]  ;;  %v12201_v9 = vld [vmem:[%s12507_s29 + $0x1] ss:$0 sm:$0xff] }
 0x731   : > { %v3091_v24 = vmul.f32 %v12285_v21, %v3081_v20  ;;  %v3076_v25 = vmul.f32 %v3074_v23, %v3047_v4 }
 0x733   : > { %v3095_v27 = vsub.f32 1.0, %v3091_v24  ;;  %v9209_v29 = vadd.f32 -1.0, %v3091_v24  ;;  %v3078_v31 = vadd.f32 0.2548296, %v3076_v25 }
 0x734   : > { %3615 = vmatpush.bf16.msrb.mxu3 %v11681_v10  ;;  %3798 = vmatpush.bf16.msra.mxu2 %v11705_v6 }
 0x735   : > { %v3099_v32 = vsel %vm3093_vm9, %v3095_v27, %v9209_v29  ;;  %v3080_v35 = vmul.f32 %v3078_v31, %v3047_v4  ;;  %v11699_v4 = vld [vmem:[%s13889_s3 + $0x1a0] sm:$0xff] }
 0x736   : > { %v3101_v34 = vadd.f32 1.0, %v3099_v32  ;;  %3735 = vmatpush.bf16.msra.mxu1 %v11699_v4  ;;  %v11679_v27 = vld [vmem:[%s13889_s3 + $0x100] sm:$0xff] }
 0x737   : > { %v3090_v38 = vmul.f32 %v12287_v36, %v3080_v35  ;;  %v11687_v29 = vld [vmem:[%s13889_s3 + $0x140] sm:$0xff]  ;;  %v11734_v35 = vld [vmem:[%s13887_s8 + $0x1b8] sm:$0xff] }
 0x738   : > { %v3103_v37 = vmul.f32 %v3101_v34, %v3025_v33  ;;  %3616 = vmatpush.bf16.msrb.mxu3 %v11680_v16  ;;  %3799 = vmatpush.bf16.msra.mxu2 %v11704_v19  ;;  %v11695_v31 = vld [vmem:[%s13889_s3 + $0x180] sm:$0xff]  ;;  %v11718_v33 = vld [vmem:[%s13887_s8 + $0x138] sm:$0xff] }
 0x739   : > { %v3094_v40 = vsub.f32 1.0, %v3090_v38  ;;  %v9208_v41 = vadd.f32 -1.0, %v3090_v38  ;;  %v11703_v32 = vld [vmem:[%s13889_s3 + $0x1c0] sm:$0xff]  ;;  %v11726_v34 = vld [vmem:[%s13887_s8 + $0x178] sm:$0xff]  ;;  %v11725_v38 = vld [vmem:[%s13887_s8 + $0x170] sm:$0xff] }
 0x73a   : > { %v3105_v39 = vpack.c.bf16 %v3103_v37, %v3103_v37  ;;  %3736 = vmatpush.bf16.msra.mxu1 %v11698_v8  ;;  %v11742_v36 = vld [vmem:[%s13887_s8 + $0x1f8] sm:$0xff]  ;;  %v11717_v37 = vld [vmem:[%s13887_s8 + $0x130] sm:$0xff] }
 0x73b   : > { %v3098_v42 = vsel %vm3092_vm12, %v3094_v40, %v9208_v41  ;;  %v11741_v40 = vld [vmem:[%s13887_s8 + $0x1f0] sm:$0xff]  ;;  %v11716_v41 = vld [vmem:[%s13887_s8 + $0x128] sm:$0xff]  ;;  %v11750_v16 = vld [vmem:[%s13886_s14 + $0x138] sm:$0xff] }
 0x73c   : > { %3226 = vmatmul.bf16.vlgmr.msrb.gmra.mxu2 %v3105_v39  ;;  %v3100_v43 = vadd.f32 1.0, %v3098_v42  ;;  %3617 = vmatpush.bf16.msrb.mxu3 %v11679_v27  ;;  %v11733_v39 = vld [vmem:[%s13887_s8 + $0x1b0] sm:$0xff]  ;;  %v11724_v42 = vld [vmem:[%s13887_s8 + $0x168] sm:$0xff]  ;;  %v11774_v19 = vld [vmem:[%s13886_s14 + $0x1f8] sm:$0xff] }
 0x73d   : > { %3800 = vmatpush.bf16.msra.mxu2 %v11703_v32  ;;  %v11756_v27 = vld [vmem:[%s13886_s14 + $0x168] sm:$0xff]  ;;  %v11747_v32 = vld [vmem:[%s13886_s14 + $0x120] sm:$0xff] }
 0x73e   : > { %v3102_v44 = vmul.f32 %v3100_v43, %v3024_v14  ;;  %3737 = vmatpush.bf16.msra.mxu1 %v11697_v12  ;;  %v11732_v14 = vld [vmem:[%s13887_s8 + $0x1a8] sm:$0xff] }
 0x73f   : > { %v11740_v43 = vld [vmem:[%s13887_s8 + $0x1e8] sm:$0xff] }
 0x740   : > { %v3104_v13 = vpack.c.bf16 %v3102_v44, %v3102_v44  ;;  %3870 = vmatpush.bf16.msra.mxu3 %v11718_v33  ;;  %v11715_v44 = vld [vmem:[%s13887_s8 + $0x120] sm:$0xff] }
 0x741   : > { %4053 = vmatpush.bf16.msrb.mxu2 %v11742_v36  ;;  %v11755_v33 = vld [vmem:[%s13886_s14 + $0x160] sm:$0xff]  ;;  %v11746_v36 = vld [vmem:[%s13886_s14 + $0x118] sm:$0xff] }
 0x742   : > { %3213 = vmatmul.bf16.vlgmr.msrb.gmra.mxu1 %v3104_v13  ;;  %v11723_v13 = vld [vmem:[%s13887_s8 + $0x160] sm:$0xff] }
 0x743   : > { %3738 = vmatpush.bf16.msra.mxu1 %v11696_v18  ;;  %v11766_v18 = vld [vmem:[%s13886_s14 + $0x1b8] sm:$0xff] }
 0x744   : > { %3871 = vmatpush.bf16.msra.mxu3 %v11717_v37  ;;  %v11754_v37 = vld [vmem:[%s13886_s14 + $0x158] sm:$0xff] }
 0x745   : > { %4054 = vmatpush.bf16.msrb.mxu2 %v11741_v40  ;;  %v11745_v40 = vld [vmem:[%s13886_s14 + $0x110] sm:$0xff] }
 0x747   : > { %3739 = vmatpush.bf16.msra.mxu1 %v11695_v31  ;;  %v11772_v31 = vld [vmem:[%s13886_s14 + $0x1e8] sm:$0xff] }
 0x748   : > { %3872 = vmatpush.bf16.msra.mxu3 %v11716_v41  ;;  %v11753_v41 = vld [vmem:[%s13886_s14 + $0x150] sm:$0xff] }
 0x749   : > { %4055 = vmatpush.bf16.msrb.mxu2 %v11740_v43  ;;  %v11744_v43 = vld [vmem:[%s13886_s14 + $0x108] sm:$0xff] }
 0x74b   : > { %3992 = vmatpush.bf16.msrb.mxu1 %v11734_v35  ;;  %v11771_v35 = vld [vmem:[%s13886_s14 + $0x1e0] sm:$0xff] }
 0x74c   : > { %3873 = vmatpush.bf16.msra.mxu3 %v11715_v44  ;;  %v11752_v44 = vld [vmem:[%s13886_s14 + $0x148] sm:$0xff] }
 0x74f   : > { %3993 = vmatpush.bf16.msrb.mxu1 %v11733_v39  ;;  %v11770_v39 = vld [vmem:[%s13886_s14 + $0x1d8] sm:$0xff] }
 0x753   : > { %3994 = vmatpush.bf16.msrb.mxu1 %v11732_v14  ;;  %v11769_v14 = vld [vmem:[%s13886_s14 + $0x1d0] sm:$0xff] }
 0x7bf   : > { %v3227_v46 = vpop.f32.mrf.mxu2  ;;  %v3214_v30 = vpop.f32.mrf.mxu1 }
 0x7c0   : > { %v3215_v47 = vadd.f32 %v12198_v45, %v3214_v30  ;;  %v11731_v45 = vld [vmem:[%s13887_s8 + $0x1a0] sm:$0xff]  ;;  %v11714_v30 = vld [vmem:[%s13887_s8 + $0x118] sm:$0xff] }
 0x7c1   : > { %3995 = vmatpush.bf16.msrb.mxu1 %v11731_v45  ;;  %3874 = vmatpush.bf16.msra.mxu3 %v11714_v30  ;;  %v11768_v45 = vld [vmem:[%s13886_s14 + $0x1c8] sm:$0xff]  ;;  %v11751_v30 = vld [vmem:[%s13886_s14 + $0x140] sm:$0xff] }
 0x7c2   : > { %v3228_v26 = vadd.f32 %v3227_v46, %v3215_v47  ;;  %v11739_v46 = vld [vmem:[%s13887_s8 + $0x1e0] sm:$0xff]  ;;  %v11722_v47 = vld [vmem:[%s13887_s8 + $0x158] sm:$0xff] }
 0x7c3   : > { %4056 = vmatpush.bf16.msrb.mxu2 %v11739_v46  ;;  %v11743_v46 = vld [vmem:[%s13886_s14 + $0x100] sm:$0xff] }
 0x7c4   : > { %v3234_v49 = vmul.f32 %v12199_v48, %v3228_v26  ;;  %v11730_v48 = vld [vmem:[%s13887_s8 + $0x198] sm:$0xff] }
 0x7c5   : > { %v11738_v26 = vld [vmem:[%s13887_s8 + $0x1d8] sm:$0xff]  ;;  %3996 = vmatpush.bf16.msrb.mxu1 %v11730_v48  ;;  %v11767_v48 = vld [vmem:[%s13886_s14 + $0x1c0] sm:$0xff] }
 0x7c6   : > { %v13026_v22 = vadd.f32 %v3234_v49, %v12943_v61  ;;  %v11693_v61 = vld [vmem:[%s13889_s3 + $0x170] sm:$0xff]  ;;  %s13907_s3 = sld [smem:[#allocation27_spill]] }
 0x7c7   : > { %v3229_v50 = vpop.f32.mrf.mxu2  ;;  %v3216_v51 = vpop.f32.mrf.mxu1  ;;  %3672 = vmatpush.bf16.msrb.mxu0 %v11693_v61  ;;  %4057 = vmatpush.bf16.msrb.mxu2 %v11738_v26  ;;  %v11713_v49 = vld [vmem:[%s13887_s8 + $0x110] sm:$0xff]  ;;  %v11719_v61 = vld [vmem:[%s13887_s8 + $0x140] sm:$0xff] }
 0x7c8   : > { %v3531_v52 = vsel %vm1717_vm2, %v13026_v22, 0.0  ;;  %v11721_v50 = vld [vmem:[%s13887_s8 + $0x150] sm:$0xff]  ;;  %3875 = vmatpush.bf16.msra.mxu3 %v11713_v49 }
 0x7c9   : > { %3532 = vadd.xlane.f32.xlu0 %v3531_v52  ;;  %v11729_v51 = vld [vmem:[%s13887_s8 + $0x190] sm:$0xff] }
 0x7ca   : > { %v11737_v52 = vld [vmem:[%s13887_s8 + $0x1d0] sm:$0xff]  ;;  %3997 = vmatpush.bf16.msrb.mxu1 %v11729_v51  ;;  %s13913_s8 = sld [smem:[#allocation31_spill]] }
 0x7cb   : > { %3673 = vmatpush.bf16.msrb.mxu0 %v11692_v63  ;;  %4058 = vmatpush.bf16.msrb.mxu2 %v11737_v52 }
 0x7cc   : > { %3876 = vmatpush.bf16.msra.mxu3 %v11712_v53 }
 0x7ce   : > { %3998 = vmatpush.bf16.msrb.mxu1 %v11728_v55 }
 0x7cf   : > { %3674 = vmatpush.bf16.msrb.mxu0 %v11691_v3  ;;  %4059 = vmatpush.bf16.msrb.mxu2 %v11736_v56  ;;  %v12207_v56 = vld [vmem:[%s12532_s24 + $0x6] ss:$0 sm:$0xff] }
 0x7d0   : > { %3877 = vmatpush.bf16.msra.mxu3 %v11711_v57 }
 0x7d2   : > { %3999 = vmatpush.bf16.msrb.mxu1 %v11727_v58 }
 0x7d3   : > { %3675 = vmatpush.bf16.msrb.mxu0 %v11690_v7  ;;  %4060 = vmatpush.bf16.msrb.mxu2 %v11735_v59  ;;  %v12200_v7 = vld [vmem:[%s12502_s25 + $0x1] ss:$0 sm:$0xff] }
 0x7d7   : > { %3676 = vmatpush.bf16.msrb.mxu0 %v11689_v11 }
 0x7db   : > { %3677 = vmatpush.bf16.msrb.mxu0 %v11688_v17  ;;  %v11758_v17 = vld [vmem:[%s13886_s14 + $0x178] sm:$0xff] }
 0x7df   : > { %3678 = vmatpush.bf16.msrb.mxu0 %v11687_v29  ;;  %v11764_v29 = vld [vmem:[%s13886_s14 + $0x1a8] sm:$0xff] }
 0x7e3   : > { %3931 = vmatpush.bf16.msra.mxu0 %v11726_v34  ;;  %v11763_v34 = vld [vmem:[%s13886_s14 + $0x1a0] sm:$0xff] }
 0x7e7   : > { %3932 = vmatpush.bf16.msra.mxu0 %v11725_v38  ;;  %v11762_v38 = vld [vmem:[%s13886_s14 + $0x198] sm:$0xff] }
 0x7eb   : > { %3933 = vmatpush.bf16.msra.mxu0 %v11724_v42  ;;  %v11761_v42 = vld [vmem:[%s13886_s14 + $0x190] sm:$0xff] }
 0x7ef   : > { %3934 = vmatpush.bf16.msra.mxu0 %v11723_v13  ;;  %v11760_v13 = vld [vmem:[%s13886_s14 + $0x188] sm:$0xff] }
 0x7f3   : > { %3935 = vmatpush.bf16.msra.mxu0 %v11722_v47  ;;  %v11759_v47 = vld [vmem:[%s13886_s14 + $0x180] sm:$0xff] }
 0x7f7   : > { %3936 = vmatpush.bf16.msra.mxu0 %v11721_v50 }
 0x7fb   : > { %3937 = vmatpush.bf16.msra.mxu0 %v11720_v54  ;;  %v12206_v54 = vld [vmem:[%s12532_s24 + $0x5] ss:$0 sm:$0xff] }
 0x7ff   : > { %3938 = vmatpush.bf16.msra.mxu0 %v11719_v61 }
 0x83c   : > { %v3533_v20 = vpop.xlane.xlu0 %3532 }
 0x83d   : > { %v3534_v21 = vmul.f32 %v3533_v20, %v12788_v60  ;;  %v11749_v20 = vld [vmem:[%s13886_s14 + $0x130] sm:$0xff] }
 0x83f   : > { %v13060_v23 = vsub.f32 %v13026_v22, %v3534_v21  ;;  %v11757_v21 = vld [vmem:[%s13886_s14 + $0x170] sm:$0xff] }
 0x841   : > { %v3536_v24 = vmul.f32 %v13060_v23, %v13060_v23 }
 0x843   : > { %v3537_v25 = vsel %vm1717_vm2, %v3536_v24, 0.0  ;;  %v11773_v24 = vld [vmem:[%s13886_s14 + $0x1f0] sm:$0xff] }
 0x844   : > { %3538 = vadd.xlane.f32.xlu1 %v3537_v25  ;;  %v11748_v25 = vld [vmem:[%s13886_s14 + $0x128] sm:$0xff] }
 0x8b7   : > { %v3539_v62 = vpop.xlane.xlu1 %3538 }
 0x8b8   : > { %v3540_v63 = vmul.f32 %v3539_v62, %v12788_v60 }
 0x8ba   : > { %v3541_v0 = vadd.f32 1e-06, %v3540_v63  ;;  %v12202_v63 = vld [vmem:[%s13885_s19 + $0x5] ss:$0 sm:$0xff] }
 0x8bc   : > { %12288 = vrsqrt.f32 %v3541_v0  ;;  %vm3548_vm14 = vweird.f32 %v3541_v0 }
 0x8c2   : > { %v12289_v1 = vpop.eup %12288 }
 0x8c3   : > { %v3543_v2 = vmul.f32 %v12289_v1, %v3541_v0  ;;  %vm3549_vm13 = vweird.f32 %v12289_v1 }
 0x8c4   : > { %vm3550_vm15 = vmor %vm3548_vm14, %vm3549_vm13 }
 0x8c5   : > { %v3544_v3 = vmul.f32 %v12289_v1, %v3543_v2  ;;  %v12203_v2 = vld [vmem:[%s13885_s19 + $0x6] ss:$0 sm:$0xff] }
 0x8c7   : > { %v3545_v4 = vmul.f32 0.5, %v3544_v3 }
 0x8c9   : > { %v3546_v28 = vsub.f32 1.5, %v3545_v4  ;;  %v12209_v4 = vld [vmem:[%s12532_s24 + $0x7] ss:$0 sm:$0xff] }
 0x8cb   : > { %v3547_v5 = vmul.f32 %v12289_v1, %v3546_v28 }
 0x8cd   : > { %v3551_v8 = vsel %vm3550_vm15, %v12289_v1, %v3547_v5  ;;  %v12208_v1 = vld [vmem:[%s12532_s24 + $0x4] ss:$0 sm:$0xff] }
 0x8ce   : > { %v3552_v10 = vmul.f32 %v3551_v8, %v13060_v23  ;;  %v11765_v23 = vld [vmem:[%s13886_s14 + $0x1b0] sm:$0xff]  ;;  %s13917_s14 = sld [smem:[#allocation38_spill]] }
 0x8d0   : > { %v3556_v11 = vmul.f32 %v12200_v7, %v3552_v10 }
 0x8d2   : > { %v3560_v12 = vadd.f32 %v12201_v9, %v3556_v11 }
 0x8d4   : > { %v13105_v6 = vpack.c.bf16 %v3560_v12, %v3560_v12 }
 0x8d6   : > { %3618 = vmatmul.bf16.vlgmr.msrb.gmra.mxu3 %v13105_v6  ;;  %3679 = vmatmul.bf16.vlgmr.msrb.gmra.mxu0 %v13105_v6 }
 0x8d7   : > { %3740 = vmatmul.bf16.vlgmr.msra.gmra.mxu1 %v13105_v6  ;;  %3801 = vmatmul.bf16.vlgmr.msra.gmra.mxu2 %v13105_v6 }
 0x8d8   : > { %4130 = vmatpush.bf16.msrb.mxu3 %v11750_v16  ;;  %4191 = vmatpush.bf16.msrb.mxu0 %v11758_v17  ;;  %v12204_v16 = vld [vmem:[%s13885_s19 + $0x4] ss:$0 sm:$0xff] }
 0x8d9   : > { %4252 = vmatpush.bf16.msra.mxu1 %v11766_v18  ;;  %4313 = vmatpush.bf16.msra.mxu2 %v11774_v19  ;;  %v12205_v19 = vld [vmem:[%s13885_s19 + $0x7] ss:$0 sm:$0xff]  ;;  %s13920_s19 = sld [smem:[#allocation37_spill]] }
 0x8dc   : > { %4131 = vmatpush.bf16.msrb.mxu3 %v11749_v20  ;;  %4192 = vmatpush.bf16.msrb.mxu0 %v11757_v21 }
 0x8dd   : > { %4253 = vmatpush.bf16.msra.mxu1 %v11765_v23  ;;  %4314 = vmatpush.bf16.msra.mxu2 %v11773_v24 }
 0x8e0   : > { %4132 = vmatpush.bf16.msrb.mxu3 %v11748_v25  ;;  %4193 = vmatpush.bf16.msrb.mxu0 %v11756_v27 }
 0x8e1   : > { %4254 = vmatpush.bf16.msra.mxu1 %v11764_v29  ;;  %4315 = vmatpush.bf16.msra.mxu2 %v11772_v31 }
 0x8e4   : > { %4133 = vmatpush.bf16.msrb.mxu3 %v11747_v32  ;;  %4194 = vmatpush.bf16.msrb.mxu0 %v11755_v33  ;;  %v12210_v32 = vld [vmem:[%s12537_s30 + $0x5] ss:$0 sm:$0xff] }
 0x8e5   : > { %4255 = vmatpush.bf16.msra.mxu1 %v11763_v34  ;;  %4316 = vmatpush.bf16.msra.mxu2 %v11771_v35  ;;  %v12211_v34 = vld [vmem:[%s12537_s30 + $0x6] ss:$0 sm:$0xff] }
 0x8e6   : > { %3878 = vmatmul.bf16.vlgmr.msra.gmra.mxu3 %v13105_v6  ;;  %3939 = vmatmul.bf16.vlgmr.msra.gmra.mxu0 %v13105_v6 }
 0x8e7   : > { %4000 = vmatmul.bf16.vlgmr.msrb.gmra.mxu1 %v13105_v6  ;;  %4061 = vmatmul.bf16.vlgmr.msrb.gmra.mxu2 %v13105_v6 }
 0x8e8   : > { %4134 = vmatpush.bf16.msrb.mxu3 %v11746_v36  ;;  %4195 = vmatpush.bf16.msrb.mxu0 %v11754_v37 }
 0x8e9   : > { %4256 = vmatpush.bf16.msra.mxu1 %v11762_v38  ;;  %4317 = vmatpush.bf16.msra.mxu2 %v11770_v39 }
 0x8ec   : > { %4135 = vmatpush.bf16.msrb.mxu3 %v11745_v40  ;;  %4196 = vmatpush.bf16.msrb.mxu0 %v11753_v41 }
 0x8ed   : > { %4257 = vmatpush.bf16.msra.mxu1 %v11761_v42  ;;  %4318 = vmatpush.bf16.msra.mxu2 %v11769_v14  ;;  %v12212_v42 = vld [vmem:[%s12537_s30 + $0x4] ss:$0 sm:$0xff] }
 0x8f0   : > { %4136 = vmatpush.bf16.msrb.mxu3 %v11744_v43  ;;  %4197 = vmatpush.bf16.msrb.mxu0 %v11752_v44  ;;  %v12213_v43 = vld [vmem:[%s12537_s30 + $0x7] ss:$0 sm:$0xff] }
 0x8f1   : > { %4258 = vmatpush.bf16.msra.mxu1 %v11760_v13  ;;  %4319 = vmatpush.bf16.msra.mxu2 %v11768_v45 }
 0x8f4   : > { %4137 = vmatpush.bf16.msrb.mxu3 %v11743_v46  ;;  %4198 = vmatpush.bf16.msrb.mxu0 %v11751_v30 }
 0x8f5   : > { %4259 = vmatpush.bf16.msra.mxu1 %v11759_v47  ;;  %4320 = vmatpush.bf16.msra.mxu2 %v11767_v48 }
 0x8f7   : > { %4138 = vmatmul.bf16.vlgmr.msrb.gmra.mxu3 %v13105_v6  ;;  %4199 = vmatmul.bf16.vlgmr.msrb.gmra.mxu0 %v13105_v6 }
 0x8f8   : > { %4260 = vmatmul.bf16.vlgmr.msra.gmra.mxu1 %v13105_v6  ;;  %4321 = vmatmul.bf16.vlgmr.msra.gmra.mxu2 %v13105_v6 }
 0x953   : > { %v3680_v26 = vpop.f32.mrf.mxu0 }
 0x954   : > { %v3741_v49 = vpop.f32.mrf.mxu1  ;;  %v3819_v8 = vadd.f32 %v12202_v63, %v3680_v26 }
 0x955   : > { %v3820_v11 = vadd.f32 %v12203_v2, %v3741_v49 }
 0x956   : > { %v4343_v21 = vpack.c.bf16 %v3819_v8, %v3819_v8 }
 0x957   : > { %v4344_v24 = vpack.c.bf16 %v3820_v11, %v3820_v11 }
 0x959   : > { %v3619_v50 = vpop.f32.mrf.mxu3 }
 0x95a   : > { %v3802_v51 = vpop.f32.mrf.mxu2  ;;  %v3818_v27 = vadd.f32 %v12204_v16, %v3619_v50 }
 0x95b   : > { %v3682_v52 = vpop.f32.mrf.mxu0  ;;  %v3821_v29 = vadd.f32 %v12205_v19, %v3802_v51 }
 0x95c   : > { %v3743_v53 = vpop.f32.mrf.mxu1  ;;  %v4342_v35 = vpack.c.bf16 %v3818_v27, %v3818_v27 }
 0x95d   : > { %v4345_v37 = vpack.c.bf16 %v3821_v29, %v3821_v29 }
 0x961   : > { %v3621_v55 = vpop.f32.mrf.mxu3 }
 0x962   : > { %v3804_v57 = vpop.f32.mrf.mxu2 }
 0x963   : > { %v3940_v61 = vpop.f32.mrf.mxu0 }
 0x964   : > { %v4079_v58 = vadd.f32 %v12206_v54, %v3940_v61  ;;  %v4001_v59 = vpop.f32.mrf.mxu1 }
 0x965   : > { %v4080_v62 = vadd.f32 %v12207_v56, %v4001_v59 }
 0x966   : > { %v4347_v0 = vpack.c.bf16 %v4079_v58, %v4079_v58 }
 0x967   : > { %v4348_v3 = vpack.c.bf16 %v4080_v62, %v4080_v62 }
 0x968   : > { %v4373_v28 = vsel %vm2544_vm7, %v4347_v0, 0 }
 0x969   : > { %v4392_v5 = vsel %vm2544_vm7, %v4348_v3, 0  ;;  %v3879_v7 = vpop.f32.mrf.mxu3  ;;  %4382 = vmatpush.bf16.xpose.msra.mxu0 %v4373_v28 }
 0x96a   : > { %v4078_v9 = vadd.f32 %v12208_v1, %v3879_v7  ;;  %v4062_v10 = vpop.f32.mrf.mxu2  ;;  %4401 = vmatpush.bf16.xpose.msrb.mxu1 %v4392_v5 }
 0x96b   : > { %v4081_v12 = vadd.f32 %v12209_v4, %v4062_v10  ;;  %v3942_v6 = vpop.f32.mrf.mxu0 }
 0x96c   : > { %v4346_v17 = vpack.c.bf16 %v4078_v9, %v4078_v9  ;;  %v4003_v18 = vpop.f32.mrf.mxu1 }
 0x96d   : > { %v4349_v20 = vpack.c.bf16 %v4081_v12, %v4081_v12 }
 0x96e   : > { %v4354_v23 = vsel %vm2544_vm7, %v4346_v17, 0 }
 0x96f   : > { %v4411_v25 = vsel %vm2544_vm7, %v4349_v20, 0  ;;  %4363 = vmatpush.bf16.xpose.msra.mxu3 %v4354_v23 }
 0x970   : > { %4420 = vmatpush.bf16.xpose.msrb.mxu2 %v4411_v25  ;;  %9936 = vmatmul.msk.bf16.vlgmr.msra.gmra.mxu0 %vm2544_vm7, %v4343_v21 }
 0x971   : > { %9937 = vmatmul.msk.bf16.vlgmr.msrb.gmra.mxu1 %vm2544_vm7, %v4344_v24  ;;  %v3881_v31 = vpop.f32.mrf.mxu3 }
 0x972   : > { %v4064_v33 = vpop.f32.mrf.mxu2  ;;  %v11778_v31 = vld [vmem:[%s13888_s6 + $0x58] sm:$0xff] }
 0x974   : > { %v4200_v36 = vpop.f32.mrf.mxu0 }
 0x975   : > { %v4339_v38 = vadd.f32 %v12210_v32, %v4200_v36  ;;  %v4261_v39 = vpop.f32.mrf.mxu1 }
 0x976   : > { %v4340_v40 = vadd.f32 %v12211_v34, %v4261_v39  ;;  %9935 = vmatmul.msk.bf16.vlgmr.msra.gmra.mxu3 %vm2544_vm7, %v4342_v35 }
 0x977   : > { %v4475_v41 = vpack.c.bf16 %v4339_v38, %v4339_v38  ;;  %9938 = vmatmul.msk.bf16.vlgmr.msrb.gmra.mxu2 %vm2544_vm7, %v4345_v37 }
 0x978   : > { %v4476_v14 = vpack.c.bf16 %v4340_v40, %v4340_v40 }
 0x979   : > { %v4501_v44 = vand.u32 %v4475_v41, %v12905_v15 }
 0x97a   : > { %v4520_v13 = vand.u32 %v4476_v14, %v12905_v15  ;;  %v4139_v45 = vpop.f32.mrf.mxu3 }
 0x97b   : > { %v4338_v46 = vadd.f32 %v12212_v42, %v4139_v45  ;;  %v4322_v30 = vpop.f32.mrf.mxu2  ;;  %4510 = vmatpush.bf16.msrb.mxu0 %v4501_v44  ;;  %v11777_v45 = vld [vmem:[%s13888_s6 + $0x50] sm:$0xff] }
 0x97c   : > { %v4341_v47 = vadd.f32 %v12213_v43, %v4322_v30  ;;  %4529 = vmatpush.bf16.msra.mxu1 %v4520_v13  ;;  %v4202_v48 = vpop.f32.mrf.mxu0  ;;  %v11782_v30 = vld [vmem:[%s13888_s6 + $0x78] sm:$0xff] }
 0x97d   : > { %v4474_v26 = vpack.c.bf16 %v4338_v46, %v4338_v46  ;;  %v4263_v49 = vpop.f32.mrf.mxu1  ;;  %v11776_v46 = vld [vmem:[%s13888_s6 + $0x48] sm:$0xff]  ;;  %v11775_v48 = vld [vmem:[%s13888_s6 + $0x40] sm:$0xff] }
 0x97e   : > { %v4477_v50 = vpack.c.bf16 %v4341_v47, %v4341_v47  ;;  %v11780_v47 = vld [vmem:[%s13888_s6 + $0x68] sm:$0xff]  ;;  %v11779_v49 = vld [vmem:[%s13888_s6 + $0x60] sm:$0xff] }
 0x97f   : > { %v4482_v51 = vand.u32 %v4474_v26, %v12905_v15  ;;  %4605 = vmatpush.bf16.msra.mxu0 %v11776_v46  ;;  %v11781_v26 = vld [vmem:[%s13888_s6 + $0x70] sm:$0xff]  ;;  %v10015_v46 = vld [vmem:[%s13899_s1 + $0xc8] sm:$0xf0]  ;;  %s13909_s6 = sld [smem:[#allocation25_spill]] }
 0x980   : > { %v4539_v52 = vand.u32 %v4477_v50, %v12905_v15  ;;  %4634 = vmatpush.bf16.msrb.mxu1 %v11780_v47  ;;  %v10005_v47 = vld [vmem:[%s13899_s1 + $0xb0] sm:$0xf] }
 0x981   : > { %4491 = vmatpush.bf16.msrb.mxu3 %v4482_v51 }
 0x982   : > { %4548 = vmatpush.bf16.msra.mxu2 %v4539_v52  ;;  %v4141_v53 = vpop.f32.mrf.mxu3 }
 0x983   : > { %v4324_v54 = vpop.f32.mrf.mxu2  ;;  %4606 = vmatpush.bf16.msra.mxu0 %v11775_v48  ;;  %v11790_v48 = vld [vmem:[%s13899_s1 + $0xb4] sm:$0xf0] }
 0x984   : > { %4635 = vmatpush.bf16.msrb.mxu1 %v11779_v49  ;;  %v10006_v49 = vor.u32 %v11790_v48, %v10005_v47  ;;  %v11803_v48 = vld [vmem:[%s13903_s13 + $0xa0] sm:$0xff] }
 0x985   : > { %4577 = vmatpush.bf16.msra.mxu3 %v11778_v31 }
 0x986   : > { %4664 = vmatpush.bf16.msrb.mxu2 %v11782_v30 }
 0x989   : > { %4578 = vmatpush.bf16.msra.mxu3 %v11777_v45 }
 0x98a   : > { %4665 = vmatpush.bf16.msrb.mxu2 %v11781_v26  ;;  %v11789_v26 = vld [vmem:[%s13899_s1 + $0xb4] sm:$0xf] }
 0x9ed   : > { %v4384_v55 = vpop.f32.mrf.mxu0 }
 0x9ee   : > { %v4403_v56 = vpop.f32.mrf.mxu1  ;;  %v4429_v57 = vsel %vm2621_vm10, %v4384_v55, -inf }
 0x9ef   : > { %4430 = vmax.xlane.f32.xlu1 %v4429_v57  ;;  %v4432_v3 = vsel %vm2621_vm10, %v4403_v56, -inf }
 0x9f5   : > { %v4386_v61 = vpop.f32.mrf.mxu0 }
 0x9f6   : > { %v4405_v58 = vpop.f32.mrf.mxu1 }
 0x9f9   : > { %v4365_v59 = vpop.f32.mrf.mxu3 }
 0x9fa   : > { %v4422_v62 = vpop.f32.mrf.mxu2  ;;  %v4426_v63 = vsel %vm2621_vm10, %v4365_v59, -inf }
 0x9fb   : > { %v4435_v0 = vsel %vm2621_vm10, %v4422_v62, -inf  ;;  %4427 = vmax.xlane.f32.xlu0 %v4426_v63 }
 0x9fc   : > { %4436 = vmax.xlane.f32.xlu2 %v4435_v0 }
 0xa01   : > { %v4367_v1 = vpop.f32.mrf.mxu3 }
 0xa02   : > { %v4424_v2 = vpop.f32.mrf.mxu2 }
 0xa04   : > { %4433 = vmax.xlane.f32.xlu2 %v4432_v3 }
 0xa62   : > { %v4431_v4 = vpop.xlane.xlu1 %4430 }
 0xa63   : > { %v4439_v28 = vsub.f32 %v4384_v55, %v4431_v4 }
 0xa65   : > { %v4444_v5 = vmul.f32 1.442695, %v4439_v28  ;;  %v12214_v28 = vld [vmem:[%s13897_s10 + $0x1] ss:$0 sm:$0xff]  ;;  %s13915_s10 = sld [smem:[#allocation33_spill]] }
 0xa67   : > { %12290 = vpow2.f32 %v4444_v5 }
 0xa6d   : > { %v12291_v7 = vpop.eup %12290 }
 0xa6e   : > { %v4428_v8 = vpop.xlane.xlu0 %4427  ;;  %v4453_v9 = vsel %vm2621_vm10, %v12291_v7, 0.0 }
 0xa6f   : > { %v4437_v10 = vpop.xlane.xlu2 %4436  ;;  %v4438_v11 = vsub.f32 %v4365_v59, %v4428_v8  ;;  %4454 = vadd.xlane.f32.xlu2 %v4453_v9  ;;  %v12215_v8 = vld [vmem:[%s13898_s18 + $0x1] ss:$0 sm:$0xff]  ;;  %s13919_s18 = sld [smem:[#allocation35_spill]] }
 0xa70   : > { %v4441_v12 = vsub.f32 %v4422_v62, %v4437_v10 }
 0xa71   : > { %v4442_v6 = vmul.f32 1.442695, %v4438_v11 }
 0xa72   : > { %v4448_v16 = vmul.f32 1.442695, %v4441_v12 }
 0xa73   : > { %12292 = vpow2.f32 %v4442_v6 }
 0xa74   : > { %12294 = vpow2.f32 %v4448_v16 }
 0xa77   : > { %v4434_v17 = vpop.xlane.xlu2 %4433 }
 0xa78   : > { %v4440_v18 = vsub.f32 %v4403_v56, %v4434_v17 }
 0xa79   : > { %v12293_v19 = vpop.eup %12292 }
 0xa7a   : > { %v12295_v20 = vpop.eup %12294  ;;  %v4446_v21 = vmul.f32 1.442695, %v4440_v18  ;;  %v4450_v23 = vsel %vm2621_vm10, %v12293_v19, 0.0  ;;  %v10037_v18 = vld [vmem:[%s13899_s1 + $0xf0] sm:$0xf] }
 0xa7b   : > { %v4459_v24 = vsel %vm2621_vm10, %v12295_v20, 0.0  ;;  %4451 = vadd.xlane.f32.xlu1 %v4450_v23  ;;  %v10039_v23 = vld [vmem:[%s13899_s1 + $0xf8] sm:$0xf0] }
 0xa7c   : > { %12296 = vpow2.f32 %v4446_v21  ;;  %4460 = vadd.xlane.f32.xlu0 %v4459_v24 }
 0xa82   : > { %v12297_v25 = vpop.eup %12296 }
 0xa83   : > { %v4456_v27 = vsel %vm2621_vm10, %v12297_v25, 0.0 }
 0xa84   : > { %4457 = vadd.xlane.f32.xlu0 %v4456_v27 }
 0xae2   : > { %v4455_v29 = vpop.xlane.xlu2 %4454 }
 0xae3   : > { %12298 = vrcp.f32 %v4455_v29 }
 0xae9   : > { %v12299_v32 = vpop.eup %12298 }
 0xaea   : > { %v4467_v33 = vmul.f32 %v12299_v32, %v12291_v7  ;;  %v10029_v32 = vld [vmem:[%s13899_s1 + $0xe0] sm:$0xf] }
 0xaec   : > { %v4471_v34 = vpack.c.bf16 %v4467_v33, %v4467_v33  ;;  %v11796_v33 = vld [vmem:[%s13899_s1 + $0xe4] sm:$0xf0] }
 0xaee   : > { %9940 = vmatmul.msk.bf16.vlgmr.msrb.gmra.mxu0 %vm2674_vm11, %v4471_v34  ;;  %v4452_v35 = vpop.xlane.xlu1 %4451  ;;  %v11795_v34 = vld [vmem:[%s13899_s1 + $0xe4] sm:$0xf] }
 0xaef   : > { %12300 = vrcp.f32 %v4452_v35  ;;  %v4461_v36 = vpop.xlane.xlu0 %4460  ;;  %v10030_v35 = vor.u32 %v11796_v33, %v10029_v32  ;;  %v11813_v33 = vld [vmem:[%s13903_s13 + $0xf0] sm:$0xff] }
 0xaf0   : > { %12302 = vrcp.f32 %v4461_v36  ;;  %v10031_v36 = vld [vmem:[%s13899_s1 + $0xe8] sm:$0xf0] }
 0xaf5   : > { %v12301_v37 = vpop.eup %12300 }
 0xaf6   : > { %v12303_v38 = vpop.eup %12302  ;;  %v4466_v39 = vmul.f32 %v12301_v37, %v12293_v19  ;;  %v11798_v19 = vld [vmem:[%s13899_s1 + $0xf4] sm:$0xf0]  ;;  %v10034_v37 = vor.u32 %v11795_v34, %v10031_v36 }
 0xaf7   : > { %v4469_v40 = vmul.f32 %v12303_v38, %v12295_v20  ;;  %v4458_v41 = vpop.xlane.xlu0 %4457  ;;  %v11797_v20 = vld [vmem:[%s13899_s1 + $0xf4] sm:$0xf]  ;;  %v10038_v21 = vor.u32 %v11798_v19, %v10037_v18  ;;  %v10021_v38 = vld [vmem:[%s13899_s1 + $0xd0] sm:$0xf]  ;;  %v12216_v19 = vld [vmem:[%s13900_s7 + $0x1] ss:$0 sm:$0xff] }
 0xaf8   : > { %v4470_v42 = vpack.c.bf16 %v4466_v39, %v4466_v39  ;;  %12304 = vrcp.f32 %v4458_v41  ;;  %v10042_v24 = vor.u32 %v11797_v20, %v10039_v23  ;;  %v11794_v39 = vld [vmem:[%s13899_s1 + $0xd4] sm:$0xf0]  ;;  %v12217_v23 = vld [vmem:[%s13901_s5 + $0x1] ss:$0 sm:$0xff]  ;;  %s13908_s5 = sld [smem:[#allocation24_spill]] }
 0xaf9   : > { %v4473_v14 = vpack.c.bf16 %v4469_v40, %v4469_v40  ;;  %v11793_v40 = vld [vmem:[%s13899_s1 + $0xd4] sm:$0xf]  ;;  %v10022_v41 = vor.u32 %v11794_v39, %v10021_v38  ;;  %s13910_s7 = sld [smem:[#allocation28_spill]] }
 0xafa   : > { %9939 = vmatmul.msk.bf16.vlgmr.msrb.gmra.mxu3 %vm2674_vm11, %v4470_v42  ;;  %4810 = vmatpush.bf16.msrb.mxu0 %v10042_v24  ;;  %v10023_v42 = vld [vmem:[%s13899_s1 + $0xd8] sm:$0xf0]  ;;  %v11805_v39 = vld [vmem:[%s13903_s13 + $0xb0] sm:$0xff] }
 0xafb   : > { %9942 = vmatmul.msk.bf16.vlgmr.msra.gmra.mxu2 %vm2674_vm11, %v4473_v14  ;;  %4797 = vmatpush.bf16.msrb.mxu3 %v10038_v21  ;;  %v10026_v14 = vor.u32 %v11793_v40, %v10023_v42  ;;  %v11811_v42 = vld [vmem:[%s13903_s13 + $0xe0] sm:$0xff] }
 0xafe   : > { %v12305_v43 = vpop.eup %12304  ;;  %4811 = vmatpush.bf16.msrb.mxu0 %v10034_v37 }
 0xaff   : > { %v4468_v44 = vmul.f32 %v12305_v43, %v12297_v25  ;;  %4798 = vmatpush.bf16.msrb.mxu3 %v10030_v35  ;;  %v10013_v43 = vld [vmem:[%s13899_s1 + $0xc0] sm:$0xf]  ;;  %v11806_v35 = vld [vmem:[%s13903_s13 + $0xb8] sm:$0xff] }
 0xb01   : > { %v4472_v13 = vpack.c.bf16 %v4468_v44, %v4468_v44  ;;  %v11792_v44 = vld [vmem:[%s13899_s1 + $0xc4] sm:$0xf0] }
 0xb02   : > { %4812 = vmatpush.bf16.msrb.mxu0 %v10026_v14  ;;  %v10014_v45 = vor.u32 %v11792_v44, %v10013_v43 }
 0xb03   : > { %9941 = vmatmul.msk.bf16.vlgmr.msra.gmra.mxu1 %vm2674_vm11, %v4472_v13  ;;  %4799 = vmatpush.bf16.msrb.mxu3 %v10022_v41  ;;  %v11791_v13 = vld [vmem:[%s13899_s1 + $0xc4] sm:$0xf] }
 0xb04   : > { %v10018_v30 = vor.u32 %v11791_v13, %v10015_v46  ;;  %5004 = vmatpush.bf16.msra.mxu1 %v11806_v35  ;;  %v11804_v13 = vld [vmem:[%s13903_s13 + $0xa8] sm:$0xff] }
 0xb06   : > { %4813 = vmatpush.bf16.msrb.mxu0 %v10018_v30  ;;  %v11810_v30 = vld [vmem:[%s13903_s13 + $0xd8] sm:$0xff] }
 0xb07   : > { %4800 = vmatpush.bf16.msrb.mxu3 %v10014_v45 }
 0xb08   : > { %5005 = vmatpush.bf16.msra.mxu1 %v11805_v39 }
 0xb0b   : > { %4801 = vmatpush.bf16.msrb.mxu3 %v10006_v49 }
 0xb0c   : > { %5006 = vmatpush.bf16.msra.mxu1 %v11804_v13 }
 0xb10   : > { %5007 = vmatpush.bf16.msra.mxu1 %v11803_v48 }
 0xb6b   : > { %v4512_v50 = vpop.f32.mrf.mxu0 }
 0xb6c   : > { %v4555_v51 = vpack.c.bf16 %v4512_v50, %v4512_v50  ;;  %v10007_v50 = vld [vmem:[%s13899_s1 + $0xb8] sm:$0xf0] }
 0xb6e   : > { %9951 = vmatmul.msk.bf16.vlgmr.msra.gmra.mxu3 %vm2544_vm7, %v4555_v51  ;;  %v10010_v51 = vor.u32 %v11789_v26, %v10007_v50  ;;  %v11809_v50 = vld [vmem:[%s13903_s13 + $0xd0] sm:$0xff] }
 0xb70   : > { %4814 = vmatpush.bf16.msrb.mxu0 %v10010_v51 }
 0xb73   : > { %v4514_v52 = vpop.f32.mrf.mxu0 }
 0xb74   : > { %v9997_v52 = vld [vmem:[%s13899_s1 + $0xa0] sm:$0xf] }
 0xb7d   : > { %v4493_v53 = vpop.f32.mrf.mxu3 }
 0xb7e   : > { %v4554_v54 = vpack.c.bf16 %v4493_v53, %v4493_v53  ;;  %v4550_v55 = vpop.f32.mrf.mxu2  ;;  %v11788_v53 = vld [vmem:[%s13899_s1 + $0xa4] sm:$0xf0] }
 0xb7f   : > { %v4642_v56 = vpack.c.bf16 %v4550_v55, %v4550_v55  ;;  %v9998_v55 = vor.u32 %v11788_v53, %v9997_v52  ;;  %v11802_v52 = vld [vmem:[%s13903_s13 + $0x98] sm:$0xff] }
 0xb80   : > { %v4531_v57 = vpop.f32.mrf.mxu1  ;;  %9960 = vmatmul.msk.bf16.vlgmr.msra.gmra.mxu0 %vm2544_vm7, %v4554_v54  ;;  %v11787_v54 = vld [vmem:[%s13899_s1 + $0xa4] sm:$0xf]  ;;  %5008 = vmatpush.bf16.msra.mxu1 %v11802_v52 }
 0xb81   : > { %v4612_v61 = vpack.c.bf16 %v4531_v57, %v4531_v57  ;;  %9978 = vmatmul.msk.bf16.vlgmr.msrb.gmra.mxu2 %vm2544_vm7, %v4642_v56  ;;  %v9999_v56 = vld [vmem:[%s13899_s1 + $0xa8] sm:$0xf0]  ;;  %4802 = vmatpush.bf16.msrb.mxu3 %v9998_v55 }
 0xb82   : > { %v10002_v57 = vor.u32 %v11787_v54, %v9999_v56  ;;  %v11808_v55 = vld [vmem:[%s13903_s13 + $0xc8] sm:$0xff] }
 0xb83   : > { %9969 = vmatmul.msk.bf16.vlgmr.msrb.gmra.mxu1 %vm2544_vm7, %v4612_v61  ;;  %v9989_v61 = vld [vmem:[%s13899_s1 + $0x90] sm:$0xf] }
 0xb84   : > { %4815 = vmatpush.bf16.msrb.mxu0 %v10002_v57  ;;  %v11801_v57 = vld [vmem:[%s13903_s13 + $0x90] sm:$0xff] }
 0xb85   : > { %v4495_v58 = vpop.f32.mrf.mxu3  ;;  %5009 = vmatpush.bf16.msra.mxu1 %v11801_v57 }
 0xb86   : > { %v4552_v59 = vpop.f32.mrf.mxu2  ;;  %v11786_v58 = vld [vmem:[%s13899_s1 + $0x94] sm:$0xf0] }
 0xb87   : > { %v11785_v59 = vld [vmem:[%s13899_s1 + $0x94] sm:$0xf] }
 0xb88   : > { %v4533_v62 = vpop.f32.mrf.mxu1 }
 0xb89   : > { %v9990_v62 = vor.u32 %v11786_v58, %v9989_v61 }
 0xb8b   : > { %4803 = vmatpush.bf16.msrb.mxu3 %v9990_v62  ;;  %v11807_v62 = vld [vmem:[%s13903_s13 + $0xc0] sm:$0xff] }
 0xbf1   : > { %v4580_v63 = vpop.f32.mrf.mxu3 }
 0xbf9   : > { %v4582_v0 = vpop.f32.mrf.mxu3 }
 0xbfd   : > { %v4608_v1 = vpop.f32.mrf.mxu0 }
 0xbfe   : > { %v4609_v2 = vadd.f32 %v4608_v1, %v4580_v63  ;;  %v9991_v63 = vld [vmem:[%s13899_s1 + $0x98] sm:$0xf0]  ;;  %v9981_v1 = vld [vmem:[%s13899_s1 + $0x80] sm:$0xf] }
 0xbff   : > { %v9994_v0 = vor.u32 %v11785_v59, %v9991_v63 }
 0xc00   : > { %v4637_v3 = vpop.f32.mrf.mxu1 }
 0xc01   : > { %v4641_v4 = vadd.f32 %v4637_v3, %v4609_v2  ;;  %v11784_v2 = vld [vmem:[%s13899_s1 + $0x84] sm:$0xf0]  ;;  %v11783_v3 = vld [vmem:[%s13899_s1 + $0x84] sm:$0xf]  ;;  %4816 = vmatpush.bf16.msrb.mxu0 %v9994_v0 }
 0xc04   : > { %v4667_v5 = vpop.f32.mrf.mxu2 }
 0xc05   : > { %v4671_v7 = vadd.f32 %v4667_v5, %v4641_v4  ;;  %v4610_v9 = vpop.f32.mrf.mxu0  ;;  %v9982_v4 = vor.u32 %v11784_v2, %v9981_v1  ;;  %v11800_v1 = vld [vmem:[%s13903_s13 + $0x88] sm:$0xff] }
 0xc06   : > { %5010 = vmatpush.bf16.msra.mxu1 %v11800_v1 }
 0xc07   : > { %v4675_v10 = vadd.f32 %v12214_v28, %v4671_v7  ;;  %v9983_v28 = vld [vmem:[%s13899_s1 + $0x88] sm:$0xf0]  ;;  %4804 = vmatpush.bf16.msrb.mxu3 %v9982_v4  ;;  %s13906_s1 = sld [smem:[#allocation26_spill]] }
 0xc08   : > { %v4639_v11 = vpop.f32.mrf.mxu1  ;;  %v9986_v5 = vor.u32 %v11783_v3, %v9983_v28 }
 0xc09   : > { %v4679_v12 = vmul.f32 %v12215_v8, %v4675_v10 }
 0xc0a   : > { %4817 = vmatpush.bf16.msrb.mxu0 %v9986_v5 }
 0xc0b   : > { %v13202_v6 = vadd.f32 %v4679_v12, %v13026_v22 }
 0xc0c   : > { %v4669_v16 = vpop.f32.mrf.mxu2 }
 0xc0d   : > { %v4681_v17 = vsel %vm1717_vm2, %v13202_v6, 0.0 }
 0xc0e   : > { %4682 = vadd.xlane.f32.xlu1 %v4681_v17 }
 0xc81   : > { %v4683_v22 = vpop.xlane.xlu1 %4682 }
 0xc82   : > { %v4684_v25 = vmul.f32 %v4683_v22, %v12788_v60 }
 0xc84   : > { %v13212_v27 = vsub.f32 %v13202_v6, %v4684_v25 }
 0xc86   : > { %v4686_v29 = vmul.f32 %v13212_v27, %v13212_v27 }
 0xc88   : > { %v4687_v31 = vsel %vm1717_vm2, %v4686_v29, 0.0  ;;  %v9516_v29 = vld [vmem:[%s13902_s9 + $0x2] sm:$0x3]  ;;  %s13914_s9 = sld [smem:[#allocation32_spill]] }
 0xc89   : > { %4688 = vadd.xlane.f32.xlu2 %v4687_v31  ;;  %v11814_v31 = vld [vmem:[%s13903_s13 + $0xf8] sm:$0xff]  ;;  %v4714_v32 = vperm.slane %v9516_v29, 1  ;;  %v4713_v38 = vperm.slane %v9516_v29, 0 }
 0xc8a   : > { %5017 = vmatpush.bf16.msra.mxu2 %v11814_v31 }
 0xc8e   : > { %5018 = vmatpush.bf16.msra.mxu2 %v11813_v33 }
 0xcfc   : > { %v4689_v7 = vpop.xlane.xlu2 %4688 }
 0xcfd   : > { %v4690_v8 = vmul.f32 %v4689_v7, %v12788_v60 }
 0xcff   : > { %v4691_v9 = vadd.f32 1e-06, %v4690_v8 }
 0xd01   : > { %12306 = vrsqrt.f32 %v4691_v9  ;;  %vm4698_vm1 = vweird.f32 %v4691_v9 }
 0xd07   : > { %v12307_v10 = vpop.eup %12306 }
 0xd08   : > { %v4693_v11 = vmul.f32 %v12307_v10, %v4691_v9  ;;  %vm4699_vm0 = vweird.f32 %v12307_v10 }
 0xd09   : > { %vm4700_vm3 = vmor %vm4698_vm1, %vm4699_vm0 }
 0xd0a   : > { %v4694_v12 = vmul.f32 %v12307_v10, %v4693_v11 }
 0xd0c   : > { %v4695_v16 = vmul.f32 0.5, %v4694_v12 }
 0xd0e   : > { %v4696_v17 = vsub.f32 1.5, %v4695_v16 }
 0xd10   : > { %v4697_v18 = vmul.f32 %v12307_v10, %v4696_v17 }
 0xd12   : > { %v4701_v20 = vsel %vm4700_vm3, %v12307_v10, %v4697_v18  ;;  %v11799_v10 = vld [vmem:[%s13903_s13 + $0x80] sm:$0xff] }
 0xd13   : > { %v4702_v21 = vmul.f32 %v4701_v20, %v13212_v27  ;;  %v11812_v27 = vld [vmem:[%s13903_s13 + $0xe8] sm:$0xff]  ;;  %5011 = vmatpush.bf16.msra.mxu1 %v11799_v10  ;;  %v11846_v10 = vld [vmem:[%s13906_s1 + $0xf8] sm:$0xff]  ;;  %s13916_s13 = sld [smem:[#allocation36_spill]] }
 0xd14   : > { %5019 = vmatpush.bf16.msra.mxu2 %v11812_v27 }
 0xd15   : > { %v4706_v24 = vmul.f32 %v12216_v19, %v4702_v21 }
 0xd17   : > { %v4710_v22 = vadd.f32 %v12217_v23, %v4706_v24 }
 0xd18   : > { %5020 = vmatpush.bf16.msra.mxu2 %v11811_v42 }
 0xd19   : > { %v4711_v25 = vpack.c.bf16 %v4710_v22, %v4710_v22 }
 0xd1b   : > { %4805 = vmatmul.bf16.vlgmr.msrb.gmra.mxu3 %v4711_v25  ;;  %4818 = vmatmul.bf16.vlgmr.msrb.gmra.mxu0 %v4711_v25 }
 0xd1c   : > { %5021 = vmatpush.bf16.msra.mxu2 %v11810_v30 }
 0xd20   : > { %5022 = vmatpush.bf16.msra.mxu2 %v11809_v50 }
 0xd24   : > { %5023 = vmatpush.bf16.msra.mxu2 %v11808_v55 }
 0xd28   : > { %5024 = vmatpush.bf16.msra.mxu2 %v11807_v62  ;;  %v12218_v62 = vld [vmem:[%s13904_s17 + $0x1] ss:$0 sm:$0xff]  ;;  %s13918_s17 = sld [smem:[#allocation34_spill]] }
 0xd2c   : > { %5574 = vmatpush.bf16.msrb.mxu2 %v11846_v10  ;;  %v11847_v10 = vld [vmem:[%s13907_s3] sm:$0xff] }
 0xd98   : > { %v4819_v34 = vpop.f32.mrf.mxu0 }
 0xd99   : > { %v13253_v36 = vadd.f32 %v4819_v34, %v4714_v32 }
 0xd9b   : > { %v13257_v37 = vmul.f32 0.70710677, %v13253_v36 }
 0xd9d   : > { %v4828_v40 = vand.u32 2147483647, %v13257_v37  ;;  %vm4892_vm15 = vcmp.ge.f32.partialorder %v13257_v37, 0.0 }
 0xd9e   : > { %v4806_v41 = vpop.f32.mrf.mxu3 }
 0xd9f   : > { %v4830_v14 = vmul.f32 0.3275911, %v4828_v40  ;;  %v13262_v43 = vadd.f32 %v4806_v41, %v4713_v38  ;;  %v4882_v5 = vmul.f32 %v4828_v40, %v4828_v40 }
 0xda0   : > { %v4821_v44 = vpop.f32.mrf.mxu0 }
 0xda1   : > { %v4832_v45 = vadd.f32 1.0, %v4830_v14  ;;  %v13266_v46 = vmul.f32 0.70710677, %v13262_v43  ;;  %v4884_v17 = vsub.f32 0.0, %v4882_v5  ;;  %v4823_v37 = vmul.f32 0.5, %v13262_v43 }
 0xda3   : > { %12308 = vrcp.f32 %v4832_v45  ;;  %v4827_v47 = vand.u32 2147483647, %v13266_v46  ;;  %v4859_v61 = vand.u32 2147483648, %v4832_v45  ;;  %v4857_v59 = vand.u32 2147483647, %v4832_v45 }
 0xda4   : > { %vm4853_vm5 = vweird.f32 %v4832_v45  ;;  %v4887_v25 = vmul.f32 1.442695, %v4884_v17  ;;  %vm4891_vm0 = vcmp.ge.f32.partialorder %v13266_v46, 0.0  ;;  %v11820_v17 = vld [vmem:[%s13906_s1 + $0x28] sm:$0xff] }
 0xda5   : > { %v4829_v26 = vmul.f32 0.3275911, %v4827_v47  ;;  %v4860_v2 = vor.u32 1.1754944e-38, %v4859_v61  ;;  %vm4858_vm8 = vcmp.eq.f32.partialorder %v4857_v59, 8.507059e+37  ;;  %v4881_v22 = vmul.f32 %v4827_v47, %v4827_v47 }
 0xda6   : > { %v4808_v49 = vpop.f32.mrf.mxu3 }
 0xda7   : > { %v4831_v51 = vadd.f32 1.0, %v4829_v26  ;;  %v4883_v34 = vsub.f32 0.0, %v4881_v22  ;;  %v4824_v49 = vmul.f32 0.5, %v13253_v36  ;;  %v11843_v22 = vld [vmem:[%s13906_s1 + $0xe0] sm:$0xff] }
 0xda9   : > { %v12309_v53 = vpop.eup %12308  ;;  %12310 = vrcp.f32 %v4831_v51  ;;  %v4844_v9 = vand.u32 2147483648, %v4831_v51  ;;  %v4842_v12 = vand.u32 2147483647, %v4831_v51  ;;  %vm4838_vm12 = vweird.f32 %v4831_v51 }
 0xdaa   : > { %v4849_v54 = vmul.f32 %v12309_v53, %v4832_v45  ;;  %vm4854_vm4 = vweird.f32 %v12309_v53  ;;  %12312 = vpow2.f32 %v4887_v25  ;;  %v4885_v40 = vmul.f32 1.442695, %v4883_v34  ;;  %v11818_v25 = vld [vmem:[%s13906_s1 + $0x18] sm:$0xff]  ;;  %v11825_v34 = vld [vmem:[%s13906_s1 + $0x50] sm:$0xff] }
 0xdab   : > { %vm4855_vm6 = vmor %vm4853_vm5, %vm4854_vm4  ;;  %v4845_v20 = vor.u32 1.1754944e-38, %v4844_v9  ;;  %vm4843_vm14 = vcmp.eq.f32.partialorder %v4842_v12, 8.507059e+37  ;;  %v11838_v9 = vld [vmem:[%s13906_s1 + $0xb8] sm:$0xff]  ;;  %v11829_v12 = vld [vmem:[%s13906_s1 + $0x70] sm:$0xff] }
 0xdac   : > { %v4850_v56 = vsub.f32 1.0, %v4849_v54  ;;  %12314 = vpow2.f32 %v4885_v40  ;;  %5513 = vmatpush.bf16.msrb.mxu1 %v11838_v9  ;;  %v11832_v40 = vld [vmem:[%s13906_s1 + $0x88] sm:$0xff] }
 0xdad   : > { %v11872_v9 = vld [vmem:[%s13907_s3 + $0xc8] sm:$0xff] }
 0xdae   : > { %v4851_v58 = vmul.f32 %v12309_v53, %v4850_v56 }
 0xdaf   : > { %v12311_v63 = vpop.eup %12310 }
 0xdb0   : > { %v4852_v0 = vadd.f32 %v12309_v53, %v4851_v58  ;;  %v4834_v3 = vmul.f32 %v12311_v63, %v4831_v51  ;;  %vm4839_vm9 = vweird.f32 %v12311_v63  ;;  %v12313_v14 = vpop.eup %12312 }
 0xdb1   : > { %vm4840_vm13 = vmor %vm4838_vm12, %vm4839_vm9 }
 0xdb2   : > { %v4856_v4 = vsel %vm4855_vm6, %v12309_v53, %v4852_v0  ;;  %v4835_v7 = vsub.f32 1.0, %v4834_v3  ;;  %v12315_v52 = vpop.eup %12314 }
 0xdb3   : > { %v4861_v28 = vsel %vm4858_vm8, %v4860_v2, %v4856_v4  ;;  %v12219_v2 = vld [vmem:[%s13905_s21 + $0x1] ss:$0 sm:$0xff]  ;;  %s13921_s21 = sld [smem:[#allocation39_spill]] }
 0xdb4   : > { %v4864_v8 = vmul.f32 1.0614054, %v4861_v28  ;;  %v4836_v11 = vmul.f32 %v12311_v63, %v4835_v7  ;;  %v11822_v7 = vld [vmem:[%s13906_s1 + $0x38] sm:$0xff] }
 0xdb5   : > { %5391 = vmatpush.bf16.msra.mxu3 %v11822_v7  ;;  %v11856_v7 = vld [vmem:[%s13907_s3 + $0x48] sm:$0xff] }
 0xdb6   : > { %v4866_v16 = vadd.f32 -1.4531521, %v4864_v8  ;;  %v4837_v18 = vadd.f32 %v12311_v63, %v4836_v11  ;;  %v11830_v8 = vld [vmem:[%s13906_s1 + $0x78] sm:$0xff]  ;;  %v11821_v11 = vld [vmem:[%s13906_s1 + $0x30] sm:$0xff] }
 0xdb7   : > { %5452 = vmatpush.bf16.msra.mxu0 %v11830_v8  ;;  %v11864_v8 = vld [vmem:[%s13907_s3 + $0x88] sm:$0xff] }
 0xdb8   : > { %v4868_v19 = vmul.f32 %v4866_v16, %v4861_v28  ;;  %v4841_v21 = vsel %vm4840_vm13, %v12311_v63, %v4837_v18  ;;  %v11845_v16 = vld [vmem:[%s13906_s1 + $0xf0] sm:$0xff]  ;;  %v11828_v18 = vld [vmem:[%s13906_s1 + $0x68] sm:$0xff] }
 0xdb9   : > { %v4846_v24 = vsel %vm4843_vm14, %v4845_v20, %v4841_v21  ;;  %5392 = vmatpush.bf16.msra.mxu3 %v11821_v11  ;;  %5575 = vmatpush.bf16.msrb.mxu2 %v11845_v16  ;;  %v11844_v20 = vld [vmem:[%s13906_s1 + $0xe8] sm:$0xff]  ;;  %v11819_v21 = vld [vmem:[%s13906_s1 + $0x20] sm:$0xff] }
 0xdba   : > { %v4870_v23 = vadd.f32 1.4214138, %v4868_v19  ;;  %v4863_v29 = vmul.f32 1.0614054, %v4846_v24  ;;  %v11836_v19 = vld [vmem:[%s13906_s1 + $0xa8] sm:$0xff]  ;;  %v11855_v11 = vld [vmem:[%s13907_s3 + $0x40] sm:$0xff] }
 0xdbb   : > { %5453 = vmatpush.bf16.msra.mxu0 %v11829_v12  ;;  %v11863_v12 = vld [vmem:[%s13907_s3 + $0x80] sm:$0xff] }
 0xdbc   : > { %v4872_v31 = vmul.f32 %v4870_v23, %v4861_v28  ;;  %v4865_v32 = vadd.f32 -1.4531521, %v4863_v29  ;;  %v11827_v23 = vld [vmem:[%s13906_s1 + $0x60] sm:$0xff]  ;;  %v11826_v29 = vld [vmem:[%s13906_s1 + $0x58] sm:$0xff] }
 0xdbd   : > { %5393 = vmatpush.bf16.msra.mxu3 %v11820_v17  ;;  %5576 = vmatpush.bf16.msrb.mxu2 %v11844_v20 }
 0xdbe   : > { %v4874_v33 = vadd.f32 -0.28449672, %v4872_v31  ;;  %v4867_v35 = vmul.f32 %v4865_v32, %v4846_v24  ;;  %v11834_v31 = vld [vmem:[%s13906_s1 + $0x98] sm:$0xff] }
 0xdbf   : > { %5454 = vmatpush.bf16.msra.mxu0 %v11828_v18  ;;  %v11842_v32 = vld [vmem:[%s13906_s1 + $0xd8] sm:$0xff] }
 0xdc0   : > { %v4876_v27 = vmul.f32 %v4874_v33, %v4861_v28  ;;  %v4869_v38 = vadd.f32 1.4214138, %v4867_v35  ;;  %v11817_v33 = vld [vmem:[%s13906_s1 + $0x10] sm:$0xff] }
 0xdc1   : > { %5394 = vmatpush.bf16.msra.mxu3 %v11819_v21  ;;  %5577 = vmatpush.bf16.msrb.mxu2 %v11843_v22  ;;  %v11833_v35 = vld [vmem:[%s13906_s1 + $0x90] sm:$0xff] }
 0xdc2   : > { %v4878_v39 = vadd.f32 0.2548296, %v4876_v27  ;;  %v4871_v41 = vmul.f32 %v4869_v38, %v4846_v24  ;;  %v11841_v27 = vld [vmem:[%s13906_s1 + $0xd0] sm:$0xff]  ;;  %v11816_v38 = vld [vmem:[%s13906_s1 + $0x8] sm:$0xff] }
 0xdc3   : > { %5455 = vmatpush.bf16.msra.mxu0 %v11827_v23 }
 0xdc4   : > { %v4880_v42 = vmul.f32 %v4878_v39, %v4861_v28  ;;  %v4873_v44 = vadd.f32 -0.28449672, %v4871_v41  ;;  %v11824_v39 = vld [vmem:[%s13906_s1 + $0x48] sm:$0xff] }
 0xdc5   : > { %5395 = vmatpush.bf16.msra.mxu3 %v11818_v25  ;;  %5578 = vmatpush.bf16.msrb.mxu2 %v11842_v32  ;;  %v11840_v41 = vld [vmem:[%s13906_s1 + $0xc8] sm:$0xff]  ;;  %v12220_v25 = vld [vmem:[%s13908_s5] ss:$0 sm:$0xff]  ;;  %s13911_s5 = sld [smem:[#allocation30_spill]] }
 0xdc6   : > { %v4890_v13 = vmul.f32 %v12313_v14, %v4880_v42  ;;  %v4875_v45 = vmul.f32 %v4873_v44, %v4846_v24 }
 0xdc7   : > { %5456 = vmatpush.bf16.msra.mxu0 %v11826_v29 }
 0xdc8   : > { %v4894_v30 = vsub.f32 1.0, %v4890_v13  ;;  %v10044_v47 = vadd.f32 -1.0, %v4890_v13  ;;  %v4877_v48 = vadd.f32 0.2548296, %v4875_v45 }
 0xdc9   : > { %5396 = vmatpush.bf16.msra.mxu3 %v11817_v33  ;;  %5579 = vmatpush.bf16.msrb.mxu2 %v11841_v27  ;;  %v11886_v27 = vld [vmem:[%s13910_s7 + $0x38] sm:$0xff] }
 0xdca   : > { %v4898_v26 = vsel %vm4892_vm15, %v4894_v30, %v10044_v47  ;;  %v4879_v51 = vmul.f32 %v4877_v48, %v4846_v24  ;;  %v11835_v24 = vld [vmem:[%s13906_s1 + $0xa0] sm:$0xff] }
 0xdcb   : > { %v4900_v50 = vadd.f32 1.0, %v4898_v26  ;;  %5457 = vmatpush.bf16.msra.mxu0 %v11825_v34  ;;  %v11815_v30 = vld [vmem:[%s13906_s1] sm:$0xff] }
 0xdcc   : > { %v4889_v54 = vmul.f32 %v12315_v52, %v4879_v51  ;;  %v11823_v47 = vld [vmem:[%s13906_s1 + $0x40] sm:$0xff]  ;;  %v11870_v51 = vld [vmem:[%s13907_s3 + $0xb8] sm:$0xff] }
 0xdcd   : > { %v4902_v53 = vmul.f32 %v4900_v50, %v4824_v49  ;;  %5397 = vmatpush.bf16.msra.mxu3 %v11816_v38  ;;  %5580 = vmatpush.bf16.msrb.mxu2 %v11840_v41  ;;  %v11831_v48 = vld [vmem:[%s13906_s1 + $0x80] sm:$0xff]  ;;  %v11854_v49 = vld [vmem:[%s13907_s3 + $0x38] sm:$0xff]  ;;  %v11885_v41 = vld [vmem:[%s13910_s7 + $0x30] sm:$0xff] }
 0xdce   : > { %v4893_v56 = vsub.f32 1.0, %v4889_v54  ;;  %v10043_v57 = vadd.f32 -1.0, %v4889_v54  ;;  %v11839_v26 = vld [vmem:[%s13906_s1 + $0xc0] sm:$0xff]  ;;  %v11862_v50 = vld [vmem:[%s13907_s3 + $0x78] sm:$0xff]  ;;  %v11861_v54 = vld [vmem:[%s13907_s3 + $0x70] sm:$0xff] }
 0xdcf   : > { %v4904_v55 = vpack.c.bf16 %v4902_v53, %v4902_v53  ;;  %5458 = vmatpush.bf16.msra.mxu0 %v11824_v39  ;;  %v11878_v52 = vld [vmem:[%s13907_s3 + $0xf8] sm:$0xff]  ;;  %v11853_v53 = vld [vmem:[%s13907_s3 + $0x30] sm:$0xff] }
 0xdd0   : > { %v4897_v61 = vsel %vm4891_vm0, %v4893_v56, %v10043_v57  ;;  %v11877_v56 = vld [vmem:[%s13907_s3 + $0xf0] sm:$0xff]  ;;  %v11852_v57 = vld [vmem:[%s13907_s3 + $0x28] sm:$0xff]  ;;  %v11894_v38 = vld [vmem:[%s13910_s7 + $0x78] sm:$0xff] }
 0xdd1   : > { %5025 = vmatmul.bf16.vlgmr.msra.gmra.mxu2 %v4904_v55  ;;  %v4899_v58 = vadd.f32 1.0, %v4897_v61  ;;  %5398 = vmatpush.bf16.msra.mxu3 %v11815_v30  ;;  %v11869_v55 = vld [vmem:[%s13907_s3 + $0xb0] sm:$0xff]  ;;  %v11860_v61 = vld [vmem:[%s13907_s3 + $0x68] sm:$0xff]  ;;  %v11902_v39 = vld [vmem:[%s13910_s7 + $0xb8] sm:$0xff] }
 0xdd2   : > { %5581 = vmatpush.bf16.msrb.mxu2 %v11839_v26  ;;  %v11900_v30 = vld [vmem:[%s13910_s7 + $0xa8] sm:$0xff]  ;;  %v11891_v26 = vld [vmem:[%s13910_s7 + $0x60] sm:$0xff] }
 0xdd3   : > { %v4901_v59 = vmul.f32 %v4899_v58, %v4823_v37  ;;  %5459 = vmatpush.bf16.msra.mxu0 %v11823_v47  ;;  %v11868_v37 = vld [vmem:[%s13907_s3 + $0xa8] sm:$0xff] }
 0xdd4   : > { %v11876_v58 = vld [vmem:[%s13907_s3 + $0xe8] sm:$0xff] }
 0xdd5   : > { %v4903_v36 = vpack.c.bf16 %v4901_v59, %v4901_v59  ;;  %5651 = vmatpush.bf16.msrb.mxu3 %v11854_v49  ;;  %v11851_v59 = vld [vmem:[%s13907_s3 + $0x20] sm:$0xff]  ;;  %v11908_v47 = vld [vmem:[%s13910_s7 + $0xe8] sm:$0xff] }
 0xdd6   : > { %5834 = vmatpush.bf16.msra.mxu2 %v11878_v52  ;;  %v11899_v49 = vld [vmem:[%s13910_s7 + $0xa0] sm:$0xff]  ;;  %v11890_v52 = vld [vmem:[%s13910_s7 + $0x58] sm:$0xff] }
 0xdd7   : > { %5012 = vmatmul.bf16.vlgmr.msra.gmra.mxu1 %v4903_v36  ;;  %5712 = vmatpush.bf16.msrb.mxu0 %v11862_v50  ;;  %v11859_v36 = vld [vmem:[%s13907_s3 + $0x60] sm:$0xff] }
 0xdd8   : > { %v11907_v50 = vld [vmem:[%s13910_s7 + $0xe0] sm:$0xff] }
 0xdd9   : > { %5652 = vmatpush.bf16.msrb.mxu3 %v11853_v53  ;;  %v11898_v53 = vld [vmem:[%s13910_s7 + $0x98] sm:$0xff] }
 0xdda   : > { %5835 = vmatpush.bf16.msra.mxu2 %v11877_v56  ;;  %v11889_v56 = vld [vmem:[%s13910_s7 + $0x50] sm:$0xff] }
 0xddb   : > { %5713 = vmatpush.bf16.msrb.mxu0 %v11861_v54  ;;  %v11906_v54 = vld [vmem:[%s13910_s7 + $0xd8] sm:$0xff] }
 0xddd   : > { %5653 = vmatpush.bf16.msrb.mxu3 %v11852_v57  ;;  %v11897_v57 = vld [vmem:[%s13910_s7 + $0x90] sm:$0xff] }
 0xdde   : > { %5836 = vmatpush.bf16.msra.mxu2 %v11876_v58  ;;  %v11888_v58 = vld [vmem:[%s13910_s7 + $0x48] sm:$0xff] }
 0xddf   : > { %5714 = vmatpush.bf16.msrb.mxu0 %v11860_v61  ;;  %v11905_v61 = vld [vmem:[%s13910_s7 + $0xd0] sm:$0xff] }
 0xde1   : > { %5654 = vmatpush.bf16.msrb.mxu3 %v11851_v59  ;;  %v11896_v59 = vld [vmem:[%s13910_s7 + $0x88] sm:$0xff] }
 0xde3   : > { %5715 = vmatpush.bf16.msrb.mxu0 %v11859_v36  ;;  %v11904_v36 = vld [vmem:[%s13910_s7 + $0xc8] sm:$0xff] }
 0xe54   : > { %v5026_v63 = vpop.f32.mrf.mxu2  ;;  %v5013_v0 = vpop.f32.mrf.mxu1 }
 0xe55   : > { %v5014_v1 = vadd.f32 %v12218_v62, %v5013_v0  ;;  %v11867_v62 = vld [vmem:[%s13907_s3 + $0xa0] sm:$0xff]  ;;  %v11850_v0 = vld [vmem:[%s13907_s3 + $0x18] sm:$0xff] }
 0xe56   : > { %5655 = vmatpush.bf16.msrb.mxu3 %v11850_v0  ;;  %v11895_v0 = vld [vmem:[%s13910_s7 + $0x80] sm:$0xff] }
 0xe57   : > { %v5027_v46 = vadd.f32 %v5026_v63, %v5014_v1  ;;  %v11875_v63 = vld [vmem:[%s13907_s3 + $0xe0] sm:$0xff]  ;;  %v11858_v1 = vld [vmem:[%s13907_s3 + $0x58] sm:$0xff] }
 0xe58   : > { %5837 = vmatpush.bf16.msra.mxu2 %v11875_v63  ;;  %5716 = vmatpush.bf16.msrb.mxu0 %v11858_v1  ;;  %v11887_v63 = vld [vmem:[%s13910_s7 + $0x40] sm:$0xff] }
 0xe59   : > { %v5033_v3 = vmul.f32 %v12219_v2, %v5027_v46  ;;  %v11866_v2 = vld [vmem:[%s13907_s3 + $0x98] sm:$0xff]  ;;  %v11903_v1 = vld [vmem:[%s13910_s7 + $0xc0] sm:$0xff] }
 0xe5a   : > { %v11874_v46 = vld [vmem:[%s13907_s3 + $0xd8] sm:$0xff] }
 0xe5b   : > { %v5034_v43 = vadd.f32 %v5033_v3, %v13202_v6  ;;  %v11837_v6 = vld [vmem:[%s13906_s1 + $0xb0] sm:$0xff] }
 0xe5c   : > { %v5028_v4 = vpop.f32.mrf.mxu2  ;;  %v5015_v28 = vpop.f32.mrf.mxu1  ;;  %5514 = vmatpush.bf16.msrb.mxu1 %v11837_v6  ;;  %5838 = vmatpush.bf16.msra.mxu2 %v11874_v46  ;;  %v11849_v3 = vld [vmem:[%s13907_s3 + $0x10] sm:$0xff]  ;;  %v11871_v6 = vld [vmem:[%s13907_s3 + $0xc0] sm:$0xff] }
 0xe5d   : > { %v5037_v5 = vsel %vm1717_vm2, %v5034_v43, 0.0  ;;  %v11857_v4 = vld [vmem:[%s13907_s3 + $0x50] sm:$0xff]  ;;  %5656 = vmatpush.bf16.msrb.mxu3 %v11849_v3 }
 0xe5e   : > { %5038 = vadd.xlane.f32.xlu0 %v5037_v5  ;;  %v11873_v28 = vld [vmem:[%s13907_s3 + $0xd0] sm:$0xff]  ;;  %5717 = vmatpush.bf16.msrb.mxu0 %v11857_v4  ;;  %v11848_v5 = vld [vmem:[%s13907_s3 + $0x8] sm:$0xff] }
 0xe60   : > { %5515 = vmatpush.bf16.msrb.mxu1 %v11836_v19  ;;  %5839 = vmatpush.bf16.msra.mxu2 %v11873_v28 }
 0xe61   : > { %5657 = vmatpush.bf16.msrb.mxu3 %v11848_v5  ;;  %v12226_v5 = vld [vmem:[%s13911_s5 + $0x1] ss:$0 sm:$0xff] }
 0xe62   : > { %5718 = vmatpush.bf16.msrb.mxu0 %v11856_v7 }
 0xe64   : > { %5516 = vmatpush.bf16.msrb.mxu1 %v11835_v24  ;;  %5840 = vmatpush.bf16.msra.mxu2 %v11872_v9 }
 0xe65   : > { %5658 = vmatpush.bf16.msrb.mxu3 %v11847_v10 }
 0xe66   : > { %5719 = vmatpush.bf16.msrb.mxu0 %v11855_v11 }
 0xe68   : > { %5517 = vmatpush.bf16.msrb.mxu1 %v11834_v31  ;;  %5841 = vmatpush.bf16.msra.mxu2 %v11871_v6  ;;  %v12221_v31 = vld [vmem:[%s13909_s6] ss:$0 sm:$0xff]  ;;  %s13912_s6 = sld [smem:[#allocation29_spill]] }
 0xe6c   : > { %5518 = vmatpush.bf16.msrb.mxu1 %v11833_v35 }
 0xe70   : > { %5519 = vmatpush.bf16.msrb.mxu1 %v11832_v40  ;;  %v11910_v40 = vld [vmem:[%s13910_s7 + $0xf8] sm:$0xff] }
 0xe74   : > { %5520 = vmatpush.bf16.msrb.mxu1 %v11831_v48  ;;  %v11883_v48 = vld [vmem:[%s13910_s7 + $0x20] sm:$0xff] }
 0xe78   : > { %5773 = vmatpush.bf16.msra.mxu1 %v11870_v51  ;;  %v11882_v51 = vld [vmem:[%s13910_s7 + $0x18] sm:$0xff] }
 0xe7c   : > { %5774 = vmatpush.bf16.msra.mxu1 %v11869_v55  ;;  %v11881_v55 = vld [vmem:[%s13910_s7 + $0x10] sm:$0xff] }
 0xe80   : > { %5775 = vmatpush.bf16.msra.mxu1 %v11868_v37  ;;  %v11880_v37 = vld [vmem:[%s13910_s7 + $0x8] sm:$0xff] }
 0xe84   : > { %5776 = vmatpush.bf16.msra.mxu1 %v11867_v62  ;;  %v11879_v62 = vld [vmem:[%s13910_s7] sm:$0xff] }
 0xe88   : > { %5777 = vmatpush.bf16.msra.mxu1 %v11866_v2 }
 0xed1   : > { %v5039_v42 = vpop.xlane.xlu0 %5038 }
 0xed2   : > { %v5040_v14 = vmul.f32 %v5039_v42, %v12788_v60  ;;  %v11893_v42 = vld [vmem:[%s13910_s7 + $0x70] sm:$0xff] }
 0xed4   : > { %v13315_v44 = vsub.f32 %v5034_v43, %v5040_v14  ;;  %v11865_v43 = vld [vmem:[%s13907_s3 + $0x90] sm:$0xff] }
 0xed5   : > { %5778 = vmatpush.bf16.msra.mxu1 %v11865_v43  ;;  %v11901_v14 = vld [vmem:[%s13910_s7 + $0xb0] sm:$0xff] }
 0xed6   : > { %v5042_v13 = vmul.f32 %v13315_v44, %v13315_v44 }
 0xed8   : > { %v5043_v45 = vsel %vm1717_vm2, %v5042_v13, 0.0  ;;  %v11884_v13 = vld [vmem:[%s13910_s7 + $0x28] sm:$0xff] }
 0xed9   : > { %5044 = vadd.xlane.f32.xlu1 %v5043_v45  ;;  %5779 = vmatpush.bf16.msra.mxu1 %v11864_v8  ;;  %v11892_v45 = vld [vmem:[%s13910_s7 + $0x68] sm:$0xff]  ;;  %v12227_v8 = vld [vmem:[%s13911_s5 + $0x2] ss:$0 sm:$0xff] }
 0xedd   : > { %5780 = vmatpush.bf16.msra.mxu1 %v11863_v12 }
 0xf4c   : > { %v5045_v16 = vpop.xlane.xlu1 %5044 }
 0xf4d   : > { %v5046_v17 = vmul.f32 %v5045_v16, %v12788_v60  ;;  %v12222_v16 = vld [vmem:[%s13912_s6 + $0x1] ss:$0 sm:$0xff] }
 0xf4f   : > { %v5047_v18 = vadd.f32 1e-06, %v5046_v17 }
 0xf51   : > { %12316 = vrsqrt.f32 %v5047_v18  ;;  %vm5054_vm3 = vweird.f32 %v5047_v18 }
 0xf57   : > { %v12317_v19 = vpop.eup %12316 }
 0xf58   : > { %v5049_v20 = vmul.f32 %v12317_v19, %v5047_v18  ;;  %vm5055_vm1 = vweird.f32 %v12317_v19  ;;  %v12228_v18 = vld [vmem:[%s13911_s5] ss:$0 sm:$0xff] }
 0xf59   : > { %vm5056_vm4 = vmor %vm5054_vm3, %vm5055_vm1 }
 0xf5a   : > { %v5050_v21 = vmul.f32 %v12317_v19, %v5049_v20 }
 0xf5c   : > { %v5051_v23 = vmul.f32 0.5, %v5050_v21  ;;  %v12229_v21 = vld [vmem:[%s13911_s5 + $0x3] ss:$0 sm:$0xff] }
 0xf5e   : > { %v5052_v24 = vsub.f32 1.5, %v5051_v23 }
 0xf60   : > { %v5053_v22 = vmul.f32 %v12317_v19, %v5052_v24 }
 0xf62   : > { %v5057_v29 = vsel %vm5056_vm4, %v12317_v19, %v5053_v22  ;;  %v12223_v19 = vld [vmem:[%s13912_s6 + $0x2] ss:$0 sm:$0xff] }
 0xf63   : > { %v5058_v32 = vmul.f32 %v5057_v29, %v13315_v44  ;;  %v11909_v44 = vld [vmem:[%s13910_s7 + $0xf0] sm:$0xff] }
 0xf65   : > { %v5062_v33 = vmul.f32 %v12220_v25, %v5058_v32 }
 0xf67   : > { %v13360_v34 = vadd.f32 %v12221_v31, %v5062_v33 }
 0xf69   : > { %v13364_v35 = vpack.c.bf16 %v13360_v34, %v13360_v34 }
 0xf6b   : > { %5399 = vmatmul.bf16.vlgmr.msra.gmra.mxu3 %v13364_v35  ;;  %5460 = vmatmul.bf16.vlgmr.msra.gmra.mxu0 %v13364_v35 }
 0xf6c   : > { %5521 = vmatmul.bf16.vlgmr.msrb.gmra.mxu1 %v13364_v35  ;;  %5582 = vmatmul.bf16.vlgmr.msrb.gmra.mxu2 %v13364_v35 }
 0xf6d   : > { %5911 = vmatpush.bf16.msra.mxu3 %v11886_v27  ;;  %5972 = vmatpush.bf16.msra.mxu0 %v11894_v38  ;;  %v12224_v27 = vld [vmem:[%s13912_s6] ss:$0 sm:$0xff] }
 0xf6e   : > { %6033 = vmatpush.bf16.msrb.mxu1 %v11902_v39  ;;  %6094 = vmatpush.bf16.msrb.mxu2 %v11910_v40  ;;  %v12225_v40 = vld [vmem:[%s13912_s6 + $0x3] ss:$0 sm:$0xff] }
 0xf71   : > { %5912 = vmatpush.bf16.msra.mxu3 %v11885_v41  ;;  %5973 = vmatpush.bf16.msra.mxu0 %v11893_v42 }
 0xf72   : > { %6034 = vmatpush.bf16.msrb.mxu1 %v11901_v14  ;;  %6095 = vmatpush.bf16.msrb.mxu2 %v11909_v44 }
 0xf75   : > { %5913 = vmatpush.bf16.msra.mxu3 %v11884_v13  ;;  %5974 = vmatpush.bf16.msra.mxu0 %v11892_v45 }
 0xf76   : > { %6035 = vmatpush.bf16.msrb.mxu1 %v11900_v30  ;;  %6096 = vmatpush.bf16.msrb.mxu2 %v11908_v47 }
 0xf79   : > { %5914 = vmatpush.bf16.msra.mxu3 %v11883_v48  ;;  %5975 = vmatpush.bf16.msra.mxu0 %v11891_v26  ;;  %v12230_v48 = vld [vmem:[%s13913_s8 + $0x1] ss:$0 sm:$0xff] }
 0xf7a   : > { %6036 = vmatpush.bf16.msrb.mxu1 %v11899_v49  ;;  %6097 = vmatpush.bf16.msrb.mxu2 %v11907_v50  ;;  %v12231_v49 = vld [vmem:[%s13913_s8 + $0x2] ss:$0 sm:$0xff] }
 0xf7b   : > { %5659 = vmatmul.bf16.vlgmr.msrb.gmra.mxu3 %v13364_v35  ;;  %5720 = vmatmul.bf16.vlgmr.msrb.gmra.mxu0 %v13364_v35 }
 0xf7c   : > { %5781 = vmatmul.bf16.vlgmr.msra.gmra.mxu1 %v13364_v35  ;;  %5842 = vmatmul.bf16.vlgmr.msra.gmra.mxu2 %v13364_v35 }
 0xf7d   : > { %5915 = vmatpush.bf16.msra.mxu3 %v11882_v51  ;;  %5976 = vmatpush.bf16.msra.mxu0 %v11890_v52 }
 0xf7e   : > { %6037 = vmatpush.bf16.msrb.mxu1 %v11898_v53  ;;  %6098 = vmatpush.bf16.msrb.mxu2 %v11906_v54 }
 0xf81   : > { %5916 = vmatpush.bf16.msra.mxu3 %v11881_v55  ;;  %5977 = vmatpush.bf16.msra.mxu0 %v11889_v56 }
 0xf82   : > { %6038 = vmatpush.bf16.msrb.mxu1 %v11897_v57  ;;  %6099 = vmatpush.bf16.msrb.mxu2 %v11905_v61  ;;  %v12232_v57 = vld [vmem:[%s13913_s8] ss:$0 sm:$0xff] }
 0xf85   : > { %5917 = vmatpush.bf16.msra.mxu3 %v11880_v37  ;;  %5978 = vmatpush.bf16.msra.mxu0 %v11888_v58  ;;  %v12233_v37 = vld [vmem:[%s13913_s8 + $0x3] ss:$0 sm:$0xff] }
 0xf86   : > { %6039 = vmatpush.bf16.msrb.mxu1 %v11896_v59  ;;  %6100 = vmatpush.bf16.msrb.mxu2 %v11904_v36 }
 0xf89   : > { %5918 = vmatpush.bf16.msra.mxu3 %v11879_v62  ;;  %5979 = vmatpush.bf16.msra.mxu0 %v11887_v63 }
 0xf8a   : > { %6040 = vmatpush.bf16.msrb.mxu1 %v11895_v0  ;;  %6101 = vmatpush.bf16.msrb.mxu2 %v11903_v1 }
 0xf8c   : > { %5919 = vmatmul.bf16.vlgmr.msra.gmra.mxu3 %v13364_v35  ;;  %5980 = vmatmul.bf16.vlgmr.msra.gmra.mxu0 %v13364_v35 }
 0xf8d   : > { %6041 = vmatmul.bf16.vlgmr.msrb.gmra.mxu1 %v13364_v35  ;;  %6102 = vmatmul.bf16.vlgmr.msrb.gmra.mxu2 %v13364_v35 }
 0xfe8   : > { %v5461_v2 = vpop.f32.mrf.mxu0 }
 0xfe9   : > { %v5522_v46 = vpop.f32.mrf.mxu1  ;;  %v5600_v25 = vadd.f32 %v12222_v16, %v5461_v2 }
 0xfea   : > { %v5601_v32 = vadd.f32 %v12223_v19, %v5522_v46 }
 0xfeb   : > { %v6124_v42 = vpack.c.bf16 %v5600_v25, %v5600_v25 }
 0xfec   : > { %v6125_v44 = vpack.c.bf16 %v5601_v32, %v5601_v32 }
 0xfee   : > { %v5400_v3 = vpop.f32.mrf.mxu3 }
 0xfef   : > { %v5583_v4 = vpop.f32.mrf.mxu2  ;;  %v5599_v45 = vadd.f32 %v12224_v27, %v5400_v3 }
 0xff0   : > { %v5463_v43 = vpop.f32.mrf.mxu0  ;;  %v5602_v30 = vadd.f32 %v12225_v40, %v5583_v4 }
 0xff1   : > { %v5524_v28 = vpop.f32.mrf.mxu1  ;;  %v6123_v50 = vpack.c.bf16 %v5599_v45, %v5599_v45 }
 0xff2   : > { %v6126_v52 = vpack.c.bf16 %v5602_v30, %v5602_v30 }
 0xff6   : > { %v5402_v7 = vpop.f32.mrf.mxu3 }
 0xff7   : > { %v5585_v9 = vpop.f32.mrf.mxu2 }
 0xff8   : > { %v5721_v10 = vpop.f32.mrf.mxu0 }
 0xff9   : > { %v5860_v11 = vadd.f32 %v12226_v5, %v5721_v10  ;;  %v5782_v12 = vpop.f32.mrf.mxu1 }
 0xffa   : > { %v5861_v6 = vadd.f32 %v12227_v8, %v5782_v12 }
 0xffb   : > { %v6128_v17 = vpack.c.bf16 %v5860_v11, %v5860_v11 }
 0xffc   : > { %v6129_v20 = vpack.c.bf16 %v5861_v6, %v5861_v6 }
 0xffd   : > { %v6154_v23 = vsel %vm2544_vm7, %v6128_v17, 0 }
 0xffe   : > { %v6173_v24 = vsel %vm2544_vm7, %v6129_v20, 0  ;;  %v5660_v22 = vpop.f32.mrf.mxu3  ;;  %6163 = vmatpush.bf16.xpose.msrb.mxu0 %v6154_v23 }
 0xfff   : > { %v5859_v29 = vadd.f32 %v12228_v18, %v5660_v22  ;;  %v5843_v31 = vpop.f32.mrf.mxu2  ;;  %6182 = vmatpush.bf16.xpose.msra.mxu1 %v6173_v24 }
0x1000   : > { %v5862_v33 = vadd.f32 %v12229_v21, %v5843_v31  ;;  %v5723_v35 = vpop.f32.mrf.mxu0 }
0x1001   : > { %v6127_v38 = vpack.c.bf16 %v5859_v29, %v5859_v29  ;;  %v5784_v39 = vpop.f32.mrf.mxu1 }
0x1002   : > { %v6130_v41 = vpack.c.bf16 %v5862_v33, %v5862_v33 }
0x1003   : > { %v6135_v14 = vsel %vm2544_vm7, %v6127_v38, 0 }
0x1004   : > { %v6192_v13 = vsel %vm2544_vm7, %v6130_v41, 0  ;;  %6144 = vmatpush.bf16.xpose.msrb.mxu3 %v6135_v14 }
0x1005   : > { %6201 = vmatpush.bf16.xpose.msra.mxu2 %v6192_v13  ;;  %10494 = vmatmul.msk.bf16.vlgmr.msrb.gmra.mxu0 %vm2544_vm7, %v6124_v42 }
0x1006   : > { %10495 = vmatmul.msk.bf16.vlgmr.msra.gmra.mxu1 %vm2544_vm7, %v6125_v44  ;;  %v5662_v47 = vpop.f32.mrf.mxu3 }
0x1007   : > { %v5845_v26 = vpop.f32.mrf.mxu2  ;;  %v11914_v47 = vld [vmem:[%s13914_s9 + $0x18] sm:$0xff] }
0x1009   : > { %v5981_v51 = vpop.f32.mrf.mxu0 }
0x100a   : > { %v6120_v53 = vadd.f32 %v12230_v48, %v5981_v51  ;;  %v6042_v54 = vpop.f32.mrf.mxu1 }
0x100b   : > { %v6121_v55 = vadd.f32 %v12231_v49, %v6042_v54  ;;  %10493 = vmatmul.msk.bf16.vlgmr.msrb.gmra.mxu3 %vm2544_vm7, %v6123_v50 }
0x100c   : > { %v6256_v56 = vpack.c.bf16 %v6120_v53, %v6120_v53  ;;  %10496 = vmatmul.msk.bf16.vlgmr.msra.gmra.mxu2 %vm2544_vm7, %v6126_v52 }
0x100d   : > { %v6257_v61 = vpack.c.bf16 %v6121_v55, %v6121_v55 }
0x100e   : > { %v6282_v58 = vand.u32 %v6256_v56, %v12905_v15 }
0x100f   : > { %v6301_v59 = vand.u32 %v6257_v61, %v12905_v15  ;;  %v5920_v36 = vpop.f32.mrf.mxu3 }
0x1010   : > { %v6119_v62 = vadd.f32 %v12232_v57, %v5920_v36  ;;  %v6103_v63 = vpop.f32.mrf.mxu2  ;;  %6291 = vmatpush.bf16.msra.mxu0 %v6282_v58  ;;  %v11913_v36 = vld [vmem:[%s13914_s9 + $0x10] sm:$0xff] }
0x1011   : > { %v6122_v0 = vadd.f32 %v12233_v37, %v6103_v63  ;;  %6310 = vmatpush.bf16.msrb.mxu1 %v6301_v59  ;;  %v5983_v1 = vpop.f32.mrf.mxu0  ;;  %v11918_v63 = vld [vmem:[%s13914_s9 + $0x38] sm:$0xff] }
0x1012   : > { %v6255_v2 = vpack.c.bf16 %v6119_v62, %v6119_v62  ;;  %v6044_v46 = vpop.f32.mrf.mxu1  ;;  %v11912_v62 = vld [vmem:[%s13914_s9 + $0x8] sm:$0xff]  ;;  %v11911_v1 = vld [vmem:[%s13914_s9] sm:$0xff] }
0x1013   : > { %v6258_v3 = vpack.c.bf16 %v6122_v0, %v6122_v0  ;;  %v11916_v0 = vld [vmem:[%s13914_s9 + $0x28] sm:$0xff]  ;;  %v11915_v46 = vld [vmem:[%s13914_s9 + $0x20] sm:$0xff] }
0x1014   : > { %v6263_v4 = vand.u32 %v6255_v2, %v12905_v15  ;;  %6386 = vmatpush.bf16.msrb.mxu0 %v11912_v62  ;;  %v11917_v2 = vld [vmem:[%s13914_s9 + $0x30] sm:$0xff] }
0x1015   : > { %v6320_v43 = vand.u32 %v6258_v3, %v12905_v15  ;;  %6415 = vmatpush.bf16.msra.mxu1 %v11916_v0  ;;  %v10563_v62 = vld [vmem:[%s13916_s13 + $0x30] sm:$0xf]  ;;  %v11925_v0 = vld [vmem:[%s13916_s13 + $0x34] sm:$0xf] }
0x1016   : > { %6272 = vmatpush.bf16.msra.mxu3 %v6263_v4 }
0x1017   : > { %6329 = vmatpush.bf16.msrb.mxu2 %v6320_v43  ;;  %v5922_v28 = vpop.f32.mrf.mxu3 }
0x1018   : > { %v6105_v5 = vpop.f32.mrf.mxu2  ;;  %6387 = vmatpush.bf16.msrb.mxu0 %v11911_v1 }
0x1019   : > { %6416 = vmatpush.bf16.msra.mxu1 %v11915_v46 }
0x101a   : > { %6358 = vmatpush.bf16.msrb.mxu3 %v11914_v47  ;;  %v11932_v47 = vld [vmem:[%s13916_s13 + $0x64] sm:$0xf0] }
0x101b   : > { %6445 = vmatpush.bf16.msra.mxu2 %v11918_v63  ;;  %v11926_v63 = vld [vmem:[%s13916_s13 + $0x34] sm:$0xf0] }
0x101c   : > { %v10564_v1 = vor.u32 %v11926_v63, %v10563_v62 }
0x101e   : > { %6359 = vmatpush.bf16.msrb.mxu3 %v11913_v36 }
0x101f   : > { %6446 = vmatpush.bf16.msra.mxu2 %v11917_v2  ;;  %v10565_v2 = vld [vmem:[%s13916_s13 + $0x38] sm:$0xf0] }
0x1020   : > { %v10568_v46 = vor.u32 %v11925_v0, %v10565_v2 }
0x1082   : > { %v6165_v7 = vpop.f32.mrf.mxu0 }
0x1083   : > { %v6184_v8 = vpop.f32.mrf.mxu1  ;;  %v6210_v9 = vsel %vm2621_vm10, %v6165_v7, -inf }
0x1084   : > { %6211 = vmax.xlane.f32.xlu1 %v6210_v9  ;;  %v6213_v20 = vsel %vm2621_vm10, %v6184_v8, -inf }
0x108a   : > { %v6167_v10 = vpop.f32.mrf.mxu0 }
0x108b   : > { %v6186_v11 = vpop.f32.mrf.mxu1 }
0x108e   : > { %v6146_v12 = vpop.f32.mrf.mxu3 }
0x108f   : > { %v6203_v6 = vpop.f32.mrf.mxu2  ;;  %v6207_v16 = vsel %vm2621_vm10, %v6146_v12, -inf }
0x1090   : > { %v6216_v17 = vsel %vm2621_vm10, %v6203_v6, -inf  ;;  %6208 = vmax.xlane.f32.xlu0 %v6207_v16 }
0x1091   : > { %6217 = vmax.xlane.f32.xlu2 %v6216_v17 }
0x1096   : > { %v6148_v18 = vpop.f32.mrf.mxu3 }
0x1097   : > { %v6205_v19 = vpop.f32.mrf.mxu2 }
0x1099   : > { %6214 = vmax.xlane.f32.xlu2 %v6213_v20 }
0x10f7   : > { %v6212_v21 = vpop.xlane.xlu1 %6211 }
0x10f8   : > { %v6220_v23 = vsub.f32 %v6165_v7, %v6212_v21 }
0x10fa   : > { %v6225_v24 = vmul.f32 1.442695, %v6220_v23  ;;  %v12234_v23 = vld [vmem:[%s13915_s10] ss:$0 sm:$0xff] }
0x10fc   : > { %12318 = vpow2.f32 %v6225_v24 }
0x1102   : > { %v12319_v22 = vpop.eup %12318 }
0x1103   : > { %v6209_v25 = vpop.xlane.xlu0 %6208  ;;  %v6234_v29 = vsel %vm2621_vm10, %v12319_v22, 0.0 }
0x1104   : > { %v6218_v31 = vpop.xlane.xlu2 %6217  ;;  %v6219_v32 = vsub.f32 %v6146_v12, %v6209_v25  ;;  %6235 = vadd.xlane.f32.xlu2 %v6234_v29 }
0x1105   : > { %v6222_v33 = vsub.f32 %v6203_v6, %v6218_v31 }
0x1106   : > { %v6223_v35 = vmul.f32 1.442695, %v6219_v32 }
0x1107   : > { %v6229_v27 = vmul.f32 1.442695, %v6222_v33 }
0x1108   : > { %12320 = vpow2.f32 %v6223_v35 }
0x1109   : > { %12322 = vpow2.f32 %v6229_v27  ;;  %v10595_v27 = vld [vmem:[%s13916_s13 + $0x70] sm:$0xf] }
0x110c   : > { %v6215_v38 = vpop.xlane.xlu2 %6214 }
0x110d   : > { %v6221_v39 = vsub.f32 %v6184_v8, %v6215_v38  ;;  %v11934_v38 = vld [vmem:[%s13916_s13 + $0x74] sm:$0xf0] }
0x110e   : > { %v12321_v40 = vpop.eup %12320 }
0x110f   : > { %v12323_v41 = vpop.eup %12322  ;;  %v6227_v42 = vmul.f32 1.442695, %v6221_v39  ;;  %v6231_v14 = vsel %vm2621_vm10, %v12321_v40, 0.0  ;;  %v11933_v39 = vld [vmem:[%s13916_s13 + $0x74] sm:$0xf] }
0x1110   : > { %v6240_v44 = vsel %vm2621_vm10, %v12323_v41, 0.0  ;;  %6232 = vadd.xlane.f32.xlu1 %v6231_v14 }
0x1111   : > { %12324 = vpow2.f32 %v6227_v42  ;;  %6241 = vadd.xlane.f32.xlu0 %v6240_v44 }
0x1117   : > { %v12325_v13 = vpop.eup %12324 }
0x1118   : > { %v6237_v45 = vsel %vm2621_vm10, %v12325_v13, 0.0 }
0x1119   : > { %6238 = vadd.xlane.f32.xlu0 %v6237_v45 }
0x1177   : > { %v6236_v30 = vpop.xlane.xlu2 %6235 }
0x1178   : > { %12326 = vrcp.f32 %v6236_v30  ;;  %v10587_v30 = vld [vmem:[%s13916_s13 + $0x60] sm:$0xf] }
0x117e   : > { %v12327_v48 = vpop.eup %12326 }
0x117f   : > { %v6248_v26 = vmul.f32 %v12327_v48, %v12319_v22  ;;  %v11931_v48 = vld [vmem:[%s13916_s13 + $0x64] sm:$0xf] }
0x1181   : > { %v6252_v49 = vpack.c.bf16 %v6248_v26, %v6248_v26  ;;  %v10588_v26 = vor.u32 %v11932_v47, %v10587_v30  ;;  %v12235_v47 = vld [vmem:[%s13918_s17] ss:$0 sm:$0xff] }
0x1183   : > { %10498 = vmatmul.msk.bf16.vlgmr.msra.gmra.mxu0 %vm2674_vm11, %v6252_v49  ;;  %v6233_v50 = vpop.xlane.xlu1 %6232  ;;  %v10589_v49 = vld [vmem:[%s13916_s13 + $0x68] sm:$0xf0] }
0x1184   : > { %12328 = vrcp.f32 %v6233_v50  ;;  %v6242_v51 = vpop.xlane.xlu0 %6241  ;;  %v10592_v50 = vor.u32 %v11931_v48, %v10589_v49 }
0x1185   : > { %12330 = vrcp.f32 %v6242_v51  ;;  %v10579_v51 = vld [vmem:[%s13916_s13 + $0x50] sm:$0xf] }
0x118a   : > { %v12329_v52 = vpop.eup %12328 }
0x118b   : > { %v12331_v53 = vpop.eup %12330  ;;  %v6247_v54 = vmul.f32 %v12329_v52, %v12321_v40  ;;  %v10596_v40 = vor.u32 %v11934_v38, %v10595_v27  ;;  %v11930_v52 = vld [vmem:[%s13916_s13 + $0x54] sm:$0xf0]  ;;  %v11947_v27 = vld [vmem:[%s13917_s14 + $0x60] sm:$0xff] }
0x118c   : > { %v6250_v55 = vmul.f32 %v12331_v53, %v12323_v41  ;;  %v6239_v56 = vpop.xlane.xlu0 %6238  ;;  %v10597_v41 = vld [vmem:[%s13916_s13 + $0x78] sm:$0xf0]  ;;  %v11929_v53 = vld [vmem:[%s13916_s13 + $0x54] sm:$0xf]  ;;  %v11939_v38 = vld [vmem:[%s13917_s14 + $0x20] sm:$0xff] }
0x118d   : > { %v6251_v57 = vpack.c.bf16 %v6247_v54, %v6247_v54  ;;  %12332 = vrcp.f32 %v6239_v56  ;;  %v10600_v42 = vor.u32 %v11933_v39, %v10597_v41  ;;  %v10580_v54 = vor.u32 %v11930_v52, %v10579_v51  ;;  %v11946_v41 = vld [vmem:[%s13917_s14 + $0x58] sm:$0xff] }
0x118e   : > { %v6254_v61 = vpack.c.bf16 %v6250_v55, %v6250_v55  ;;  %v10581_v55 = vld [vmem:[%s13916_s13 + $0x58] sm:$0xf0] }
0x118f   : > { %10497 = vmatmul.msk.bf16.vlgmr.msra.gmra.mxu3 %vm2674_vm11, %v6251_v57  ;;  %6587 = vmatpush.bf16.msra.mxu0 %v10600_v42  ;;  %v10584_v56 = vor.u32 %v11929_v53, %v10581_v55  ;;  %v10571_v57 = vld [vmem:[%s13916_s13 + $0x40] sm:$0xf]  ;;  %v11938_v42 = vld [vmem:[%s13917_s14 + $0x18] sm:$0xff]  ;;  %v11944_v53 = vld [vmem:[%s13917_s14 + $0x48] sm:$0xff] }
0x1190   : > { %10500 = vmatmul.msk.bf16.vlgmr.msrb.gmra.mxu2 %vm2674_vm11, %v6254_v61  ;;  %6574 = vmatpush.bf16.msra.mxu3 %v10596_v40  ;;  %v11928_v61 = vld [vmem:[%s13916_s13 + $0x44] sm:$0xf0]  ;;  %v11943_v55 = vld [vmem:[%s13917_s14 + $0x40] sm:$0xff] }
0x1193   : > { %v12333_v37 = vpop.eup %12332  ;;  %6588 = vmatpush.bf16.msra.mxu0 %v10592_v50 }
0x1194   : > { %v6249_v58 = vmul.f32 %v12333_v37, %v12325_v13  ;;  %6575 = vmatpush.bf16.msra.mxu3 %v10588_v26  ;;  %v11927_v37 = vld [vmem:[%s13916_s13 + $0x44] sm:$0xf]  ;;  %v12236_v26 = vld [vmem:[%s13919_s18] ss:$0 sm:$0xff] }
0x1196   : > { %v6253_v59 = vpack.c.bf16 %v6249_v58, %v6249_v58  ;;  %v10572_v58 = vor.u32 %v11928_v61, %v10571_v57  ;;  %v11935_v57 = vld [vmem:[%s13917_s14] sm:$0xff] }
0x1197   : > { %6589 = vmatpush.bf16.msra.mxu0 %v10584_v56  ;;  %v11936_v56 = vld [vmem:[%s13917_s14 + $0x8] sm:$0xff]  ;;  %v5306_v61 = vld [vmem:[%s13920_s19] sm:$0x3] }
0x1198   : > { %10499 = vmatmul.msk.bf16.vlgmr.msrb.gmra.mxu1 %vm2674_vm11, %v6253_v59  ;;  %6576 = vmatpush.bf16.msra.mxu3 %v10580_v54  ;;  %v10573_v59 = vld [vmem:[%s13916_s13 + $0x48] sm:$0xf0]  ;;  %v11937_v54 = vld [vmem:[%s13917_s14 + $0x10] sm:$0xff] }
0x1199   : > { %v10576_v36 = vor.u32 %v11927_v37, %v10573_v59  ;;  %v6491_v37 = vperm.slane %v5306_v61, 1 }
0x119b   : > { %6590 = vmatpush.bf16.msra.mxu0 %v10576_v36  ;;  %v6490_v36 = vperm.slane %v5306_v61, 0  ;;  %v12014_v61 = vld [vmem:[%s13907_s3 + $0x1f8] sm:$0xff] }
0x119c   : > { %6577 = vmatpush.bf16.msra.mxu3 %v10572_v58 }
0x119f   : > { %6591 = vmatpush.bf16.msra.mxu0 %v10568_v46 }
0x11a0   : > { %6578 = vmatpush.bf16.msra.mxu3 %v10564_v1 }
0x1200   : > { %v6293_v3 = vpop.f32.mrf.mxu0 }
0x1201   : > { %v6336_v4 = vpack.c.bf16 %v6293_v3, %v6293_v3  ;;  %v10555_v3 = vld [vmem:[%s13916_s13 + $0x20] sm:$0xf] }
0x1203   : > { %10509 = vmatmul.msk.bf16.vlgmr.msrb.gmra.mxu3 %vm2544_vm7, %v6336_v4  ;;  %v11924_v4 = vld [vmem:[%s13916_s13 + $0x24] sm:$0xf0] }
0x1208   : > { %v6295_v43 = vpop.f32.mrf.mxu0 }
0x1209   : > { %v11923_v43 = vld [vmem:[%s13916_s13 + $0x24] sm:$0xf] }
0x1212   : > { %v6274_v28 = vpop.f32.mrf.mxu3 }
0x1213   : > { %v6335_v5 = vpack.c.bf16 %v6274_v28, %v6274_v28  ;;  %v6331_v7 = vpop.f32.mrf.mxu2  ;;  %v10556_v28 = vor.u32 %v11924_v4, %v10555_v3  ;;  %v12237_v4 = vld [vmem:[%s13921_s21] ss:$0 sm:$0xff] }
0x1214   : > { %v6423_v8 = vpack.c.bf16 %v6331_v7, %v6331_v7 }
0x1215   : > { %v6312_v9 = vpop.f32.mrf.mxu1  ;;  %10518 = vmatmul.msk.bf16.vlgmr.msrb.gmra.mxu0 %vm2544_vm7, %v6335_v5  ;;  %v10557_v5 = vld [vmem:[%s13916_s13 + $0x28] sm:$0xf0]  ;;  %6579 = vmatpush.bf16.msra.mxu3 %v10556_v28 }
0x1216   : > { %v6393_v10 = vpack.c.bf16 %v6312_v9, %v6312_v9  ;;  %10536 = vmatmul.msk.bf16.vlgmr.msra.gmra.mxu2 %vm2544_vm7, %v6423_v8  ;;  %v10560_v7 = vor.u32 %v11923_v43, %v10557_v5  ;;  %v10547_v8 = vld [vmem:[%s13916_s13 + $0x10] sm:$0xf]  ;;  %v11922_v9 = vld [vmem:[%s13916_s13 + $0x14] sm:$0xf0] }
0x1218   : > { %10527 = vmatmul.msk.bf16.vlgmr.msra.gmra.mxu1 %vm2544_vm7, %v6393_v10  ;;  %6592 = vmatpush.bf16.msra.mxu0 %v10560_v7  ;;  %v11921_v10 = vld [vmem:[%s13916_s13 + $0x14] sm:$0xf] }
0x121a   : > { %v6276_v11 = vpop.f32.mrf.mxu3 }
0x121b   : > { %v6333_v12 = vpop.f32.mrf.mxu2  ;;  %v10548_v11 = vor.u32 %v11922_v9, %v10547_v8 }
0x121c   : > { %v10549_v12 = vld [vmem:[%s13916_s13 + $0x18] sm:$0xf0] }
0x121d   : > { %v6314_v6 = vpop.f32.mrf.mxu1  ;;  %6580 = vmatpush.bf16.msra.mxu3 %v10548_v11 }
0x121e   : > { %v10552_v6 = vor.u32 %v11921_v10, %v10549_v12  ;;  %v11958_v12 = vld [vmem:[%s13906_s1 + $0x138] sm:$0xff] }
0x1220   : > { %6593 = vmatpush.bf16.msra.mxu0 %v10552_v6  ;;  %v11966_v6 = vld [vmem:[%s13906_s1 + $0x178] sm:$0xff] }
0x1286   : > { %v6361_v16 = vpop.f32.mrf.mxu3 }
0x128e   : > { %v6363_v17 = vpop.f32.mrf.mxu3 }
0x128f   : > { %v11920_v17 = vld [vmem:[%s13916_s13 + $0x4] sm:$0xf0] }
0x1292   : > { %v6389_v18 = vpop.f32.mrf.mxu0 }
0x1293   : > { %v6390_v19 = vadd.f32 %v6389_v18, %v6361_v16  ;;  %v10539_v16 = vld [vmem:[%s13916_s13] sm:$0xf]  ;;  %v11919_v18 = vld [vmem:[%s13916_s13 + $0x4] sm:$0xf] }
0x1295   : > { %v6418_v20 = vpop.f32.mrf.mxu1 }
0x1296   : > { %v6422_v21 = vadd.f32 %v6418_v20, %v6390_v19  ;;  %v10540_v19 = vor.u32 %v11920_v17, %v10539_v16  ;;  %v10541_v20 = vld [vmem:[%s13916_s13 + $0x8] sm:$0xf0]  ;;  %v11974_v16 = vld [vmem:[%s13906_s1 + $0x1b8] sm:$0xff] }
0x1297   : > { %v11982_v17 = vld [vmem:[%s13906_s1 + $0x1f8] sm:$0xff] }
0x1298   : > { %6581 = vmatpush.bf16.msra.mxu3 %v10540_v19  ;;  %v11965_v19 = vld [vmem:[%s13906_s1 + $0x170] sm:$0xff] }
0x1299   : > { %v6448_v24 = vpop.f32.mrf.mxu2 }
0x129a   : > { %v6452_v22 = vadd.f32 %v6448_v24, %v6422_v21  ;;  %v6391_v25 = vpop.f32.mrf.mxu0  ;;  %v10544_v21 = vor.u32 %v11919_v18, %v10541_v20  ;;  %v11942_v24 = vld [vmem:[%s13917_s14 + $0x38] sm:$0xff]  ;;  %v11957_v18 = vld [vmem:[%s13906_s1 + $0x130] sm:$0xff] }
0x129b   : > { %6703 = vmatpush.bf16.msrb.mxu1 %v11942_v24  ;;  %v11973_v20 = vld [vmem:[%s13906_s1 + $0x1b0] sm:$0xff]  ;;  %v11964_v24 = vld [vmem:[%s13906_s1 + $0x168] sm:$0xff] }
0x129c   : > { %v6456_v29 = vadd.f32 %v12234_v23, %v6452_v22  ;;  %6594 = vmatpush.bf16.msra.mxu0 %v10544_v21  ;;  %v11950_v23 = vld [vmem:[%s13917_s14 + $0x78] sm:$0xff]  ;;  %7100 = vmatpush.bf16.msrb.mxu3 %v11958_v12  ;;  %v11981_v21 = vld [vmem:[%s13906_s1 + $0x1f0] sm:$0xff]  ;;  %v11992_v12 = vld [vmem:[%s13907_s3 + $0x148] sm:$0xff] }
0x129d   : > { %v6420_v31 = vpop.f32.mrf.mxu1  ;;  %6716 = vmatpush.bf16.msrb.mxu2 %v11950_v23  ;;  %v11956_v23 = vld [vmem:[%s13906_s1 + $0x128] sm:$0xff] }
0x129e   : > { %v6457_v32 = vadd.f32 %v6456_v29, %v13360_v34  ;;  %v11949_v29 = vld [vmem:[%s13917_s14 + $0x70] sm:$0xff] }
0x129f   : > { %v11941_v31 = vld [vmem:[%s13917_s14 + $0x30] sm:$0xff] }
0x12a0   : > { %v6458_v33 = vsel %vm1717_vm2, %v6457_v32, 0.0  ;;  %6704 = vmatpush.bf16.msrb.mxu1 %v11941_v31  ;;  %7161 = vmatpush.bf16.msrb.mxu0 %v11966_v6  ;;  %v11963_v31 = vld [vmem:[%s13906_s1 + $0x160] sm:$0xff]  ;;  %v12000_v6 = vld [vmem:[%s13907_s3 + $0x188] sm:$0xff] }
0x12a1   : > { %v6450_v35 = vpop.f32.mrf.mxu2  ;;  %6459 = vadd.xlane.f32.xlu1 %v6458_v33  ;;  %6717 = vmatpush.bf16.msrb.mxu2 %v11949_v29  ;;  %v11948_v33 = vld [vmem:[%s13917_s14 + $0x68] sm:$0xff]  ;;  %v11955_v29 = vld [vmem:[%s13906_s1 + $0x120] sm:$0xff] }
0x12a2   : > { %v11940_v35 = vld [vmem:[%s13917_s14 + $0x28] sm:$0xff]  ;;  %7101 = vmatpush.bf16.msrb.mxu3 %v11957_v18  ;;  %v11991_v18 = vld [vmem:[%s13907_s3 + $0x140] sm:$0xff] }
0x12a4   : > { %6705 = vmatpush.bf16.msrb.mxu1 %v11940_v35  ;;  %7162 = vmatpush.bf16.msrb.mxu0 %v11965_v19  ;;  %v11954_v35 = vld [vmem:[%s13906_s1 + $0x118] sm:$0xff]  ;;  %v11999_v19 = vld [vmem:[%s13907_s3 + $0x180] sm:$0xff] }
0x12a5   : > { %6718 = vmatpush.bf16.msrb.mxu2 %v11948_v33  ;;  %v11979_v33 = vld [vmem:[%s13906_s1 + $0x1e0] sm:$0xff] }
0x12a6   : > { %7102 = vmatpush.bf16.msrb.mxu3 %v11956_v23 }
0x12a8   : > { %6706 = vmatpush.bf16.msrb.mxu1 %v11939_v38  ;;  %7163 = vmatpush.bf16.msrb.mxu0 %v11964_v24  ;;  %v11970_v38 = vld [vmem:[%s13906_s1 + $0x198] sm:$0xff] }
0x12a9   : > { %6719 = vmatpush.bf16.msrb.mxu2 %v11947_v27  ;;  %v11962_v27 = vld [vmem:[%s13906_s1 + $0x158] sm:$0xff] }
0x12aa   : > { %7103 = vmatpush.bf16.msrb.mxu3 %v11955_v29 }
0x12ac   : > { %6707 = vmatpush.bf16.msrb.mxu1 %v11938_v42  ;;  %7164 = vmatpush.bf16.msrb.mxu0 %v11963_v31  ;;  %v11969_v42 = vld [vmem:[%s13906_s1 + $0x190] sm:$0xff] }
0x12ad   : > { %6720 = vmatpush.bf16.msrb.mxu2 %v11946_v41  ;;  %v11961_v41 = vld [vmem:[%s13906_s1 + $0x150] sm:$0xff] }
0x12ae   : > { %7104 = vmatpush.bf16.msrb.mxu3 %v11954_v35 }
0x12b0   : > { %6708 = vmatpush.bf16.msrb.mxu1 %v11937_v54  ;;  %7165 = vmatpush.bf16.msrb.mxu0 %v11962_v27  ;;  %v11975_v54 = vld [vmem:[%s13906_s1 + $0x1c0] sm:$0xff] }
0x12b4   : > { %6709 = vmatpush.bf16.msrb.mxu1 %v11936_v56  ;;  %7166 = vmatpush.bf16.msrb.mxu0 %v11961_v41  ;;  %v11998_v56 = vld [vmem:[%s13907_s3 + $0x178] sm:$0xff] }
0x12b8   : > { %6710 = vmatpush.bf16.msrb.mxu1 %v11935_v57  ;;  %v12006_v57 = vld [vmem:[%s13907_s3 + $0x1b8] sm:$0xff] }
0x12bc   : > { %7222 = vmatpush.bf16.msra.mxu1 %v11974_v16  ;;  %v12008_v16 = vld [vmem:[%s13907_s3 + $0x1c8] sm:$0xff] }
0x12c0   : > { %7223 = vmatpush.bf16.msra.mxu1 %v11973_v20  ;;  %v12007_v20 = vld [vmem:[%s13907_s3 + $0x1c0] sm:$0xff] }
0x1314   : > { %v6460_v14 = vpop.xlane.xlu1 %6459 }
0x1315   : > { %v6461_v34 = vmul.f32 %v6460_v14, %v12788_v60 }
0x1317   : > { %v13466_v44 = vsub.f32 %v6457_v32, %v6461_v34 }
0x1319   : > { %v6463_v13 = vmul.f32 %v13466_v44, %v13466_v44 }
0x131b   : > { %v6464_v45 = vsel %vm1717_vm2, %v6463_v13, 0.0  ;;  %v11945_v13 = vld [vmem:[%s13917_s14 + $0x50] sm:$0xff] }
0x131c   : > { %6465 = vadd.xlane.f32.xlu2 %v6464_v45  ;;  %6721 = vmatpush.bf16.msrb.mxu2 %v11945_v13  ;;  %v11960_v13 = vld [vmem:[%s13906_s1 + $0x148] sm:$0xff] }
0x131d   : > { %7167 = vmatpush.bf16.msrb.mxu0 %v11960_v13  ;;  %v12038_v13 = vld [vmem:[%s13910_s7 + $0x1b8] sm:$0xff] }
0x1320   : > { %6722 = vmatpush.bf16.msrb.mxu2 %v11944_v53  ;;  %v11967_v53 = vld [vmem:[%s13906_s1 + $0x180] sm:$0xff] }
0x1324   : > { %6723 = vmatpush.bf16.msrb.mxu2 %v11943_v55  ;;  %v11990_v55 = vld [vmem:[%s13907_s3 + $0x138] sm:$0xff] }
0x1328   : > { %7283 = vmatpush.bf16.msra.mxu2 %v11982_v17  ;;  %v11983_v17 = vld [vmem:[%s13907_s3 + $0x100] sm:$0xff] }
0x132c   : > { %7284 = vmatpush.bf16.msra.mxu2 %v11981_v21 }
0x138f   : > { %v6466_v22 = vpop.xlane.xlu2 %6465 }
0x1390   : > { %v6467_v25 = vmul.f32 %v6466_v22, %v12788_v60  ;;  %v11972_v22 = vld [vmem:[%s13906_s1 + $0x1a8] sm:$0xff] }
0x1391   : > { %7224 = vmatpush.bf16.msra.mxu1 %v11972_v22 }
0x1392   : > { %v6468_v32 = vadd.f32 1e-05, %v6467_v25  ;;  %v11980_v25 = vld [vmem:[%s13906_s1 + $0x1e8] sm:$0xff] }
0x1393   : > { %7285 = vmatpush.bf16.msra.mxu2 %v11980_v25 }
0x1394   : > { %12334 = vrsqrt.f32 %v6468_v32  ;;  %vm6475_vm6 = vweird.f32 %v6468_v32 }
0x1397   : > { %7286 = vmatpush.bf16.msra.mxu2 %v11979_v33 }
0x139a   : > { %v12335_v39 = vpop.eup %12334 }
0x139b   : > { %v6470_v40 = vmul.f32 %v12335_v39, %v6468_v32  ;;  %vm6476_vm5 = vweird.f32 %v12335_v39  ;;  %v11971_v32 = vld [vmem:[%s13906_s1 + $0x1a0] sm:$0xff] }
0x139c   : > { %vm6477_vm8 = vmor %vm6475_vm6, %vm6476_vm5  ;;  %7225 = vmatpush.bf16.msra.mxu1 %v11971_v32 }
0x139d   : > { %v6471_v14 = vmul.f32 %v12335_v39, %v6470_v40  ;;  %v11953_v40 = vld [vmem:[%s13906_s1 + $0x110] sm:$0xff] }
0x139e   : > { %7105 = vmatpush.bf16.msrb.mxu3 %v11953_v40 }
0x139f   : > { %v6472_v34 = vmul.f32 0.5, %v6471_v14  ;;  %v11977_v14 = vld [vmem:[%s13906_s1 + $0x1d0] sm:$0xff] }
0x13a0   : > { %7226 = vmatpush.bf16.msra.mxu1 %v11970_v38  ;;  %v12239_v38 = vld [vmem:[%s12677_s27] ss:$0 sm:$0xff] }
0x13a1   : > { %v6473_v45 = vsub.f32 1.5, %v6472_v34  ;;  %v11952_v34 = vld [vmem:[%s13906_s1 + $0x108] sm:$0xff] }
0x13a2   : > { %7106 = vmatpush.bf16.msrb.mxu3 %v11952_v34  ;;  %v12030_v34 = vld [vmem:[%s13910_s7 + $0x178] sm:$0xff] }
0x13a3   : > { %v6474_v30 = vmul.f32 %v12335_v39, %v6473_v45  ;;  %v11968_v45 = vld [vmem:[%s13906_s1 + $0x188] sm:$0xff] }
0x13a4   : > { %7227 = vmatpush.bf16.msra.mxu1 %v11969_v42 }
0x13a5   : > { %v6478_v48 = vsel %vm6477_vm8, %v12335_v39, %v6474_v30  ;;  %v11978_v39 = vld [vmem:[%s13906_s1 + $0x1d8] sm:$0xff]  ;;  %v11976_v30 = vld [vmem:[%s13906_s1 + $0x1c8] sm:$0xff] }
0x13a6   : > { %v6479_v49 = vmul.f32 %v6478_v48, %v13466_v44  ;;  %7287 = vmatpush.bf16.msra.mxu2 %v11978_v39 }
0x13a8   : > { %v6483_v50 = vmul.f32 %v12235_v47, %v6479_v49  ;;  %7228 = vmatpush.bf16.msra.mxu1 %v11968_v45  ;;  %v12046_v45 = vld [vmem:[%s13910_s7 + $0x1f8] sm:$0xff] }
0x13aa   : > { %v6487_v51 = vadd.f32 %v12236_v26, %v6483_v50  ;;  %7288 = vmatpush.bf16.msra.mxu2 %v11977_v14  ;;  %v12022_v14 = vld [vmem:[%s13910_s7 + $0x138] sm:$0xff] }
0x13ac   : > { %v6488_v52 = vpack.c.bf16 %v6487_v51, %v6487_v51  ;;  %7229 = vmatpush.bf16.msra.mxu1 %v11967_v53  ;;  %v12019_v53 = vld [vmem:[%s13910_s7 + $0x120] sm:$0xff] }
0x13ae   : > { %6582 = vmatmul.bf16.vlgmr.msra.gmra.mxu3 %v6488_v52  ;;  %6595 = vmatmul.bf16.vlgmr.msra.gmra.mxu0 %v6488_v52  ;;  %v11959_v52 = vld [vmem:[%s13906_s1 + $0x140] sm:$0xff] }
0x13af   : > { %7289 = vmatpush.bf16.msra.mxu2 %v11976_v30  ;;  %7168 = vmatpush.bf16.msrb.mxu0 %v11959_v52  ;;  %v12021_v30 = vld [vmem:[%s13910_s7 + $0x130] sm:$0xff]  ;;  %v12044_v52 = vld [vmem:[%s13910_s7 + $0x1e8] sm:$0xff] }
0x13b3   : > { %7290 = vmatpush.bf16.msra.mxu2 %v11975_v54  ;;  %7421 = vmatpush.bf16.msra.mxu0 %v11998_v56  ;;  %v12027_v54 = vld [vmem:[%s13910_s7 + $0x160] sm:$0xff] }
0x13b4   : > { %v12043_v56 = vld [vmem:[%s13910_s7 + $0x1e0] sm:$0xff] }
0x142b   : > { %v6596_v44 = vpop.f32.mrf.mxu0 }
0x142c   : > { %v6597_v58 = vadd.f32 %v6596_v44, %v6491_v37  ;;  %v11989_v37 = vld [vmem:[%s13907_s3 + $0x130] sm:$0xff] }
0x142d   : > { %v11997_v44 = vld [vmem:[%s13907_s3 + $0x170] sm:$0xff] }
0x142e   : > { %v6601_v59 = vmax.f32 %v6597_v58, 0.0  ;;  %v12005_v58 = vld [vmem:[%s13907_s3 + $0x1b0] sm:$0xff]  ;;  %7422 = vmatpush.bf16.msra.mxu0 %v11997_v44  ;;  %v12042_v44 = vld [vmem:[%s13910_s7 + $0x1d8] sm:$0xff] }
0x1430   : > { %v6603_v62 = vpack.c.bf16 %v6601_v59, %v6601_v59  ;;  %v12013_v59 = vld [vmem:[%s13907_s3 + $0x1f0] sm:$0xff] }
0x1431   : > { %v6583_v63 = vpop.f32.mrf.mxu3 }
0x1432   : > { %v6584_v0 = vadd.f32 %v6583_v63, %v6490_v36  ;;  %6724 = vmatmul.bf16.vlgmr.msrb.gmra.mxu2 %v6603_v62  ;;  %v11988_v36 = vld [vmem:[%s13907_s3 + $0x128] sm:$0xff] }
0x1433   : > { %v6598_v1 = vpop.f32.mrf.mxu0  ;;  %7543 = vmatpush.bf16.msrb.mxu2 %v12014_v61  ;;  %v11996_v62 = vld [vmem:[%s13907_s3 + $0x168] sm:$0xff]  ;;  %v12026_v61 = vld [vmem:[%s13910_s7 + $0x158] sm:$0xff] }
0x1434   : > { %v6600_v2 = vmax.f32 %v6584_v0, 0.0  ;;  %v12004_v63 = vld [vmem:[%s13907_s3 + $0x1a8] sm:$0xff]  ;;  %7423 = vmatpush.bf16.msra.mxu0 %v11996_v62  ;;  %v11987_v1 = vld [vmem:[%s13907_s3 + $0x120] sm:$0xff]  ;;  %v12041_v62 = vld [vmem:[%s13910_s7 + $0x1d0] sm:$0xff] }
0x1435   : > { %v12012_v0 = vld [vmem:[%s13907_s3 + $0x1e8] sm:$0xff] }
0x1436   : > { %v6602_v46 = vpack.c.bf16 %v6600_v2, %v6600_v2  ;;  %v11995_v2 = vld [vmem:[%s13907_s3 + $0x160] sm:$0xff] }
0x1437   : > { %7544 = vmatpush.bf16.msrb.mxu2 %v12013_v59  ;;  %v12025_v59 = vld [vmem:[%s13910_s7 + $0x150] sm:$0xff] }
0x1438   : > { %6711 = vmatmul.bf16.vlgmr.msrb.gmra.mxu1 %v6602_v46  ;;  %v12003_v46 = vld [vmem:[%s13907_s3 + $0x1a0] sm:$0xff]  ;;  %7424 = vmatpush.bf16.msra.mxu0 %v11995_v2  ;;  %v12040_v2 = vld [vmem:[%s13910_s7 + $0x1c8] sm:$0xff] }
0x1439   : > { %v6585_v3 = vpop.f32.mrf.mxu3  ;;  %7482 = vmatpush.bf16.msrb.mxu1 %v12006_v57  ;;  %v12018_v57 = vld [vmem:[%s13910_s7 + $0x118] sm:$0xff] }
0x143a   : > { %v12011_v3 = vld [vmem:[%s13907_s3 + $0x1e0] sm:$0xff] }
0x143b   : > { %7545 = vmatpush.bf16.msrb.mxu2 %v12012_v0  ;;  %v12024_v0 = vld [vmem:[%s13910_s7 + $0x148] sm:$0xff] }
0x143d   : > { %7483 = vmatpush.bf16.msrb.mxu1 %v12005_v58  ;;  %v12017_v58 = vld [vmem:[%s13910_s7 + $0x110] sm:$0xff] }
0x143f   : > { %7546 = vmatpush.bf16.msrb.mxu2 %v12011_v3  ;;  %v12023_v3 = vld [vmem:[%s13910_s7 + $0x140] sm:$0xff] }
0x1441   : > { %7484 = vmatpush.bf16.msrb.mxu1 %v12004_v63  ;;  %v12016_v63 = vld [vmem:[%s13910_s7 + $0x108] sm:$0xff] }
0x1445   : > { %7485 = vmatpush.bf16.msrb.mxu1 %v12003_v46  ;;  %v12015_v46 = vld [vmem:[%s13910_s7 + $0x100] sm:$0xff] }
0x14b5   : > { %v6712_v43 = vpop.f32.mrf.mxu1  ;;  %v6725_v28 = vpop.f32.mrf.mxu2 }
0x14b6   : > { %v6713_v5 = vadd.f32 %v12237_v4, %v6712_v43  ;;  %v11986_v4 = vld [vmem:[%s13907_s3 + $0x118] sm:$0xff] }
0x14b7   : > { %v11994_v43 = vld [vmem:[%s13907_s3 + $0x158] sm:$0xff] }
0x14b8   : > { %v6726_v7 = vadd.f32 %v6725_v28, %v6713_v5  ;;  %v12002_v28 = vld [vmem:[%s13907_s3 + $0x198] sm:$0xff]  ;;  %7425 = vmatpush.bf16.msra.mxu0 %v11994_v43  ;;  %v12039_v43 = vld [vmem:[%s13910_s7 + $0x1c0] sm:$0xff] }
0x14b9   : > { %v12010_v5 = vld [vmem:[%s13907_s3 + $0x1d8] sm:$0xff]  ;;  %7486 = vmatpush.bf16.msrb.mxu1 %v12002_v28 }
0x14ba   : > { %v6729_v8 = vadd.f32 %v6726_v7, %v6487_v51  ;;  %v11951_v51 = vld [vmem:[%s13906_s1 + $0x100] sm:$0xff]  ;;  %7547 = vmatpush.bf16.msrb.mxu2 %v12010_v5  ;;  %v11985_v7 = vld [vmem:[%s13907_s3 + $0x110] sm:$0xff]  ;;  %s13922_s1 = sld [smem:[#allocation40_spill]] }
0x14bb   : > { %7107 = vmatpush.bf16.msrb.mxu3 %v11951_v51  ;;  %v12036_v51 = vld [vmem:[%s13910_s7 + $0x1a8] sm:$0xff] }
0x14bc   : > { %v6730_v9 = vsel %vm1717_vm2, %v6729_v8, 0.0 }
0x14bd   : > { %v6714_v10 = vpop.f32.mrf.mxu1  ;;  %v6727_v11 = vpop.f32.mrf.mxu2  ;;  %6731 = vadd.xlane.f32.xlu0 %v6730_v9  ;;  %v12001_v9 = vld [vmem:[%s13907_s3 + $0x190] sm:$0xff] }
0x14be   : > { %v12009_v10 = vld [vmem:[%s13907_s3 + $0x1d0] sm:$0xff]  ;;  %7487 = vmatpush.bf16.msrb.mxu1 %v12001_v9  ;;  %v11984_v11 = vld [vmem:[%s13907_s3 + $0x108] sm:$0xff] }
0x14bf   : > { %7360 = vmatpush.bf16.msra.mxu3 %v11990_v55  ;;  %7548 = vmatpush.bf16.msrb.mxu2 %v12009_v10  ;;  %v12035_v55 = vld [vmem:[%s13910_s7 + $0x1a0] sm:$0xff] }
0x14c0   : > { %v12238_v35 = vld [vmem:[%s13922_s1] ss:$0 sm:$0xff] }
0x14c2   : > { %7488 = vmatpush.bf16.msrb.mxu1 %v12000_v6  ;;  %v12245_v6 = vld [vmem:[%s13911_s5 + $0x6] ss:$0 sm:$0xff] }
0x14c3   : > { %7361 = vmatpush.bf16.msra.mxu3 %v11989_v37  ;;  %7549 = vmatpush.bf16.msrb.mxu2 %v12008_v16  ;;  %v12034_v37 = vld [vmem:[%s13910_s7 + $0x198] sm:$0xff] }
0x14c6   : > { %7489 = vmatpush.bf16.msrb.mxu1 %v11999_v19 }
0x14c7   : > { %7362 = vmatpush.bf16.msra.mxu3 %v11988_v36  ;;  %7550 = vmatpush.bf16.msrb.mxu2 %v12007_v20  ;;  %v12033_v36 = vld [vmem:[%s13910_s7 + $0x190] sm:$0xff] }
0x14cb   : > { %7363 = vmatpush.bf16.msra.mxu3 %v11987_v1  ;;  %v12032_v1 = vld [vmem:[%s13910_s7 + $0x188] sm:$0xff] }
0x14cf   : > { %7364 = vmatpush.bf16.msra.mxu3 %v11986_v4  ;;  %v12031_v4 = vld [vmem:[%s13910_s7 + $0x180] sm:$0xff] }
0x14d3   : > { %7365 = vmatpush.bf16.msra.mxu3 %v11985_v7 }
0x14d7   : > { %7366 = vmatpush.bf16.msra.mxu3 %v11984_v11  ;;  %v12244_v11 = vld [vmem:[%s13911_s5 + $0x5] ss:$0 sm:$0xff] }
0x14db   : > { %7367 = vmatpush.bf16.msra.mxu3 %v11983_v17 }
0x1530   : > { %v6732_v47 = vpop.xlane.xlu0 %6731 }
0x1531   : > { %v6733_v48 = vmul.f32 %v6732_v47, %v12788_v60  ;;  %v12029_v47 = vld [vmem:[%s13910_s7 + $0x170] sm:$0xff] }
0x1533   : > { %v13551_v26 = vsub.f32 %v6729_v8, %v6733_v48  ;;  %v11993_v8 = vld [vmem:[%s13907_s3 + $0x150] sm:$0xff]  ;;  %s1285_s3 = sand.u32 1, %s12414_s23  }
0x1534   : > { %7426 = vmatpush.bf16.msra.mxu0 %v11993_v8  ;;  %v12037_v48 = vld [vmem:[%s13910_s7 + $0x1b0] sm:$0xff] }
0x1535   : > { %v6735_v49 = vmul.f32 %v13551_v26, %v13551_v26 }
0x1537   : > { %v6736_v50 = vsel %vm1717_vm2, %v6735_v49, 0.0  ;;  %v12020_v49 = vld [vmem:[%s13910_s7 + $0x128] sm:$0xff] }
0x1538   : > { %6737 = vadd.xlane.f32.xlu1 %v6736_v50  ;;  %7427 = vmatpush.bf16.msra.mxu0 %v11992_v12  ;;  %v12028_v50 = vld [vmem:[%s13910_s7 + $0x168] sm:$0xff] }
0x153c   : > { %7428 = vmatpush.bf16.msra.mxu0 %v11991_v18 }
0x15ab   : > { %v6738_v21 = vpop.xlane.xlu1 %6737 }
0x15ac   : > { %v6739_v23 = vmul.f32 %v6738_v21, %v12788_v60  ;;  %v12240_v21 = vld [vmem:[%s13912_s6 + $0x5] ss:$0 sm:$0xff] }
0x15ae   : > { %v6740_v24 = vadd.f32 1e-05, %v6739_v23 }
0x15b0   : > { %12336 = vrsqrt.f32 %v6740_v24  ;;  %vm6747_vm12 = vweird.f32 %v6740_v24 }
0x15b6   : > { %v12337_v22 = vpop.eup %12336 }
0x15b7   : > { %v6742_v25 = vmul.f32 %v12337_v22, %v6740_v24  ;;  %vm6748_vm9 = vweird.f32 %v12337_v22  ;;  %v12246_v24 = vld [vmem:[%s13911_s5 + $0x4] ss:$0 sm:$0xff] }
0x15b8   : > { %vm6749_vm13 = vmor %vm6747_vm12, %vm6748_vm9 }
0x15b9   : > { %v6743_v29 = vmul.f32 %v12337_v22, %v6742_v25 }
0x15bb   : > { %v6744_v31 = vmul.f32 0.5, %v6743_v29  ;;  %v12247_v29 = vld [vmem:[%s13911_s5 + $0x7] ss:$0 sm:$0xff]  ;;  %s1286_s5 = scalar_lea.vmem [#allocation2], %s1285_s3 }
0x15bd   : > { %v6745_v32 = vsub.f32 1.5, %v6744_v31 }
0x15bf   : > { %v6746_v33 = vmul.f32 %v12337_v22, %v6745_v32 }
0x15c1   : > { %v6750_v27 = vsel %vm6749_vm13, %v12337_v22, %v6746_v33  ;;  %v12241_v22 = vld [vmem:[%s13912_s6 + $0x6] ss:$0 sm:$0xff] }
0x15c2   : > { %v6751_v39 = vmul.f32 %v6750_v27, %v13551_v26  ;;  %v12045_v26 = vld [vmem:[%s13910_s7 + $0x1f0] sm:$0xff]  ;;  %s8551_s7 = scalar_lea.sflag [#allocation3], %s1285_s3 }
0x15c4   : > { %v6755_v40 = vmul.f32 %v12238_v35, %v6751_v39 }
0x15c6   : > { %v13596_v41 = vadd.f32 %v12239_v38, %v6755_v40 }
0x15c8   : > { %v13600_v42 = vpack.c.bf16 %v13596_v41, %v13596_v41 }
0x15ca   : > { %7108 = vmatmul.bf16.vlgmr.msrb.gmra.mxu3 %v13600_v42  ;;  %7169 = vmatmul.bf16.vlgmr.msrb.gmra.mxu0 %v13600_v42 }
0x15cb   : > { %7230 = vmatmul.bf16.vlgmr.msra.gmra.mxu1 %v13600_v42  ;;  %7291 = vmatmul.bf16.vlgmr.msra.gmra.mxu2 %v13600_v42 }
0x15cc   : > { %7620 = vmatpush.bf16.msrb.mxu3 %v12022_v14  ;;  %7681 = vmatpush.bf16.msrb.mxu0 %v12030_v34  ;;  %v12242_v14 = vld [vmem:[%s13912_s6 + $0x4] ss:$0 sm:$0xff] }
0x15cd   : > { %7742 = vmatpush.bf16.msra.mxu1 %v12038_v13  ;;  %7803 = vmatpush.bf16.msra.mxu2 %v12046_v45  ;;  %v12243_v45 = vld [vmem:[%s13912_s6 + $0x7] ss:$0 sm:$0xff]  ;;  %s8561_s6 = sshll.u32 %s1286_s5, 4  ;;  %s8562_s6 = int_to_ptr.vmem [resolvable:$true] %s8561_s6 }
0x15d0   : > { %7621 = vmatpush.bf16.msrb.mxu3 %v12021_v30  ;;  %7682 = vmatpush.bf16.msrb.mxu0 %v12029_v47 }
0x15d1   : > { %7743 = vmatpush.bf16.msra.mxu1 %v12037_v48  ;;  %7804 = vmatpush.bf16.msra.mxu2 %v12045_v26 }
0x15d4   : > { %7622 = vmatpush.bf16.msrb.mxu3 %v12020_v49  ;;  %7683 = vmatpush.bf16.msrb.mxu0 %v12028_v50 }
0x15d5   : > { %7744 = vmatpush.bf16.msra.mxu1 %v12036_v51  ;;  %7805 = vmatpush.bf16.msra.mxu2 %v12044_v52 }
0x15d8   : > { %7623 = vmatpush.bf16.msrb.mxu3 %v12019_v53  ;;  %7684 = vmatpush.bf16.msrb.mxu0 %v12027_v54  ;;  %v12248_v53 = vld [vmem:[%s13913_s8 + $0x5] ss:$0 sm:$0xff] }
0x15d9   : > { %7745 = vmatpush.bf16.msra.mxu1 %v12035_v55  ;;  %7806 = vmatpush.bf16.msra.mxu2 %v12043_v56  ;;  %v12249_v55 = vld [vmem:[%s13913_s8 + $0x6] ss:$0 sm:$0xff] }
0x15da   : > { %7368 = vmatmul.bf16.vlgmr.msra.gmra.mxu3 %v13600_v42  ;;  %7429 = vmatmul.bf16.vlgmr.msra.gmra.mxu0 %v13600_v42 }
0x15db   : > { %7490 = vmatmul.bf16.vlgmr.msrb.gmra.mxu1 %v13600_v42  ;;  %7551 = vmatmul.bf16.vlgmr.msrb.gmra.mxu2 %v13600_v42 }
0x15dc   : > { %7624 = vmatpush.bf16.msrb.mxu3 %v12018_v57  ;;  %7685 = vmatpush.bf16.msrb.mxu0 %v12026_v61 }
0x15dd   : > { %7746 = vmatpush.bf16.msra.mxu1 %v12034_v37  ;;  %7807 = vmatpush.bf16.msra.mxu2 %v12042_v44 }
0x15e0   : > { %7625 = vmatpush.bf16.msrb.mxu3 %v12017_v58  ;;  %7686 = vmatpush.bf16.msrb.mxu0 %v12025_v59 }
0x15e1   : > { %7747 = vmatpush.bf16.msra.mxu1 %v12033_v36  ;;  %7808 = vmatpush.bf16.msra.mxu2 %v12041_v62  ;;  %v12250_v36 = vld [vmem:[%s13913_s8 + $0x4] ss:$0 sm:$0xff] }
0x15e4   : > { %7626 = vmatpush.bf16.msrb.mxu3 %v12016_v63  ;;  %7687 = vmatpush.bf16.msrb.mxu0 %v12024_v0  ;;  %v12251_v63 = vld [vmem:[%s13913_s8 + $0x7] ss:$0 sm:$0xff] }
0x15e5   : > { %7748 = vmatpush.bf16.msra.mxu1 %v12032_v1  ;;  %7809 = vmatpush.bf16.msra.mxu2 %v12040_v2 }
0x15e8   : > { %7627 = vmatpush.bf16.msrb.mxu3 %v12015_v46  ;;  %7688 = vmatpush.bf16.msrb.mxu0 %v12023_v3 }
0x15e9   : > { %7749 = vmatpush.bf16.msra.mxu1 %v12031_v4  ;;  %7810 = vmatpush.bf16.msra.mxu2 %v12039_v43 }
0x15eb   : > { %7628 = vmatmul.bf16.vlgmr.msrb.gmra.mxu3 %v13600_v42  ;;  %7689 = vmatmul.bf16.vlgmr.msrb.gmra.mxu0 %v13600_v42 }
0x15ec   : > { %7750 = vmatmul.bf16.vlgmr.msra.gmra.mxu1 %v13600_v42  ;;  %7811 = vmatmul.bf16.vlgmr.msra.gmra.mxu2 %v13600_v42 }
0x1647   : > { %v7170_v28 = vpop.f32.mrf.mxu0 }
0x1648   : > { %v7231_v5 = vpop.f32.mrf.mxu1  ;;  %v7309_v35 = vadd.f32 %v12240_v21, %v7170_v28 }
0x1649   : > { %v7310_v39 = vadd.f32 %v12241_v22, %v7231_v5 }
0x164a   : > { %v7833_v47 = vpack.c.bf16 %v7309_v35, %v7309_v35 }
0x164b   : > { %v7834_v26 = vpack.c.bf16 %v7310_v39, %v7310_v39 }
0x164d   : > { %v7109_v7 = vpop.f32.mrf.mxu3 }
0x164e   : > { %v7292_v8 = vpop.f32.mrf.mxu2  ;;  %v7308_v50 = vadd.f32 %v12242_v14, %v7109_v7 }
0x164f   : > { %v7172_v9 = vpop.f32.mrf.mxu0  ;;  %v7311_v51 = vadd.f32 %v12243_v45, %v7292_v8 }
0x1650   : > { %v7233_v10 = vpop.f32.mrf.mxu1  ;;  %v7832_v56 = vpack.c.bf16 %v7308_v50, %v7308_v50 }
0x1651   : > { %v7835_v61 = vpack.c.bf16 %v7311_v51, %v7311_v51  ;;  %v12050_v51 = vld [vmem:[%s13914_s9 + $0x58] sm:$0xff] }
0x1655   : > { %v7111_v12 = vpop.f32.mrf.mxu3 }
0x1656   : > { %v7294_v16 = vpop.f32.mrf.mxu2 }
0x1657   : > { %v7430_v17 = vpop.f32.mrf.mxu0 }
0x1658   : > { %v7569_v18 = vadd.f32 %v12244_v11, %v7430_v17  ;;  %v7491_v19 = vpop.f32.mrf.mxu1 }
0x1659   : > { %v7570_v20 = vadd.f32 %v12245_v6, %v7491_v19 }
0x165a   : > { %v7837_v23 = vpack.c.bf16 %v7569_v18, %v7569_v18 }
0x165b   : > { %v7838_v25 = vpack.c.bf16 %v7570_v20, %v7570_v20 }
0x165c   : > { %v7863_v31 = vsel %vm2544_vm7, %v7837_v23, 0 }
0x165d   : > { %v7882_v32 = vsel %vm2544_vm7, %v7838_v25, 0  ;;  %v7369_v33 = vpop.f32.mrf.mxu3  ;;  %7872 = vmatpush.bf16.xpose.msra.mxu0 %v7863_v31 }
0x165e   : > { %v7568_v27 = vadd.f32 %v12246_v24, %v7369_v33  ;;  %v7552_v38 = vpop.f32.mrf.mxu2  ;;  %7891 = vmatpush.bf16.xpose.msrb.mxu1 %v7882_v32 }
0x165f   : > { %v7571_v40 = vadd.f32 %v12247_v29, %v7552_v38  ;;  %v7432_v42 = vpop.f32.mrf.mxu0 }
0x1660   : > { %v7836_v34 = vpack.c.bf16 %v7568_v27, %v7568_v27  ;;  %v7493_v13 = vpop.f32.mrf.mxu1 }
0x1661   : > { %v7839_v30 = vpack.c.bf16 %v7571_v40, %v7571_v40 }
0x1662   : > { %v7844_v48 = vsel %vm2544_vm7, %v7836_v34, 0 }
0x1663   : > { %v7901_v49 = vsel %vm2544_vm7, %v7839_v30, 0  ;;  %7853 = vmatpush.bf16.xpose.msra.mxu3 %v7844_v48 }
0x1664   : > { %7910 = vmatpush.bf16.xpose.msrb.mxu2 %v7901_v49  ;;  %11325 = vmatmul.msk.bf16.vlgmr.msra.gmra.mxu0 %vm2544_vm7, %v7833_v47 }
0x1665   : > { %11326 = vmatmul.msk.bf16.vlgmr.msrb.gmra.mxu1 %vm2544_vm7, %v7834_v26  ;;  %v7371_v52 = vpop.f32.mrf.mxu3 }
0x1666   : > { %v7554_v54 = vpop.f32.mrf.mxu2 }
0x1668   : > { %v7690_v57 = vpop.f32.mrf.mxu0 }
0x1669   : > { %v7829_v37 = vadd.f32 %v12248_v53, %v7690_v57  ;;  %v7751_v44 = vpop.f32.mrf.mxu1 }
0x166a   : > { %v7830_v58 = vadd.f32 %v12249_v55, %v7751_v44  ;;  %11324 = vmatmul.msk.bf16.vlgmr.msra.gmra.mxu3 %vm2544_vm7, %v7832_v56 }
0x166b   : > { %v7965_v59 = vpack.c.bf16 %v7829_v37, %v7829_v37  ;;  %11327 = vmatmul.msk.bf16.vlgmr.msrb.gmra.mxu2 %vm2544_vm7, %v7835_v61 }
0x166c   : > { %v7966_v62 = vpack.c.bf16 %v7830_v58, %v7830_v58 }
0x166d   : > { %v7991_v0 = vand.u32 %v7965_v59, %v12905_v15 }
0x166e   : > { %v8010_v1 = vand.u32 %v7966_v62, %v12905_v15  ;;  %v7629_v2 = vpop.f32.mrf.mxu3 }
0x166f   : > { %v7828_v46 = vadd.f32 %v12250_v36, %v7629_v2  ;;  %v7812_v3 = vpop.f32.mrf.mxu2  ;;  %8000 = vmatpush.bf16.msrb.mxu0 %v7991_v0  ;;  %v12048_v2 = vld [vmem:[%s13914_s9 + $0x48] sm:$0xff] }
0x1670   : > { %v7831_v4 = vadd.f32 %v12251_v63, %v7812_v3  ;;  %8019 = vmatpush.bf16.msra.mxu1 %v8010_v1  ;;  %v7692_v43 = vpop.f32.mrf.mxu0  ;;  %v12049_v1 = vld [vmem:[%s13914_s9 + $0x50] sm:$0xff]  ;;  %v12052_v3 = vld [vmem:[%s13914_s9 + $0x68] sm:$0xff] }
0x1671   : > { %v7964_v28 = vpack.c.bf16 %v7828_v46, %v7828_v46  ;;  %v7753_v5 = vpop.f32.mrf.mxu1  ;;  %v12054_v46 = vld [vmem:[%s13914_s9 + $0x78] sm:$0xff]  ;;  %v12053_v43 = vld [vmem:[%s13914_s9 + $0x70] sm:$0xff] }
0x1672   : > { %v7967_v7 = vpack.c.bf16 %v7831_v4, %v7831_v4  ;;  %v12047_v4 = vld [vmem:[%s13914_s9 + $0x40] sm:$0xff] }
0x1673   : > { %v7972_v8 = vand.u32 %v7964_v28, %v12905_v15  ;;  %8095 = vmatpush.bf16.msra.mxu0 %v12048_v2  ;;  %v12051_v28 = vld [vmem:[%s13914_s9 + $0x60] sm:$0xff]  ;;  %v12062_v2 = vld [vmem:[%s13916_s13 + $0xb4] sm:$0xf0] }
0x1674   : > { %v8029_v9 = vand.u32 %v7967_v7, %v12905_v15  ;;  %8124 = vmatpush.bf16.msrb.mxu1 %v12052_v3 }
0x1675   : > { %7981 = vmatpush.bf16.msrb.mxu3 %v7972_v8 }
0x1676   : > { %8038 = vmatpush.bf16.msra.mxu2 %v8029_v9  ;;  %v7631_v10 = vpop.f32.mrf.mxu3 }
0x1677   : > { %v7814_v11 = vpop.f32.mrf.mxu2  ;;  %8096 = vmatpush.bf16.msra.mxu0 %v12047_v4  ;;  %v11396_v4 = vld [vmem:[%s13916_s13 + $0xb8] sm:$0xf0] }
0x1678   : > { %8125 = vmatpush.bf16.msrb.mxu1 %v12051_v28  ;;  %v11386_v28 = vld [vmem:[%s13916_s13 + $0xa0] sm:$0xf] }
0x1679   : > { %8067 = vmatpush.bf16.msra.mxu3 %v12050_v51  ;;  %v12067_v51 = vld [vmem:[%s13916_s13 + $0xe4] sm:$0xf] }
0x167a   : > { %8154 = vmatpush.bf16.msrb.mxu2 %v12054_v46  ;;  %v12061_v46 = vld [vmem:[%s13916_s13 + $0xb4] sm:$0xf] }
0x167d   : > { %8068 = vmatpush.bf16.msra.mxu3 %v12049_v1  ;;  %v11394_v1 = vld [vmem:[%s13916_s13 + $0xb0] sm:$0xf] }
0x167e   : > { %8155 = vmatpush.bf16.msrb.mxu2 %v12053_v43  ;;  %v11395_v3 = vor.u32 %v12062_v2, %v11394_v1  ;;  %v11399_v43 = vor.u32 %v12061_v46, %v11396_v4 }
0x16e1   : > { %v7874_v12 = vpop.f32.mrf.mxu0 }
0x16e2   : > { %v7893_v6 = vpop.f32.mrf.mxu1  ;;  %v7919_v16 = vsel %vm2621_vm10, %v7874_v12, -inf }
0x16e3   : > { %7920 = vmax.xlane.f32.xlu1 %v7919_v16  ;;  %v7922_v22 = vsel %vm2621_vm10, %v7893_v6, -inf }
0x16e9   : > { %v7876_v17 = vpop.f32.mrf.mxu0 }
0x16ea   : > { %v7895_v18 = vpop.f32.mrf.mxu1 }
0x16ed   : > { %v7855_v19 = vpop.f32.mrf.mxu3 }
0x16ee   : > { %v7912_v20 = vpop.f32.mrf.mxu2  ;;  %v7916_v21 = vsel %vm2621_vm10, %v7855_v19, -inf }
0x16ef   : > { %v7925_v23 = vsel %vm2621_vm10, %v7912_v20, -inf  ;;  %7917 = vmax.xlane.f32.xlu0 %v7916_v21 }
0x16f0   : > { %7926 = vmax.xlane.f32.xlu2 %v7925_v23 }
0x16f5   : > { %v7857_v15 = vpop.f32.mrf.mxu3 }
0x16f6   : > { %v7914_v24 = vpop.f32.mrf.mxu2 }
0x16f8   : > { %7923 = vmax.xlane.f32.xlu2 %v7922_v22 }
0x1756   : > { %v7921_v25 = vpop.xlane.xlu1 %7920 }
0x1757   : > { %v7929_v29 = vsub.f32 %v7874_v12, %v7921_v25  ;;  %v12252_v25 = vld [vmem:[%s13915_s10 + $0x1] ss:$0 sm:$0xff] }
0x1759   : > { %v7934_v31 = vmul.f32 1.442695, %v7929_v29 }
0x175b   : > { %12338 = vpow2.f32 %v7934_v31 }
0x1761   : > { %v12339_v32 = vpop.eup %12338 }
0x1762   : > { %v7918_v33 = vpop.xlane.xlu0 %7917  ;;  %v7943_v35 = vsel %vm2621_vm10, %v12339_v32, 0.0 }
0x1763   : > { %v7927_v27 = vpop.xlane.xlu2 %7926  ;;  %v7928_v38 = vsub.f32 %v7855_v19, %v7918_v33  ;;  %7944 = vadd.xlane.f32.xlu2 %v7943_v35 }
0x1764   : > { %v7931_v39 = vsub.f32 %v7912_v20, %v7927_v27 }
0x1765   : > { %v7932_v40 = vmul.f32 1.442695, %v7928_v38 }
0x1766   : > { %v7938_v42 = vmul.f32 1.442695, %v7931_v39 }
0x1767   : > { %12340 = vpow2.f32 %v7932_v40  ;;  %v11426_v40 = vld [vmem:[%s13916_s13 + $0xf0] sm:$0xf] }
0x1768   : > { %12342 = vpow2.f32 %v7938_v42  ;;  %v12070_v42 = vld [vmem:[%s13916_s13 + $0xf4] sm:$0xf0] }
0x176b   : > { %v7924_v14 = vpop.xlane.xlu2 %7923 }
0x176c   : > { %v7930_v34 = vsub.f32 %v7893_v6, %v7924_v14  ;;  %v12069_v14 = vld [vmem:[%s13916_s13 + $0xf4] sm:$0xf] }
0x176d   : > { %v12341_v13 = vpop.eup %12340 }
0x176e   : > { %v12343_v45 = vpop.eup %12342  ;;  %v7936_v30 = vmul.f32 1.442695, %v7930_v34  ;;  %v7940_v47 = vsel %vm2621_vm10, %v12341_v13, 0.0  ;;  %v11427_v34 = vor.u32 %v12070_v42, %v11426_v40  ;;  %v12075_v40 = vld [vmem:[%s13917_s14 + $0xa0] sm:$0xff] }
0x176f   : > { %v7949_v48 = vsel %vm2621_vm10, %v12343_v45, 0.0  ;;  %7941 = vadd.xlane.f32.xlu1 %v7940_v47 }
0x1770   : > { %12344 = vpow2.f32 %v7936_v30  ;;  %7950 = vadd.xlane.f32.xlu0 %v7949_v48 }
0x1776   : > { %v12345_v26 = vpop.eup %12344 }
0x1777   : > { %v7946_v49 = vsel %vm2621_vm10, %v12345_v26, 0.0 }
0x1778   : > { %7947 = vadd.xlane.f32.xlu0 %v7946_v49  ;;  %v11418_v49 = vld [vmem:[%s13916_s13 + $0xe0] sm:$0xf] }
0x17d6   : > { %v7945_v50 = vpop.xlane.xlu2 %7944 }
0x17d7   : > { %12346 = vrcp.f32 %v7945_v50  ;;  %v12068_v50 = vld [vmem:[%s13916_s13 + $0xe4] sm:$0xf0] }
0x17dd   : > { %v12347_v52 = vpop.eup %12346 }
0x17de   : > { %v7957_v53 = vmul.f32 %v12347_v52, %v12339_v32  ;;  %v11419_v52 = vor.u32 %v12068_v50, %v11418_v49  ;;  %v12253_v49 = vld [vmem:[%s13918_s17 + $0x1] ss:$0 sm:$0xff] }
0x17e0   : > { %v7961_v54 = vpack.c.bf16 %v7957_v53, %v7957_v53  ;;  %v11420_v53 = vld [vmem:[%s13916_s13 + $0xe8] sm:$0xf0] }
0x17e2   : > { %11329 = vmatmul.msk.bf16.vlgmr.msrb.gmra.mxu0 %vm2674_vm11, %v7961_v54  ;;  %v7942_v55 = vpop.xlane.xlu1 %7941  ;;  %v11423_v54 = vor.u32 %v12067_v51, %v11420_v53  ;;  %v12254_v51 = vld [vmem:[%s13919_s18 + $0x1] ss:$0 sm:$0xff] }
0x17e3   : > { %12348 = vrcp.f32 %v7942_v55  ;;  %v7951_v56 = vpop.xlane.xlu0 %7950  ;;  %v11410_v55 = vld [vmem:[%s13916_s13 + $0xd0] sm:$0xf] }
0x17e4   : > { %12350 = vrcp.f32 %v7951_v56  ;;  %v12066_v56 = vld [vmem:[%s13916_s13 + $0xd4] sm:$0xf0] }
0x17e9   : > { %v12349_v57 = vpop.eup %12348 }
0x17ea   : > { %v12351_v61 = vpop.eup %12350  ;;  %v7956_v37 = vmul.f32 %v12349_v57, %v12341_v13  ;;  %v11428_v13 = vld [vmem:[%s13916_s13 + $0xf8] sm:$0xf0]  ;;  %v12065_v57 = vld [vmem:[%s13916_s13 + $0xd4] sm:$0xf] }
0x17eb   : > { %v7959_v44 = vmul.f32 %v12351_v61, %v12343_v45  ;;  %v7948_v58 = vpop.xlane.xlu0 %7947  ;;  %v11431_v45 = vor.u32 %v12069_v14, %v11428_v13  ;;  %v11411_v61 = vor.u32 %v12066_v56, %v11410_v55  ;;  %v12074_v13 = vld [vmem:[%s13917_s14 + $0x98] sm:$0xff]  ;;  %v12080_v56 = vld [vmem:[%s13917_s14 + $0xc8] sm:$0xff] }
0x17ec   : > { %v7960_v59 = vpack.c.bf16 %v7956_v37, %v7956_v37  ;;  %12352 = vrcp.f32 %v7948_v58  ;;  %v11412_v37 = vld [vmem:[%s13916_s13 + $0xd8] sm:$0xf0]  ;;  %v11402_v58 = vld [vmem:[%s13916_s13 + $0xc0] sm:$0xf] }
0x17ed   : > { %v7963_v36 = vpack.c.bf16 %v7959_v44, %v7959_v44  ;;  %8296 = vmatpush.bf16.msrb.mxu0 %v11431_v45  ;;  %v11415_v44 = vor.u32 %v12065_v57, %v11412_v37  ;;  %v12073_v57 = vld [vmem:[%s13917_s14 + $0x90] sm:$0xff]  ;;  %v12072_v37 = vld [vmem:[%s13917_s14 + $0x88] sm:$0xff] }
0x17ee   : > { %11328 = vmatmul.msk.bf16.vlgmr.msrb.gmra.mxu3 %vm2674_vm11, %v7960_v59  ;;  %v12064_v59 = vld [vmem:[%s13916_s13 + $0xc4] sm:$0xf0] }
0x17ef   : > { %11331 = vmatmul.msk.bf16.vlgmr.msra.gmra.mxu2 %vm2674_vm11, %v7963_v36  ;;  %8283 = vmatpush.bf16.msrb.mxu3 %v11427_v34  ;;  %v12063_v36 = vld [vmem:[%s13916_s13 + $0xc4] sm:$0xf]  ;;  %v12082_v34 = vld [vmem:[%s13917_s14 + $0xd8] sm:$0xff] }
0x17f1   : > { %8297 = vmatpush.bf16.msrb.mxu0 %v11423_v54 }
0x17f2   : > { %v12353_v62 = vpop.eup %12352 }
0x17f3   : > { %v7958_v63 = vmul.f32 %v12353_v62, %v12345_v26  ;;  %8284 = vmatpush.bf16.msrb.mxu3 %v11419_v52  ;;  %v11403_v62 = vor.u32 %v12064_v59, %v11402_v58  ;;  %v10904_v58 = vld [vmem:[%s13920_s19 + $0x2] sm:$0x3] }
0x17f4   : > { %v8200_v59 = vperm.slane %v10904_v58, 1 }
0x17f5   : > { %v7962_v0 = vpack.c.bf16 %v7958_v63, %v7958_v63  ;;  %8298 = vmatpush.bf16.msrb.mxu0 %v11415_v44  ;;  %v11404_v63 = vld [vmem:[%s13916_s13 + $0xc8] sm:$0xf0]  ;;  %v12071_v44 = vld [vmem:[%s13917_s14 + $0x80] sm:$0xff] }
0x17f7   : > { %11330 = vmatmul.msk.bf16.vlgmr.msra.gmra.mxu1 %vm2674_vm11, %v7962_v0  ;;  %8285 = vmatpush.bf16.msrb.mxu3 %v11411_v61  ;;  %v11407_v0 = vor.u32 %v12063_v36, %v11404_v63  ;;  %v12079_v61 = vld [vmem:[%s13917_s14 + $0xc0] sm:$0xff]  ;;  %v8199_v63 = vperm.slane %v10904_v58, 0 }
0x17f9   : > { %8299 = vmatpush.bf16.msrb.mxu0 %v11407_v0 }
0x17fb   : > { %8286 = vmatpush.bf16.msrb.mxu3 %v11403_v62 }
0x17fd   : > { %8300 = vmatpush.bf16.msrb.mxu0 %v11399_v43 }
0x17ff   : > { %8287 = vmatpush.bf16.msrb.mxu3 %v11395_v3 }
0x185f   : > { %v8002_v5 = vpop.f32.mrf.mxu0 }
0x1860   : > { %v8045_v7 = vpack.c.bf16 %v8002_v5, %v8002_v5  ;;  %v12060_v5 = vld [vmem:[%s13916_s13 + $0xa4] sm:$0xf0] }
0x1862   : > { %11340 = vmatmul.msk.bf16.vlgmr.msra.gmra.mxu3 %vm2544_vm7, %v8045_v7  ;;  %v12059_v7 = vld [vmem:[%s13916_s13 + $0xa4] sm:$0xf] }
0x1867   : > { %v8004_v8 = vpop.f32.mrf.mxu0 }
0x1868   : > { %v11387_v8 = vor.u32 %v12060_v5, %v11386_v28  ;;  %v12255_v28 = vld [vmem:[%s13921_s21 + $0x1] ss:$0 sm:$0xff] }
0x186a   : > { %8288 = vmatpush.bf16.msrb.mxu3 %v11387_v8 }
0x1871   : > { %v7983_v9 = vpop.f32.mrf.mxu3 }
0x1872   : > { %v8044_v10 = vpack.c.bf16 %v7983_v9, %v7983_v9  ;;  %v8040_v11 = vpop.f32.mrf.mxu2  ;;  %v11388_v9 = vld [vmem:[%s13916_s13 + $0xa8] sm:$0xf0] }
0x1873   : > { %v8132_v12 = vpack.c.bf16 %v8040_v11, %v8040_v11  ;;  %v11378_v11 = vld [vmem:[%s13916_s13 + $0x90] sm:$0xf] }
0x1874   : > { %v8021_v6 = vpop.f32.mrf.mxu1  ;;  %11349 = vmatmul.msk.bf16.vlgmr.msra.gmra.mxu0 %vm2544_vm7, %v8044_v10  ;;  %v11391_v10 = vor.u32 %v12059_v7, %v11388_v9 }
0x1875   : > { %v8102_v16 = vpack.c.bf16 %v8021_v6, %v8021_v6  ;;  %11367 = vmatmul.msk.bf16.vlgmr.msrb.gmra.mxu2 %vm2544_vm7, %v8132_v12  ;;  %v12058_v12 = vld [vmem:[%s13916_s13 + $0x94] sm:$0xf0]  ;;  %v12057_v6 = vld [vmem:[%s13916_s13 + $0x94] sm:$0xf] }
0x1876   : > { %8301 = vmatpush.bf16.msrb.mxu0 %v11391_v10 }
0x1877   : > { %11358 = vmatmul.msk.bf16.vlgmr.msrb.gmra.mxu1 %vm2544_vm7, %v8102_v16  ;;  %v11379_v16 = vor.u32 %v12058_v12, %v11378_v11 }
0x1879   : > { %v7985_v17 = vpop.f32.mrf.mxu3  ;;  %8289 = vmatpush.bf16.msrb.mxu3 %v11379_v16  ;;  %v12094_v16 = vld [vmem:[%s13884_s4 + $0x38] sm:$0xff] }
0x187a   : > { %v8042_v18 = vpop.f32.mrf.mxu2  ;;  %v11380_v17 = vld [vmem:[%s13916_s13 + $0x98] sm:$0xf0] }
0x187b   : > { %v11383_v18 = vor.u32 %v12057_v6, %v11380_v17 }
0x187c   : > { %v8023_v19 = vpop.f32.mrf.mxu1 }
0x187d   : > { %8302 = vmatpush.bf16.msrb.mxu0 %v11383_v18  ;;  %v11370_v19 = vld [vmem:[%s13916_s13 + $0x80] sm:$0xf] }
0x18e5   : > { %v8070_v20 = vpop.f32.mrf.mxu3 }
0x18ed   : > { %v8072_v21 = vpop.f32.mrf.mxu3 }
0x18ee   : > { %v12055_v21 = vld [vmem:[%s13916_s13 + $0x84] sm:$0xf] }
0x18f1   : > { %v8098_v23 = vpop.f32.mrf.mxu0 }
0x18f2   : > { %v8099_v15 = vadd.f32 %v8098_v23, %v8070_v20  ;;  %v12056_v20 = vld [vmem:[%s13916_s13 + $0x84] sm:$0xf0] }
0x18f3   : > { %v11371_v23 = vor.u32 %v12056_v20, %v11370_v19 }
0x18f4   : > { %v8127_v24 = vpop.f32.mrf.mxu1 }
0x18f5   : > { %v8131_v22 = vadd.f32 %v8127_v24, %v8099_v15  ;;  %v11372_v15 = vld [vmem:[%s13916_s13 + $0x88] sm:$0xf0]  ;;  %8290 = vmatpush.bf16.msrb.mxu3 %v11371_v23  ;;  %v12093_v23 = vld [vmem:[%s13884_s4 + $0x30] sm:$0xff] }
0x18f6   : > { %v11375_v24 = vor.u32 %v12055_v21, %v11372_v15  ;;  %v12092_v15 = vld [vmem:[%s13884_s4 + $0x28] sm:$0xff] }
0x18f8   : > { %v8157_v29 = vpop.f32.mrf.mxu2  ;;  %8303 = vmatpush.bf16.msrb.mxu0 %v11375_v24  ;;  %v12091_v24 = vld [vmem:[%s13884_s4 + $0x20] sm:$0xff] }
0x18f9   : > { %v8161_v31 = vadd.f32 %v8157_v29, %v8131_v22  ;;  %v8100_v32 = vpop.f32.mrf.mxu0  ;;  %v12086_v22 = vld [vmem:[%s13917_s14 + $0xf8] sm:$0xff]  ;;  %8535 = vmatpush.bf16.msra.mxu3 %v12094_v16 }
0x18fa   : > { %8425 = vmatpush.bf16.msra.mxu2 %v12086_v22  ;;  %v12085_v32 = vld [vmem:[%s13917_s14 + $0xf0] sm:$0xff]  ;;  %v12090_v22 = vld [vmem:[%s13884_s4 + $0x18] sm:$0xff] }
0x18fb   : > { %v8165_v33 = vadd.f32 %v12252_v25, %v8161_v31  ;;  %v12078_v25 = vld [vmem:[%s13917_s14 + $0xb8] sm:$0xff] }
0x18fc   : > { %v8129_v35 = vpop.f32.mrf.mxu1  ;;  %8412 = vmatpush.bf16.msra.mxu1 %v12078_v25  ;;  %v12089_v25 = vld [vmem:[%s13884_s4 + $0x10] sm:$0xff] }
0x18fd   : > { %v8166_v27 = vadd.f32 %v8165_v33, %v13596_v41  ;;  %v12077_v33 = vld [vmem:[%s13917_s14 + $0xb0] sm:$0xff]  ;;  %8536 = vmatpush.bf16.msra.mxu3 %v12093_v23 }
0x18fe   : > { %8426 = vmatpush.bf16.msra.mxu2 %v12085_v32 }
0x18ff   : > { %v8167_v38 = vsel %vm1717_vm2, %v8166_v27, 0.0 }
0x1900   : > { %v8159_v39 = vpop.f32.mrf.mxu2  ;;  %8168 = vadd.xlane.f32.xlu1 %v8167_v38  ;;  %8413 = vmatpush.bf16.msra.mxu1 %v12077_v33  ;;  %v12076_v38 = vld [vmem:[%s13917_s14 + $0xa8] sm:$0xff] }
0x1901   : > { %v12083_v39 = vld [vmem:[%s13917_s14 + $0xe0] sm:$0xff]  ;;  %8537 = vmatpush.bf16.msra.mxu3 %v12092_v15 }
0x1904   : > { %8414 = vmatpush.bf16.msra.mxu1 %v12076_v38 }
0x1905   : > { %8538 = vmatpush.bf16.msra.mxu3 %v12091_v24 }
0x1908   : > { %8415 = vmatpush.bf16.msra.mxu1 %v12075_v40 }
0x1909   : > { %8539 = vmatpush.bf16.msra.mxu3 %v12090_v22 }
0x190c   : > { %8416 = vmatpush.bf16.msra.mxu1 %v12074_v13 }
0x190d   : > { %8540 = vmatpush.bf16.msra.mxu3 %v12089_v25 }
0x1910   : > { %8417 = vmatpush.bf16.msra.mxu1 %v12073_v57 }
0x1914   : > { %8418 = vmatpush.bf16.msra.mxu1 %v12072_v37 }
0x1918   : > { %8419 = vmatpush.bf16.msra.mxu1 %v12071_v44 }
0x1973   : > { %v8169_v30 = vpop.xlane.xlu1 %8168 }
0x1974   : > { %v8170_v41 = vmul.f32 %v8169_v30, %v12788_v60 }
0x1976   : > { %v13702_v47 = vsub.f32 %v8166_v27, %v8170_v41  ;;  %v12084_v27 = vld [vmem:[%s13917_s14 + $0xe8] sm:$0xff]  ;;  %v12081_v41 = vld [vmem:[%s13917_s14 + $0xd0] sm:$0xff] }
0x1977   : > { %8427 = vmatpush.bf16.msra.mxu2 %v12084_v27 }
0x1978   : > { %v8172_v48 = vmul.f32 %v13702_v47, %v13702_v47 }
0x197a   : > { %v8173_v26 = vsel %vm1717_vm2, %v8172_v48, 0.0 }
0x197b   : > { %8174 = vadd.xlane.f32.xlu2 %v8173_v26  ;;  %8428 = vmatpush.bf16.msra.mxu2 %v12083_v39 }
0x197f   : > { %8429 = vmatpush.bf16.msra.mxu2 %v12082_v34  ;;  %v12256_v34 = vld [vmem:[%s13922_s1 + $0x1] ss:$0 sm:$0xff] }
0x1983   : > { %8430 = vmatpush.bf16.msra.mxu2 %v12081_v41 }
0x1987   : > { %8431 = vmatpush.bf16.msra.mxu2 %v12080_v56 }
0x198b   : > { %8432 = vmatpush.bf16.msra.mxu2 %v12079_v61 }
0x19ee   : > { %v8175_v29 = vpop.xlane.xlu2 %8174 }
0x19ef   : > { %v8176_v31 = vmul.f32 %v8175_v29, %v12788_v60  ;;  %v12088_v29 = vld [vmem:[%s13884_s4 + $0x8] sm:$0xff] }
0x19f0   : > { %8541 = vmatpush.bf16.msra.mxu3 %v12088_v29 }
0x19f1   : > { %v8177_v35 = vadd.f32 1e-05, %v8176_v31  ;;  %v12087_v31 = vld [vmem:[%s13884_s4] sm:$0xff]  ;;  %s8559_s4 = scalar_lea.hbm %s12692_s20, %s12715_s0  ;;  %s12380_s0 = scalar_lea.hbm %s12692_s20, 2 }
0x19f2   : > { %s8563_s1 = sshll.u32 %s8559_s4, 4  ;;  %s8564_s1 = int_to_ptr.hbm [resolvable:$true] %s8563_s1 }
0x19f3   : > { %12354 = vrsqrt.f32 %v8177_v35  ;;  %vm8184_vm10 = vweird.f32 %v8177_v35  ;;  %s12374_s8 = sshra.s32 %s8564_s1, 4  ;;  %s12375_s8 = int_to_ptr.hbm [resolvable:$true] %s12374_s8 }
0x19f4   : > { %8542 = vmatpush.bf16.msra.mxu3 %v12087_v31  ;;  %s12376_s9 = scalar_lea.hbm %s12375_s8, 1  ;;  %p12381_p0 = scmp.lt.s32.totalorder %s12375_s8, %s12692_s20 }
0x19f5   : > { %p12377_p11 = scmp.ne.s32.totalorder %s12375_s8, %s12376_s9  ;;  %p12382_p1 = scmp.lt.s32.totalorder %s12380_s0, %s12376_s9 }
0x19f7   : > { %p12378_p12 = pnand %p12377_p11, %p12732_p5  ;;  %p12383_p2 = por %p12382_p1, %p12381_p0 }
0x19f9   : > { %v12355_v42 = vpop.eup %12354  ;;  %p12379_p13 = pneg %p12378_p12 }
0x19fa   : > { %v8179_v14 = vmul.f32 %v12355_v42, %v8177_v35  ;;  %vm8185_vm7 = vweird.f32 %v12355_v42 }
0x19fb   : > { %vm8186_vm11 = vmor %vm8184_vm10, %vm8185_vm7  ;;  %p12384_p3 = pnand %p12383_p2, %p12379_p13 }
0x19fc   : > { %v8180_v45 = vmul.f32 %v12355_v42, %v8179_v14 }
0x19fe   : > { %v8181_v30 = vmul.f32 0.5, %v8180_v45 }
0x1a00   : > { %v8182_v48 = vsub.f32 1.5, %v8181_v30  ;;  %v12257_v30 = vld [vmem:[%s12677_s27 + $0x1] ss:$0 sm:$0xff] }
0x1a02   : > { %v8183_v26 = vmul.f32 %v12355_v42, %v8182_v48 }
0x1a04   : > { %v8187_v50 = vsel %vm8186_vm11, %v12355_v42, %v8183_v26  ;;  %v8486_v26 = vld [vmem:[%s12687_s12] sm:$0x1] }
0x1a05   : > { %v8188_v52 = vmul.f32 %v8187_v50, %v13702_v47 }
0x1a07   : > { %v8192_v53 = vmul.f32 %v12253_v49, %v8188_v52 }
0x1a09   : > { %v8196_v54 = vadd.f32 %v12254_v51, %v8192_v53 }
0x1a0b   : > { %v8197_v55 = vpack.c.bf16 %v8196_v54, %v8196_v54 }
0x1a0d   : > { %8291 = vmatmul.bf16.vlgmr.msrb.gmra.mxu3 %v8197_v55  ;;  %8304 = vmatmul.bf16.vlgmr.msrb.gmra.mxu0 %v8197_v55 }
0x1a8a   : > { %v8305_v47 = vpop.f32.mrf.mxu0 }
0x1a8b   : > { %v8306_v36 = vadd.f32 %v8305_v47, %v8200_v59 }
0x1a8d   : > { %v8310_v62 = vmax.f32 %v8306_v36, 0.0 }
0x1a8f   : > { %v8312_v0 = vpack.c.bf16 %v8310_v62, %v8310_v62 }
0x1a90   : > { %v8292_v1 = vpop.f32.mrf.mxu3 }
0x1a91   : > { %v8293_v2 = vadd.f32 %v8292_v1, %v8199_v63  ;;  %8433 = vmatmul.bf16.vlgmr.msra.gmra.mxu2 %v8312_v0 }
0x1a92   : > { %v8307_v46 = vpop.f32.mrf.mxu0 }
0x1a93   : > { %v8309_v3 = vmax.f32 %v8293_v2, 0.0 }
0x1a95   : > { %v8311_v4 = vpack.c.bf16 %v8309_v3, %v8309_v3 }
0x1a97   : > { %8420 = vmatmul.bf16.vlgmr.msra.gmra.mxu1 %v8311_v4 }
0x1a98   : > { %v8294_v43 = vpop.f32.mrf.mxu3 }
0x1b14   : > { %v8421_v5 = vpop.f32.mrf.mxu1  ;;  %v8434_v7 = vpop.f32.mrf.mxu2 }
0x1b15   : > { %v8422_v8 = vadd.f32 %v12255_v28, %v8421_v5 }
0x1b17   : > { %v8435_v9 = vadd.f32 %v8434_v7, %v8422_v8 }
0x1b19   : > { %v8438_v10 = vadd.f32 %v8435_v9, %v8196_v54 }
0x1b1b   : > { %v8439_v11 = vsel %vm1717_vm2, %v8438_v10, 0.0 }
0x1b1c   : > { %v8423_v12 = vpop.f32.mrf.mxu1  ;;  %v8436_v6 = vpop.f32.mrf.mxu2  ;;  %8440 = vadd.xlane.f32.xlu0 %v8439_v11 }
0x1b8f   : > { %v8441_v17 = vpop.xlane.xlu0 %8440 }
0x1b90   : > { %v8442_v18 = vmul.f32 %v8441_v17, %v12788_v60 }
0x1b92   : > { %v8443_v19 = vsub.f32 %v8438_v10, %v8442_v18 }
0x1b94   : > { %v8444_v20 = vmul.f32 %v8443_v19, %v8443_v19 }
0x1b96   : > { %v8445_v21 = vsel %vm1717_vm2, %v8444_v20, 0.0 }
0x1b97   : > { %8446 = vadd.xlane.f32.xlu1 %v8445_v21 }
0x1c0a   : > { %v8447_v32 = vpop.xlane.xlu1 %8446 }
0x1c0b   : > { %v8448_v33 = vmul.f32 %v8447_v32, %v12788_v60 }
0x1c0d   : > { %v8449_v35 = vadd.f32 1e-05, %v8448_v33 }
0x1c0f   : > { %12356 = vrsqrt.f32 %v8449_v35  ;;  %vm8456_vm14 = vweird.f32 %v8449_v35 }
0x1c15   : > { %v12357_v27 = vpop.eup %12356 }
0x1c16   : > { %v8451_v38 = vmul.f32 %v12357_v27, %v8449_v35  ;;  %vm8457_vm2 = vweird.f32 %v12357_v27 }
0x1c17   : > { %vm8458_vm15 = vmor %vm8456_vm14, %vm8457_vm2 }
0x1c18   : > { %v8452_v39 = vmul.f32 %v12357_v27, %v8451_v38 }
0x1c1a   : > { %v8453_v40 = vmul.f32 0.5, %v8452_v39 }
0x1c1c   : > { %v8454_v42 = vsub.f32 1.5, %v8453_v40 }
0x1c1e   : > { %v8455_v14 = vmul.f32 %v12357_v27, %v8454_v42 }
0x1c20   : > { %v8459_v13 = vsel %vm8458_vm15, %v12357_v27, %v8455_v14 }
0x1c21   : > { %v8460_v45 = vmul.f32 %v8459_v13, %v8443_v19 }
0x1c23   : > { %v8464_v60 = vmul.f32 %v12256_v34, %v8460_v45 }
0x1c25   : > { %v8468_v41 = vadd.f32 %v12257_v30, %v8464_v60 }
0x1c27   : > { %v8469_v48 = vpack.c.bf16 %v8468_v41, %v8468_v41 }
0x1c29   : > { %8543 = vmatmul.bf16.vlgmr.msra.gmra.mxu3 %v8469_v48 }
0x1cac   : > { %v8544_v49 = vpop.f32.mrf.mxu3 }
0x1cad   : > { %v8545_v50 = vadd.f32 %v8544_v49, %v8486_v26 }
0x1caf   : > { %12358 = vtanh.f32 %v8545_v50 }
0x1cb4   : > { %v8546_v51 = vpop.f32.mrf.mxu3 }
0x1cb5   : > { %v12359_v52 = vpop.eup %12358 }
0x1cb6   : > { %8549 = vst [vmem:[%s1286_s5] sm:$0x1] %v12359_v52 }
0x1cb7   : > { %12387 = shalt.err (!%p12384_p3)
}
0x1cb8   : > { %12095 = dma.vmem_to_hbm [thread:$0]  (%p12732_p5), %s8562_s6, 16, %s8564_s1, %s8551_s7  }
0x1cb9 PF: > { %p12101_p4 = scmp.ge.s32.totalorder %s12422_s28, 2  ;;  %s8575_s3 = sand.u32 1, %s12410_s22  }
0x1cba   : > { %s8576_s4 = scalar_lea.sflag [#allocation3], %s8575_s3 }
0x1cbb   : > { %p12098_p7 = pnand %p12101_p4, %p12736_p6 }
0x1cbd   : > { %p12099_p8 = pneg %p12098_p7 }
0x1cbf   : > { %12405 = dma.done.wait (%p12099_p8), %s8576_s4, 16  }
0x1cc0   : > { %12407 = vsyncadd (%p12099_p8), %s8576_s4, 4294967280  ;;  %p97_p9 = scmp.ge.s32.totalorder %s12719_s2, 4   ;;  %s13923_s22 = smov %s12414_s23 }
0x1cc1   : > { %s13924_s23 = smov %s12418_s26  ;;  %s13925_s26 = smov %s12730_s11 }
0x1cc2   : > { %s13926_s28 = smov %s12719_s2  ;;  %99 = sbr.rel (!%p97_p9) target bundleno = 98 (0x62), region = 304 }
0x1cc7   :  { %8581 = vsyncpa [#allocation3], 1 }
0x1cc8   :  { %8583 = vsyncpa [#allocation3 + $0x1], 1 }

</bundles_post_ra>
